<compile_context>
chip_gen: v5e
topology: v5e:2x2
jax: 0.10.0
libtpu: 0.0.40
codegen_flags: <defaults>
</compile_context>

<pallas_src>
import math

import jax
import jax.numpy as jnp
from jax.experimental import pallas as pl
from jax.experimental.pallas import tpu as pltpu

# Layer sizes from the PyTorch module.
LAYER_DIMS = [4, 128, 256, 512, 1024, 512, 256, 128, 64, 5]
NUM_LAYERS = len(LAYER_DIMS) - 1  # 9 linear layers
OUT_PAD = 128                     # lane-dense padded width of the final layer

# Per-layer output widths as seen inside the kernel (fc9 padded to OUT_PAD).
KERNEL_OUT_DIMS = LAYER_DIMS[1:-1] + [OUT_PAD]
# Each bias occupies a 128-lane-aligned slot of the concatenated bias array so
# every in-kernel slice starts on a lane-tile boundary.
BIAS_SLOT_WIDTHS = [((d + 127) // 128) * 128 for d in KERNEL_OUT_DIMS]
BIAS_OFFSETS = [sum(BIAS_SLOT_WIDTHS[:i]) for i in range(NUM_LAYERS)]
BIAS_TOTAL = sum(BIAS_SLOT_WIDTHS)  # 3072


def bb84nn_kernel(x_ref, bias_ref, *rest):
    """rest = (w1, ..., w9, out_ref).

    x is bf16 (block_b, 4); weights are bf16 (in, out); bias_ref is the
    concatenated f32 (1, BIAS_TOTAL) bias array.  Matmuls run on the MXU with
    f32 accumulation; bias-add / ReLU run on the VPU in f32.
    """
    w_refs = rest[:NUM_LAYERS]
    out_ref = rest[NUM_LAYERS]

    h = x_ref[...]                                        # bf16 (block_b, 4)
    for layer in range(NUM_LAYERS):
        off = BIAS_OFFSETS[layer]
        width = KERNEL_OUT_DIMS[layer]
        b = bias_ref[:, off:off + width]                  # f32 (1, width)
        h = jnp.dot(h, w_refs[layer][...],
                    preferred_element_type=jnp.float32) + b
        if layer < NUM_LAYERS - 1:                        # ReLU on fc1..fc8
            h = jnp.maximum(h, 0.0).astype(jnp.bfloat16)
    out_ref[...] = h.astype(out_ref.dtype)


def prepare_kernel_params(params_f32):
    """Cast weights to bf16, pad fc9 to OUT_PAD columns, concatenate biases."""
    weights = []
    bias_segs = []
    for layer in range(NUM_LAYERS):
        w = params_f32[2 * layer].astype(jnp.bfloat16)
        b = params_f32[2 * layer + 1].astype(jnp.float32).reshape(1, -1)
        if layer == NUM_LAYERS - 1:
            w = jnp.pad(w, ((0, 0), (0, OUT_PAD - w.shape[1])))
        weights.append(w)
        bias_segs.append(
            jnp.pad(b, ((0, 0), (0, BIAS_SLOT_WIDTHS[layer] - b.shape[1]))))
    bias_cat = jnp.concatenate(bias_segs, axis=1)         # (1, BIAS_TOTAL) f32
    return weights, bias_cat


def _choose_block_b(batch):
    """Tile height: multiple of 16 (bf16 sublane tile).  Small batches get a
    single tile; large batches get ~512-row tiles with an even grid length so
    v7x megacore splits the work evenly across both TensorCores."""
    if batch <= 256:
        return 16 * pl.cdiv(max(batch, 1), 16)
    n_tiles = 2 * pl.cdiv(batch, 2 * 512)                 # even, tiles <= 512 rows
    return 16 * pl.cdiv(batch, 16 * n_tiles)


def bb84nn_forward(x, params_f32, *, block_b=None):
    """x: (B, 4) float32. params_f32: flat list [w1, b1, ..., w9, b9] in f32,
    weights stored as (in, out), biases as (1, out).  Returns (B, 5) f32."""
    batch = x.shape[0]
    if block_b is None:
        block_b = _choose_block_b(batch)

    b_pad = block_b * pl.cdiv(batch, block_b)
    x = x.astype(jnp.bfloat16)                            # halve x DMA traffic
    if b_pad != batch:
        x = jnp.pad(x, ((0, b_pad - batch), (0, 0)))

    weights, bias_cat = prepare_kernel_params(params_f32)
    grid = (b_pad // block_b,)

    # Advisory cost estimate for XLA's scheduler.
    flops = 2 * b_pad * sum(w.shape[0] * w.shape[1] for w in weights)
    bytes_accessed = (
        x.size * x.dtype.itemsize
        + sum(w.size * w.dtype.itemsize for w in weights)
        + bias_cat.size * bias_cat.dtype.itemsize
        + b_pad * OUT_PAD * 2                             # bf16 output
    )
    cost = pl.CostEstimate(flops=flops, transcendentals=0,
                           bytes_accessed=bytes_accessed)

    def param_spec(shape, single_buffered):
        # Grid-invariant parameters: constant index_map keeps them VMEM
        # resident; single-buffering avoids a wasted second copy.
        if single_buffered:
            return pl.BlockSpec(shape, lambda i: (0, 0),
                                pipeline_mode=pl.Buffered(1))
        return pl.BlockSpec(shape, lambda i: (0, 0))

    def run(single_buffered_params):
        in_specs = [pl.BlockSpec((block_b, LAYER_DIMS[0]), lambda i: (i, 0)),
                    param_spec(bias_cat.shape, single_buffered_params)]
        in_specs += [param_spec(w.shape, single_buffered_params)
                     for w in weights]
        out_specs = pl.BlockSpec((block_b, OUT_PAD), lambda i: (i, 0))
        return pl.pallas_call(
            bb84nn_kernel,
            out_shape=jax.ShapeDtypeStruct((b_pad, OUT_PAD), jnp.bfloat16),
            grid=grid,
            in_specs=in_specs,
            out_specs=out_specs,
            compiler_params=pltpu.CompilerParams(
                dimension_semantics=("parallel",),        # v7x: 2 TCs split batch
                vmem_limit_bytes=32 * 1024 * 1024,        # ~12 MB actual footprint
            ),
            cost_estimate=cost,
        )(x, bias_cat, *weights)

    try:
        out_padded = run(True)
    except Exception:
        # Fallback if this jax/libtpu build rejects pipeline_mode=pl.Buffered(1)
        # on grid-level BlockSpecs; default double-buffering is still correct.
        out_padded = run(False)

    return out_padded[:batch, :LAYER_DIMS[-1]].astype(jnp.float32)


def init_params(key):
    """Deterministic init mimicking PyTorch nn.Linear defaults:
    W, b ~ U(-1/sqrt(fan_in), 1/sqrt(fan_in)).
    Weights stored as (in, out) for the kernel's h @ W convention."""
    params = []
    for layer in range(NUM_LAYERS):
        fan_in = LAYER_DIMS[layer]
        fan_out = LAYER_DIMS[layer + 1]
        bound = 1.0 / math.sqrt(fan_in)
        key, wk, bk = jax.random.split(key, 3)
        w = jax.random.uniform(
            wk, (fan_in, fan_out), minval=-bound, maxval=bound, dtype=jnp.float32
        )
        b = jax.random.uniform(
            bk, (1, fan_out), minval=-bound, maxval=bound, dtype=jnp.float32
        )
        params.extend([w, b])
    return params


def reference_forward(x, params_f32):
    """Plain-JAX reference with the same bf16-weight / f32-accum numerics."""
    h = x.astype(jnp.bfloat16)
    for layer in range(NUM_LAYERS):
        w = params_f32[2 * layer].astype(jnp.bfloat16)
        b = params_f32[2 * layer + 1]
        h = jnp.dot(h, w, preferred_element_type=jnp.float32) + b
        if layer < NUM_LAYERS - 1:
            h = jnp.maximum(h, 0.0).astype(jnp.bfloat16)
    return h


if __name__ == "__main__":
    key = jax.random.PRNGKey(0)
    key, xk = jax.random.split(key)
    params = init_params(key)

    # Small-batch path (single grid step).
    batch = 8
    x = jax.random.normal(xk, (batch, LAYER_DIMS[0]), dtype=jnp.float32)
    out = jax.block_until_ready(bb84nn_forward(x, params))
    ref = reference_forward(x, params)
    assert out.shape == (batch, LAYER_DIMS[-1]), out.shape
    assert jnp.allclose(out, ref, atol=1e-2, rtol=1e-2), (
        "Pallas output mismatch vs JAX reference (batch=8)"
    )

    # Larger, non-multiple batch to exercise the batch grid + padding path
    # (even grid of 2 tiles -> both v7x TensorCores under megacore).
    batch2 = 260
    key, xk2 = jax.random.split(key)
    x2 = jax.random.normal(xk2, (batch2, LAYER_DIMS[0]), dtype=jnp.float32)
    out2 = jax.block_until_ready(bb84nn_forward(x2, params))
    ref2 = reference_forward(x2, params)
    assert out2.shape == (batch2, LAYER_DIMS[-1]), out2.shape
    assert jnp.allclose(out2, ref2, atol=1e-2, rtol=1e-2), (
        "Pallas output mismatch vs JAX reference (batch=260)"
    )

    print("KERNEL_OK")
</pallas_src>

<mosaic_0001>
module attributes {stable_mosaic.version = 11 : i64} {
  func.func @bb84nn_kernel(%arg0: i32, %arg1: memref<16x4xbf16, #tpu.memory_space<vmem>>, %arg2: memref<1x3072xf32, #tpu.memory_space<vmem>>, %arg3: memref<4x128xbf16, #tpu.memory_space<vmem>>, %arg4: memref<128x256xbf16, #tpu.memory_space<vmem>>, %arg5: memref<256x512xbf16, #tpu.memory_space<vmem>>, %arg6: memref<512x1024xbf16, #tpu.memory_space<vmem>>, %arg7: memref<1024x512xbf16, #tpu.memory_space<vmem>>, %arg8: memref<512x256xbf16, #tpu.memory_space<vmem>>, %arg9: memref<256x128xbf16, #tpu.memory_space<vmem>>, %arg10: memref<128x64xbf16, #tpu.memory_space<vmem>>, %arg11: memref<64x128xbf16, #tpu.memory_space<vmem>>, %arg12: memref<16x128xbf16, #tpu.memory_space<vmem>>) attributes {dimension_semantics = [#tpu.dimension_semantics<parallel>], iteration_bounds = array<i64: 1>, scalar_prefetch = 0 : i64, scratch_operands = 0 : i64, tpu.core_type = #tpu.core_type<tc>, window_params = [{transform_indices = @transform_0, window_bounds = array<i64: 16, 4>}, {pipeline_mode = #tpu.pipeline_mode<synchronous>, transform_indices = @transform_1, window_bounds = array<i64: 1, 3072>}, {pipeline_mode = #tpu.pipeline_mode<synchronous>, transform_indices = @transform_2, window_bounds = array<i64: 4, 128>}, {pipeline_mode = #tpu.pipeline_mode<synchronous>, transform_indices = @transform_3, window_bounds = array<i64: 128, 256>}, {pipeline_mode = #tpu.pipeline_mode<synchronous>, transform_indices = @transform_4, window_bounds = array<i64: 256, 512>}, {pipeline_mode = #tpu.pipeline_mode<synchronous>, transform_indices = @transform_5, window_bounds = array<i64: 512, 1024>}, {pipeline_mode = #tpu.pipeline_mode<synchronous>, transform_indices = @transform_6, window_bounds = array<i64: 1024, 512>}, {pipeline_mode = #tpu.pipeline_mode<synchronous>, transform_indices = @transform_7, window_bounds = array<i64: 512, 256>}, {pipeline_mode = #tpu.pipeline_mode<synchronous>, transform_indices = @transform_8, window_bounds = array<i64: 256, 128>}, {pipeline_mode = #tpu.pipeline_mode<synchronous>, transform_indices = @transform_9, window_bounds = array<i64: 128, 64>}, {pipeline_mode = #tpu.pipeline_mode<synchronous>, transform_indices = @transform_10, window_bounds = array<i64: 64, 128>}, {transform_indices = @transform_11, window_bounds = array<i64: 16, 128>}]} {
    %c0 = arith.constant 0 : index
    %c0_0 = arith.constant 0 : index
    %0 = vector.load %arg1[%c0, %c0_0] : memref<16x4xbf16, #tpu.memory_space<vmem>>, vector<16x4xbf16>
    %c0_1 = arith.constant 0 : index
    %c0_2 = arith.constant 0 : index
    %1 = vector.load %arg2[%c0_1, %c0_2] : memref<1x3072xf32, #tpu.memory_space<vmem>>, vector<1x128xf32>
    %c0_3 = arith.constant 0 : index
    %c0_4 = arith.constant 0 : index
    %2 = vector.load %arg3[%c0_3, %c0_4] : memref<4x128xbf16, #tpu.memory_space<vmem>>, vector<4x128xbf16>
    %cst = arith.constant dense<0.000000e+00> : vector<16x128xf32>
    %3 = tpu.matmul %0, %2, %cst {dimension_numbers = #tpu.dot_dimension_numbers<[1], [0], [0], [1], [0, 0, 1, 1], [], []>} : vector<16x4xbf16>, vector<4x128xbf16>, vector<16x128xf32> -> vector<16x128xf32>
    %4 = vector.broadcast %1 : vector<1x128xf32> to vector<16x128xf32>
    %5 = arith.addf %3, %4 : vector<16x128xf32>
    %cst_5 = arith.constant 0.000000e+00 : f32
    %6 = vector.broadcast %cst_5 : f32 to vector<16x128xf32>
    %7 = arith.maximumf %5, %6 : vector<16x128xf32>
    %8 = arith.truncf %7 : vector<16x128xf32> to vector<16x128xbf16>
    %c0_6 = arith.constant 0 : index
    %c128 = arith.constant 128 : index
    %9 = vector.load %arg2[%c0_6, %c128] : memref<1x3072xf32, #tpu.memory_space<vmem>>, vector<1x256xf32>
    %c0_7 = arith.constant 0 : index
    %c0_8 = arith.constant 0 : index
    %10 = vector.load %arg4[%c0_7, %c0_8] : memref<128x256xbf16, #tpu.memory_space<vmem>>, vector<128x256xbf16>
    %cst_9 = arith.constant dense<0.000000e+00> : vector<16x256xf32>
    %11 = tpu.matmul %8, %10, %cst_9 {dimension_numbers = #tpu.dot_dimension_numbers<[1], [0], [0], [1], [0, 0, 1, 1], [], []>} : vector<16x128xbf16>, vector<128x256xbf16>, vector<16x256xf32> -> vector<16x256xf32>
    %12 = vector.broadcast %9 : vector<1x256xf32> to vector<16x256xf32>
    %13 = arith.addf %11, %12 : vector<16x256xf32>
    %cst_10 = arith.constant 0.000000e+00 : f32
    %14 = vector.broadcast %cst_10 : f32 to vector<16x256xf32>
    %15 = arith.maximumf %13, %14 : vector<16x256xf32>
    %16 = arith.truncf %15 : vector<16x256xf32> to vector<16x256xbf16>
    %c0_11 = arith.constant 0 : index
    %c384 = arith.constant 384 : index
    %17 = vector.load %arg2[%c0_11, %c384] : memref<1x3072xf32, #tpu.memory_space<vmem>>, vector<1x512xf32>
    %c0_12 = arith.constant 0 : index
    %c0_13 = arith.constant 0 : index
    %18 = vector.load %arg5[%c0_12, %c0_13] : memref<256x512xbf16, #tpu.memory_space<vmem>>, vector<256x512xbf16>
    %cst_14 = arith.constant dense<0.000000e+00> : vector<16x512xf32>
    %19 = tpu.matmul %16, %18, %cst_14 {dimension_numbers = #tpu.dot_dimension_numbers<[1], [0], [0], [1], [0, 0, 1, 1], [], []>} : vector<16x256xbf16>, vector<256x512xbf16>, vector<16x512xf32> -> vector<16x512xf32>
    %20 = vector.broadcast %17 : vector<1x512xf32> to vector<16x512xf32>
    %21 = arith.addf %19, %20 : vector<16x512xf32>
    %cst_15 = arith.constant 0.000000e+00 : f32
    %22 = vector.broadcast %cst_15 : f32 to vector<16x512xf32>
    %23 = arith.maximumf %21, %22 : vector<16x512xf32>
    %24 = arith.truncf %23 : vector<16x512xf32> to vector<16x512xbf16>
    %c0_16 = arith.constant 0 : index
    %c896 = arith.constant 896 : index
    %25 = vector.load %arg2[%c0_16, %c896] : memref<1x3072xf32, #tpu.memory_space<vmem>>, vector<1x1024xf32>
    %c0_17 = arith.constant 0 : index
    %c0_18 = arith.constant 0 : index
    %26 = vector.load %arg6[%c0_17, %c0_18] : memref<512x1024xbf16, #tpu.memory_space<vmem>>, vector<512x1024xbf16>
    %cst_19 = arith.constant dense<0.000000e+00> : vector<16x1024xf32>
    %27 = tpu.matmul %24, %26, %cst_19 {dimension_numbers = #tpu.dot_dimension_numbers<[1], [0], [0], [1], [0, 0, 1, 1], [], []>} : vector<16x512xbf16>, vector<512x1024xbf16>, vector<16x1024xf32> -> vector<16x1024xf32>
    %28 = vector.broadcast %25 : vector<1x1024xf32> to vector<16x1024xf32>
    %29 = arith.addf %27, %28 : vector<16x1024xf32>
    %cst_20 = arith.constant 0.000000e+00 : f32
    %30 = vector.broadcast %cst_20 : f32 to vector<16x1024xf32>
    %31 = arith.maximumf %29, %30 : vector<16x1024xf32>
    %32 = arith.truncf %31 : vector<16x1024xf32> to vector<16x1024xbf16>
    %c0_21 = arith.constant 0 : index
    %c1920 = arith.constant 1920 : index
    %33 = vector.load %arg2[%c0_21, %c1920] : memref<1x3072xf32, #tpu.memory_space<vmem>>, vector<1x512xf32>
    %c0_22 = arith.constant 0 : index
    %c0_23 = arith.constant 0 : index
    %34 = vector.load %arg7[%c0_22, %c0_23] : memref<1024x512xbf16, #tpu.memory_space<vmem>>, vector<1024x512xbf16>
    %cst_24 = arith.constant dense<0.000000e+00> : vector<16x512xf32>
    %35 = tpu.matmul %32, %34, %cst_24 {dimension_numbers = #tpu.dot_dimension_numbers<[1], [0], [0], [1], [0, 0, 1, 1], [], []>} : vector<16x1024xbf16>, vector<1024x512xbf16>, vector<16x512xf32> -> vector<16x512xf32>
    %36 = vector.broadcast %33 : vector<1x512xf32> to vector<16x512xf32>
    %37 = arith.addf %35, %36 : vector<16x512xf32>
    %cst_25 = arith.constant 0.000000e+00 : f32
    %38 = vector.broadcast %cst_25 : f32 to vector<16x512xf32>
    %39 = arith.maximumf %37, %38 : vector<16x512xf32>
    %40 = arith.truncf %39 : vector<16x512xf32> to vector<16x512xbf16>
    %c0_26 = arith.constant 0 : index
    %c2432 = arith.constant 2432 : index
    %41 = vector.load %arg2[%c0_26, %c2432] : memref<1x3072xf32, #tpu.memory_space<vmem>>, vector<1x256xf32>
    %c0_27 = arith.constant 0 : index
    %c0_28 = arith.constant 0 : index
    %42 = vector.load %arg8[%c0_27, %c0_28] : memref<512x256xbf16, #tpu.memory_space<vmem>>, vector<512x256xbf16>
    %cst_29 = arith.constant dense<0.000000e+00> : vector<16x256xf32>
    %43 = tpu.matmul %40, %42, %cst_29 {dimension_numbers = #tpu.dot_dimension_numbers<[1], [0], [0], [1], [0, 0, 1, 1], [], []>} : vector<16x512xbf16>, vector<512x256xbf16>, vector<16x256xf32> -> vector<16x256xf32>
    %44 = vector.broadcast %41 : vector<1x256xf32> to vector<16x256xf32>
    %45 = arith.addf %43, %44 : vector<16x256xf32>
    %cst_30 = arith.constant 0.000000e+00 : f32
    %46 = vector.broadcast %cst_30 : f32 to vector<16x256xf32>
    %47 = arith.maximumf %45, %46 : vector<16x256xf32>
    %48 = arith.truncf %47 : vector<16x256xf32> to vector<16x256xbf16>
    %c0_31 = arith.constant 0 : index
    %c2688 = arith.constant 2688 : index
    %49 = vector.load %arg2[%c0_31, %c2688] : memref<1x3072xf32, #tpu.memory_space<vmem>>, vector<1x128xf32>
    %c0_32 = arith.constant 0 : index
    %c0_33 = arith.constant 0 : index
    %50 = vector.load %arg9[%c0_32, %c0_33] : memref<256x128xbf16, #tpu.memory_space<vmem>>, vector<256x128xbf16>
    %cst_34 = arith.constant dense<0.000000e+00> : vector<16x128xf32>
    %51 = tpu.matmul %48, %50, %cst_34 {dimension_numbers = #tpu.dot_dimension_numbers<[1], [0], [0], [1], [0, 0, 1, 1], [], []>} : vector<16x256xbf16>, vector<256x128xbf16>, vector<16x128xf32> -> vector<16x128xf32>
    %52 = vector.broadcast %49 : vector<1x128xf32> to vector<16x128xf32>
    %53 = arith.addf %51, %52 : vector<16x128xf32>
    %cst_35 = arith.constant 0.000000e+00 : f32
    %54 = vector.broadcast %cst_35 : f32 to vector<16x128xf32>
    %55 = arith.maximumf %53, %54 : vector<16x128xf32>
    %56 = arith.truncf %55 : vector<16x128xf32> to vector<16x128xbf16>
    %c0_36 = arith.constant 0 : index
    %c2816 = arith.constant 2816 : index
    %57 = vector.load %arg2[%c0_36, %c2816] : memref<1x3072xf32, #tpu.memory_space<vmem>>, vector<1x64xf32>
    %c0_37 = arith.constant 0 : index
    %c0_38 = arith.constant 0 : index
    %58 = vector.load %arg10[%c0_37, %c0_38] : memref<128x64xbf16, #tpu.memory_space<vmem>>, vector<128x64xbf16>
    %cst_39 = arith.constant dense<0.000000e+00> : vector<16x64xf32>
    %59 = tpu.matmul %56, %58, %cst_39 {dimension_numbers = #tpu.dot_dimension_numbers<[1], [0], [0], [1], [0, 0, 1, 1], [], []>} : vector<16x128xbf16>, vector<128x64xbf16>, vector<16x64xf32> -> vector<16x64xf32>
    %60 = vector.broadcast %57 : vector<1x64xf32> to vector<16x64xf32>
    %61 = arith.addf %59, %60 : vector<16x64xf32>
    %cst_40 = arith.constant 0.000000e+00 : f32
    %62 = vector.broadcast %cst_40 : f32 to vector<16x64xf32>
    %63 = arith.maximumf %61, %62 : vector<16x64xf32>
    %64 = arith.truncf %63 : vector<16x64xf32> to vector<16x64xbf16>
    %c0_41 = arith.constant 0 : index
    %c2944 = arith.constant 2944 : index
    %65 = vector.load %arg2[%c0_41, %c2944] : memref<1x3072xf32, #tpu.memory_space<vmem>>, vector<1x128xf32>
    %c0_42 = arith.constant 0 : index
    %c0_43 = arith.constant 0 : index
    %66 = vector.load %arg11[%c0_42, %c0_43] : memref<64x128xbf16, #tpu.memory_space<vmem>>, vector<64x128xbf16>
    %cst_44 = arith.constant dense<0.000000e+00> : vector<16x128xf32>
    %67 = tpu.matmul %64, %66, %cst_44 {dimension_numbers = #tpu.dot_dimension_numbers<[1], [0], [0], [1], [0, 0, 1, 1], [], []>} : vector<16x64xbf16>, vector<64x128xbf16>, vector<16x128xf32> -> vector<16x128xf32>
    %68 = vector.broadcast %65 : vector<1x128xf32> to vector<16x128xf32>
    %69 = arith.addf %67, %68 : vector<16x128xf32>
    %70 = arith.truncf %69 : vector<16x128xf32> to vector<16x128xbf16>
    %c0_45 = arith.constant 0 : index
    %c0_46 = arith.constant 0 : index
    %71 = vector.load %arg12[%c0_45, %c0_46] : memref<16x128xbf16, #tpu.memory_space<vmem>>, vector<16x128xbf16>
    tpu.vector_store %arg12[%c0_45, %c0_46], %70 {strides = array<i32>} : memref<16x128xbf16, #tpu.memory_space<vmem>>, vector<16x128xbf16>,
    return
  }
  func.func @transform_0(%arg0: i32) -> (i32, i32) {
    %c0_i32 = arith.constant 0 : i32
    %c0_i32_0 = arith.constant 0 : i32
    return %arg0, %c0_i32 : i32, i32
  }
  func.func @transform_1(%arg0: i32) -> (i32, i32) {
    %c0_i32 = arith.constant 0 : i32
    %c0_i32_0 = arith.constant 0 : i32
    %c0_i32_1 = arith.constant 0 : i32
    return %c0_i32, %c0_i32_0 : i32, i32
  }
  func.func @transform_2(%arg0: i32) -> (i32, i32) {
    %c0_i32 = arith.constant 0 : i32
    %c0_i32_0 = arith.constant 0 : i32
    %c0_i32_1 = arith.constant 0 : i32
    return %c0_i32, %c0_i32_0 : i32, i32
  }
  func.func @transform_3(%arg0: i32) -> (i32, i32) {
    %c0_i32 = arith.constant 0 : i32
    %c0_i32_0 = arith.constant 0 : i32
    %c0_i32_1 = arith.constant 0 : i32
    return %c0_i32, %c0_i32_0 : i32, i32
  }
  func.func @transform_4(%arg0: i32) -> (i32, i32) {
    %c0_i32 = arith.constant 0 : i32
    %c0_i32_0 = arith.constant 0 : i32
    %c0_i32_1 = arith.constant 0 : i32
    return %c0_i32, %c0_i32_0 : i32, i32
  }
  func.func @transform_5(%arg0: i32) -> (i32, i32) {
    %c0_i32 = arith.constant 0 : i32
    %c0_i32_0 = arith.constant 0 : i32
    %c0_i32_1 = arith.constant 0 : i32
    return %c0_i32, %c0_i32_0 : i32, i32
  }
  func.func @transform_6(%arg0: i32) -> (i32, i32) {
    %c0_i32 = arith.constant 0 : i32
    %c0_i32_0 = arith.constant 0 : i32
    %c0_i32_1 = arith.constant 0 : i32
    return %c0_i32, %c0_i32_0 : i32, i32
  }
  func.func @transform_7(%arg0: i32) -> (i32, i32) {
    %c0_i32 = arith.constant 0 : i32
    %c0_i32_0 = arith.constant 0 : i32
    %c0_i32_1 = arith.constant 0 : i32
    return %c0_i32, %c0_i32_0 : i32, i32
  }
  func.func @transform_8(%arg0: i32) -> (i32, i32) {
    %c0_i32 = arith.constant 0 : i32
    %c0_i32_0 = arith.constant 0 : i32
    %c0_i32_1 = arith.constant 0 : i32
    return %c0_i32, %c0_i32_0 : i32, i32
  }
  func.func @transform_9(%arg0: i32) -> (i32, i32) {
    %c0_i32 = arith.constant 0 : i32
    %c0_i32_0 = arith.constant 0 : i32
    %c0_i32_1 = arith.constant 0 : i32
    return %c0_i32, %c0_i32_0 : i32, i32
  }
  func.func @transform_10(%arg0: i32) -> (i32, i32) {
    %c0_i32 = arith.constant 0 : i32
    %c0_i32_0 = arith.constant 0 : i32
    %c0_i32_1 = arith.constant 0 : i32
    return %c0_i32, %c0_i32_0 : i32, i32
  }
  func.func @transform_11(%arg0: i32) -> (i32, i32) {
    %c0_i32 = arith.constant 0 : i32
    %c0_i32_0 = arith.constant 0 : i32
    return %arg0, %c0_i32 : i32, i32
  }
}

module attributes {stable_mosaic.version = 11 : i64} {
  func.func @bb84nn_kernel(%arg0: i32, %arg1: memref<16x4xbf16, #tpu.memory_space<vmem>>, %arg2: memref<1x3072xf32, #tpu.memory_space<vmem>>, %arg3: memref<4x128xbf16, #tpu.memory_space<vmem>>, %arg4: memref<128x256xbf16, #tpu.memory_space<vmem>>, %arg5: memref<256x512xbf16, #tpu.memory_space<vmem>>, %arg6: memref<512x1024xbf16, #tpu.memory_space<vmem>>, %arg7: memref<1024x512xbf16, #tpu.memory_space<vmem>>, %arg8: memref<512x256xbf16, #tpu.memory_space<vmem>>, %arg9: memref<256x128xbf16, #tpu.memory_space<vmem>>, %arg10: memref<128x64xbf16, #tpu.memory_space<vmem>>, %arg11: memref<64x128xbf16, #tpu.memory_space<vmem>>, %arg12: memref<16x128xbf16, #tpu.memory_space<vmem>>) attributes {dimension_semantics = [#tpu.dimension_semantics<parallel>], iteration_bounds = array<i64: 1>, scalar_prefetch = 0 : i64, scratch_operands = 0 : i64, tpu.core_type = #tpu.core_type<tc>, window_params = [{transform_indices = @transform_0, window_bounds = array<i64: 16, 4>}, {pipeline_mode = #tpu.pipeline_mode<synchronous>, transform_indices = @transform_1, window_bounds = array<i64: 1, 3072>}, {pipeline_mode = #tpu.pipeline_mode<synchronous>, transform_indices = @transform_2, window_bounds = array<i64: 4, 128>}, {pipeline_mode = #tpu.pipeline_mode<synchronous>, transform_indices = @transform_3, window_bounds = array<i64: 128, 256>}, {pipeline_mode = #tpu.pipeline_mode<synchronous>, transform_indices = @transform_4, window_bounds = array<i64: 256, 512>}, {pipeline_mode = #tpu.pipeline_mode<synchronous>, transform_indices = @transform_5, window_bounds = array<i64: 512, 1024>}, {pipeline_mode = #tpu.pipeline_mode<synchronous>, transform_indices = @transform_6, window_bounds = array<i64: 1024, 512>}, {pipeline_mode = #tpu.pipeline_mode<synchronous>, transform_indices = @transform_7, window_bounds = array<i64: 512, 256>}, {pipeline_mode = #tpu.pipeline_mode<synchronous>, transform_indices = @transform_8, window_bounds = array<i64: 256, 128>}, {pipeline_mode = #tpu.pipeline_mode<synchronous>, transform_indices = @transform_9, window_bounds = array<i64: 128, 64>}, {pipeline_mode = #tpu.pipeline_mode<synchronous>, transform_indices = @transform_10, window_bounds = array<i64: 64, 128>}, {transform_indices = @transform_11, window_bounds = array<i64: 16, 128>}]} {
    %c0 = arith.constant 0 : index
    %c0_0 = arith.constant 0 : index
    %0 = vector.load %arg1[%c0, %c0_0] : memref<16x4xbf16, #tpu.memory_space<vmem>>, vector<16x4xbf16>
    %c0_1 = arith.constant 0 : index
    %c0_2 = arith.constant 0 : index
    %1 = vector.load %arg2[%c0_1, %c0_2] : memref<1x3072xf32, #tpu.memory_space<vmem>>, vector<1x128xf32>
    %c0_3 = arith.constant 0 : index
    %c0_4 = arith.constant 0 : index
    %2 = vector.load %arg3[%c0_3, %c0_4] : memref<4x128xbf16, #tpu.memory_space<vmem>>, vector<4x128xbf16>
    %cst = arith.constant dense<0.000000e+00> : vector<16x128xf32>
    %3 = tpu.matmul %0, %2, %cst {dimension_numbers = #tpu.dot_dimension_numbers<[1], [0], [0], [1], [0, 0, 1, 1], [], []>} : vector<16x4xbf16>, vector<4x128xbf16>, vector<16x128xf32> -> vector<16x128xf32>
    %4 = vector.broadcast %1 : vector<1x128xf32> to vector<16x128xf32>
    %5 = arith.addf %3, %4 : vector<16x128xf32>
    %cst_5 = arith.constant 0.000000e+00 : f32
    %6 = vector.broadcast %cst_5 : f32 to vector<16x128xf32>
    %7 = arith.maximumf %5, %6 : vector<16x128xf32>
    %8 = arith.truncf %7 : vector<16x128xf32> to vector<16x128xbf16>
    %c0_6 = arith.constant 0 : index
    %c128 = arith.constant 128 : index
    %9 = vector.load %arg2[%c0_6, %c128] : memref<1x3072xf32, #tpu.memory_space<vmem>>, vector<1x256xf32>
    %c0_7 = arith.constant 0 : index
    %c0_8 = arith.constant 0 : index
    %10 = vector.load %arg4[%c0_7, %c0_8] : memref<128x256xbf16, #tpu.memory_space<vmem>>, vector<128x256xbf16>
    %cst_9 = arith.constant dense<0.000000e+00> : vector<16x256xf32>
    %11 = tpu.matmul %8, %10, %cst_9 {dimension_numbers = #tpu.dot_dimension_numbers<[1], [0], [0], [1], [0, 0, 1, 1], [], []>} : vector<16x128xbf16>, vector<128x256xbf16>, vector<16x256xf32> -> vector<16x256xf32>
    %12 = vector.broadcast %9 : vector<1x256xf32> to vector<16x256xf32>
    %13 = arith.addf %11, %12 : vector<16x256xf32>
    %cst_10 = arith.constant 0.000000e+00 : f32
    %14 = vector.broadcast %cst_10 : f32 to vector<16x256xf32>
    %15 = arith.maximumf %13, %14 : vector<16x256xf32>
    %16 = arith.truncf %15 : vector<16x256xf32> to vector<16x256xbf16>
    %c0_11 = arith.constant 0 : index
    %c384 = arith.constant 384 : index
    %17 = vector.load %arg2[%c0_11, %c384] : memref<1x3072xf32, #tpu.memory_space<vmem>>, vector<1x512xf32>
    %c0_12 = arith.constant 0 : index
    %c0_13 = arith.constant 0 : index
    %18 = vector.load %arg5[%c0_12, %c0_13] : memref<256x512xbf16, #tpu.memory_space<vmem>>, vector<256x512xbf16>
    %cst_14 = arith.constant dense<0.000000e+00> : vector<16x512xf32>
    %19 = tpu.matmul %16, %18, %cst_14 {dimension_numbers = #tpu.dot_dimension_numbers<[1], [0], [0], [1], [0, 0, 1, 1], [], []>} : vector<16x256xbf16>, vector<256x512xbf16>, vector<16x512xf32> -> vector<16x512xf32>
    %20 = vector.broadcast %17 : vector<1x512xf32> to vector<16x512xf32>
    %21 = arith.addf %19, %20 : vector<16x512xf32>
    %cst_15 = arith.constant 0.000000e+00 : f32
    %22 = vector.broadcast %cst_15 : f32 to vector<16x512xf32>
    %23 = arith.maximumf %21, %22 : vector<16x512xf32>
    %24 = arith.truncf %23 : vector<16x512xf32> to vector<16x512xbf16>
    %c0_16 = arith.constant 0 : index
    %c896 = arith.constant 896 : index
    %25 = vector.load %arg2[%c0_16, %c896] : memref<1x3072xf32, #tpu.memory_space<vmem>>, vector<1x1024xf32>
    %c0_17 = arith.constant 0 : index
    %c0_18 = arith.constant 0 : index
    %26 = vector.load %arg6[%c0_17, %c0_18] : memref<512x1024xbf16, #tpu.memory_space<vmem>>, vector<512x1024xbf16>
    %cst_19 = arith.constant dense<0.000000e+00> : vector<16x1024xf32>
    %27 = tpu.matmul %24, %26, %cst_19 {dimension_numbers = #tpu.dot_dimension_numbers<[1], [0], [0], [1], [0, 0, 1, 1], [], []>} : vector<16x512xbf16>, vector<512x1024xbf16>, vector<16x1024xf32> -> vector<16x1024xf32>
    %28 = vector.broadcast %25 : vector<1x1024xf32> to vector<16x1024xf32>
    %29 = arith.addf %27, %28 : vector<16x1024xf32>
    %cst_20 = arith.constant 0.000000e+00 : f32
    %30 = vector.broadcast %cst_20 : f32 to vector<16x1024xf32>
    %31 = arith.maximumf %29, %30 : vector<16x1024xf32>
    %32 = arith.truncf %31 : vector<16x1024xf32> to vector<16x1024xbf16>
    %c0_21 = arith.constant 0 : index
    %c1920 = arith.constant 1920 : index
    %33 = vector.load %arg2[%c0_21, %c1920] : memref<1x3072xf32, #tpu.memory_space<vmem>>, vector<1x512xf32>
    %c0_22 = arith.constant 0 : index
    %c0_23 = arith.constant 0 : index
    %34 = vector.load %arg7[%c0_22, %c0_23] : memref<1024x512xbf16, #tpu.memory_space<vmem>>, vector<1024x512xbf16>
    %cst_24 = arith.constant dense<0.000000e+00> : vector<16x512xf32>
    %35 = tpu.matmul %32, %34, %cst_24 {dimension_numbers = #tpu.dot_dimension_numbers<[1], [0], [0], [1], [0, 0, 1, 1], [], []>} : vector<16x1024xbf16>, vector<1024x512xbf16>, vector<16x512xf32> -> vector<16x512xf32>
    %36 = vector.broadcast %33 : vector<1x512xf32> to vector<16x512xf32>
    %37 = arith.addf %35, %36 : vector<16x512xf32>
    %cst_25 = arith.constant 0.000000e+00 : f32
    %38 = vector.broadcast %cst_25 : f32 to vector<16x512xf32>
    %39 = arith.maximumf %37, %38 : vector<16x512xf32>
    %40 = arith.truncf %39 : vector<16x512xf32> to vector<16x512xbf16>
    %c0_26 = arith.constant 0 : index
    %c2432 = arith.constant 2432 : index
    %41 = vector.load %arg2[%c0_26, %c2432] : memref<1x3072xf32, #tpu.memory_space<vmem>>, vector<1x256xf32>
    %c0_27 = arith.constant 0 : index
    %c0_28 = arith.constant 0 : index
    %42 = vector.load %arg8[%c0_27, %c0_28] : memref<512x256xbf16, #tpu.memory_space<vmem>>, vector<512x256xbf16>
    %cst_29 = arith.constant dense<0.000000e+00> : vector<16x256xf32>
    %43 = tpu.matmul %40, %42, %cst_29 {dimension_numbers = #tpu.dot_dimension_numbers<[1], [0], [0], [1], [0, 0, 1, 1], [], []>} : vector<16x512xbf16>, vector<512x256xbf16>, vector<16x256xf32> -> vector<16x256xf32>
    %44 = vector.broadcast %41 : vector<1x256xf32> to vector<16x256xf32>
    %45 = arith.addf %43, %44 : vector<16x256xf32>
    %cst_30 = arith.constant 0.000000e+00 : f32
    %46 = vector.broadcast %cst_30 : f32 to vector<16x256xf32>
    %47 = arith.maximumf %45, %46 : vector<16x256xf32>
    %48 = arith.truncf %47 : vector<16x256xf32> to vector<16x256xbf16>
    %c0_31 = arith.constant 0 : index
    %c2688 = arith.constant 2688 : index
    %49 = vector.load %arg2[%c0_31, %c2688] : memref<1x3072xf32, #tpu.memory_space<vmem>>, vector<1x128xf32>
    %c0_32 = arith.constant 0 : index
    %c0_33 = arith.constant 0 : index
    %50 = vector.load %arg9[%c0_32, %c0_33] : memref<256x128xbf16, #tpu.memory_space<vmem>>, vector<256x128xbf16>
    %cst_34 = arith.constant dense<0.000000e+00> : vector<16x128xf32>
    %51 = tpu.matmul %48, %50, %cst_34 {dimension_numbers = #tpu.dot_dimension_numbers<[1], [0], [0], [1], [0, 0, 1, 1], [], []>} : vector<16x256xbf16>, vector<256x128xbf16>, vector<16x128xf32> -> vector<16x128xf32>
    %52 = vector.broadcast %49 : vector<1x128xf32> to vector<16x128xf32>
    %53 = arith.addf %51, %52 : vector<16x128xf32>
    %cst_35 = arith.constant 0.000000e+00 : f32
    %54 = vector.broadcast %cst_35 : f32 to vector<16x128xf32>
    %55 = arith.maximumf %53, %54 : vector<16x128xf32>
    %56 = arith.truncf %55 : vector<16x128xf32> to vector<16x128xbf16>
    %c0_36 = arith.constant 0 : index
    %c2816 = arith.constant 2816 : index
    %57 = vector.load %arg2[%c0_36, %c2816] : memref<1x3072xf32, #tpu.memory_space<vmem>>, vector<1x64xf32>
    %c0_37 = arith.constant 0 : index
    %c0_38 = arith.constant 0 : index
    %58 = vector.load %arg10[%c0_37, %c0_38] : memref<128x64xbf16, #tpu.memory_space<vmem>>, vector<128x64xbf16>
    %cst_39 = arith.constant dense<0.000000e+00> : vector<16x64xf32>
    %59 = tpu.matmul %56, %58, %cst_39 {dimension_numbers = #tpu.dot_dimension_numbers<[1], [0], [0], [1], [0, 0, 1, 1], [], []>} : vector<16x128xbf16>, vector<128x64xbf16>, vector<16x64xf32> -> vector<16x64xf32>
    %60 = vector.broadcast %57 : vector<1x64xf32> to vector<16x64xf32>
    %61 = arith.addf %59, %60 : vector<16x64xf32>
    %cst_40 = arith.constant 0.000000e+00 : f32
    %62 = vector.broadcast %cst_40 : f32 to vector<16x64xf32>
    %63 = arith.maximumf %61, %62 : vector<16x64xf32>
    %64 = arith.truncf %63 : vector<16x64xf32> to vector<16x64xbf16>
    %c0_41 = arith.constant 0 : index
    %c2944 = arith.constant 2944 : index
    %65 = vector.load %arg2[%c0_41, %c2944] : memref<1x3072xf32, #tpu.memory_space<vmem>>, vector<1x128xf32>
    %c0_42 = arith.constant 0 : index
    %c0_43 = arith.constant 0 : index
    %66 = vector.load %arg11[%c0_42, %c0_43] : memref<64x128xbf16, #tpu.memory_space<vmem>>, vector<64x128xbf16>
    %cst_44 = arith.constant dense<0.000000e+00> : vector<16x128xf32>
    %67 = tpu.matmul %64, %66, %cst_44 {dimension_numbers = #tpu.dot_dimension_numbers<[1], [0], [0], [1], [0, 0, 1, 1], [], []>} : vector<16x64xbf16>, vector<64x128xbf16>, vector<16x128xf32> -> vector<16x128xf32>
    %68 = vector.broadcast %65 : vector<1x128xf32> to vector<16x128xf32>
    %69 = arith.addf %67, %68 : vector<16x128xf32>
    %70 = arith.truncf %69 : vector<16x128xf32> to vector<16x128xbf16>
    %c0_45 = arith.constant 0 : index
    %c0_46 = arith.constant 0 : index
    %71 = vector.load %arg12[%c0_45, %c0_46] : memref<16x128xbf16, #tpu.memory_space<vmem>>, vector<16x128xbf16>
    tpu.vector_store %arg12[%c0_45, %c0_46], %70 {strides = array<i32>} : memref<16x128xbf16, #tpu.memory_space<vmem>>, vector<16x128xbf16>,
    return
  }
  func.func @transform_0(%arg0: i32) -> (i32, i32) {
    %c0_i32 = arith.constant 0 : i32
    %c0_i32_0 = arith.constant 0 : i32
    return %arg0, %c0_i32 : i32, i32
  }
  func.func @transform_1(%arg0: i32) -> (i32, i32) {
    %c0_i32 = arith.constant 0 : i32
    %c0_i32_0 = arith.constant 0 : i32
    %c0_i32_1 = arith.constant 0 : i32
    return %c0_i32, %c0_i32_0 : i32, i32
  }
  func.func @transform_2(%arg0: i32) -> (i32, i32) {
    %c0_i32 = arith.constant 0 : i32
    %c0_i32_0 = arith.constant 0 : i32
    %c0_i32_1 = arith.constant 0 : i32
    return %c0_i32, %c0_i32_0 : i32, i32
  }
  func.func @transform_3(%arg0: i32) -> (i32, i32) {
    %c0_i32 = arith.constant 0 : i32
    %c0_i32_0 = arith.constant 0 : i32
    %c0_i32_1 = arith.constant 0 : i32
    return %c0_i32, %c0_i32_0 : i32, i32
  }
  func.func @transform_4(%arg0: i32) -> (i32, i32) {
    %c0_i32 = arith.constant 0 : i32
    %c0_i32_0 = arith.constant 0 : i32
    %c0_i32_1 = arith.constant 0 : i32
    return %c0_i32, %c0_i32_0 : i32, i32
  }
  func.func @transform_5(%arg0: i32) -> (i32, i32) {
    %c0_i32 = arith.constant 0 : i32
    %c0_i32_0 = arith.constant 0 : i32
    %c0_i32_1 = arith.constant 0 : i32
    return %c0_i32, %c0_i32_0 : i32, i32
  }
  func.func @transform_6(%arg0: i32) -> (i32, i32) {
    %c0_i32 = arith.constant 0 : i32
    %c0_i32_0 = arith.constant 0 : i32
    %c0_i32_1 = arith.constant 0 : i32
    return %c0_i32, %c0_i32_0 : i32, i32
  }
  func.func @transform_7(%arg0: i32) -> (i32, i32) {
    %c0_i32 = arith.constant 0 : i32
    %c0_i32_0 = arith.constant 0 : i32
    %c0_i32_1 = arith.constant 0 : i32
    return %c0_i32, %c0_i32_0 : i32, i32
  }
  func.func @transform_8(%arg0: i32) -> (i32, i32) {
    %c0_i32 = arith.constant 0 : i32
    %c0_i32_0 = arith.constant 0 : i32
    %c0_i32_1 = arith.constant 0 : i32
    return %c0_i32, %c0_i32_0 : i32, i32
  }
  func.func @transform_9(%arg0: i32) -> (i32, i32) {
    %c0_i32 = arith.constant 0 : i32
    %c0_i32_0 = arith.constant 0 : i32
    %c0_i32_1 = arith.constant 0 : i32
    return %c0_i32, %c0_i32_0 : i32, i32
  }
  func.func @transform_10(%arg0: i32) -> (i32, i32) {
    %c0_i32 = arith.constant 0 : i32
    %c0_i32_0 = arith.constant 0 : i32
    %c0_i32_1 = arith.constant 0 : i32
    return %c0_i32, %c0_i32_0 : i32, i32
  }
  func.func @transform_11(%arg0: i32) -> (i32, i32) {
    %c0_i32 = arith.constant 0 : i32
    %c0_i32_0 = arith.constant 0 : i32
    return %arg0, %c0_i32 : i32, i32
  }
}

</mosaic_0001>

<bundles_post_ra>
// kernel: tpu_custom_call.1
= control target key start
LH: loop header
LB: loop body
LE: loop exit
PB: predicated region body
PF: predicated region fallthrough
CT: control target
= control target key end

     0   :  { %16 = vsyncpa [#allocation3], 0  ;;  %s9739_s0 = inlined_call_operand.vmem [shape: bf16[16,4], index: 0, kind: input, shape index: {}]   ;;  %s9740_s1 = inlined_call_operand.vmem [shape: f32[1,3072], index: 1, kind: input, shape index: {}]   ;;  %s9741_s2 = inlined_call_operand.vmem [shape: bf16[4,128], index: 2, kind: input, shape index: {}]   ;;  %s9742_s3 = inlined_call_operand.hbm [shape: bf16[128,256], index: 3, kind: input, shape index: {}]   ;;  %s9743_s4 = inlined_call_operand.hbm [shape: bf16[256,512], index: 4, kind: input, shape index: {}]   ;;  %s9744_s5 = inlined_call_operand.hbm [shape: bf16[512,1024], index: 5, kind: input, shape index: {}]   ;;  %s9745_s6 = inlined_call_operand.hbm [shape: bf16[1024,512], index: 6, kind: input, shape index: {}]   ;;  %s9746_s7 = inlined_call_operand.hbm [shape: bf16[512,256], index: 7, kind: input, shape index: {}]   ;;  %s9747_s8 = inlined_call_operand.hbm [shape: bf16[256,128], index: 8, kind: input, shape index: {}]   ;;  %s9748_s9 = inlined_call_operand.vmem [shape: bf16[128,64], index: 9, kind: input, shape index: {}]   ;;  %s9749_s10 = inlined_call_operand.vmem [shape: bf16[64,128], index: 10, kind: input, shape index: {}]   ;;  %s9750_s11 = inlined_call_operand.hbm [shape: bf16[16,128], index: 11, kind: output, shape index: {}]  }
   0x1   :  { %17 = vsyncpa [#allocation6], 0 }
   0x2   :  { %18 = vsyncpa [#allocation9], 0 }
   0x3   :  { %19 = vsyncpa [#allocation12], 0  ;;  %s44_s19 = sshll.u32 %s9743_s4, 4  ;;  %s45_s19 = int_to_ptr.hbm [resolvable:$true] %s44_s19 }
   0x4   :  { %20 = vsyncpa [#allocation4], 0  ;;  %s9323_s20 = smov [#allocation5]   ;;  %s70_s24 = sshll.u32 %s9745_s6, 4  ;;  %s71_s24 = int_to_ptr.hbm [resolvable:$true] %s70_s24 }
   0x5   :  { %s46_s21 = sshll.u32 %s9323_s20, 4  ;;  %s9324_s25 = smov 256   ;;  %s47_s21 = int_to_ptr.vmem [resolvable:$true] %s46_s21 }
   0x6   :  { %s9325_s26 = smov 16   ;;  %s9326_s27 = smov [#allocation8]  }
   0x7   :  { %52 = dma.hbm_to_vmem [thread:$0]  %s45_s19, 8192, %s47_s21, [#allocation6], %s9324_s25, %s9324_s25, %s9325_s26  }
   0x8   :  { %s72_s28 = sshll.u32 %s9326_s27, 4  ;;  %s31_s12 = sshll.u32 %s9742_s3, 4  ;;  %s73_s28 = int_to_ptr.vmem [resolvable:$true] %s72_s28  ;;  %s32_s12 = int_to_ptr.hbm [resolvable:$true] %s31_s12 }
   0x9   :  { %78 = dma.hbm_to_vmem [thread:$0]  %s71_s24, 32768, %s73_s28, [#allocation9], %s9324_s25, %s9324_s25, %s9325_s26  }
   0xa   :  { %s9327_s4 = smov [#allocation2]   ;;  %s57_s6 = sshll.u32 %s9744_s5, 4  ;;  %s58_s6 = int_to_ptr.hbm [resolvable:$true] %s57_s6 }
   0xb   :  { %s33_s13 = sshll.u32 %s9327_s4, 4  ;;  %s9328_s16 = smov 128   ;;  %s34_s13 = int_to_ptr.vmem [resolvable:$true] %s33_s13 }
   0xc   :  { %s9329_s17 = smov 8   ;;  %s9330_s18 = smov [#allocation7]  }
   0xd   :  { %39 = dma.hbm_to_vmem [thread:$0]  %s32_s12, 2048, %s34_s13, [#allocation3], %s9328_s16, %s9328_s16, %s9329_s17  }
   0xe   :  { %s59_s19 = sshll.u32 %s9330_s18, 4  ;;  %s9331_s20 = smov 512   ;;  %s60_s19 = int_to_ptr.vmem [resolvable:$true] %s59_s19 }
   0xf   :  { %s9332_s21 = smov 32   ;;  %s83_s23 = sshll.u32 %s9746_s7, 4  ;;  %s84_s23 = int_to_ptr.hbm [resolvable:$true] %s83_s23 }
  0x10   :  { %65 = dma.hbm_to_vmem [thread:$0]  %s58_s6, 32768, %s60_s19, [#allocation6], %s9331_s20, %s9331_s20, %s9332_s21  }
  0x11   :  { %s9333_s24 = smov [#allocation10]   ;;  %s96_s27 = sshll.u32 %s9747_s8, 4  ;;  %s97_s27 = int_to_ptr.hbm [resolvable:$true] %s96_s27 }
  0x12   :  { %s85_s25 = sshll.u32 %s9333_s24, 4  ;;  %s9334_s28 = smov [#allocation11]   ;;  %s86_s25 = int_to_ptr.vmem [resolvable:$true] %s85_s25 }
  0x13   :  { %91 = dma.hbm_to_vmem [thread:$0]  %s84_s23, 8192, %s86_s25, [#allocation9], %s9328_s16, %s9328_s16, %s9329_s17  }
  0x14   :  { %s98_s29 = sshll.u32 %s9334_s28, 4  ;;  %s9335_s30 = smov 64   ;;  %s99_s29 = int_to_ptr.vmem [resolvable:$true] %s98_s29 }
  0x15   :  { %s9336_s12 = smov 4  }
  0x16   :  { %104 = dma.hbm_to_vmem [thread:$0]  %s97_s27, 2048, %s99_s29, [#allocation12], %s9335_s30, %s9335_s30, %s9336_s12  }
  0x17   :  { %9313 = dma.done.wait [#allocation3], 2048  }
  0x18   :  { %9314 = vsyncadd [#allocation3], 4294965248 }
  0x19   :  { %9315 = dma.done.wait [#allocation6], 40960  }
  0x1a   :  { %9316 = vsyncadd [#allocation6], 4294926336 }
  0x1b   :  { %9317 = dma.done.wait [#allocation9], 40960  }
  0x1c   :  { %9318 = vsyncadd [#allocation9], 4294926336 }
  0x1d   :  { %9319 = dma.done.wait [#allocation12], 2048  }
  0x1e   :  { %9320 = vsyncadd [#allocation12], 4294965248  ;;  %vm150_vm0 = vcmask 1041408   ;;  %v137_v0 = vld [vmem:[%s9741_s2] sm:$0x3]  ;;  %vm146_vm1 = vcmask 31744  }
  0x1f   :  { %v5756_v1 = vld [vmem:[#allocation2 + $0x70] sm:$0xf]  ;;  %v152_v2 = vsel %vm150_vm0, %v137_v0, 0  ;;  %v8435_v3 = vld [vmem:[%s9739_s0] sm:$0xff]  ;;  %v8451_v4 = vld [vmem:[#allocation2 + $0x74] sm:$0xf0] }
  0x20   :  { %v8450_v5 = vld [vmem:[#allocation2 + $0x74] sm:$0xf]  ;;  %161 = vmatpush.bf16.msra.mxu0 %v152_v2  ;;  %v5757_v6 = vor.u32 %v8451_v4, %v5756_v1  ;;  %v5758_v7 = vld [vmem:[#allocation2 + $0x78] sm:$0xf0]  ;;  %v5748_v8 = vld [vmem:[#allocation2 + $0x60] sm:$0xf] }
  0x21   :  { %v8449_v9 = vld [vmem:[#allocation2 + $0x64] sm:$0xf0]  ;;  %v5761_v10 = vor.u32 %v8450_v5, %v5758_v7  ;;  %v8448_v11 = vld [vmem:[#allocation2 + $0x64] sm:$0xf]  ;;  %v5750_v12 = vld [vmem:[#allocation2 + $0x68] sm:$0xf0] }
  0x22   :  { %273 = vmatpush.bf16.msra.mxu1 %v5757_v6  ;;  %v5749_v13 = vor.u32 %v8449_v9, %v5748_v8  ;;  %v5753_v14 = vor.u32 %v8448_v11, %v5750_v12  ;;  %v5740_v15 = vld [vmem:[#allocation2 + $0x50] sm:$0xf]  ;;  %v8447_v16 = vld [vmem:[#allocation2 + $0x54] sm:$0xf0]  ;;  %v8446_v17 = vld [vmem:[#allocation2 + $0x54] sm:$0xf] }
  0x23   :  { %5697 = vmatmul.msk.bf16.vlgmr.msra.gmra.mxu0 %vm146_vm1, %v8435_v3  ;;  %287 = vmatpush.bf16.msra.mxu2 %v5761_v10  ;;  %v5742_v18 = vld [vmem:[#allocation2 + $0x58] sm:$0xf0]  ;;  %v5741_v19 = vor.u32 %v8447_v16, %v5740_v15  ;;  %v5732_v21 = vld [vmem:[#allocation2 + $0x40] sm:$0xf]  ;;  %v8445_v22 = vld [vmem:[#allocation2 + $0x44] sm:$0xf0] }
  0x24   :  { %v5745_v20 = vor.u32 %v8446_v17, %v5742_v18  ;;  %v8444_v23 = vld [vmem:[#allocation2 + $0x44] sm:$0xf]  ;;  %v5734_v24 = vld [vmem:[#allocation2 + $0x48] sm:$0xf0]  ;;  %v5733_v25 = vor.u32 %v8445_v22, %v5732_v21  ;;  %v5724_v27 = vld [vmem:[#allocation2 + $0x30] sm:$0xf] }
  0x25   :  { %v5737_v26 = vor.u32 %v8444_v23, %v5734_v24  ;;  %v8443_v28 = vld [vmem:[#allocation2 + $0x34] sm:$0xf0]  ;;  %v8442_v29 = vld [vmem:[#allocation2 + $0x34] sm:$0xf]  ;;  %v5726_v31 = vld [vmem:[#allocation2 + $0x38] sm:$0xf0] }
  0x26   :  { %274 = vmatpush.bf16.msra.mxu1 %v5749_v13  ;;  %v5725_v30 = vor.u32 %v8443_v28, %v5724_v27  ;;  %v5729_v32 = vor.u32 %v8442_v29, %v5726_v31  ;;  %v5716_v33 = vld [vmem:[#allocation2 + $0x20] sm:$0xf]  ;;  %v8441_v34 = vld [vmem:[#allocation2 + $0x24] sm:$0xf0]  ;;  %v8440_v35 = vld [vmem:[#allocation2 + $0x24] sm:$0xf] }
  0x27   :  { %288 = vmatpush.bf16.msra.mxu2 %v5753_v14  ;;  %v5717_v36 = vor.u32 %v8441_v34, %v5716_v33  ;;  %v5718_v37 = vld [vmem:[#allocation2 + $0x28] sm:$0xf0]  ;;  %v5708_v39 = vld [vmem:[#allocation2 + $0x10] sm:$0xf]  ;;  %v8439_v40 = vld [vmem:[#allocation2 + $0x14] sm:$0xf0] }
  0x28   :  { %v5721_v38 = vor.u32 %v8440_v35, %v5718_v37  ;;  %v8438_v41 = vld [vmem:[#allocation2 + $0x14] sm:$0xf]  ;;  %v5709_v42 = vor.u32 %v8439_v40, %v5708_v39  ;;  %v5710_v43 = vld [vmem:[#allocation2 + $0x18] sm:$0xf0]  ;;  %v5700_v45 = vld [vmem:[#allocation2] sm:$0xf] }
  0x29   :  { %v5713_v44 = vor.u32 %v8438_v41, %v5710_v43  ;;  %v8437_v46 = vld [vmem:[#allocation2 + $0x4] sm:$0xf0]  ;;  %v8436_v47 = vld [vmem:[#allocation2 + $0x4] sm:$0xf]  ;;  %v5702_v49 = vld [vmem:[#allocation2 + $0x8] sm:$0xf0] }
  0x2a   :  { %275 = vmatpush.bf16.msra.mxu1 %v5741_v19  ;;  %v5701_v48 = vor.u32 %v8437_v46, %v5700_v45  ;;  %v5705_v50 = vor.u32 %v8436_v47, %v5702_v49  ;;  %v5876_v51 = vld [vmem:[#allocation5 + $0xe0] sm:$0xf]  ;;  %v8482_v52 = vld [vmem:[#allocation5 + $0xec] sm:$0xf0]  ;;  %v8480_v53 = vld [vmem:[#allocation5 + $0xe4] sm:$0xf] }
  0x2b   :  { %289 = vmatpush.bf16.msra.mxu2 %v5745_v20  ;;  %v5877_v54 = vor.u32 %v8482_v52, %v5876_v51  ;;  %v5878_v55 = vld [vmem:[#allocation5 + $0xf0] sm:$0xf0]  ;;  %v5860_v56 = vld [vmem:[#allocation5 + $0xc0] sm:$0xf]  ;;  %v8478_v57 = vld [vmem:[#allocation5 + $0xcc] sm:$0xf0] }
  0x2c   :  { %v5881_v58 = vor.u32 %v8480_v53, %v5878_v55  ;;  %v8476_v59 = vld [vmem:[#allocation5 + $0xc4] sm:$0xf]  ;;  %v5862_v60 = vld [vmem:[#allocation5 + $0xd0] sm:$0xf0]  ;;  %v6004_v61 = vld [vmem:[#allocation5 + $0x1e0] sm:$0xf]  ;;  %v5861_v62 = vor.u32 %v8478_v57, %v5860_v56 }
  0x2d   :  { %701 = vmatpush.bf16.msra.mxu3 %v5877_v54  ;;  %v8514_v63 = vld [vmem:[#allocation5 + $0x1ec] sm:$0xf0]  ;;  %v8512_v0 = vld [vmem:[#allocation5 + $0x1e4] sm:$0xf]  ;;  %v6006_v1 = vld [vmem:[#allocation5 + $0x1f0] sm:$0xf0]  ;;  %v5865_v2 = vor.u32 %v8476_v59, %v5862_v60 }
  0x2e   :  { %276 = vmatpush.bf16.msra.mxu1 %v5733_v25  ;;  %v6005_v3 = vor.u32 %v8514_v63, %v6004_v61  ;;  %v6009_v4 = vor.u32 %v8512_v0, %v6006_v1  ;;  %v5844_v5 = vld [vmem:[#allocation5 + $0xa0] sm:$0xf]  ;;  %v8474_v6 = vld [vmem:[#allocation5 + $0xac] sm:$0xf0]  ;;  %v8472_v7 = vld [vmem:[#allocation5 + $0xa4] sm:$0xf] }
  0x2f   :  { %290 = vmatpush.bf16.msra.mxu2 %v5737_v26  ;;  %v5846_v8 = vld [vmem:[#allocation5 + $0xb0] sm:$0xf0]  ;;  %v5988_v9 = vld [vmem:[#allocation5 + $0x1c0] sm:$0xf]  ;;  %v8510_v10 = vld [vmem:[#allocation5 + $0x1cc] sm:$0xf0]  ;;  %v5845_v14 = vor.u32 %v8474_v6, %v5844_v5 }
  0x30   :  { %715 = vmatpush.bf16.msrb.mxu0 %v6005_v3  ;;  %v5989_v11 = vor.u32 %v8510_v10, %v5988_v9  ;;  %v8508_v12 = vld [vmem:[#allocation5 + $0x1c4] sm:$0xf]  ;;  %v5990_v13 = vld [vmem:[#allocation5 + $0x1d0] sm:$0xf0]  ;;  %v5828_v16 = vld [vmem:[#allocation5 + $0x80] sm:$0xf]  ;;  %v5849_v18 = vor.u32 %v8472_v7, %v5846_v8 }
  0x31   :  { %702 = vmatpush.bf16.msra.mxu3 %v5861_v62  ;;  %v5993_v15 = vor.u32 %v8508_v12, %v5990_v13  ;;  %v8470_v17 = vld [vmem:[#allocation5 + $0x8c] sm:$0xf0]  ;;  %v5972_v19 = vld [vmem:[#allocation5 + $0x1a0] sm:$0xf]  ;;  %v8504_v21 = vld [vmem:[#allocation5 + $0x1a4] sm:$0xf] }
  0x32   :  { %277 = vmatpush.bf16.msra.mxu1 %v5725_v30  ;;  %v8506_v20 = vld [vmem:[#allocation5 + $0x1ac] sm:$0xf0]  ;;  %v8468_v22 = vld [vmem:[#allocation5 + $0x84] sm:$0xf]  ;;  %v5830_v23 = vld [vmem:[#allocation5 + $0x90] sm:$0xf0]  ;;  %v5829_v28 = vor.u32 %v8470_v17, %v5828_v16 }
  0x33   :  { %291 = vmatpush.bf16.msra.mxu2 %v5729_v32  ;;  %v5974_v24 = vld [vmem:[#allocation5 + $0x1b0] sm:$0xf0]  ;;  %v5973_v25 = vor.u32 %v8506_v20, %v5972_v19  ;;  %v5956_v27 = vld [vmem:[#allocation5 + $0x180] sm:$0xf]  ;;  %v8502_v29 = vld [vmem:[#allocation5 + $0x18c] sm:$0xf0]  ;;  %v5833_v32 = vor.u32 %v8468_v22, %v5830_v23 }
  0x34   :  { %716 = vmatpush.bf16.msrb.mxu0 %v5989_v11  ;;  %v5977_v26 = vor.u32 %v8504_v21, %v5974_v24  ;;  %v8500_v30 = vld [vmem:[#allocation5 + $0x184] sm:$0xf]  ;;  %v5958_v31 = vld [vmem:[#allocation5 + $0x190] sm:$0xf0]  ;;  %v5812_v33 = vld [vmem:[#allocation5 + $0x60] sm:$0xf]  ;;  %v5957_v37 = vor.u32 %v8502_v29, %v5956_v27 }
  0x35   :  { %703 = vmatpush.bf16.msra.mxu3 %v5845_v14  ;;  %v8466_v34 = vld [vmem:[#allocation5 + $0x6c] sm:$0xf0]  ;;  %v8464_v35 = vld [vmem:[#allocation5 + $0x64] sm:$0xf]  ;;  %v5940_v39 = vld [vmem:[#allocation5 + $0x160] sm:$0xf] }
  0x36   :  { %278 = vmatpush.bf16.msra.mxu1 %v5717_v36  ;;  %v5814_v36 = vld [vmem:[#allocation5 + $0x70] sm:$0xf0]  ;;  %v5813_v40 = vor.u32 %v8466_v34, %v5812_v33  ;;  %v8498_v41 = vld [vmem:[#allocation5 + $0x16c] sm:$0xf0]  ;;  %v5796_v45 = vld [vmem:[#allocation5 + $0x40] sm:$0xf] }
  0x37   :  { %292 = vmatpush.bf16.msra.mxu2 %v5721_v38  ;;  %v5961_v38 = vor.u32 %v8500_v30, %v5958_v31  ;;  %v5942_v43 = vld [vmem:[#allocation5 + $0x170] sm:$0xf0]  ;;  %v8462_v46 = vld [vmem:[#allocation5 + $0x4c] sm:$0xf0]  ;;  %v5924_v52 = vld [vmem:[#allocation5 + $0x140] sm:$0xf] }
  0x38   :  { %717 = vmatpush.bf16.msrb.mxu0 %v5973_v25  ;;  %v5798_v49 = vld [vmem:[#allocation5 + $0x50] sm:$0xf0]  ;;  %v5797_v53 = vor.u32 %v8462_v46, %v5796_v45  ;;  %v8494_v54 = vld [vmem:[#allocation5 + $0x14c] sm:$0xf0]  ;;  %v8492_v55 = vld [vmem:[#allocation5 + $0x144] sm:$0xf] }
  0x39   :  { %704 = vmatpush.bf16.msra.mxu3 %v5829_v28  ;;  %v5926_v56 = vld [vmem:[#allocation5 + $0x150] sm:$0xf0]  ;;  %v9140_v57 = vld [vmem:[%s9740_s1] ss:$0 sm:$0xff]  ;;  %v8458_v60 = vld [vmem:[#allocation5 + $0x2c] sm:$0xf0]  ;;  %v5925_v63 = vor.u32 %v8494_v54, %v5924_v52 }
  0x3a   :  { %279 = vmatpush.bf16.msra.mxu1 %v5709_v42  ;;  %v8496_v42 = vld [vmem:[#allocation5 + $0x164] sm:$0xf]  ;;  %v5780_v59 = vld [vmem:[#allocation5 + $0x20] sm:$0xf]  ;;  %v5782_v62 = vld [vmem:[#allocation5 + $0x30] sm:$0xf0]  ;;  %v5929_v0 = vor.u32 %v8492_v55, %v5926_v56 }
  0x3b   :  { %293 = vmatpush.bf16.msra.mxu2 %v5713_v44  ;;  %v5817_v44 = vor.u32 %v8464_v35, %v5814_v36  ;;  %v5945_v51 = vor.u32 %v8496_v42, %v5942_v43  ;;  %v8456_v61 = vld [vmem:[#allocation5 + $0x24] sm:$0xf]  ;;  %v5781_v1 = vor.u32 %v8458_v60, %v5780_v59  ;;  %v8454_v5 = vld [vmem:[#allocation5 + $0xc] sm:$0xf0]  ;;  %v5766_v9 = vld [vmem:[#allocation5 + $0x10] sm:$0xf0] }
  0x3c   :  { %718 = vmatpush.bf16.msrb.mxu0 %v5957_v37  ;;  %v5785_v3 = vor.u32 %v8456_v61, %v5782_v62  ;;  %v8452_v8 = vld [vmem:[#allocation5 + $0x4] sm:$0xf]  ;;  %v8483_v16 = vld [vmem:[#allocation5 + $0xf4] sm:$0xf0]  ;;  %v8481_v17 = vld [vmem:[#allocation5 + $0xec] sm:$0xf] }
  0x3d   :  { %705 = vmatpush.bf16.msra.mxu3 %v5813_v40  ;;  %v5769_v13 = vor.u32 %v8452_v8, %v5766_v9  ;;  %v5886_v19 = vld [vmem:[#allocation5 + $0xf8] sm:$0xf0]  ;;  %v5908_v20 = vld [vmem:[#allocation5 + $0x120] sm:$0xf]  ;;  %v8490_v21 = vld [vmem:[#allocation5 + $0x12c] sm:$0xf0] }
  0x3e   :  { %280 = vmatpush.bf16.msra.mxu1 %v5701_v48  ;;  %v8460_v48 = vld [vmem:[#allocation5 + $0x44] sm:$0xf]  ;;  %v5889_v22 = vor.u32 %v8481_v17, %v5886_v19  ;;  %v5909_v23 = vor.u32 %v8490_v21, %v5908_v20  ;;  %v5910_v25 = vld [vmem:[#allocation5 + $0x130] sm:$0xf0]  ;;  %v5868_v27 = vld [vmem:[#allocation5 + $0xc8] sm:$0xf] }
  0x3f   :  { %294 = vmatpush.bf16.msra.mxu2 %v5705_v50  ;;  %v5941_v50 = vor.u32 %v8498_v41, %v5940_v39  ;;  %v8488_v24 = vld [vmem:[#allocation5 + $0x124] sm:$0xf]  ;;  %v8479_v28 = vld [vmem:[#allocation5 + $0xd4] sm:$0xf0]  ;;  %v8477_v29 = vld [vmem:[#allocation5 + $0xcc] sm:$0xf] }
  0x40   :  { %v5869_v30 = vor.u32 %v8479_v28, %v5868_v27  ;;  %v5870_v31 = vld [vmem:[#allocation5 + $0xd8] sm:$0xf0]  ;;  %v8486_v33 = vld [vmem:[#allocation5 + $0x10c] sm:$0xf0]  ;;  %v8484_v36 = vld [vmem:[#allocation5 + $0x104] sm:$0xf] }
  0x41   :  { %719 = vmatpush.bf16.msrb.mxu0 %v5941_v50  ;;  %706 = vmatpush.bf16.msra.mxu3 %v5797_v53  ;;  %v5873_v34 = vor.u32 %v8477_v29, %v5870_v31  ;;  %v5894_v37 = vld [vmem:[#allocation5 + $0x110] sm:$0xf0]  ;;  %v6012_v39 = vld [vmem:[#allocation5 + $0x1e8] sm:$0xf]  ;;  %v8515_v40 = vld [vmem:[#allocation5 + $0x1f4] sm:$0xf0] }
  0x42   :  { %729 = vmatpush.bf16.msrb.mxu1 %v5881_v58  ;;  %v5801_v58 = vor.u32 %v8460_v48, %v5798_v49  ;;  %v8513_v41 = vld [vmem:[#allocation5 + $0x1ec] sm:$0xf]  ;;  %v6013_v42 = vor.u32 %v8515_v40, %v6012_v39  ;;  %v6014_v43 = vld [vmem:[#allocation5 + $0x1f8] sm:$0xf0]  ;;  %v8475_v45 = vld [vmem:[#allocation5 + $0xb4] sm:$0xf0] }
  0x43   :  { %743 = vmatpush.bf16.msrb.mxu2 %v6009_v4  ;;  %v5764_v4 = vld [vmem:[#allocation5] sm:$0xf]  ;;  %v6017_v46 = vor.u32 %v8513_v41, %v6014_v43  ;;  %v8473_v48 = vld [vmem:[#allocation5 + $0xac] sm:$0xf]  ;;  %v5854_v49 = vld [vmem:[#allocation5 + $0xb8] sm:$0xf0] }
  0x44   :  { %v5765_v10 = vor.u32 %v8454_v5, %v5764_v4  ;;  %v5857_v50 = vor.u32 %v8473_v48, %v5854_v49  ;;  %v8511_v52 = vld [vmem:[#allocation5 + $0x1d4] sm:$0xf0]  ;;  %v8509_v53 = vld [vmem:[#allocation5 + $0x1cc] sm:$0xf]  ;;  %v5998_v55 = vld [vmem:[#allocation5 + $0x1d8] sm:$0xf0] }
  0x45   :  { %720 = vmatpush.bf16.msrb.mxu0 %v5925_v63  ;;  %707 = vmatpush.bf16.msra.mxu3 %v5781_v1  ;;  %v6001_v56 = vor.u32 %v8509_v53, %v5998_v55  ;;  %v8469_v59 = vld [vmem:[#allocation5 + $0x8c] sm:$0xf]  ;;  %v5838_v61 = vld [vmem:[#allocation5 + $0x98] sm:$0xf0]  ;;  %v5980_v63 = vld [vmem:[#allocation5 + $0x1a8] sm:$0xf] }
  0x46   :  { %730 = vmatpush.bf16.msrb.mxu1 %v5865_v2  ;;  %v5841_v62 = vor.u32 %v8469_v59, %v5838_v61  ;;  %v8505_v1 = vld [vmem:[#allocation5 + $0x1ac] sm:$0xf]  ;;  %v5820_v5 = vld [vmem:[#allocation5 + $0x68] sm:$0xf]  ;;  %v5822_v9 = vld [vmem:[#allocation5 + $0x78] sm:$0xf0] }
  0x47   :  { %744 = vmatpush.bf16.msrb.mxu2 %v5993_v15  ;;  %v5884_v15 = vld [vmem:[#allocation5 + $0xe8] sm:$0xf]  ;;  %v8461_v19 = vld [vmem:[#allocation5 + $0x4c] sm:$0xf]  ;;  %v5806_v21 = vld [vmem:[#allocation5 + $0x58] sm:$0xf0] }
  0x48   :  { %v5804_v17 = vld [vmem:[#allocation5 + $0x48] sm:$0xf]  ;;  %v5950_v27 = vld [vmem:[#allocation5 + $0x178] sm:$0xf0]  ;;  %v8457_v31 = vld [vmem:[#allocation5 + $0x2c] sm:$0xf] }
  0x49   :  { %708 = vmatpush.bf16.msra.mxu3 %v5765_v10  ;;  %721 = vmatpush.bf16.msrb.mxu0 %v5909_v23  ;;  %v5948_v23 = vld [vmem:[#allocation5 + $0x168] sm:$0xf]  ;;  %v5934_v39 = vld [vmem:[#allocation5 + $0x158] sm:$0xf0]  ;;  %v8453_v43 = vld [vmem:[#allocation5 + $0xc] sm:$0xf] }
  0x4a   :  { %731 = vmatpush.bf16.msrb.mxu1 %v5849_v18  ;;  %v5885_v18 = vor.u32 %v8483_v16, %v5884_v15  ;;  %v5966_v15 = vld [vmem:[#allocation5 + $0x198] sm:$0xf0]  ;;  %v5788_v29 = vld [vmem:[#allocation5 + $0x28] sm:$0xf]  ;;  %v8491_v48 = vld [vmem:[#allocation5 + $0x134] sm:$0xf0] }
  0x4b   :  { %745 = vmatpush.bf16.msrb.mxu2 %v5977_v26  ;;  %v5913_v26 = vor.u32 %v8488_v24, %v5910_v25  ;;  %v8499_v24 = vld [vmem:[#allocation5 + $0x174] sm:$0xf0]  ;;  %v8497_v25 = vld [vmem:[#allocation5 + $0x16c] sm:$0xf]  ;;  %v5772_v40 = vld [vmem:[#allocation5 + $0x8] sm:$0xf] }
  0x4c   :  { %v5953_v28 = vor.u32 %v8497_v25, %v5950_v27  ;;  %v8489_v49 = vld [vmem:[#allocation5 + $0x12c] sm:$0xf]  ;;  %v5900_v53 = vld [vmem:[#allocation5 + $0x108] sm:$0xf]  ;;  %v5902_v59 = vld [vmem:[#allocation5 + $0x118] sm:$0xf0] }
  0x4d   :  { %757 = vmatpush.bf16.msrb.mxu3 %v5885_v18  ;;  %v8463_v18 = vld [vmem:[#allocation5 + $0x54] sm:$0xf0]  ;;  %v8485_v55 = vld [vmem:[#allocation5 + $0x10c] sm:$0xf]  ;;  %v8560_v25 = vld [vmem:[#allocation7 + $0x15c] sm:$0xf0] }
  0x4e   :  { %732 = vmatpush.bf16.msrb.mxu1 %v5833_v32  ;;  %v5892_v32 = vld [vmem:[#allocation5 + $0x100] sm:$0xf]  ;;  %v5805_v20 = vor.u32 %v8463_v18, %v5804_v17  ;;  %vm5649_vm2 = vcmask 523264   ;;  %s5677_s7 = sshll.u32 %s9750_s11, 4  ;;  %s5678_s7 = int_to_ptr.hbm [resolvable:$true] %s5677_s7 }
  0x4f   :  { %746 = vmatpush.bf16.msrb.mxu2 %v5961_v38  ;;  %v5893_v35 = vor.u32 %v8486_v33, %v5892_v32  ;;  %v5897_v38 = vor.u32 %v8484_v36, %v5894_v37  ;;  %v5790_v33 = vld [vmem:[#allocation5 + $0x38] sm:$0xf0]  ;;  %v6500_v17 = vld [vmem:[#allocation7 + $0x3c0] sm:$0xf] }
  0x50   :  { %v5793_v36 = vor.u32 %v8457_v31, %v5790_v33  ;;  %v8696_v18 = vld [vmem:[#allocation7 + $0x59c] sm:$0xf0] }
  0x51   :  { %758 = vmatpush.bf16.msrb.mxu3 %v5869_v30  ;;  %722 = vmatpush.bf16.msrb.mxu0 %v5893_v35  ;;  %v8459_v30 = vld [vmem:[#allocation5 + $0x34] sm:$0xf0] }
  0x52   :  { %733 = vmatpush.bf16.msrb.mxu1 %v5817_v44  ;;  %v5852_v44 = vld [vmem:[#allocation5 + $0xa8] sm:$0xf]  ;;  %v5789_v32 = vor.u32 %v8459_v30, %v5788_v29  ;;  %v8495_v35 = vld [vmem:[#allocation5 + $0x154] sm:$0xf0]  ;;  %v6692_v29 = vld [vmem:[#allocation7 + $0x540] sm:$0xf] }
  0x53   :  { %747 = vmatpush.bf16.msrb.mxu2 %v5945_v51  ;;  %v5996_v51 = vld [vmem:[#allocation5 + $0x1c8] sm:$0xf]  ;;  %v8688_v30 = vld [vmem:[#allocation7 + $0x55c] sm:$0xf0] }
  0x54   :  { %v5997_v54 = vor.u32 %v8511_v52, %v5996_v51 }
  0x55   :  { %771 = vmatpush.bf16.msra.mxu0 %v6013_v42  ;;  %v8455_v42 = vld [vmem:[#allocation5 + $0x14] sm:$0xf0] }
  0x56   :  { %734 = vmatpush.bf16.msrb.mxu1 %v5801_v58  ;;  %v8471_v58 = vld [vmem:[#allocation5 + $0x94] sm:$0xf0] }
  0x57   :  { %748 = vmatpush.bf16.msrb.mxu2 %v5929_v0  ;;  %v8507_v0 = vld [vmem:[#allocation5 + $0x1b4] sm:$0xf0] }
  0x59   :  { %772 = vmatpush.bf16.msra.mxu0 %v5997_v54  ;;  %v8487_v54 = vld [vmem:[#allocation5 + $0x114] sm:$0xf0] }
  0x5a   :  { %735 = vmatpush.bf16.msrb.mxu1 %v5785_v3  ;;  %v5982_v3 = vld [vmem:[#allocation5 + $0x1b8] sm:$0xf0] }
  0x5b   :  { %749 = vmatpush.bf16.msrb.mxu2 %v5913_v26  ;;  %v5985_v4 = vor.u32 %v8505_v1, %v5982_v3  ;;  %v5949_v26 = vor.u32 %v8499_v24, %v5948_v23  ;;  %v6244_v3 = vld [vmem:[#allocation7 + $0x1c0] sm:$0xf] }
  0x5c   :  { %v6180_v24 = vld [vmem:[#allocation7 + $0x140] sm:$0xf] }
  0x5e   :  { %736 = vmatpush.bf16.msrb.mxu1 %v5769_v13  ;;  %v8501_v13 = vld [vmem:[#allocation5 + $0x18c] sm:$0xf] }
  0x5f   :  { %750 = vmatpush.bf16.msrb.mxu2 %v5897_v38  ;;  %v5969_v16 = vor.u32 %v8501_v13, %v5966_v15  ;;  %v8493_v38 = vld [vmem:[#allocation5 + $0x14c] sm:$0xf]  ;;  %v8568_v13 = vld [vmem:[#allocation7 + $0x19c] sm:$0xf0] }
  0x60   :  { %v5937_v41 = vor.u32 %v8493_v38, %v5934_v39  ;;  %v6724_v15 = vld [vmem:[#allocation7 + $0x580] sm:$0xf]  ;;  %v6181_v38 = vor.u32 %v8560_v25, %v6180_v24  ;;  %v6214_v24 = vld [vmem:[#allocation7 + $0x1a0] sm:$0xf0] }
  0x61   :  { %v6148_v39 = vld [vmem:[#allocation7 + $0x100] sm:$0xf] }
  0x62   :  { %v6276_v25 = vld [vmem:[#allocation7 + $0x200] sm:$0xf] }
  0xa0   :  { %v163_v47 = vpop.f32.mrf.mxu0 }
  0xa1   :  { %v164_v2 = vadd.f32 %v9140_v57, %v163_v47  ;;  %v5853_v47 = vor.u32 %v8475_v45, %v5852_v44  ;;  %v5774_v44 = vld [vmem:[#allocation5 + $0x18] sm:$0xf0]  ;;  %v5773_v45 = vor.u32 %v8455_v42, %v5772_v40  ;;  %v6693_v40 = vor.u32 %v8688_v30, %v6692_v29  ;;  %v6660_v42 = vld [vmem:[#allocation7 + $0x500] sm:$0xf] }
  0xa3   :  { %v168_v11 = vmax.f32 %v164_v2, 0.0  ;;  %759 = vmatpush.bf16.msrb.mxu3 %v5853_v47  ;;  %v5981_v2 = vor.u32 %v8507_v0, %v5980_v63  ;;  %v5916_v47 = vld [vmem:[#allocation5 + $0x128] sm:$0xf] }
  0xa4   :  { %v5917_v51 = vor.u32 %v8491_v48, %v5916_v47  ;;  %v8624_v47 = vld [vmem:[#allocation7 + $0x35c] sm:$0xf0] }
  0xa5   :  { %773 = vmatpush.bf16.msra.mxu0 %v5981_v2  ;;  %v6948_v48 = vld [vmem:[#allocation7 + $0x740] sm:$0xf] }
  0xa8   :  { %v165_v6 = vpop.f32.mrf.mxu0 }
  0xa9   :  { %v166_v7 = vadd.f32 %v9140_v57, %v165_v6  ;;  %v5836_v57 = vld [vmem:[#allocation5 + $0x88] sm:$0xf]  ;;  %v8467_v6 = vld [vmem:[#allocation5 + $0x74] sm:$0xf0] }
  0xaa   :  { %v5837_v60 = vor.u32 %v8471_v58, %v5836_v57  ;;  %v5821_v8 = vor.u32 %v8467_v6, %v5820_v5  ;;  %v5901_v58 = vor.u32 %v8487_v54, %v5900_v53  ;;  %v8544_v53 = vld [vmem:[#allocation7 + $0xdc] sm:$0xf0] }
  0xab   :  { %v169_v12 = vmax.f32 %v166_v7, 0.0  ;;  %v8465_v7 = vld [vmem:[#allocation5 + $0x6c] sm:$0xf]  ;;  %v6628_v54 = vld [vmem:[#allocation7 + $0x4c0] sm:$0xf] }
  0xac   :  { %760 = vmatpush.bf16.msrb.mxu3 %v5837_v60  ;;  %v5825_v10 = vor.u32 %v8465_v7, %v5822_v9  ;;  %v5905_v60 = vor.u32 %v8485_v55, %v5902_v59  ;;  %v6756_v7 = vld [vmem:[#allocation7 + $0x5c0] sm:$0xf] }
  0xad   :  { %v170_v14 = vpack.c.bf16 %v169_v12, %v168_v11  ;;  %v5964_v11 = vld [vmem:[#allocation5 + $0x188] sm:$0xf]  ;;  %v8503_v12 = vld [vmem:[#allocation5 + $0x194] sm:$0xf0]  ;;  %v8704_v9 = vld [vmem:[#allocation7 + $0x5dc] sm:$0xf0] }
  0xae   :  { %v8672_v55 = vld [vmem:[#allocation7 + $0x4dc] sm:$0xf0] }
  0xaf   :  { %281 = vmatmul.bf16.vlgmr.msra.gmra.mxu1 %v170_v14  ;;  %295 = vmatmul.bf16.vlgmr.msra.gmra.mxu2 %v170_v14  ;;  %v5965_v14 = vor.u32 %v8503_v12, %v5964_v11  ;;  %v6212_v12 = vld [vmem:[#allocation7 + $0x180] sm:$0xf] }
  0xb0   :  { %785 = vmatpush.bf16.msra.mxu1 %v5889_v22  ;;  %799 = vmatpush.bf16.msra.mxu2 %v6017_v46  ;;  %v5809_v22 = vor.u32 %v8461_v19, %v5806_v21  ;;  %v5777_v46 = vor.u32 %v8453_v43, %v5774_v44  ;;  %v7012_v21 = vld [vmem:[#allocation7 + $0x7c0] sm:$0xf]  ;;  %v6213_v23 = vor.u32 %v8568_v13, %v6212_v12 }
  0xb1   :  { %761 = vmatpush.bf16.msrb.mxu3 %v5821_v8  ;;  %774 = vmatpush.bf16.msra.mxu0 %v5965_v14  ;;  %v6757_v14 = vor.u32 %v8704_v9, %v6756_v7  ;;  %v8680_v43 = vld [vmem:[#allocation7 + $0x51c] sm:$0xf0] }
  0xb2   :  { %v8616_v59 = vld [vmem:[#allocation7 + $0x31c] sm:$0xf0] }
  0xb3   :  { %v6052_v7 = vld [vmem:[#allocation7 + $0x40] sm:$0xf] }
  0xb4   :  { %786 = vmatpush.bf16.msra.mxu1 %v5873_v34  ;;  %800 = vmatpush.bf16.msra.mxu2 %v6001_v56  ;;  %v5932_v34 = vld [vmem:[#allocation5 + $0x148] sm:$0xf]  ;;  %v171_v56 = vld [vmem:[%s9740_s1 + $0x1] sm:$0x3] }
  0xb5   :  { %762 = vmatpush.bf16.msrb.mxu3 %v5805_v20  ;;  %775 = vmatpush.bf16.msra.mxu0 %v5949_v26  ;;  %v5933_v37 = vor.u32 %v8495_v35, %v5932_v34  ;;  %v189_v61 = vperm.slane %v171_v56, 0  ;;  %v190_v1 = vperm.slane %v171_v56, 1  ;;  %v8640_v20 = vld [vmem:[#allocation7 + $0x3dc] sm:$0xf0]  ;;  %v6725_v26 = vor.u32 %v8696_v18, %v6724_v15 }
  0xb6   :  { %v6501_v31 = vor.u32 %v8640_v20, %v6500_v17  ;;  %v8632_v35 = vld [vmem:[#allocation7 + $0x39c] sm:$0xf0]  ;;  %v6246_v17 = vld [vmem:[#allocation7 + $0x1e0] sm:$0xf0] }
  0xb7   :  { %v8600_v12 = vld [vmem:[#allocation7 + $0x29c] sm:$0xf0] }
  0xb8   :  { %787 = vmatpush.bf16.msra.mxu1 %v5857_v50  ;;  %801 = vmatpush.bf16.msra.mxu2 %v5985_v4  ;;  %v5918_v50 = vld [vmem:[#allocation5 + $0x138] sm:$0xf0]  ;;  %v8576_v4 = vld [vmem:[#allocation7 + $0x1dc] sm:$0xf0] }
  0xb9   :  { %763 = vmatpush.bf16.msrb.mxu3 %v5789_v32  ;;  %776 = vmatpush.bf16.msra.mxu0 %v5933_v37  ;;  %v5921_v52 = vor.u32 %v8489_v49, %v5918_v50  ;;  %v6245_v8 = vor.u32 %v8576_v4, %v6244_v3  ;;  %v6468_v32 = vld [vmem:[#allocation7 + $0x380] sm:$0xf] }
  0xba   :  { %v8760_v37 = vld [vmem:[#allocation7 + $0x79c] sm:$0xf0]  ;;  %v6469_v44 = vor.u32 %v8632_v35, %v6468_v32 }
  0xbb   :  { %v8752_v49 = vld [vmem:[#allocation7 + $0x75c] sm:$0xf0] }
  0xbc   :  { %788 = vmatpush.bf16.msra.mxu1 %v5841_v62  ;;  %802 = vmatpush.bf16.msra.mxu2 %v5969_v16  ;;  %v6372_v4 = vld [vmem:[#allocation7 + $0x2c0] sm:$0xf] }
  0xbd   :  { %764 = vmatpush.bf16.msrb.mxu3 %v5773_v45  ;;  %777 = vmatpush.bf16.msra.mxu0 %v5917_v51  ;;  %v6436_v45 = vld [vmem:[#allocation7 + $0x340] sm:$0xf] }
  0xbe   :  { %v6116_v51 = vld [vmem:[#allocation7 + $0xc0] sm:$0xf]  ;;  %v6437_v56 = vor.u32 %v8624_v47, %v6436_v45 }
  0xbf   :  { %v6308_v18 = vld [vmem:[#allocation7 + $0x240] sm:$0xf] }
  0xc0   :  { %789 = vmatpush.bf16.msra.mxu1 %v5825_v10  ;;  %803 = vmatpush.bf16.msra.mxu2 %v5953_v28  ;;  %v6596_v32 = vld [vmem:[#allocation7 + $0x480] sm:$0xf] }
  0xc1   :  { %778 = vmatpush.bf16.msra.mxu0 %v5901_v58  ;;  %v6949_v58 = vor.u32 %v8752_v49, %v6948_v48  ;;  %v8656_v45 = vld [vmem:[#allocation7 + $0x45c] sm:$0xf0] }
  0xc2   :  { %v8728_v48 = vld [vmem:[#allocation7 + $0x69c] sm:$0xf0] }
  0xc4   :  { %790 = vmatpush.bf16.msra.mxu1 %v5809_v22  ;;  %804 = vmatpush.bf16.msra.mxu2 %v5937_v41  ;;  %v8768_v22 = vld [vmem:[#allocation7 + $0x7dc] sm:$0xf0] }
  0xc5   :  { %v7013_v33 = vor.u32 %v8768_v22, %v7012_v21  ;;  %v8552_v41 = vld [vmem:[#allocation7 + $0x11c] sm:$0xf0] }
  0xc6   :  { %v6149_v50 = vor.u32 %v8552_v41, %v6148_v39  ;;  %v8628_v41 = vld [vmem:[#allocation7 + $0x384] sm:$0xf] }
  0xc8   :  { %791 = vmatpush.bf16.msra.mxu1 %v5793_v36  ;;  %805 = vmatpush.bf16.msra.mxu2 %v5921_v52  ;;  %v6980_v36 = vld [vmem:[#allocation7 + $0x780] sm:$0xf]  ;;  %v6661_v52 = vor.u32 %v8680_v43, %v6660_v42  ;;  %v6470_v42 = vld [vmem:[#allocation7 + $0x3a0] sm:$0xf0] }
  0xc9   :  { %v6473_v43 = vor.u32 %v8628_v41, %v6470_v42 }
  0xcc   :  { %792 = vmatpush.bf16.msra.mxu1 %v5777_v46  ;;  %806 = vmatpush.bf16.msra.mxu2 %v5905_v60  ;;  %v6981_v46 = vor.u32 %v8760_v37, %v6980_v36  ;;  %v6916_v60 = vld [vmem:[#allocation7 + $0x700] sm:$0xf]  ;;  %v8556_v37 = vld [vmem:[#allocation7 + $0x144] sm:$0xf] }
  0xcd   :  { %v8736_v36 = vld [vmem:[#allocation7 + $0x6dc] sm:$0xf0] }
 0x12c   :  { %v282_v57 = vpop.f32.mrf.mxu1 }
 0x12d   :  { %v283_v63 = vadd.f32 %v282_v57, %v189_v61  ;;  %v6404_v57 = vld [vmem:[#allocation7 + $0x300] sm:$0xf] }
 0x12f   :  { %v301_v5 = vmax.f32 %v283_v63, 0.0  ;;  %v6629_v63 = vor.u32 %v8672_v55, %v6628_v54  ;;  %v6438_v54 = vld [vmem:[#allocation7 + $0x360] sm:$0xf0] }
 0x132   :  { %v296_v62 = vpop.f32.mrf.mxu2 }
 0x133   :  { %v297_v10 = vadd.f32 %v296_v62, %v190_v1  ;;  %v6117_v62 = vor.u32 %v8544_v53, %v6116_v51  ;;  %v6150_v51 = vld [vmem:[#allocation7 + $0x120] sm:$0xf0] }
 0x134   :  { %v284_v0 = vpop.f32.mrf.mxu1 }
 0x135   :  { %v285_v2 = vadd.f32 %v284_v0, %v189_v61  ;;  %v302_v27 = vmax.f32 %v297_v10, 0.0  ;;  %v8744_v61 = vld [vmem:[#allocation7 + $0x71c] sm:$0xf0] }
 0x136   :  { %v6084_v0 = vld [vmem:[#allocation7 + $0x80] sm:$0xf]  ;;  %v6917_v3 = vor.u32 %v8744_v61, %v6916_v60  ;;  %v8540_v61 = vld [vmem:[#allocation7 + $0xc4] sm:$0xf] }
 0x137   :  { %v303_v6 = vmax.f32 %v285_v2, 0.0  ;;  %v6405_v2 = vor.u32 %v8616_v59, %v6404_v57  ;;  %v6340_v10 = vld [vmem:[#allocation7 + $0x280] sm:$0xf] }
 0x138   :  { %v6341_v15 = vor.u32 %v8600_v12, %v6340_v10  ;;  %v8648_v57 = vld [vmem:[#allocation7 + $0x41c] sm:$0xf0]  ;;  %v8532_v10 = vld [vmem:[#allocation7 + $0x84] sm:$0xf] }
 0x139   :  { %v9432_v11 = vpack.c.bf16 %v303_v6, %v301_v5  ;;  %v8608_v5 = vld [vmem:[#allocation7 + $0x2dc] sm:$0xf0]  ;;  %v6086_v12 = vld [vmem:[#allocation7 + $0xa0] sm:$0xf0] }
 0x13a   :  { %v298_v16 = vpop.f32.mrf.mxu2  ;;  %v6373_v9 = vor.u32 %v8608_v5, %v6372_v4  ;;  %v8720_v60 = vld [vmem:[#allocation7 + $0x65c] sm:$0xf0]  ;;  %v6758_v5 = vld [vmem:[#allocation7 + $0x5e0] sm:$0xf0] }
 0x13b   :  { %v299_v19 = vadd.f32 %v298_v16, %v190_v1  ;;  %709 = vmatmul.bf16.vlgmr.msra.gmra.mxu3 %v9432_v11  ;;  %737 = vmatmul.bf16.vlgmr.msrb.gmra.mxu1 %v9432_v11  ;;  %v8536_v1 = vld [vmem:[#allocation7 + $0x9c] sm:$0xf0]  ;;  %v8572_v16 = vld [vmem:[#allocation7 + $0x1c4] sm:$0xf] }
 0x13c   :  { %2379 = vmatpush.bf16.msra.mxu3 %v6245_v8  ;;  %2407 = vmatpush.bf16.msrb.mxu1 %v6757_v14  ;;  %v6085_v6 = vor.u32 %v8536_v1, %v6084_v0  ;;  %v8528_v8 = vld [vmem:[#allocation7 + $0x5c] sm:$0xf0]  ;;  %v6249_v21 = vor.u32 %v8572_v16, %v6246_v17  ;;  %v8612_v1 = vld [vmem:[#allocation7 + $0x304] sm:$0xf] }
 0x13d   :  { %v304_v28 = vmax.f32 %v299_v19, 0.0  ;;  %v6053_v13 = vor.u32 %v8528_v8, %v6052_v7  ;;  %v6020_v14 = vld [vmem:[#allocation7] sm:$0xf]  ;;  %v6726_v16 = vld [vmem:[#allocation7 + $0x5a0] sm:$0xf0] }
 0x13e   :  { %v8592_v19 = vld [vmem:[#allocation7 + $0x25c] sm:$0xf0] }
 0x13f   :  { %v9436_v34 = vpack.c.bf16 %v304_v28, %v302_v27  ;;  %v6309_v22 = vor.u32 %v8592_v19, %v6308_v18  ;;  %v8636_v27 = vld [vmem:[#allocation7 + $0x3c4] sm:$0xf]  ;;  %v6788_v7 = vld [vmem:[#allocation7 + $0x600] sm:$0xf] }
 0x140   :  { %2380 = vmatpush.bf16.msra.mxu3 %v6213_v23  ;;  %2408 = vmatpush.bf16.msrb.mxu1 %v6725_v26  ;;  %v8564_v23 = vld [vmem:[#allocation7 + $0x184] sm:$0xf]  ;;  %v8584_v26 = vld [vmem:[#allocation7 + $0x21c] sm:$0xf0] }
 0x141   :  { %723 = vmatmul.bf16.vlgmr.msrb.gmra.mxu0 %v9436_v34  ;;  %751 = vmatmul.bf16.vlgmr.msrb.gmra.mxu2 %v9436_v34  ;;  %v6502_v28 = vld [vmem:[#allocation7 + $0x3e0] sm:$0xf0]  ;;  %v6217_v29 = vor.u32 %v8564_v23, %v6214_v24  ;;  %v6277_v30 = vor.u32 %v8584_v26, %v6276_v25  ;;  %v8712_v8 = vld [vmem:[#allocation7 + $0x61c] sm:$0xf0] }
 0x142   :  { %2393 = vmatpush.bf16.msrb.mxu0 %v6501_v31  ;;  %2421 = vmatpush.bf16.msrb.mxu2 %v7013_v33  ;;  %v6505_v31 = vor.u32 %v8636_v27, %v6502_v28  ;;  %v8664_v33 = vld [vmem:[#allocation7 + $0x49c] sm:$0xf0]  ;;  %v8764_v19 = vld [vmem:[#allocation7 + $0x7c4] sm:$0xf] }
 0x143   :  { %v6597_v35 = vor.u32 %v8664_v33, %v6596_v32  ;;  %v6054_v23 = vld [vmem:[#allocation7 + $0x60] sm:$0xf0] }
 0x144   :  { %2381 = vmatpush.bf16.msra.mxu3 %v6181_v38  ;;  %2409 = vmatpush.bf16.msrb.mxu1 %v6693_v40  ;;  %v6182_v38 = vld [vmem:[#allocation7 + $0x160] sm:$0xf0] }
 0x145   :  { %v6185_v40 = vor.u32 %v8556_v37, %v6182_v38  ;;  %v8596_v25 = vld [vmem:[#allocation7 + $0x284] sm:$0xf] }
 0x146   :  { %2394 = vmatpush.bf16.msrb.mxu0 %v6469_v44  ;;  %2422 = vmatpush.bf16.msrb.mxu2 %v6981_v46  ;;  %v6564_v44 = vld [vmem:[#allocation7 + $0x440] sm:$0xf]  ;;  %v6342_v26 = vld [vmem:[#allocation7 + $0x2a0] sm:$0xf0] }
 0x147   :  { %v6852_v46 = vld [vmem:[#allocation7 + $0x680] sm:$0xf]  ;;  %v6565_v47 = vor.u32 %v8656_v45, %v6564_v44  ;;  %v8684_v27 = vld [vmem:[#allocation7 + $0x544] sm:$0xf]  ;;  %v6345_v28 = vor.u32 %v8596_v25, %v6342_v26 }
 0x148   :  { %2382 = vmatpush.bf16.msra.mxu3 %v6149_v50  ;;  %2410 = vmatpush.bf16.msrb.mxu1 %v6661_v52  ;;  %v6853_v49 = vor.u32 %v8728_v48, %v6852_v46  ;;  %v8548_v50 = vld [vmem:[#allocation7 + $0x104] sm:$0xf] }
 0x149   :  { %v8620_v52 = vld [vmem:[#allocation7 + $0x344] sm:$0xf]  ;;  %v6153_v53 = vor.u32 %v8548_v50, %v6150_v51 }
 0x14a   :  { %2395 = vmatpush.bf16.msrb.mxu0 %v6437_v56  ;;  %2423 = vmatpush.bf16.msrb.mxu2 %v6949_v58  ;;  %v6441_v55 = vor.u32 %v8620_v52, %v6438_v54  ;;  %v6532_v56 = vld [vmem:[#allocation7 + $0x400] sm:$0xf]  ;;  %v6310_v38 = vld [vmem:[#allocation7 + $0x260] sm:$0xf0] }
 0x14b   :  { %765 = vmatmul.bf16.vlgmr.msrb.gmra.mxu3 %v9432_v11  ;;  %793 = vmatmul.bf16.vlgmr.msra.gmra.mxu1 %v9432_v11  ;;  %v8520_v11 = vld [vmem:[#allocation7 + $0x1c] sm:$0xf0]  ;;  %v6533_v59 = vor.u32 %v8648_v57, %v6532_v56  ;;  %v6950_v44 = vld [vmem:[#allocation7 + $0x760] sm:$0xf0] }
 0x14c   :  { %2383 = vmatpush.bf16.msra.mxu3 %v6117_v62  ;;  %2411 = vmatpush.bf16.msrb.mxu1 %v6629_v63  ;;  %v6021_v20 = vor.u32 %v8520_v11, %v6020_v14  ;;  %v6820_v58 = vld [vmem:[#allocation7 + $0x640] sm:$0xf]  ;;  %v6118_v62 = vld [vmem:[#allocation7 + $0xe0] sm:$0xf0]  ;;  %v6089_v14 = vor.u32 %v8532_v10, %v6086_v12 }
 0x14d   :  { %v6821_v63 = vor.u32 %v8720_v60, %v6820_v58  ;;  %v6121_v0 = vor.u32 %v8540_v61, %v6118_v62  ;;  %v6374_v11 = vld [vmem:[#allocation7 + $0x2e0] sm:$0xf0] }
 0x14e   :  { %2396 = vmatpush.bf16.msrb.mxu0 %v6405_v2  ;;  %2424 = vmatpush.bf16.msrb.mxu2 %v6917_v3  ;;  %v6406_v2 = vld [vmem:[#allocation7 + $0x320] sm:$0xf0] }
 0x14f   :  { %v8700_v3 = vld [vmem:[#allocation7 + $0x5c4] sm:$0xf]  ;;  %v6409_v4 = vor.u32 %v8612_v1, %v6406_v2 }
 0x150   :  { %2384 = vmatpush.bf16.msra.mxu3 %v6085_v6  ;;  %2412 = vmatpush.bf16.msrb.mxu1 %v6597_v35  ;;  %v6761_v6 = vor.u32 %v8700_v3, %v6758_v5  ;;  %v6022_v35 = vld [vmem:[#allocation7 + $0x20] sm:$0xf0] }
 0x151   :  { %779 = vmatmul.bf16.vlgmr.msra.gmra.mxu0 %v9436_v34  ;;  %807 = vmatmul.bf16.vlgmr.msra.gmra.mxu2 %v9436_v34  ;;  %v6884_v34 = vld [vmem:[#allocation7 + $0x6c0] sm:$0xf]  ;;  %v8580_v46 = vld [vmem:[#allocation7 + $0x204] sm:$0xf] }
 0x152   :  { %2397 = vmatpush.bf16.msrb.mxu0 %v6373_v9  ;;  %v6885_v39 = vor.u32 %v8736_v36, %v6884_v34  ;;  %v6789_v9 = vor.u32 %v8712_v8, %v6788_v7  ;;  %v8516_v34 = vld [vmem:[#allocation7 + $0x4] sm:$0xf] }
 0x153   :  { %v8588_v36 = vld [vmem:[#allocation7 + $0x244] sm:$0xf]  ;;  %v6025_v37 = vor.u32 %v8516_v34, %v6022_v35  ;;  %v6220_v35 = vld [vmem:[#allocation7 + $0x188] sm:$0xf] }
 0x154   :  { %2385 = vmatpush.bf16.msra.mxu3 %v6053_v13  ;;  %2425 = vmatpush.bf16.msrb.mxu2 %v6885_v39  ;;  %v8604_v13 = vld [vmem:[#allocation7 + $0x2c4] sm:$0xf]  ;;  %v6313_v41 = vor.u32 %v8588_v36, %v6310_v38 }
 0x155   :  { %2413 = vmatpush.bf16.msrb.mxu1 %v6565_v47  ;;  %v6377_v17 = vor.u32 %v8604_v13, %v6374_v11  ;;  %v8676_v39 = vld [vmem:[#allocation7 + $0x504] sm:$0xf] }
 0x156   :  { %2398 = vmatpush.bf16.msrb.mxu0 %v6341_v15  ;;  %v8692_v15 = vld [vmem:[#allocation7 + $0x584] sm:$0xf] }
 0x157   :  { %v6729_v18 = vor.u32 %v8692_v15, %v6726_v16  ;;  %v6278_v47 = vld [vmem:[#allocation7 + $0x220] sm:$0xf0] }
 0x158   :  { %2386 = vmatpush.bf16.msra.mxu3 %v6021_v20  ;;  %2426 = vmatpush.bf16.msrb.mxu2 %v6853_v49  ;;  %v7014_v20 = vld [vmem:[#allocation7 + $0x7e0] sm:$0xf0]  ;;  %v6281_v49 = vor.u32 %v8580_v46, %v6278_v47 }
 0x159   :  { %2414 = vmatpush.bf16.msrb.mxu1 %v6533_v59  ;;  %v8668_v48 = vld [vmem:[#allocation7 + $0x4c4] sm:$0xf] }
 0x15a   :  { %2399 = vmatpush.bf16.msrb.mxu0 %v6309_v22  ;;  %v8524_v22 = vld [vmem:[#allocation7 + $0x44] sm:$0xf] }
 0x15b   :  { %v6057_v24 = vor.u32 %v8524_v22, %v6054_v23  ;;  %v6630_v50 = vld [vmem:[#allocation7 + $0x4e0] sm:$0xf0] }
 0x15c   :  { %2435 = vmatpush.bf16.msrb.mxu3 %v6249_v21  ;;  %2427 = vmatpush.bf16.msrb.mxu2 %v6821_v63  ;;  %v7017_v21 = vor.u32 %v8764_v19, %v7014_v20  ;;  %v8740_v51 = vld [vmem:[#allocation7 + $0x704] sm:$0xf] }
 0x15d   :  { %2463 = vmatpush.bf16.msra.mxu1 %v6761_v6  ;;  %v6918_v52 = vld [vmem:[#allocation7 + $0x720] sm:$0xf0] }
 0x15e   :  { %2400 = vmatpush.bf16.msrb.mxu0 %v6277_v30  ;;  %v8756_v30 = vld [vmem:[#allocation7 + $0x784] sm:$0xf]  ;;  %v6921_v54 = vor.u32 %v8740_v51, %v6918_v52  ;;  %v8561_v51 = vld [vmem:[#allocation7 + $0x164] sm:$0xf0] }
 0x15f   :  { %v6598_v56 = vld [vmem:[#allocation7 + $0x4a0] sm:$0xf0]  ;;  %v6476_v52 = vld [vmem:[#allocation7 + $0x388] sm:$0xf] }
 0x160   :  { %2436 = vmatpush.bf16.msrb.mxu3 %v6217_v29  ;;  %2428 = vmatpush.bf16.msrb.mxu2 %v6789_v9  ;;  %v6694_v29 = vld [vmem:[#allocation7 + $0x560] sm:$0xf0] }
 0x161   :  { %2464 = vmatpush.bf16.msra.mxu1 %v6729_v18  ;;  %v6697_v32 = vor.u32 %v8684_v27, %v6694_v29  ;;  %v8732_v57 = vld [vmem:[#allocation7 + $0x6c4] sm:$0xf]  ;;  %v6252_v27 = vld [vmem:[#allocation7 + $0x1c8] sm:$0xf] }
 0x162   :  { %2449 = vmatpush.bf16.msra.mxu0 %v6505_v31  ;;  %v6982_v31 = vld [vmem:[#allocation7 + $0x7a0] sm:$0xf0] }
 0x163   :  { %v6985_v33 = vor.u32 %v8756_v30, %v6982_v31  ;;  %v6886_v59 = vld [vmem:[#allocation7 + $0x6e0] sm:$0xf0] }
 0x164   :  { %2437 = vmatpush.bf16.msrb.mxu3 %v6185_v40  ;;  %2477 = vmatpush.bf16.msra.mxu2 %v7017_v21  ;;  %v6662_v40 = vld [vmem:[#allocation7 + $0x520] sm:$0xf0]  ;;  %v6889_v60 = vor.u32 %v8732_v57, %v6886_v59  ;;  %v6156_v59 = vld [vmem:[#allocation7 + $0x108] sm:$0xf] }
 0x165   :  { %2465 = vmatpush.bf16.msra.mxu1 %v6697_v32  ;;  %v6665_v42 = vor.u32 %v8676_v39, %v6662_v40  ;;  %v8652_v61 = vld [vmem:[#allocation7 + $0x444] sm:$0xf]  ;;  %v8569_v39 = vld [vmem:[#allocation7 + $0x1a4] sm:$0xf0] }
 0x166   :  { %2450 = vmatpush.bf16.msra.mxu0 %v6473_v43  ;;  %v8748_v43 = vld [vmem:[#allocation7 + $0x744] sm:$0xf]  ;;  %v6508_v40 = vld [vmem:[#allocation7 + $0x3c8] sm:$0xf]  ;;  %v6221_v47 = vor.u32 %v8569_v39, %v6220_v35 }
 0x167   :  { %v6953_v45 = vor.u32 %v8748_v43, %v6950_v44  ;;  %v6566_v62 = vld [vmem:[#allocation7 + $0x460] sm:$0xf0] }
 0x168   :  { %2438 = vmatpush.bf16.msrb.mxu3 %v6153_v53  ;;  %2478 = vmatpush.bf16.msra.mxu2 %v6985_v33  ;;  %v6633_v53 = vor.u32 %v8668_v48, %v6630_v50  ;;  %v8724_v63 = vld [vmem:[#allocation7 + $0x684] sm:$0xf]  ;;  %v6569_v1 = vor.u32 %v8652_v61, %v6566_v62  ;;  %v6444_v61 = vld [vmem:[#allocation7 + $0x348] sm:$0xf] }
 0x169   :  { %2466 = vmatpush.bf16.msra.mxu1 %v6665_v42  ;;  %v6854_v2 = vld [vmem:[#allocation7 + $0x6a0] sm:$0xf0]  ;;  %v8625_v62 = vld [vmem:[#allocation7 + $0x364] sm:$0xf0] }
 0x16a   :  { %2451 = vmatpush.bf16.msra.mxu0 %v6441_v55  ;;  %v8660_v55 = vld [vmem:[#allocation7 + $0x484] sm:$0xf]  ;;  %v6857_v3 = vor.u32 %v8724_v63, %v6854_v2 }
 0x16b   :  { %v6601_v58 = vor.u32 %v8660_v55, %v6598_v56  ;;  %v6534_v5 = vld [vmem:[#allocation7 + $0x420] sm:$0xf0] }
 0x16c   :  { %2439 = vmatpush.bf16.msrb.mxu3 %v6121_v0  ;;  %2479 = vmatpush.bf16.msra.mxu2 %v6953_v45  ;;  %v8716_v6 = vld [vmem:[#allocation7 + $0x644] sm:$0xf] }
 0x16d   :  { %2467 = vmatpush.bf16.msra.mxu1 %v6633_v53  ;;  %v6822_v8 = vld [vmem:[#allocation7 + $0x660] sm:$0xf0]  ;;  %v8633_v53 = vld [vmem:[#allocation7 + $0x3a4] sm:$0xf0] }
 0x16e   :  { %2452 = vmatpush.bf16.msra.mxu0 %v6409_v4  ;;  %v8644_v4 = vld [vmem:[#allocation7 + $0x404] sm:$0xf]  ;;  %v6825_v13 = vor.u32 %v8716_v6, %v6822_v8  ;;  %v6124_v6 = vld [vmem:[#allocation7 + $0xc8] sm:$0xf] }
 0x16f   :  { %v6537_v7 = vor.u32 %v8644_v4, %v6534_v5  ;;  %v9447_v9 = vld [vmem:[%s9740_s1 + $0x3] sm:$0xf]  ;;  %v6445_v5 = vor.u32 %v8625_v62, %v6444_v61  ;;  %v8573_v61 = vld [vmem:[#allocation7 + $0x1cc] sm:$0xf] }
 0x170   :  { %2440 = vmatpush.bf16.msrb.mxu3 %v6089_v14  ;;  %2480 = vmatpush.bf16.msra.mxu2 %v6921_v54  ;;  %v373_v14 = vperm.slane %v9447_v9, 0  ;;  %v8708_v11 = vld [vmem:[#allocation7 + $0x604] sm:$0xf]  ;;  %v374_v20 = vperm.slane %v9447_v9, 1  ;;  %v375_v46 = vperm.slane %v9447_v9, 2  ;;  %v376_v55 = vperm.slane %v9447_v9, 3 }
 0x171   :  { %2468 = vmatpush.bf16.msra.mxu1 %v6601_v58  ;;  %v6790_v15 = vld [vmem:[#allocation7 + $0x620] sm:$0xf0]  ;;  %v6477_v58 = vor.u32 %v8633_v53, %v6476_v52  ;;  %v8545_v9 = vld [vmem:[#allocation7 + $0xe4] sm:$0xf0]  ;;  %v6254_v62 = vld [vmem:[#allocation7 + $0x1e8] sm:$0xf0] }
 0x172   :  { %2453 = vmatpush.bf16.msra.mxu0 %v6377_v17  ;;  %v6793_v16 = vor.u32 %v8708_v11, %v6790_v15  ;;  %v8521_v52 = vld [vmem:[#allocation7 + $0x24] sm:$0xf0] }
 0x174   :  { %2441 = vmatpush.bf16.msrb.mxu3 %v6057_v24  ;;  %2481 = vmatpush.bf16.msra.mxu2 %v6889_v60  ;;  %v8553_v60 = vld [vmem:[#allocation7 + $0x124] sm:$0xf0] }
 0x175   :  { %2469 = vmatpush.bf16.msra.mxu1 %v6569_v1  ;;  %v6157_v4 = vor.u32 %v8553_v60, %v6156_v59  ;;  %v6956_v59 = vld [vmem:[#allocation7 + $0x748] sm:$0xf] }
 0x176   :  { %2454 = vmatpush.bf16.msra.mxu0 %v6345_v28  ;;  %v8577_v28 = vld [vmem:[#allocation7 + $0x1e4] sm:$0xf0] }
 0x177   :  { %v6253_v34 = vor.u32 %v8577_v28, %v6252_v27  ;;  %v8609_v27 = vld [vmem:[#allocation7 + $0x2e4] sm:$0xf0] }
 0x178   :  { %2442 = vmatpush.bf16.msrb.mxu3 %v6025_v37  ;;  %2482 = vmatpush.bf16.msra.mxu2 %v6857_v3  ;;  %v6732_v28 = vld [vmem:[#allocation7 + $0x588] sm:$0xf] }
 0x179   :  { %2470 = vmatpush.bf16.msra.mxu1 %v6537_v7  ;;  %v8753_v60 = vld [vmem:[#allocation7 + $0x764] sm:$0xf0] }
 0x17a   :  { %2455 = vmatpush.bf16.msra.mxu0 %v6313_v41  ;;  %v8641_v41 = vld [vmem:[#allocation7 + $0x3e4] sm:$0xf0] }
 0x17b   :  { %v6509_v48 = vor.u32 %v8641_v41, %v6508_v40 }
 0x17c   :  { %2483 = vmatpush.bf16.msra.mxu2 %v6825_v13  ;;  %v6764_v13 = vld [vmem:[#allocation7 + $0x5c8] sm:$0xf] }
 0x17e   :  { %2456 = vmatpush.bf16.msra.mxu0 %v6281_v49  ;;  %v6188_v49 = vld [vmem:[#allocation7 + $0x148] sm:$0xf] }
 0x17f   :  { %v6189_v57 = vor.u32 %v8561_v51, %v6188_v49  ;;  %v6028_v51 = vld [vmem:[#allocation7 + $0x8] sm:$0xf] }
 0x180   :  { %2484 = vmatpush.bf16.msra.mxu2 %v6793_v16 }
 0x1b8   :  { %v738_v0 = vpop.f32.mrf.mxu1 }
 0x1b9   :  { %v739_v25 = vadd.f32 %v738_v0, %v374_v20 }
 0x1be   :  { %v710_v10 = vpop.f32.mrf.mxu3  ;;  %v724_v12 = vpop.f32.mrf.mxu0 }
 0x1bf   :  { %v711_v17 = vadd.f32 %v710_v10, %v373_v14  ;;  %v6412_v10 = vld [vmem:[#allocation7 + $0x308] sm:$0xf] }
 0x1c0   :  { %v740_v18 = vpop.f32.mrf.mxu1 }
 0x1c1   :  { %v725_v23 = vadd.f32 %v724_v12, %v711_v17  ;;  %v741_v30 = vadd.f32 %v740_v18, %v374_v20  ;;  %v8617_v12 = vld [vmem:[#allocation7 + $0x324] sm:$0xf0] }
 0x1c2   :  { %v6413_v20 = vor.u32 %v8617_v12, %v6412_v10  ;;  %v8565_v10 = vld [vmem:[#allocation7 + $0x18c] sm:$0xf] }
 0x1c3   :  { %v813_v29 = vmax.f32 %v725_v23, 0.0  ;;  %v6222_v12 = vld [vmem:[#allocation7 + $0x1a8] sm:$0xf0] }
 0x1c4   :  { %v752_v19 = vpop.f32.mrf.mxu2 }
 0x1c5   :  { %v753_v31 = vadd.f32 %v752_v19, %v739_v25  ;;  %v6125_v19 = vor.u32 %v8545_v9, %v6124_v6  ;;  %v8673_v6 = vld [vmem:[#allocation7 + $0x4e4] sm:$0xf0] }
 0x1c6   :  { %v712_v21 = vpop.f32.mrf.mxu3  ;;  %v726_v22 = vpop.f32.mrf.mxu0  ;;  %v8745_v9 = vld [vmem:[#allocation7 + $0x724] sm:$0xf0] }
 0x1c7   :  { %v713_v24 = vadd.f32 %v712_v21, %v373_v14  ;;  %v814_v44 = vmax.f32 %v753_v31, 0.0  ;;  %v8705_v14 = vld [vmem:[#allocation7 + $0x5e4] sm:$0xf0] }
 0x1c8   :  { %v794_v37 = vpop.f32.mrf.mxu1  ;;  %v6092_v21 = vld [vmem:[#allocation7 + $0x88] sm:$0xf]  ;;  %v6765_v25 = vor.u32 %v8705_v14, %v6764_v13  ;;  %v8637_v13 = vld [vmem:[#allocation7 + $0x3cc] sm:$0xf] }
 0x1c9   :  { %v727_v26 = vadd.f32 %v726_v22, %v713_v24  ;;  %v795_v7 = vadd.f32 %v794_v37, %v376_v55  ;;  %v8537_v22 = vld [vmem:[#allocation7 + $0xa4] sm:$0xf0]  ;;  %v6510_v14 = vld [vmem:[#allocation7 + $0x3e8] sm:$0xf0] }
 0x1ca   :  { %v8769_v31 = vld [vmem:[#allocation7 + $0x7e4] sm:$0xf0] }
 0x1cb   :  { %v817_v32 = vmax.f32 %v727_v26, 0.0  ;;  %v6380_v26 = vld [vmem:[#allocation7 + $0x2c8] sm:$0xf] }
 0x1cc   :  { %v754_v33 = vpop.f32.mrf.mxu2  ;;  %v6381_v35 = vor.u32 %v8609_v27, %v6380_v26  ;;  %v6060_v37 = vld [vmem:[#allocation7 + $0x48] sm:$0xf]  ;;  %v8629_v26 = vld [vmem:[#allocation7 + $0x38c] sm:$0xf] }
 0x1cd   :  { %v9451_v36 = vpack.c.bf16 %v817_v32, %v813_v29  ;;  %v755_v38 = vadd.f32 %v754_v33, %v741_v30  ;;  %v8697_v29 = vld [vmem:[#allocation7 + $0x5a4] sm:$0xf0]  ;;  %v6478_v27 = vld [vmem:[#allocation7 + $0x3a8] sm:$0xf0] }
 0x1ce   :  { %v766_v42 = vpop.f32.mrf.mxu3  ;;  %v780_v43 = vpop.f32.mrf.mxu0  ;;  %v7020_v30 = vld [vmem:[#allocation7 + $0x7c8] sm:$0xf]  ;;  %v6733_v40 = vor.u32 %v8697_v29, %v6732_v28 }
 0x1cf   :  { %v818_v45 = vmax.f32 %v755_v38, 0.0  ;;  %2387 = vmatmul.bf16.vlgmr.msra.gmra.mxu3 %v9451_v36  ;;  %v767_v54 = vadd.f32 %v766_v42, %v375_v46  ;;  %v8529_v38 = vld [vmem:[#allocation7 + $0x64] sm:$0xf0]  ;;  %v7021_v41 = vor.u32 %v8769_v31, %v7020_v30 }
 0x1d0   :  { %2491 = vmatpush.bf16.msra.mxu3 %v6253_v34  ;;  %v796_v2 = vpop.f32.mrf.mxu1  ;;  %v6093_v34 = vor.u32 %v8537_v22, %v6092_v21  ;;  %v6348_v42 = vld [vmem:[#allocation7 + $0x288] sm:$0xf] }
 0x1d1   :  { %v9455_v50 = vpack.c.bf16 %v818_v45, %v814_v44  ;;  %v781_v0 = vadd.f32 %v780_v43, %v767_v54  ;;  %v797_v15 = vadd.f32 %v796_v2, %v376_v55  ;;  %v8601_v43 = vld [vmem:[#allocation7 + $0x2a4] sm:$0xf0] }
 0x1d2   :  { %v6700_v44 = vld [vmem:[#allocation7 + $0x548] sm:$0xf]  ;;  %v6349_v49 = vor.u32 %v8601_v43, %v6348_v42 }
 0x1d3   :  { %2401 = vmatmul.bf16.vlgmr.msrb.gmra.mxu0 %v9455_v50  ;;  %v815_v11 = vmax.f32 %v781_v0, 0.0  ;;  %v8689_v45 = vld [vmem:[#allocation7 + $0x564] sm:$0xf0] }
 0x1d4   :  { %2492 = vmatpush.bf16.msra.mxu3 %v6221_v47  ;;  %2505 = vmatpush.bf16.msrb.mxu0 %v6509_v48  ;;  %v808_v56 = vpop.f32.mrf.mxu2  ;;  %v8761_v47 = vld [vmem:[#allocation7 + $0x7a4] sm:$0xf0]  ;;  %v6061_v48 = vor.u32 %v8529_v38, %v6060_v37  ;;  %v6701_v53 = vor.u32 %v8689_v45, %v6700_v44  ;;  %v8549_v37 = vld [vmem:[#allocation7 + $0x10c] sm:$0xf] }
 0x1d5   :  { %v809_v16 = vadd.f32 %v808_v56, %v795_v7  ;;  %v6316_v55 = vld [vmem:[#allocation7 + $0x248] sm:$0xf]  ;;  %v6257_v7 = vor.u32 %v8573_v61, %v6254_v62  ;;  %v6158_v38 = vld [vmem:[#allocation7 + $0x128] sm:$0xf0] }
 0x1d6   :  { %v768_v63 = vpop.f32.mrf.mxu3  ;;  %v782_v3 = vpop.f32.mrf.mxu0  ;;  %v8593_v56 = vld [vmem:[#allocation7 + $0x264] sm:$0xf0] }
 0x1d7   :  { %v769_v1 = vadd.f32 %v768_v63, %v375_v46  ;;  %v816_v32 = vmax.f32 %v809_v16, 0.0  ;;  %v6988_v46 = vld [vmem:[#allocation7 + $0x788] sm:$0xf]  ;;  %v6029_v63 = vor.u32 %v8521_v52, %v6028_v51  ;;  %v6317_v0 = vor.u32 %v8593_v56, %v6316_v55  ;;  %v8541_v51 = vld [vmem:[#allocation7 + $0xcc] sm:$0xf] }
 0x1d8   :  { %2493 = vmatpush.bf16.msra.mxu3 %v6189_v57  ;;  %2506 = vmatpush.bf16.msrb.mxu0 %v6477_v58  ;;  %v6989_v54 = vor.u32 %v8761_v47, %v6988_v46  ;;  %v6668_v57 = vld [vmem:[#allocation7 + $0x508] sm:$0xf]  ;;  %v6161_v46 = vor.u32 %v8549_v37, %v6158_v38  ;;  %v6126_v52 = vld [vmem:[#allocation7 + $0xe8] sm:$0xf0] }
 0x1d9   :  { %v783_v8 = vadd.f32 %v782_v3, %v769_v1  ;;  %v8681_v58 = vld [vmem:[#allocation7 + $0x524] sm:$0xf0]  ;;  %v6957_v3 = vor.u32 %v8753_v60, %v6956_v59  ;;  %v8701_v55 = vld [vmem:[#allocation7 + $0x5cc] sm:$0xf]  ;;  %v6129_v60 = vor.u32 %v8541_v51, %v6126_v52  ;;  %v8570_v51 = vld [vmem:[#allocation7 + $0x1ac] sm:$0xf0] }
 0x1da   :  { %v6284_v1 = vld [vmem:[#allocation7 + $0x208] sm:$0xf]  ;;  %v6669_v2 = vor.u32 %v8681_v58, %v6668_v57  ;;  %v6766_v56 = vld [vmem:[#allocation7 + $0x5e8] sm:$0xf0]  ;;  %v6516_v52 = vld [vmem:[#allocation7 + $0x3d0] sm:$0xf] }
 0x1db   :  { %v819_v17 = vmax.f32 %v783_v8, 0.0  ;;  %v6924_v8 = vld [vmem:[#allocation7 + $0x708] sm:$0xf] }
 0x1dc   :  { %2494 = vmatpush.bf16.msra.mxu3 %v6157_v4  ;;  %2507 = vmatpush.bf16.msrb.mxu0 %v6445_v5  ;;  %v810_v18 = vpop.f32.mrf.mxu2  ;;  %v8585_v4 = vld [vmem:[#allocation7 + $0x224] sm:$0xf0]  ;;  %v6925_v16 = vor.u32 %v8745_v9, %v6924_v8 }
 0x1dd   :  { %v9459_v23 = vpack.c.bf16 %v819_v17, %v815_v11  ;;  %v811_v24 = vadd.f32 %v810_v18, %v797_v15  ;;  %v6636_v5 = vld [vmem:[#allocation7 + $0x4c8] sm:$0xf]  ;;  %v6285_v11 = vor.u32 %v8585_v4, %v6284_v1  ;;  %v6769_v1 = vor.u32 %v8701_v55, %v6766_v56  ;;  %v8693_v4 = vld [vmem:[#allocation7 + $0x58c] sm:$0xf] }
 0x1de   :  { %v6637_v15 = vor.u32 %v8673_v6, %v6636_v5  ;;  %v6604_v17 = vld [vmem:[#allocation7 + $0x488] sm:$0xf]  ;;  %v6734_v5 = vld [vmem:[#allocation7 + $0x5a8] sm:$0xf0] }
 0x1df   :  { %v820_v33 = vmax.f32 %v811_v24, 0.0  ;;  %2415 = vmatmul.bf16.vlgmr.msrb.gmra.mxu1 %v9459_v23  ;;  %2443 = vmatmul.bf16.vlgmr.msrb.gmra.mxu3 %v9451_v36  ;;  %v8665_v18 = vld [vmem:[#allocation7 + $0x4a4] sm:$0xf0]  ;;  %v8557_v24 = vld [vmem:[#allocation7 + $0x14c] sm:$0xf] }
 0x1e0   :  { %2495 = vmatpush.bf16.msra.mxu3 %v6125_v19  ;;  %2508 = vmatpush.bf16.msrb.mxu0 %v6413_v20  ;;  %v6225_v19 = vor.u32 %v8565_v10, %v6222_v12  ;;  %v6513_v20 = vor.u32 %v8637_v13, %v6510_v14  ;;  %v6892_v21 = vld [vmem:[#allocation7 + $0x6c8] sm:$0xf]  ;;  %v6605_v28 = vor.u32 %v8665_v18, %v6604_v17  ;;  %v8765_v6 = vld [vmem:[#allocation7 + $0x7cc] sm:$0xf] }
 0x1e1   :  { %v9463_v39 = vpack.c.bf16 %v820_v33, %v816_v32  ;;  %2519 = vmatpush.bf16.msrb.mxu1 %v6765_v25  ;;  %v8737_v22 = vld [vmem:[#allocation7 + $0x6e4] sm:$0xf0]  ;;  %v6190_v25 = vld [vmem:[#allocation7 + $0x168] sm:$0xf0]  ;;  %v6481_v33 = vor.u32 %v8629_v26, %v6478_v27  ;;  %v6737_v14 = vor.u32 %v8693_v4, %v6734_v5 }
 0x1e2   :  { %v6893_v29 = vor.u32 %v8737_v22, %v6892_v21  ;;  %v6572_v30 = vld [vmem:[#allocation7 + $0x448] sm:$0xf]  ;;  %v6193_v32 = vor.u32 %v8557_v24, %v6190_v25  ;;  %v8525_v12 = vld [vmem:[#allocation7 + $0x4c] sm:$0xf] }
 0x1e3   :  { %2429 = vmatmul.bf16.vlgmr.msrb.gmra.mxu2 %v9463_v39  ;;  %2457 = vmatmul.bf16.vlgmr.msra.gmra.mxu0 %v9455_v50  ;;  %v8657_v31 = vld [vmem:[#allocation7 + $0x464] sm:$0xf0]  ;;  %v6062_v13 = vld [vmem:[#allocation7 + $0x68] sm:$0xf0] }
 0x1e4   :  { %2496 = vmatpush.bf16.msra.mxu3 %v6093_v34  ;;  %2509 = vmatpush.bf16.msrb.mxu0 %v6381_v35  ;;  %v6860_v34 = vld [vmem:[#allocation7 + $0x688] sm:$0xf]  ;;  %v6573_v42 = vor.u32 %v8657_v31, %v6572_v30  ;;  %v8685_v17 = vld [vmem:[#allocation7 + $0x54c] sm:$0xf]  ;;  %v6065_v21 = vor.u32 %v8525_v12, %v6062_v13  ;;  %v6164_v12 = vld [vmem:[#allocation7 + $0x110] sm:$0xf] }
 0x1e5   :  { %2520 = vmatpush.bf16.msrb.mxu1 %v6733_v40  ;;  %2533 = vmatpush.bf16.msrb.mxu2 %v7021_v41  ;;  %v8729_v35 = vld [vmem:[#allocation7 + $0x6a4] sm:$0xf0]  ;;  %v8621_v40 = vld [vmem:[#allocation7 + $0x34c] sm:$0xf]  ;;  %v8554_v13 = vld [vmem:[#allocation7 + $0x12c] sm:$0xf0] }
 0x1e6   :  { %v6446_v41 = vld [vmem:[#allocation7 + $0x368] sm:$0xf0]  ;;  %v6861_v43 = vor.u32 %v8729_v35, %v6860_v34  ;;  %v6540_v44 = vld [vmem:[#allocation7 + $0x408] sm:$0xf]  ;;  %v6260_v34 = vld [vmem:[#allocation7 + $0x1d0] sm:$0xf] }
 0x1e7   :  { %v8649_v45 = vld [vmem:[#allocation7 + $0x424] sm:$0xf0]  ;;  %v6449_v47 = vor.u32 %v8621_v40, %v6446_v41  ;;  %v6702_v18 = vld [vmem:[#allocation7 + $0x568] sm:$0xf0]  ;;  %v8578_v35 = vld [vmem:[#allocation7 + $0x1ec] sm:$0xf0] }
 0x1e8   :  { %2497 = vmatpush.bf16.msra.mxu3 %v6061_v48  ;;  %2510 = vmatpush.bf16.msrb.mxu0 %v6349_v49  ;;  %v6828_v48 = vld [vmem:[#allocation7 + $0x648] sm:$0xf]  ;;  %v6541_v57 = vor.u32 %v8649_v45, %v6540_v44  ;;  %v8517_v24 = vld [vmem:[#allocation7 + $0xc] sm:$0xf]  ;;  %v6705_v26 = vor.u32 %v8685_v17, %v6702_v18 }
 0x1e9   :  { %2521 = vmatpush.bf16.msrb.mxu1 %v6701_v53  ;;  %2534 = vmatpush.bf16.msrb.mxu2 %v6989_v54  ;;  %v8721_v49 = vld [vmem:[#allocation7 + $0x664] sm:$0xf0]  ;;  %v8613_v53 = vld [vmem:[#allocation7 + $0x30c] sm:$0xf] }
 0x1ea   :  { %v6414_v54 = vld [vmem:[#allocation7 + $0x328] sm:$0xf0]  ;;  %v6829_v58 = vor.u32 %v8721_v49, %v6828_v48  ;;  %v6796_v59 = vld [vmem:[#allocation7 + $0x608] sm:$0xf]  ;;  %v6228_v49 = vld [vmem:[#allocation7 + $0x190] sm:$0xf] }
 0x1eb   :  { %v6417_v61 = vor.u32 %v8613_v53, %v6414_v54  ;;  %v8713_v62 = vld [vmem:[#allocation7 + $0x624] sm:$0xf0]  ;;  %v6030_v25 = vld [vmem:[#allocation7 + $0x28] sm:$0xf0]  ;;  %v8642_v53 = vld [vmem:[#allocation7 + $0x3ec] sm:$0xf0] }
 0x1ec   :  { %2498 = vmatpush.bf16.msra.mxu3 %v6029_v63  ;;  %2511 = vmatpush.bf16.msrb.mxu0 %v6317_v0  ;;  %v8533_v63 = vld [vmem:[#allocation7 + $0x8c] sm:$0xf]  ;;  %v6797_v8 = vor.u32 %v8713_v62, %v6796_v59  ;;  %v6033_v37 = vor.u32 %v8517_v24, %v6030_v25  ;;  %v6229_v59 = vor.u32 %v8570_v51, %v6228_v49  ;;  %v6132_v24 = vld [vmem:[#allocation7 + $0xd0] sm:$0xf] }
 0x1ed   :  { %2522 = vmatpush.bf16.msrb.mxu1 %v6669_v2  ;;  %2535 = vmatpush.bf16.msrb.mxu2 %v6957_v3  ;;  %v6094_v0 = vld [vmem:[#allocation7 + $0xa8] sm:$0xf0]  ;;  %v8546_v25 = vld [vmem:[#allocation7 + $0xec] sm:$0xf0] }
 0x1ee   :  { %v8605_v2 = vld [vmem:[#allocation7 + $0x2cc] sm:$0xf]  ;;  %v6097_v9 = vor.u32 %v8533_v63, %v6094_v0  ;;  %v6196_v63 = vld [vmem:[#allocation7 + $0x150] sm:$0xf] }
 0x1ef   :  { %2471 = vmatmul.bf16.vlgmr.msra.gmra.mxu1 %v9459_v23  ;;  %2499 = vmatmul.bf16.vlgmr.msra.gmra.mxu3 %v9451_v36  ;;  %v6382_v3 = vld [vmem:[#allocation7 + $0x2e8] sm:$0xf0]  ;;  %v8562_v0 = vld [vmem:[#allocation7 + $0x16c] sm:$0xf0] }
 0x1f0   :  { %2547 = vmatpush.bf16.msrb.mxu3 %v6257_v7  ;;  %2512 = vmatpush.bf16.msrb.mxu0 %v6285_v11  ;;  %v7022_v7 = vld [vmem:[#allocation7 + $0x7e8] sm:$0xf0]  ;;  %v6385_v10 = vor.u32 %v8605_v2, %v6382_v3  ;;  %v8634_v2 = vld [vmem:[#allocation7 + $0x3ac] sm:$0xf0] }
 0x1f1   :  { %2523 = vmatpush.bf16.msrb.mxu1 %v6637_v15  ;;  %2536 = vmatpush.bf16.msrb.mxu2 %v6925_v16  ;;  %v7025_v11 = vor.u32 %v8765_v6, %v7022_v7  ;;  %v8597_v15 = vld [vmem:[#allocation7 + $0x28c] sm:$0xf]  ;;  %v6197_v7 = vor.u32 %v8562_v0, %v6196_v63  ;;  %v6068_v51 = vld [vmem:[#allocation7 + $0x50] sm:$0xf] }
 0x1f2   :  { %v6350_v16 = vld [vmem:[#allocation7 + $0x2a8] sm:$0xf0]  ;;  %v6036_v63 = vld [vmem:[#allocation7 + $0x10] sm:$0xf] }
 0x1f3   :  { %2485 = vmatmul.bf16.vlgmr.msra.gmra.mxu2 %v9463_v39  ;;  %2513 = vmatmul.bf16.vlgmr.msrb.gmra.mxu0 %v9455_v50  ;;  %v6353_v22 = vor.u32 %v8597_v15, %v6350_v16  ;;  %v8677_v30 = vld [vmem:[#allocation7 + $0x50c] sm:$0xf]  ;;  %v8522_v0 = vld [vmem:[#allocation7 + $0x2c] sm:$0xf0] }
 0x1f4   :  { %2548 = vmatpush.bf16.msrb.mxu3 %v6225_v19  ;;  %2561 = vmatpush.bf16.msra.mxu0 %v6513_v20  ;;  %v8757_v19 = vld [vmem:[#allocation7 + $0x78c] sm:$0xf] }
 0x1f5   :  { %2524 = vmatpush.bf16.msrb.mxu1 %v6605_v28  ;;  %2537 = vmatpush.bf16.msrb.mxu2 %v6893_v29  ;;  %v6990_v20 = vld [vmem:[#allocation7 + $0x7a8] sm:$0xf0] }
 0x1f6   :  { %v6993_v27 = vor.u32 %v8757_v19, %v6990_v20  ;;  %v8589_v28 = vld [vmem:[#allocation7 + $0x24c] sm:$0xf]  ;;  %v6165_v19 = vor.u32 %v8554_v13, %v6164_v12  ;;  %v6037_v12 = vor.u32 %v8522_v0, %v6036_v63  ;;  %v8542_v63 = vld [vmem:[#allocation7 + $0xd4] sm:$0xf] }
 0x1f7   :  { %v6318_v29 = vld [vmem:[#allocation7 + $0x268] sm:$0xf0]  ;;  %v6134_v0 = vld [vmem:[#allocation7 + $0xf0] sm:$0xf0] }
 0x1f8   :  { %2549 = vmatpush.bf16.msrb.mxu3 %v6193_v32  ;;  %2562 = vmatpush.bf16.msra.mxu0 %v6481_v33  ;;  %v6670_v31 = vld [vmem:[#allocation7 + $0x528] sm:$0xf0]  ;;  %v6321_v38 = vor.u32 %v8589_v28, %v6318_v29  ;;  %v6772_v28 = vld [vmem:[#allocation7 + $0x5d0] sm:$0xf] }
 0x1f9   :  { %2525 = vmatpush.bf16.msrb.mxu1 %v6573_v42  ;;  %2538 = vmatpush.bf16.msrb.mxu2 %v6861_v43  ;;  %v8749_v32 = vld [vmem:[#allocation7 + $0x74c] sm:$0xf]  ;;  %v6673_v41 = vor.u32 %v8677_v30, %v6670_v31  ;;  %v8706_v29 = vld [vmem:[#allocation7 + $0x5ec] sm:$0xf0] }
 0x1fa   :  { %v6958_v33 = vld [vmem:[#allocation7 + $0x768] sm:$0xf0] }
 0x1fb   :  { %v8581_v40 = vld [vmem:[#allocation7 + $0x20c] sm:$0xf]  ;;  %v6961_v42 = vor.u32 %v8749_v32, %v6958_v33  ;;  %v6133_v33 = vor.u32 %v8546_v25, %v6132_v24  ;;  %v6230_v24 = vld [vmem:[#allocation7 + $0x1b0] sm:$0xf0] }
 0x1fc   :  { %2550 = vmatpush.bf16.msrb.mxu3 %v6161_v46  ;;  %2563 = vmatpush.bf16.msra.mxu0 %v6449_v47  ;;  %v6286_v43 = vld [vmem:[#allocation7 + $0x228] sm:$0xf0]  ;;  %v6261_v46 = vor.u32 %v8578_v35, %v6260_v34  ;;  %v8638_v25 = vld [vmem:[#allocation7 + $0x3d4] sm:$0xf] }
 0x1fd   :  { %2526 = vmatpush.bf16.msrb.mxu1 %v6541_v57  ;;  %2539 = vmatpush.bf16.msrb.mxu2 %v6829_v58  ;;  %v8669_v44 = vld [vmem:[#allocation7 + $0x4cc] sm:$0xf]  ;;  %v6289_v54 = vor.u32 %v8581_v40, %v6286_v43  ;;  %v6773_v40 = vor.u32 %v8706_v29, %v6772_v28  ;;  %v6740_v43 = vld [vmem:[#allocation7 + $0x590] sm:$0xf] }
 0x1fe   :  { %v6638_v45 = vld [vmem:[#allocation7 + $0x4e8] sm:$0xf0] }
 0x1ff   :  { %v8741_v47 = vld [vmem:[#allocation7 + $0x70c] sm:$0xf]  ;;  %v6641_v55 = vor.u32 %v8669_v44, %v6638_v45  ;;  %v8698_v44 = vld [vmem:[#allocation7 + $0x5ac] sm:$0xf0] }
 0x200   :  { %2551 = vmatpush.bf16.msrb.mxu3 %v6129_v60  ;;  %2564 = vmatpush.bf16.msra.mxu0 %v6417_v61  ;;  %v6926_v48 = vld [vmem:[#allocation7 + $0x728] sm:$0xf0]  ;;  %v6517_v60 = vor.u32 %v8642_v53, %v6516_v52  ;;  %v7028_v45 = vld [vmem:[#allocation7 + $0x7d0] sm:$0xf]  ;;  %v6741_v53 = vor.u32 %v8698_v44, %v6740_v43 }
 0x201   :  { %2575 = vmatpush.bf16.msra.mxu1 %v6769_v1  ;;  %2540 = vmatpush.bf16.msrb.mxu2 %v6797_v8  ;;  %v6929_v56 = vor.u32 %v8741_v47, %v6926_v48  ;;  %v8661_v57 = vld [vmem:[#allocation7 + $0x48c] sm:$0xf]  ;;  %v6484_v1 = vld [vmem:[#allocation7 + $0x390] sm:$0xf] }
 0x202   :  { %2527 = vmatmul.bf16.vlgmr.msrb.gmra.mxu1 %v9459_v23  ;;  %v6606_v58 = vld [vmem:[#allocation7 + $0x4a8] sm:$0xf0]  ;;  %v6485_v8 = vor.u32 %v8634_v2, %v6484_v1  ;;  %v8530_v52 = vld [vmem:[#allocation7 + $0x6c] sm:$0xf0] }
 0x203   :  { %v8733_v61 = vld [vmem:[#allocation7 + $0x6cc] sm:$0xf]  ;;  %v6609_v3 = vor.u32 %v8661_v57, %v6606_v58  ;;  %v6708_v57 = vld [vmem:[#allocation7 + $0x550] sm:$0xf] }
 0x204   :  { %2552 = vmatpush.bf16.msrb.mxu3 %v6097_v9  ;;  %2565 = vmatpush.bf16.msra.mxu0 %v6385_v10  ;;  %v6894_v62 = vld [vmem:[#allocation7 + $0x6e8] sm:$0xf0]  ;;  %v8690_v58 = vld [vmem:[#allocation7 + $0x56c] sm:$0xf0] }
 0x205   :  { %2576 = vmatpush.bf16.msra.mxu1 %v6737_v14  ;;  %2589 = vmatpush.bf16.msra.mxu2 %v7025_v11  ;;  %v6897_v4 = vor.u32 %v8733_v61, %v6894_v62  ;;  %v8653_v5 = vld [vmem:[#allocation7 + $0x44c] sm:$0xf]  ;;  %v6452_v14 = vld [vmem:[#allocation7 + $0x350] sm:$0xf]  ;;  %v6069_v61 = vor.u32 %v8530_v52, %v6068_v51  ;;  %v6709_v1 = vor.u32 %v8690_v58, %v6708_v57  ;;  %v8550_v51 = vld [vmem:[#allocation7 + $0x114] sm:$0xf] }
 0x206   :  { %2541 = vmatmul.bf16.vlgmr.msrb.gmra.mxu2 %v9463_v39  ;;  %v6574_v6 = vld [vmem:[#allocation7 + $0x468] sm:$0xf0]  ;;  %v8626_v11 = vld [vmem:[#allocation7 + $0x36c] sm:$0xf0]  ;;  %v6166_v52 = vld [vmem:[#allocation7 + $0x130] sm:$0xf0] }
 0x207   :  { %v8725_v9 = vld [vmem:[#allocation7 + $0x68c] sm:$0xf]  ;;  %v6577_v15 = vor.u32 %v8653_v5, %v6574_v6  ;;  %v6453_v20 = vor.u32 %v8626_v11, %v6452_v14  ;;  %v6676_v5 = vld [vmem:[#allocation7 + $0x510] sm:$0xf] }
 0x208   :  { %2553 = vmatpush.bf16.msrb.mxu3 %v6065_v21  ;;  %2566 = vmatpush.bf16.msra.mxu0 %v6353_v22  ;;  %v6862_v10 = vld [vmem:[#allocation7 + $0x6a8] sm:$0xf0]  ;;  %v8682_v6 = vld [vmem:[#allocation7 + $0x52c] sm:$0xf0] }
 0x209   :  { %2577 = vmatpush.bf16.msra.mxu1 %v6705_v26  ;;  %2590 = vmatpush.bf16.msra.mxu2 %v6993_v27  ;;  %v6865_v16 = vor.u32 %v8725_v9, %v6862_v10  ;;  %v8645_v17 = vld [vmem:[#allocation7 + $0x40c] sm:$0xf]  ;;  %v6420_v26 = vld [vmem:[#allocation7 + $0x310] sm:$0xf]  ;;  %v8574_v9 = vld [vmem:[#allocation7 + $0x1d4] sm:$0xf]  ;;  %v6677_v11 = vor.u32 %v8682_v6, %v6676_v5 }
 0x20a   :  { %v6542_v18 = vld [vmem:[#allocation7 + $0x428] sm:$0xf0]  ;;  %v8618_v27 = vld [vmem:[#allocation7 + $0x32c] sm:$0xf0]  ;;  %v6262_v10 = vld [vmem:[#allocation7 + $0x1f0] sm:$0xf0] }
 0x20b   :  { %v8717_v21 = vld [vmem:[#allocation7 + $0x64c] sm:$0xf]  ;;  %v6545_v30 = vor.u32 %v8645_v17, %v6542_v18  ;;  %v6421_v34 = vor.u32 %v8618_v27, %v6420_v26  ;;  %v6292_v14 = vld [vmem:[#allocation7 + $0x210] sm:$0xf]  ;;  %v6518_v26 = vld [vmem:[#allocation7 + $0x3f0] sm:$0xf0] }
 0x20c   :  { %2554 = vmatpush.bf16.msrb.mxu3 %v6033_v37  ;;  %2567 = vmatpush.bf16.msra.mxu0 %v6321_v38  ;;  %v6830_v22 = vld [vmem:[#allocation7 + $0x668] sm:$0xf0]  ;;  %v6100_v37 = vld [vmem:[#allocation7 + $0x90] sm:$0xf] }
 0x20d   :  { %2578 = vmatpush.bf16.msra.mxu1 %v6673_v41  ;;  %2591 = vmatpush.bf16.msra.mxu2 %v6961_v42  ;;  %v6833_v31 = vor.u32 %v8717_v21, %v6830_v22  ;;  %v8709_v32 = vld [vmem:[#allocation7 + $0x60c] sm:$0xf]  ;;  %v8538_v38 = vld [vmem:[#allocation7 + $0xac] sm:$0xf0]  ;;  %v8566_v22 = vld [vmem:[#allocation7 + $0x194] sm:$0xf] }
 0x20e   :  { %v6798_v35 = vld [vmem:[#allocation7 + $0x628] sm:$0xf0]  ;;  %v6388_v41 = vld [vmem:[#allocation7 + $0x2d0] sm:$0xf]  ;;  %v6101_v48 = vor.u32 %v8538_v38, %v6100_v37  ;;  %v8558_v37 = vld [vmem:[#allocation7 + $0x154] sm:$0xf] }
 0x20f   :  { %2555 = vmatmul.bf16.vlgmr.msrb.gmra.mxu3 %v9451_v36  ;;  %v8610_v42 = vld [vmem:[#allocation7 + $0x2ec] sm:$0xf0]  ;;  %v6801_v47 = vor.u32 %v8709_v32, %v6798_v35  ;;  %v6233_v32 = vor.u32 %v8566_v22, %v6230_v24  ;;  %v6198_v38 = vld [vmem:[#allocation7 + $0x170] sm:$0xf0] }
 0x210   :  { %2603 = vmatpush.bf16.msra.mxu3 %v6261_v46  ;;  %2568 = vmatpush.bf16.msra.mxu0 %v6289_v54  ;;  %v8770_v46 = vld [vmem:[#allocation7 + $0x7ec] sm:$0xf0]  ;;  %v6389_v49 = vor.u32 %v8610_v42, %v6388_v41  ;;  %v6486_v41 = vld [vmem:[#allocation7 + $0x3b0] sm:$0xf0] }
 0x211   :  { %2579 = vmatpush.bf16.msra.mxu1 %v6641_v55  ;;  %2592 = vmatpush.bf16.msra.mxu2 %v6929_v56  ;;  %v7029_v54 = vor.u32 %v8770_v46, %v7028_v45  ;;  %v6356_v55 = vld [vmem:[#allocation7 + $0x290] sm:$0xf]  ;;  %v6201_v46 = vor.u32 %v8558_v37, %v6198_v38  ;;  %v8526_v24 = vld [vmem:[#allocation7 + $0x54] sm:$0xf] }
 0x212   :  { %v8602_v56 = vld [vmem:[#allocation7 + $0x2ac] sm:$0xf0]  ;;  %v8518_v37 = vld [vmem:[#allocation7 + $0x14] sm:$0xf] }
 0x213   :  { %2569 = vmatmul.bf16.vlgmr.msra.gmra.mxu0 %v9455_v50  ;;  %v6357_v62 = vor.u32 %v8602_v56, %v6356_v55  ;;  %v6644_v17 = vld [vmem:[#allocation7 + $0x4d0] sm:$0xf]  ;;  %v6038_v38 = vld [vmem:[#allocation7 + $0x30] sm:$0xf0] }
 0x214   :  { %2604 = vmatpush.bf16.msra.mxu3 %v6229_v59  ;;  %2617 = vmatpush.bf16.msrb.mxu0 %v6517_v60  ;;  %v6996_v59 = vld [vmem:[#allocation7 + $0x790] sm:$0xf] }
 0x215   :  { %2580 = vmatpush.bf16.msra.mxu1 %v6609_v3  ;;  %2593 = vmatpush.bf16.msra.mxu2 %v6897_v4  ;;  %v8762_v60 = vld [vmem:[#allocation7 + $0x7ac] sm:$0xf0] }
 0x216   :  { %v6997_v2 = vor.u32 %v8762_v60, %v6996_v59  ;;  %v6324_v3 = vld [vmem:[#allocation7 + $0x250] sm:$0xf]  ;;  %v6169_v59 = vor.u32 %v8550_v51, %v6166_v52  ;;  %v6041_v51 = vor.u32 %v8518_v37, %v6038_v38  ;;  %v6140_v37 = vld [vmem:[#allocation7 + $0xd8] sm:$0xf] }
 0x217   :  { %v8594_v4 = vld [vmem:[#allocation7 + $0x26c] sm:$0xf0]  ;;  %v8547_v38 = vld [vmem:[#allocation7 + $0xf4] sm:$0xf0] }
 0x218   :  { %2605 = vmatpush.bf16.msra.mxu3 %v6197_v7  ;;  %2618 = vmatpush.bf16.msrb.mxu0 %v6485_v8  ;;  %v6964_v7 = vld [vmem:[#allocation7 + $0x750] sm:$0xf]  ;;  %v6325_v13 = vor.u32 %v8594_v4, %v6324_v3  ;;  %v8702_v3 = vld [vmem:[#allocation7 + $0x5d4] sm:$0xf] }
 0x219   :  { %2581 = vmatpush.bf16.msra.mxu1 %v6577_v15  ;;  %2594 = vmatpush.bf16.msra.mxu2 %v6865_v16  ;;  %v8754_v8 = vld [vmem:[#allocation7 + $0x76c] sm:$0xf0]  ;;  %v6774_v4 = vld [vmem:[#allocation7 + $0x5f0] sm:$0xf0] }
 0x21a   :  { %v6965_v15 = vor.u32 %v8754_v8, %v6964_v7  ;;  %v8586_v16 = vld [vmem:[#allocation7 + $0x22c] sm:$0xf0]  ;;  %v6137_v8 = vor.u32 %v8542_v63, %v6134_v0  ;;  %v8571_v63 = vld [vmem:[#allocation7 + $0x1b4] sm:$0xf0] }
 0x21b   :  { %v8674_v18 = vld [vmem:[#allocation7 + $0x4ec] sm:$0xf0]  ;;  %v6293_v27 = vor.u32 %v8586_v16, %v6292_v14  ;;  %v6777_v14 = vor.u32 %v8702_v3, %v6774_v4  ;;  %v8694_v16 = vld [vmem:[#allocation7 + $0x594] sm:$0xf]  ;;  %v6524_v0 = vld [vmem:[#allocation7 + $0x3d8] sm:$0xf] }
 0x21c   :  { %2606 = vmatpush.bf16.msra.mxu3 %v6165_v19  ;;  %2619 = vmatpush.bf16.msrb.mxu0 %v6453_v20  ;;  %v6265_v19 = vor.u32 %v8574_v9, %v6262_v10  ;;  %v6932_v20 = vld [vmem:[#allocation7 + $0x710] sm:$0xf]  ;;  %v6645_v28 = vor.u32 %v8674_v18, %v6644_v17  ;;  %v6742_v17 = vld [vmem:[#allocation7 + $0x5b0] sm:$0xf0] }
 0x21d   :  { %2582 = vmatpush.bf16.msra.mxu1 %v6545_v30  ;;  %2595 = vmatpush.bf16.msra.mxu2 %v6833_v31  ;;  %v8746_v21 = vld [vmem:[#allocation7 + $0x72c] sm:$0xf0]  ;;  %v8766_v18 = vld [vmem:[#allocation7 + $0x7d4] sm:$0xf] }
 0x21e   :  { %v6933_v29 = vor.u32 %v8746_v21, %v6932_v20  ;;  %v6612_v30 = vld [vmem:[#allocation7 + $0x490] sm:$0xf] }
 0x21f   :  { %v8666_v31 = vld [vmem:[#allocation7 + $0x4ac] sm:$0xf0] }
 0x220   :  { %2607 = vmatpush.bf16.msra.mxu3 %v6133_v33  ;;  %2620 = vmatpush.bf16.msrb.mxu0 %v6421_v34  ;;  %v6521_v33 = vor.u32 %v8638_v25, %v6518_v26  ;;  %v6900_v34 = vld [vmem:[#allocation7 + $0x6d0] sm:$0xf]  ;;  %v6613_v42 = vor.u32 %v8666_v31, %v6612_v30  ;;  %v6070_v25 = vld [vmem:[#allocation7 + $0x70] sm:$0xf0]  ;;  %v6745_v26 = vor.u32 %v8694_v16, %v6742_v17 }
 0x221   :  { %2631 = vmatpush.bf16.msrb.mxu1 %v6773_v40  ;;  %2596 = vmatpush.bf16.msra.mxu2 %v6801_v47  ;;  %v8738_v35 = vld [vmem:[#allocation7 + $0x6ec] sm:$0xf0]  ;;  %v8630_v40 = vld [vmem:[#allocation7 + $0x394] sm:$0xf] }
 0x222   :  { %2583 = vmatmul.bf16.vlgmr.msra.gmra.mxu1 %v9459_v23  ;;  %v6901_v43 = vor.u32 %v8738_v35, %v6900_v34  ;;  %v6580_v44 = vld [vmem:[#allocation7 + $0x450] sm:$0xf]  ;;  %v6489_v47 = vor.u32 %v8630_v40, %v6486_v41  ;;  %v8686_v30 = vld [vmem:[#allocation7 + $0x554] sm:$0xf]  ;;  %v6073_v34 = vor.u32 %v8526_v24, %v6070_v25  ;;  %v6172_v24 = vld [vmem:[#allocation7 + $0x118] sm:$0xf] }
 0x223   :  { %v8658_v45 = vld [vmem:[#allocation7 + $0x46c] sm:$0xf0]  ;;  %v6710_v31 = vld [vmem:[#allocation7 + $0x570] sm:$0xf0]  ;;  %v8555_v25 = vld [vmem:[#allocation7 + $0x134] sm:$0xf0] }
 0x224   :  { %2608 = vmatpush.bf16.msra.mxu3 %v6101_v48  ;;  %2621 = vmatpush.bf16.msrb.mxu0 %v6389_v49  ;;  %v6868_v48 = vld [vmem:[#allocation7 + $0x690] sm:$0xf]  ;;  %v6581_v55 = vor.u32 %v8658_v45, %v6580_v44  ;;  %v6713_v40 = vor.u32 %v8686_v30, %v6710_v31  ;;  %v8678_v44 = vld [vmem:[#allocation7 + $0x514] sm:$0xf] }
 0x225   :  { %2632 = vmatpush.bf16.msrb.mxu1 %v6741_v53  ;;  %2645 = vmatpush.bf16.msrb.mxu2 %v7029_v54  ;;  %v8730_v49 = vld [vmem:[#allocation7 + $0x6ac] sm:$0xf0]  ;;  %v8622_v53 = vld [vmem:[#allocation7 + $0x354] sm:$0xf] }
 0x226   :  { %2597 = vmatmul.bf16.vlgmr.msra.gmra.mxu2 %v9463_v39  ;;  %v6454_v54 = vld [vmem:[#allocation7 + $0x370] sm:$0xf0]  ;;  %v6869_v56 = vor.u32 %v8730_v49, %v6868_v48  ;;  %v6548_v57 = vld [vmem:[#allocation7 + $0x410] sm:$0xf]  ;;  %v6268_v48 = vld [vmem:[#allocation7 + $0x1d8] sm:$0xf] }
 0x227   :  { %v8650_v58 = vld [vmem:[#allocation7 + $0x42c] sm:$0xf0]  ;;  %v6457_v60 = vor.u32 %v8622_v53, %v6454_v54  ;;  %v6678_v45 = vld [vmem:[#allocation7 + $0x530] sm:$0xf0]  ;;  %v8579_v49 = vld [vmem:[#allocation7 + $0x1f4] sm:$0xf0] }
 0x228   :  { %2609 = vmatpush.bf16.msra.mxu3 %v6069_v61  ;;  %2622 = vmatpush.bf16.msrb.mxu0 %v6357_v62  ;;  %v6836_v61 = vld [vmem:[#allocation7 + $0x650] sm:$0xf]  ;;  %v6549_v5 = vor.u32 %v8650_v58, %v6548_v57  ;;  %v8582_v53 = vld [vmem:[#allocation7 + $0x214] sm:$0xf]  ;;  %v6681_v54 = vor.u32 %v8678_v44, %v6678_v45 }
 0x229   :  { %2633 = vmatpush.bf16.msrb.mxu1 %v6709_v1  ;;  %2646 = vmatpush.bf16.msrb.mxu2 %v6997_v2  ;;  %v8722_v62 = vld [vmem:[#allocation7 + $0x66c] sm:$0xf0]  ;;  %v8614_v1 = vld [vmem:[#allocation7 + $0x314] sm:$0xf] }
 0x22a   :  { %v6422_v2 = vld [vmem:[#allocation7 + $0x330] sm:$0xf0]  ;;  %v6837_v6 = vor.u32 %v8722_v62, %v6836_v61  ;;  %v6804_v7 = vld [vmem:[#allocation7 + $0x610] sm:$0xf]  ;;  %v6236_v62 = vld [vmem:[#allocation7 + $0x198] sm:$0xf] }
 0x22b   :  { %v6425_v9 = vor.u32 %v8614_v1, %v6422_v2  ;;  %v8714_v10 = vld [vmem:[#allocation7 + $0x62c] sm:$0xf0]  ;;  %v8670_v57 = vld [vmem:[#allocation7 + $0x4d4] sm:$0xf]  ;;  %v8643_v1 = vld [vmem:[#allocation7 + $0x3f4] sm:$0xf0] }
 0x22c   :  { %2610 = vmatpush.bf16.msra.mxu3 %v6037_v12  ;;  %2623 = vmatpush.bf16.msrb.mxu0 %v6325_v13  ;;  %v8534_v12 = vld [vmem:[#allocation7 + $0x94] sm:$0xf]  ;;  %v6805_v20 = vor.u32 %v8714_v10, %v6804_v7  ;;  %v6237_v7 = vor.u32 %v8571_v63, %v6236_v62  ;;  %v6076_v63 = vld [vmem:[#allocation7 + $0x58] sm:$0xf] }
 0x22d   :  { %2634 = vmatpush.bf16.msrb.mxu1 %v6677_v11  ;;  %2647 = vmatpush.bf16.msrb.mxu2 %v6965_v15  ;;  %v6102_v13 = vld [vmem:[#allocation7 + $0xb0] sm:$0xf0] }
 0x22e   :  { %v8606_v11 = vld [vmem:[#allocation7 + $0x2d4] sm:$0xf]  ;;  %v6105_v21 = vor.u32 %v8534_v12, %v6102_v13  ;;  %v6204_v12 = vld [vmem:[#allocation7 + $0x158] sm:$0xf] }
 0x22f   :  { %2611 = vmatmul.bf16.vlgmr.msra.gmra.mxu3 %v9451_v36  ;;  %v6390_v15 = vld [vmem:[#allocation7 + $0x2f0] sm:$0xf0]  ;;  %v8563_v13 = vld [vmem:[#allocation7 + $0x174] sm:$0xf0] }
 0x230   :  { %2659 = vmatpush.bf16.msrb.mxu3 %v6265_v19  ;;  %2624 = vmatpush.bf16.msrb.mxu0 %v6293_v27  ;;  %v7030_v19 = vld [vmem:[#allocation7 + $0x7f0] sm:$0xf0]  ;;  %v6393_v22 = vor.u32 %v8606_v11, %v6390_v15  ;;  %v8635_v11 = vld [vmem:[#allocation7 + $0x3b4] sm:$0xf0] }
 0x231   :  { %2635 = vmatpush.bf16.msrb.mxu1 %v6645_v28  ;;  %2648 = vmatpush.bf16.msrb.mxu2 %v6933_v29  ;;  %v7033_v27 = vor.u32 %v8766_v18, %v7030_v19  ;;  %v8598_v28 = vld [vmem:[#allocation7 + $0x294] sm:$0xf]  ;;  %v6205_v19 = vor.u32 %v8563_v13, %v6204_v12  ;;  %v6044_v12 = vld [vmem:[#allocation7 + $0x18] sm:$0xf] }
 0x232   :  { %v6358_v29 = vld [vmem:[#allocation7 + $0x2b0] sm:$0xf0]  ;;  %v8523_v13 = vld [vmem:[#allocation7 + $0x34] sm:$0xf0] }
 0x233   :  { %2625 = vmatmul.bf16.vlgmr.msrb.gmra.mxu0 %v9455_v50  ;;  %v6361_v35 = vor.u32 %v8598_v28, %v6358_v29  ;;  %v6646_v58 = vld [vmem:[#allocation7 + $0x4f0] sm:$0xf0] }
 0x234   :  { %2660 = vmatpush.bf16.msrb.mxu3 %v6233_v32  ;;  %2673 = vmatpush.bf16.msra.mxu0 %v6521_v33  ;;  %v8758_v32 = vld [vmem:[#allocation7 + $0x794] sm:$0xf]  ;;  %v6649_v3 = vor.u32 %v8670_v57, %v6646_v58  ;;  %v8699_v57 = vld [vmem:[#allocation7 + $0x5b4] sm:$0xf0] }
 0x235   :  { %2636 = vmatpush.bf16.msrb.mxu1 %v6613_v42  ;;  %2649 = vmatpush.bf16.msrb.mxu2 %v6901_v43  ;;  %v6998_v33 = vld [vmem:[#allocation7 + $0x7b0] sm:$0xf0]  ;;  %v7036_v58 = vld [vmem:[#allocation7 + $0x7d8] sm:$0xf] }
 0x236   :  { %v7001_v41 = vor.u32 %v8758_v32, %v6998_v33  ;;  %v8590_v42 = vld [vmem:[#allocation7 + $0x254] sm:$0xf]  ;;  %v6173_v32 = vor.u32 %v8555_v25, %v6172_v24  ;;  %v6270_v24 = vld [vmem:[#allocation7 + $0x1f8] sm:$0xf0]  ;;  %v6045_v25 = vor.u32 %v8523_v13, %v6044_v12  ;;  %v8651_v12 = vld [vmem:[#allocation7 + $0x434] sm:$0xf0] }
 0x237   :  { %v6326_v43 = vld [vmem:[#allocation7 + $0x270] sm:$0xf0] }
 0x238   :  { %2661 = vmatpush.bf16.msrb.mxu3 %v6201_v46  ;;  %2674 = vmatpush.bf16.msra.mxu0 %v6489_v47  ;;  %v8750_v46 = vld [vmem:[#allocation7 + $0x754] sm:$0xf]  ;;  %v6329_v52 = vor.u32 %v8590_v42, %v6326_v43  ;;  %v6780_v42 = vld [vmem:[#allocation7 + $0x5d8] sm:$0xf] }
 0x239   :  { %2637 = vmatpush.bf16.msrb.mxu1 %v6581_v55  ;;  %2650 = vmatpush.bf16.msrb.mxu2 %v6869_v56  ;;  %v6966_v47 = vld [vmem:[#allocation7 + $0x770] sm:$0xf0]  ;;  %v8707_v43 = vld [vmem:[#allocation7 + $0x5f4] sm:$0xf0] }
 0x23a   :  { %v6969_v55 = vor.u32 %v8750_v46, %v6966_v47  ;;  %v6294_v56 = vld [vmem:[#allocation7 + $0x230] sm:$0xf0]  ;;  %v6141_v47 = vor.u32 %v8547_v38, %v6140_v37  ;;  %v8567_v37 = vld [vmem:[#allocation7 + $0x19c] sm:$0xf] }
 0x23b   :  { %v6934_v61 = vld [vmem:[#allocation7 + $0x730] sm:$0xf0]  ;;  %v6297_v2 = vor.u32 %v8582_v53, %v6294_v56  ;;  %v6781_v53 = vor.u32 %v8707_v43, %v6780_v42  ;;  %v6748_v56 = vld [vmem:[#allocation7 + $0x598] sm:$0xf]  ;;  %v6238_v38 = vld [vmem:[#allocation7 + $0x1b8] sm:$0xf0] }
 0x23c   :  { %2662 = vmatpush.bf16.msrb.mxu3 %v6169_v59  ;;  %2675 = vmatpush.bf16.msra.mxu0 %v6457_v60  ;;  %v6269_v59 = vor.u32 %v8579_v49, %v6268_v48  ;;  %v8742_v60 = vld [vmem:[#allocation7 + $0x714] sm:$0xf] }
 0x23d   :  { %2638 = vmatpush.bf16.msrb.mxu1 %v6549_v5  ;;  %2651 = vmatpush.bf16.msrb.mxu2 %v6837_v6  ;;  %v6937_v4 = vor.u32 %v8742_v60, %v6934_v61  ;;  %v8662_v5 = vld [vmem:[#allocation7 + $0x494] sm:$0xf] }
 0x23e   :  { %v6614_v6 = vld [vmem:[#allocation7 + $0x4b0] sm:$0xf0] }
 0x23f   :  { %v6902_v10 = vld [vmem:[#allocation7 + $0x6f0] sm:$0xf0]  ;;  %v6617_v15 = vor.u32 %v8662_v5, %v6614_v6  ;;  %v6716_v5 = vld [vmem:[#allocation7 + $0x558] sm:$0xf] }
 0x240   :  { %2663 = vmatpush.bf16.msrb.mxu3 %v6137_v8  ;;  %2676 = vmatpush.bf16.msra.mxu0 %v6425_v9  ;;  %v6525_v8 = vor.u32 %v8643_v1, %v6524_v0  ;;  %v8734_v9 = vld [vmem:[#allocation7 + $0x6d4] sm:$0xf]  ;;  %v8531_v0 = vld [vmem:[#allocation7 + $0x74] sm:$0xf0]  ;;  %v6749_v1 = vor.u32 %v8699_v57, %v6748_v56  ;;  %v8631_v56 = vld [vmem:[#allocation7 + $0x39c] sm:$0xf] }
 0x241   :  { %2687 = vmatpush.bf16.msra.mxu1 %v6777_v14  ;;  %2652 = vmatpush.bf16.msrb.mxu2 %v6805_v20  ;;  %v6492_v14 = vld [vmem:[#allocation7 + $0x398] sm:$0xf]  ;;  %v6905_v16 = vor.u32 %v8734_v9, %v6902_v10  ;;  %v8654_v17 = vld [vmem:[#allocation7 + $0x454] sm:$0xf]  ;;  %v6077_v9 = vor.u32 %v8531_v0, %v6076_v63  ;;  %v6494_v57 = vld [vmem:[#allocation7 + $0x3b8] sm:$0xf0] }
 0x242   :  { %2639 = vmatmul.bf16.vlgmr.msrb.gmra.mxu1 %v9459_v23  ;;  %v6582_v18 = vld [vmem:[#allocation7 + $0x470] sm:$0xf0]  ;;  %v6493_v20 = vor.u32 %v8635_v11, %v6492_v14  ;;  %v8691_v6 = vld [vmem:[#allocation7 + $0x574] sm:$0xf0]  ;;  %v6497_v0 = vor.u32 %v8631_v56, %v6494_v57  ;;  %v6366_v56 = vld [vmem:[#allocation7 + $0x2b8] sm:$0xf0] }
 0x243   :  { %v6585_v28 = vor.u32 %v8654_v17, %v6582_v18  ;;  %v8646_v30 = vld [vmem:[#allocation7 + $0x414] sm:$0xf]  ;;  %v6717_v14 = vor.u32 %v8691_v6, %v6716_v5  ;;  %v6684_v17 = vld [vmem:[#allocation7 + $0x518] sm:$0xf]  ;;  %v6174_v5 = vld [vmem:[#allocation7 + $0x138] sm:$0xf0] }
 0x244   :  { %2664 = vmatpush.bf16.msrb.mxu3 %v6105_v21  ;;  %2677 = vmatpush.bf16.msra.mxu0 %v6393_v22  ;;  %v8726_v21 = vld [vmem:[#allocation7 + $0x694] sm:$0xf]  ;;  %v8683_v18 = vld [vmem:[#allocation7 + $0x534] sm:$0xf0]  ;;  %v8623_v6 = vld [vmem:[#allocation7 + $0x35c] sm:$0xf] }
 0x245   :  { %2688 = vmatpush.bf16.msra.mxu1 %v6745_v26  ;;  %2701 = vmatpush.bf16.msra.mxu2 %v7033_v27  ;;  %v6870_v22 = vld [vmem:[#allocation7 + $0x6b0] sm:$0xf0]  ;;  %v6460_v26 = vld [vmem:[#allocation7 + $0x358] sm:$0xf]  ;;  %v8687_v57 = vld [vmem:[#allocation7 + $0x55c] sm:$0xf] }
 0x246   :  { %2653 = vmatmul.bf16.vlgmr.msrb.gmra.mxu2 %v9463_v39  ;;  %v8627_v27 = vld [vmem:[#allocation7 + $0x374] sm:$0xf0]  ;;  %v6873_v29 = vor.u32 %v8726_v21, %v6870_v22  ;;  %v6550_v31 = vld [vmem:[#allocation7 + $0x430] sm:$0xf0]  ;;  %v8575_v22 = vld [vmem:[#allocation7 + $0x1dc] sm:$0xf] }
 0x247   :  { %v6461_v33 = vor.u32 %v8627_v27, %v6460_v26  ;;  %v6553_v44 = vor.u32 %v8646_v30, %v6550_v31  ;;  %v8710_v46 = vld [vmem:[#allocation7 + $0x614] sm:$0xf]  ;;  %v6300_v27 = vld [vmem:[#allocation7 + $0x218] sm:$0xf] }
 0x248   :  { %2665 = vmatpush.bf16.msrb.mxu3 %v6073_v34  ;;  %2678 = vmatpush.bf16.msra.mxu0 %v6361_v35  ;;  %v8718_v34 = vld [vmem:[#allocation7 + $0x654] sm:$0xf]  ;;  %v8587_v30 = vld [vmem:[#allocation7 + $0x234] sm:$0xf0] }
 0x249   :  { %2689 = vmatpush.bf16.msra.mxu1 %v6713_v40  ;;  %2702 = vmatpush.bf16.msra.mxu2 %v7001_v41  ;;  %v6838_v35 = vld [vmem:[#allocation7 + $0x670] sm:$0xf0]  ;;  %v6428_v40 = vld [vmem:[#allocation7 + $0x318] sm:$0xf]  ;;  %v6301_v42 = vor.u32 %v8587_v30, %v6300_v27 }
 0x24a   :  { %v8619_v41 = vld [vmem:[#allocation7 + $0x334] sm:$0xf0]  ;;  %v6841_v45 = vor.u32 %v8718_v34, %v6838_v35  ;;  %v6806_v49 = vld [vmem:[#allocation7 + $0x630] sm:$0xf0] }
 0x24b   :  { %v6429_v48 = vor.u32 %v8619_v41, %v6428_v40  ;;  %v6809_v60 = vor.u32 %v8710_v46, %v6806_v49  ;;  %v6652_v31 = vld [vmem:[#allocation7 + $0x4d8] sm:$0xf]  ;;  %v8639_v40 = vld [vmem:[#allocation7 + $0x3dc] sm:$0xf]  ;;  %v6241_v49 = vor.u32 %v8567_v37, %v6238_v38 }
 0x24c   :  { %2666 = vmatpush.bf16.msrb.mxu3 %v6041_v51  ;;  %2679 = vmatpush.bf16.msra.mxu0 %v6329_v52  ;;  %v6108_v51 = vld [vmem:[#allocation7 + $0x98] sm:$0xf]  ;;  %v6526_v41 = vld [vmem:[#allocation7 + $0x3f8] sm:$0xf0] }
 0x24d   :  { %2690 = vmatpush.bf16.msra.mxu1 %v6681_v54  ;;  %2703 = vmatpush.bf16.msra.mxu2 %v6969_v55  ;;  %v8539_v52 = vld [vmem:[#allocation7 + $0xb4] sm:$0xf0]  ;;  %v8607_v37 = vld [vmem:[#allocation7 + $0x2dc] sm:$0xf] }
 0x24e   :  { %v6396_v54 = vld [vmem:[#allocation7 + $0x2d8] sm:$0xf]  ;;  %v6109_v61 = vor.u32 %v8539_v52, %v6108_v51  ;;  %v6529_v51 = vor.u32 %v8639_v40, %v6526_v41  ;;  %v6398_v38 = vld [vmem:[#allocation7 + $0x2f8] sm:$0xf0] }
 0x24f   :  { %2667 = vmatmul.bf16.vlgmr.msrb.gmra.mxu3 %v9451_v36  ;;  %v8611_v55 = vld [vmem:[#allocation7 + $0x2f4] sm:$0xf0]  ;;  %v8695_v40 = vld [vmem:[#allocation7 + $0x59c] sm:$0xf] }
 0x250   :  { %2715 = vmatpush.bf16.msra.mxu3 %v6269_v59  ;;  %2680 = vmatpush.bf16.msra.mxu0 %v6297_v2  ;;  %v8771_v59 = vld [vmem:[#allocation7 + $0x7f4] sm:$0xf0]  ;;  %v6397_v62 = vor.u32 %v8611_v55, %v6396_v54  ;;  %v9487_v43 = vpop.f32.mrf.mxu0  ;;  %v8559_v54 = vld [vmem:[#allocation7 + $0x15c] sm:$0xf] }
 0x251   :  { %2691 = vmatpush.bf16.msra.mxu1 %v6649_v3  ;;  %2704 = vmatpush.bf16.msra.mxu2 %v6937_v4  ;;  %v7037_v2 = vor.u32 %v8771_v59, %v7036_v58  ;;  %v6364_v3 = vld [vmem:[#allocation7 + $0x298] sm:$0xf]  ;;  %v6206_v55 = vld [vmem:[#allocation7 + $0x178] sm:$0xf0] }
 0x252   :  { %v8603_v4 = vld [vmem:[#allocation7 + $0x2b4] sm:$0xf0]  ;;  %v9485_v21 = vpop.f32.mrf.mxu3  ;;  %v6209_v63 = vor.u32 %v8559_v54, %v6206_v55  ;;  %v6750_v41 = vld [vmem:[#allocation7 + $0x5b8] sm:$0xf0] }
 0x253   :  { %2681 = vmatmul.bf16.vlgmr.msra.gmra.mxu0 %v9455_v50  ;;  %v6365_v10 = vor.u32 %v8603_v4, %v6364_v3  ;;  %v6940_v34 = vld [vmem:[#allocation7 + $0x718] sm:$0xf]  ;;  %v8551_v3 = vld [vmem:[#allocation7 + $0x11c] sm:$0xf] }
 0x254   :  { %2716 = vmatpush.bf16.msra.mxu3 %v6237_v7  ;;  %2729 = vmatpush.bf16.msrb.mxu0 %v6525_v8  ;;  %v7004_v7 = vld [vmem:[#allocation7 + $0x798] sm:$0xf]  ;;  %v6177_v13 = vor.u32 %v8551_v3, %v6174_v5  ;;  %v8599_v55 = vld [vmem:[#allocation7 + $0x29c] sm:$0xf] }
 0x255   :  { %2692 = vmatpush.bf16.msra.mxu1 %v6617_v15  ;;  %2705 = vmatpush.bf16.msra.mxu2 %v6905_v16  ;;  %v8763_v8 = vld [vmem:[#allocation7 + $0x7b4] sm:$0xf0]  ;;  %v6046_v3 = vld [vmem:[#allocation7 + $0x38] sm:$0xf0] }
 0x256   :  { %v7005_v11 = vor.u32 %v8763_v8, %v7004_v7  ;;  %v6332_v15 = vld [vmem:[#allocation7 + $0x258] sm:$0xf]  ;;  %v6462_v7 = vld [vmem:[#allocation7 + $0x378] sm:$0xf0] }
 0x257   :  { %v8595_v16 = vld [vmem:[#allocation7 + $0x274] sm:$0xf0] }
 0x258   :  { %2717 = vmatpush.bf16.msra.mxu3 %v6205_v19  ;;  %2730 = vmatpush.bf16.msrb.mxu0 %v6493_v20  ;;  %v6972_v19 = vld [vmem:[#allocation7 + $0x758] sm:$0xf]  ;;  %v6333_v26 = vor.u32 %v8595_v16, %v6332_v15  ;;  %v8543_v16 = vld [vmem:[#allocation7 + $0xdc] sm:$0xf] }
 0x259   :  { %2693 = vmatpush.bf16.msra.mxu1 %v6585_v28  ;;  %2706 = vmatpush.bf16.msra.mxu2 %v6873_v29  ;;  %v8755_v20 = vld [vmem:[#allocation7 + $0x774] sm:$0xf0]  ;;  %v6685_v28 = vor.u32 %v8683_v18, %v6684_v17  ;;  %v9497_v17 = vpop.f32.mrf.mxu0 }
 0x25a   :  { %v6973_v29 = vor.u32 %v8755_v20, %v6972_v19  ;;  %v8747_v35 = vld [vmem:[#allocation7 + $0x734] sm:$0xf0]  ;;  %v9492_v58 = vpop.f32.mrf.mxu3  ;;  %v6142_v19 = vld [vmem:[#allocation7 + $0xf8] sm:$0xf0] }
 0x25b   :  { %v6941_v46 = vor.u32 %v8747_v35, %v6940_v34  ;;  %v6908_v52 = vld [vmem:[#allocation7 + $0x6d8] sm:$0xf]  ;;  %v8615_v20 = vld [vmem:[#allocation7 + $0x31c] sm:$0xf] }
 0x25c   :  { %2718 = vmatpush.bf16.msra.mxu3 %v6173_v32  ;;  %2731 = vmatpush.bf16.msrb.mxu0 %v6461_v33  ;;  %v8675_v32 = vld [vmem:[#allocation7 + $0x4f4] sm:$0xf0]  ;;  %v6273_v33 = vor.u32 %v8575_v22, %v6270_v24  ;;  %v6430_v22 = vld [vmem:[#allocation7 + $0x338] sm:$0xf0] }
 0x25d   :  { %2694 = vmatpush.bf16.msra.mxu1 %v6553_v44  ;;  %2707 = vmatpush.bf16.msra.mxu2 %v6841_v45  ;;  %v9489_v44 = vpop.f32.mrf.mxu1  ;;  %v6653_v45 = vor.u32 %v8675_v32, %v6652_v31  ;;  %v8723_v15 = vld [vmem:[#allocation7 + $0x674] sm:$0xf0]  ;;  %v8703_v24 = vld [vmem:[#allocation7 + $0x5dc] sm:$0xf]  ;;  %v6433_v30 = vor.u32 %v8615_v20, %v6430_v22 }
 0x25e   :  { %v8715_v31 = vld [vmem:[#allocation7 + $0x634] sm:$0xf0]  ;;  %v8535_v32 = vld [vmem:[#allocation7 + $0x9c] sm:$0xf] }
 0x25f   :  { %v8583_v20 = vld [vmem:[#allocation7 + $0x21c] sm:$0xf] }
 0x260   :  { %2719 = vmatpush.bf16.msra.mxu3 %v6141_v47  ;;  %2732 = vmatpush.bf16.msrb.mxu0 %v6429_v48  ;;  %v6620_v47 = vld [vmem:[#allocation7 + $0x498] sm:$0xf] }
 0x261   :  { %2743 = vmatpush.bf16.msrb.mxu1 %v6781_v53  ;;  %2708 = vmatpush.bf16.msra.mxu2 %v6809_v60  ;;  %v8667_v48 = vld [vmem:[#allocation7 + $0x4b4] sm:$0xf0] }
 0x262   :  { %2695 = vmatmul.bf16.vlgmr.msra.gmra.mxu1 %v9459_v23  ;;  %v8739_v53 = vld [vmem:[#allocation7 + $0x6f4] sm:$0xf0]  ;;  %v6621_v59 = vor.u32 %v8667_v48, %v6620_v47  ;;  %v9501_v34 = vpop.f32.mrf.mxu3 }
 0x263   :  { %v6909_v60 = vor.u32 %v8739_v53, %v6908_v52  ;;  %v6078_v52 = vld [vmem:[#allocation7 + $0x78] sm:$0xf0]  ;;  %v6753_v53 = vor.u32 %v8695_v40, %v6750_v41 }
 0x264   :  { %2720 = vmatpush.bf16.msra.mxu3 %v6109_v61  ;;  %2733 = vmatpush.bf16.msrb.mxu0 %v6397_v62  ;;  %v6588_v61 = vld [vmem:[#allocation7 + $0x458] sm:$0xf] }
 0x265   :  { %2744 = vmatpush.bf16.msrb.mxu1 %v6749_v1  ;;  %2757 = vmatpush.bf16.msrb.mxu2 %v7037_v2  ;;  %v8659_v62 = vld [vmem:[#allocation7 + $0x474] sm:$0xf0]  ;;  %v9499_v18 = vpop.f32.mrf.mxu1 }
 0x266   :  { %2709 = vmatmul.bf16.vlgmr.msra.gmra.mxu2 %v9463_v39  ;;  %v6876_v1 = vld [vmem:[#allocation7 + $0x698] sm:$0xf]  ;;  %v9494_v4 = vpop.f32.mrf.mxu2  ;;  %v6589_v8 = vor.u32 %v8659_v62, %v6588_v61  ;;  %v7006_v61 = vld [vmem:[#allocation7 + $0x7b8] sm:$0xf0]  ;;  %v9506_v62 = vpop.f32.mrf.mxu0 }
 0x267   :  { %v8731_v2 = vld [vmem:[#allocation7 + $0x6b4] sm:$0xf0] }
 0x268   :  { %2721 = vmatpush.bf16.msra.mxu3 %v6077_v9  ;;  %2734 = vmatpush.bf16.msrb.mxu0 %v6365_v10  ;;  %v6877_v9 = vor.u32 %v8731_v2, %v6876_v1  ;;  %v6556_v10 = vld [vmem:[#allocation7 + $0x418] sm:$0xf]  ;;  %v6369_v1 = vor.u32 %v8599_v55, %v6366_v56  ;;  %v8519_v2 = vld [vmem:[#allocation7 + $0x1c] sm:$0xf]  ;;  %v8794_v55 = vld [vmem:[#allocation8 + $0xac] sm:$0xf0] }
 0x269   :  { %2745 = vmatpush.bf16.msrb.mxu1 %v6717_v14  ;;  %2758 = vmatpush.bf16.msrb.mxu2 %v7005_v11  ;;  %v6465_v14 = vor.u32 %v8623_v6, %v6462_v7  ;;  %v6844_v11 = vld [vmem:[#allocation7 + $0x658] sm:$0xf]  ;;  %v8591_v7 = vld [vmem:[#allocation7 + $0x25c] sm:$0xf]  ;;  %v7268_v56 = vld [vmem:[#allocation8 + $0x1c0] sm:$0xf] }
 0x26a   :  { %v6845_v27 = vor.u32 %v8723_v15, %v6844_v11  ;;  %v7156_v11 = vld [vmem:[#allocation8 + $0xe0] sm:$0xf]  ;;  %v8802_v15 = vld [vmem:[#allocation8 + $0xec] sm:$0xf0] }
 0x26c   :  { %2722 = vmatpush.bf16.msra.mxu3 %v6045_v25  ;;  %2735 = vmatpush.bf16.msrb.mxu0 %v6333_v26  ;;  %v6782_v25 = vld [vmem:[#allocation7 + $0x5f8] sm:$0xf0]  ;;  %v6557_v26 = vor.u32 %v8651_v12, %v6556_v10 }
 0x26d   :  { %2746 = vmatpush.bf16.msrb.mxu1 %v6685_v28  ;;  %2759 = vmatpush.bf16.msrb.mxu2 %v6973_v29  ;;  %v6812_v28 = vld [vmem:[#allocation7 + $0x618] sm:$0xf]  ;;  %v6145_v29 = vor.u32 %v8543_v16, %v6142_v19  ;;  %v6785_v35 = vor.u32 %v8703_v24, %v6782_v25  ;;  %v6686_v10 = vld [vmem:[#allocation7 + $0x538] sm:$0xf0]  ;;  %v6049_v16 = vor.u32 %v8519_v2, %v6046_v3 }
 0x26e   :  { %v6813_v47 = vor.u32 %v8715_v31, %v6812_v28  ;;  %v8751_v12 = vld [vmem:[#allocation7 + $0x75c] sm:$0xf]  ;;  %v9515_v40 = vpop.f32.mrf.mxu0 }
 0x26f   :  { %2723 = vmatmul.bf16.vlgmr.msra.gmra.mxu3 %v9451_v36  ;;  %v6654_v28 = vld [vmem:[#allocation7 + $0x4f8] sm:$0xf0] }
 0x270   :  { %2771 = vmatpush.bf16.msrb.mxu3 %v6273_v33  ;;  %2736 = vmatpush.bf16.msrb.mxu0 %v6301_v42  ;;  %v6110_v33 = vld [vmem:[#allocation7 + $0xb8] sm:$0xf0] }
 0x271   :  { %2747 = vmatpush.bf16.msrb.mxu1 %v6653_v45  ;;  %2760 = vmatpush.bf16.msrb.mxu2 %v6941_v46  ;;  %v8767_v42 = vld [vmem:[#allocation7 + $0x7dc] sm:$0xf]  ;;  %v9503_v46 = vpop.f32.mrf.mxu2  ;;  %v6113_v48 = vor.u32 %v8535_v32, %v6110_v33  ;;  %v7140_v32 = vld [vmem:[#allocation8 + $0xc0] sm:$0xf]  ;;  %v8798_v33 = vld [vmem:[#allocation8 + $0xcc] sm:$0xf0] }
 0x272   :  { %v7038_v45 = vld [vmem:[#allocation7 + $0x7f8] sm:$0xf0] }
 0x273   :  { %2737 = vmatmul.bf16.vlgmr.msrb.gmra.mxu0 %v9455_v50  ;;  %v7041_v54 = vor.u32 %v8767_v42, %v7038_v45  ;;  %v6942_v31 = vld [vmem:[#allocation7 + $0x738] sm:$0xf0] }
 0x274   :  { %2772 = vmatpush.bf16.msrb.mxu3 %v6241_v49  ;;  %2785 = vmatpush.bf16.msra.mxu0 %v6529_v51  ;;  %v6401_v49 = vor.u32 %v8607_v37, %v6398_v38  ;;  %v8527_v51 = vld [vmem:[#allocation7 + $0x5c] sm:$0xf]  ;;  %v8834_v37 = vld [vmem:[#allocation8 + $0x1ec] sm:$0xf0] }
 0x275   :  { %2748 = vmatpush.bf16.msrb.mxu1 %v6621_v59  ;;  %2761 = vmatpush.bf16.msrb.mxu2 %v6909_v60  ;;  %v6718_v59 = vld [vmem:[#allocation7 + $0x578] sm:$0xf0] }
 0x276   :  { %v8759_v60 = vld [vmem:[#allocation7 + $0x79c] sm:$0xf]  ;;  %v6721_v5 = vor.u32 %v8687_v57, %v6718_v59  ;;  %v8830_v57 = vld [vmem:[#allocation8 + $0x1cc] sm:$0xf0]  ;;  %v9523_v59 = vld [vmem:[%s9740_s1 + $0x7] sm:$0xff] }
 0x277   :  { %v7009_v6 = vor.u32 %v8759_v60, %v7006_v61  ;;  %v6590_v2 = vld [vmem:[#allocation7 + $0x478] sm:$0xf0]  ;;  %v7269_v3 = vor.u32 %v8830_v57, %v7268_v56  ;;  %v8818_v56 = vld [vmem:[#allocation8 + $0x16c] sm:$0xf0] }
 0x278   :  { %2773 = vmatpush.bf16.msrb.mxu3 %v6209_v63  ;;  %2786 = vmatpush.bf16.msra.mxu0 %v6497_v0  ;;  %v9508_v63 = vpop.f32.mrf.mxu1  ;;  %v6081_v0 = vor.u32 %v8527_v51, %v6078_v52  ;;  %v8735_v52 = vld [vmem:[#allocation7 + $0x6dc] sm:$0xf] }
 0x279   :  { %2749 = vmatpush.bf16.msrb.mxu1 %v6589_v8  ;;  %2762 = vmatpush.bf16.msrb.mxu2 %v6877_v9  ;;  %v6334_v8 = vld [vmem:[#allocation7 + $0x278] sm:$0xf0]  ;;  %v9513_v22 = vpop.f32.mrf.mxu2 }
 0x27a   :  { %v8679_v9 = vld [vmem:[#allocation7 + $0x51c] sm:$0xf]  ;;  %v6337_v19 = vor.u32 %v8591_v7, %v6334_v8  ;;  %v7108_v7 = vld [vmem:[#allocation8 + $0x80] sm:$0xf] }
 0x27b   :  { %v6689_v24 = vor.u32 %v8679_v9, %v6686_v10  ;;  %v8790_v9 = vld [vmem:[#allocation8 + $0x8c] sm:$0xf0]  ;;  %v7252_v10 = vld [vmem:[#allocation8 + $0x1a0] sm:$0xf] }
 0x27c   :  { %2774 = vmatpush.bf16.msrb.mxu3 %v6177_v13  ;;  %2787 = vmatpush.bf16.msra.mxu0 %v6465_v14  ;;  %v6974_v13 = vld [vmem:[#allocation7 + $0x778] sm:$0xf0]  ;;  %v9511_v14 = vpop.f32.mrf.mxu3 }
 0x27d   :  { %2750 = vmatpush.bf16.msrb.mxu1 %v6557_v26  ;;  %2763 = vmatpush.bf16.msrb.mxu2 %v6845_v27  ;;  %v6977_v25 = vor.u32 %v8751_v12, %v6974_v13  ;;  %v6302_v26 = vld [vmem:[#allocation7 + $0x238] sm:$0xf0]  ;;  %v8826_v12 = vld [vmem:[#allocation8 + $0x1ac] sm:$0xf0]  ;;  %v1083_v13 = vperm.slane %v9523_v59, 0 }
 0x27e   :  { %v8671_v27 = vld [vmem:[#allocation7 + $0x4dc] sm:$0xf]  ;;  %v6305_v38 = vor.u32 %v8583_v20, %v6302_v26  ;;  %v7109_v20 = vor.u32 %v8790_v9, %v7108_v7 }
 0x27f   :  { %v6657_v42 = vor.u32 %v8671_v27, %v6654_v28  ;;  %v6846_v26 = vld [vmem:[#allocation7 + $0x678] sm:$0xf0]  ;;  %v7092_v27 = vld [vmem:[#allocation8 + $0x60] sm:$0xf]  ;;  %v9531_v28 = vpop.f32.mrf.mxu0 }
 0x280   :  { %2775 = vmatpush.bf16.msrb.mxu3 %v6145_v29  ;;  %2788 = vmatpush.bf16.msra.mxu0 %v6433_v30  ;;  %v7157_v29 = vor.u32 %v8802_v15, %v7156_v11  ;;  %v8743_v30 = vld [vmem:[#allocation7 + $0x71c] sm:$0xf]  ;;  %v9517_v41 = vpop.f32.mrf.mxu1 }
 0x281   :  { %2799 = vmatpush.bf16.msra.mxu1 %v6785_v35  ;;  %2764 = vmatpush.bf16.msrb.mxu2 %v6813_v47  ;;  %v7284_v35 = vld [vmem:[#allocation8 + $0x1e0] sm:$0xf]  ;;  %v6945_v45 = vor.u32 %v8743_v30, %v6942_v31  ;;  %v8663_v47 = vld [vmem:[#allocation7 + $0x49c] sm:$0xf]  ;;  %v9527_v8 = vpop.f32.mrf.mxu2  ;;  %v8822_v31 = vld [vmem:[#allocation8 + $0x18c] sm:$0xf0] }
 0x282   :  { %2751 = vmatmul.bf16.vlgmr.msrb.gmra.mxu1 %v9459_v23  ;;  %v7285_v51 = vor.u32 %v8834_v37, %v7284_v35  ;;  %v7236_v30 = vld [vmem:[#allocation8 + $0x180] sm:$0xf]  ;;  %v8866_v35 = vld [vmem:[#allocation8 + $0x2ec] sm:$0xf0]  ;;  %v2391_v37 = vadd.f32 %v9492_v58, %v1083_v13 }
 0x283   :  { %v7396_v58 = vld [vmem:[#allocation8 + $0x2c0] sm:$0xf] }
 0x284   :  { %2776 = vmatpush.bf16.msrb.mxu3 %v6113_v48  ;;  %2789 = vmatpush.bf16.msra.mxu0 %v6401_v49  ;;  %v6622_v48 = vld [vmem:[#allocation7 + $0x4b8] sm:$0xf0]  ;;  %v7141_v49 = vor.u32 %v8798_v33, %v7140_v32  ;;  %v9525_v60 = vpop.f32.mrf.mxu3  ;;  %v2389_v32 = vadd.f32 %v9485_v21, %v1083_v13  ;;  %v7412_v33 = vld [vmem:[#allocation8 + $0x2e0] sm:$0xf] }
 0x285   :  { %2800 = vmatpush.bf16.msra.mxu1 %v6753_v53  ;;  %2813 = vmatpush.bf16.msra.mxu2 %v7041_v54  ;;  %v6910_v53 = vld [vmem:[#allocation7 + $0x6f8] sm:$0xf0]  ;;  %v7124_v54 = vld [vmem:[#allocation8 + $0xa0] sm:$0xf]  ;;  %v6625_v61 = vor.u32 %v8663_v47, %v6622_v48  ;;  %v7413_v21 = vor.u32 %v8866_v35, %v7412_v33 }
 0x286   :  { %2765 = vmatmul.bf16.vlgmr.msrb.gmra.mxu2 %v9463_v39  ;;  %v8711_v47 = vld [vmem:[#allocation7 + $0x61c] sm:$0xf]  ;;  %v2403_v57 = vadd.f32 %v9487_v43, %v2389_v32  ;;  %v8778_v43 = vld [vmem:[#allocation8 + $0x2c] sm:$0xf0]  ;;  %v7188_v35 = vld [vmem:[#allocation8 + $0x120] sm:$0xf] }
 0x288   :  { %2777 = vmatpush.bf16.msrb.mxu3 %v6081_v0  ;;  %2790 = vmatpush.bf16.msra.mxu0 %v6369_v1  ;;  %v6913_v0 = vor.u32 %v8735_v52, %v6910_v53  ;;  %v8655_v1 = vld [vmem:[#allocation7 + $0x45c] sm:$0xf]  ;;  %v7076_v52 = vld [vmem:[#allocation8 + $0x40] sm:$0xf]  ;;  %v8782_v53 = vld [vmem:[#allocation8 + $0x4c] sm:$0xf0] }
 0x289   :  { %2801 = vmatpush.bf16.msra.mxu1 %v6721_v5  ;;  %2814 = vmatpush.bf16.msra.mxu2 %v7009_v6  ;;  %v8727_v5 = vld [vmem:[#allocation7 + $0x69c] sm:$0xf]  ;;  %v6593_v11 = vor.u32 %v8655_v1, %v6590_v2  ;;  %v8898_v1 = vld [vmem:[#allocation8 + $0x3ec] sm:$0xf0]  ;;  %v7077_v7 = vor.u32 %v8782_v53, %v7076_v52 }
 0x28a   :  { %v6878_v6 = vld [vmem:[#allocation7 + $0x6b8] sm:$0xf0]  ;;  %v8930_v52 = vld [vmem:[#allocation8 + $0x4ec] sm:$0xf0] }
 0x28b   :  { %v6881_v15 = vor.u32 %v8727_v5, %v6878_v6 }
 0x28c   :  { %2778 = vmatpush.bf16.msrb.mxu3 %v6049_v16  ;;  %2791 = vmatpush.bf16.msra.mxu0 %v6337_v19  ;;  %v8647_v16 = vld [vmem:[#allocation7 + $0x41c] sm:$0xf] }
 0x28d   :  { %2802 = vmatpush.bf16.msra.mxu1 %v6689_v24  ;;  %2815 = vmatpush.bf16.msra.mxu2 %v6977_v25  ;;  %v6558_v19 = vld [vmem:[#allocation7 + $0x438] sm:$0xf0]  ;;  %v7253_v24 = vor.u32 %v8826_v12, %v7252_v10  ;;  %v7060_v10 = vld [vmem:[#allocation8 + $0x20] sm:$0xf]  ;;  %v2417_v12 = vadd.f32 %v9489_v44, %v2403_v57 }
 0x28e   :  { %v8719_v25 = vld [vmem:[#allocation7 + $0x65c] sm:$0xf] }
 0x28f   :  { %2779 = vmatmul.bf16.vlgmr.msrb.gmra.mxu3 %v9451_v36  ;;  %v7125_v36 = vor.u32 %v8794_v55, %v7124_v54  ;;  %v9538_v54 = vpop.f32.mrf.mxu3  ;;  %v7220_v55 = vld [vmem:[#allocation8 + $0x160] sm:$0xf] }
 0x290   :  { %4397 = vmatpush.bf16.msra.mxu3 %v7157_v29  ;;  %2792 = vmatpush.bf16.msra.mxu0 %v6305_v38  ;;  %v8786_v29 = vld [vmem:[#allocation8 + $0x6c] sm:$0xf0]  ;;  %v1084_v38 = vperm.slane %v9523_v59, 1  ;;  %v7221_v9 = vor.u32 %v8818_v56, %v7220_v55 }
 0x291   :  { %2803 = vmatpush.bf16.msra.mxu1 %v6657_v42  ;;  %2816 = vmatpush.bf16.msra.mxu2 %v6945_v45  ;;  %v6561_v42 = vor.u32 %v8647_v16, %v6558_v19  ;;  %v6849_v45 = vor.u32 %v8719_v25, %v6846_v26  ;;  %v7093_v48 = vor.u32 %v8786_v29, %v7092_v27  ;;  %v7380_v16 = vld [vmem:[#allocation8 + $0x2a0] sm:$0xf]  ;;  %v8858_v19 = vld [vmem:[#allocation8 + $0x2ac] sm:$0xf0]  ;;  %v1085_v27 = vperm.slane %v9523_v59, 2 }
 0x292   :  { %v2445_v2 = vadd.f32 %v9501_v34, %v1084_v38  ;;  %v2447_v6 = vadd.f32 %v9511_v14, %v1084_v38  ;;  %v7524_v14 = vld [vmem:[#allocation8 + $0x3c0] sm:$0xf]  ;;  %v7061_v29 = vor.u32 %v8778_v43, %v7060_v10  ;;  %v8962_v43 = vld [vmem:[#allocation8 + $0x5ec] sm:$0xf0] }
 0x293   :  { %2793 = vmatmul.bf16.vlgmr.msra.gmra.mxu0 %v9455_v50  ;;  %v9533_v50 = vpop.f32.mrf.mxu1  ;;  %v7364_v38 = vld [vmem:[#allocation8 + $0x280] sm:$0xf] }
 0x294   :  { %4398 = vmatpush.bf16.msra.mxu3 %v7141_v49  ;;  %4411 = vmatpush.bf16.msrb.mxu0 %v7285_v51  ;;  %v7237_v49 = vor.u32 %v8822_v31, %v7236_v30  ;;  %v6814_v51 = vld [vmem:[#allocation7 + $0x638] sm:$0xf0]  ;;  %v2459_v25 = vadd.f32 %v9506_v62, %v2445_v2  ;;  %v8774_v31 = vld [vmem:[#allocation8 + $0xc] sm:$0xf0]  ;;  %v7492_v2 = vld [vmem:[#allocation8 + $0x380] sm:$0xf] }
 0x295   :  { %2804 = vmatpush.bf16.msra.mxu1 %v6625_v61  ;;  %2817 = vmatpush.bf16.msra.mxu2 %v6913_v0  ;;  %v8862_v61 = vld [vmem:[#allocation8 + $0x2cc] sm:$0xf0]  ;;  %v7540_v0 = vld [vmem:[#allocation8 + $0x3e0] sm:$0xf]  ;;  %v6817_v5 = vor.u32 %v8711_v47, %v6814_v51 }
 0x296   :  { %v7397_v34 = vor.u32 %v8862_v61, %v7396_v58  ;;  %v2473_v62 = vadd.f32 %v9508_v63, %v2459_v25  ;;  %v8890_v47 = vld [vmem:[#allocation8 + $0x3ac] sm:$0xf0]  ;;  %v7668_v51 = vld [vmem:[#allocation8 + $0x4e0] sm:$0xf] }
 0x297   :  { %v9563_v32 = vpop.f32.mrf.mxu3  ;;  %v8806_v61 = vld [vmem:[#allocation8 + $0x10c] sm:$0xf0]  ;;  %v7796_v10 = vld [vmem:[#allocation8 + $0x5e0] sm:$0xf] }
 0x298   :  { %4399 = vmatpush.bf16.msra.mxu3 %v7125_v36  ;;  %4412 = vmatpush.bf16.msrb.mxu0 %v7269_v3  ;;  %v2405_v36 = vadd.f32 %v9497_v17, %v2391_v37  ;;  %v9543_v3 = vpop.f32.mrf.mxu2  ;;  %v7541_v17 = vor.u32 %v8898_v1, %v7540_v0  ;;  %v8810_v37 = vld [vmem:[#allocation8 + $0x12c] sm:$0xf0]  ;;  %v7348_v0 = vld [vmem:[#allocation8 + $0x260] sm:$0xf]  ;;  %v7669_v1 = vor.u32 %v8930_v52, %v7668_v51 }
 0x299   :  { %2805 = vmatpush.bf16.msra.mxu1 %v6593_v11  ;;  %2818 = vmatpush.bf16.msra.mxu2 %v6881_v15  ;;  %v7204_v11 = vld [vmem:[#allocation8 + $0x140] sm:$0xf]  ;;  %v8814_v15 = vld [vmem:[#allocation8 + $0x14c] sm:$0xf0]  ;;  %v7189_v55 = vor.u32 %v8810_v37, %v7188_v35 }
 0x29a   :  { %v2419_v13 = vadd.f32 %v9499_v18, %v2405_v36  ;;  %v9556_v18 = vpop.f32.mrf.mxu0  ;;  %v7205_v30 = vor.u32 %v8814_v15, %v7204_v11  ;;  %v8886_v36 = vld [vmem:[#allocation8 + $0x38c] sm:$0xf0]  ;;  %v7636_v25 = vld [vmem:[#allocation8 + $0x4a0] sm:$0xf] }
 0x29b   :  { %v9558_v26 = vpop.f32.mrf.mxu1  ;;  %v7316_v37 = vld [vmem:[#allocation8 + $0x220] sm:$0xf]  ;;  %v8954_v51 = vld [vmem:[#allocation8 + $0x5ac] sm:$0xf0] }
 0x29c   :  { %4400 = vmatpush.bf16.msra.mxu3 %v7109_v20  ;;  %4413 = vmatpush.bf16.msrb.mxu0 %v7253_v24  ;;  %v8894_v20 = vld [vmem:[#allocation8 + $0x3cc] sm:$0xf0]  ;;  %v9550_v24 = vadd.f32 %v9494_v4, %v2417_v12  ;;  %v9554_v44 = vadd.f32 %v9503_v46, %v2419_v13  ;;  %v7044_v4 = vld [vmem:[#allocation8] sm:$0xf]  ;;  %v7381_v46 = vor.u32 %v8858_v19, %v7380_v16 }
 0x29d   :  { %2806 = vmatpush.bf16.msra.mxu1 %v6561_v42  ;;  %2819 = vmatpush.bf16.msra.mxu2 %v6849_v45  ;;  %v7525_v33 = vor.u32 %v8894_v20, %v7524_v14  ;;  %v7508_v45 = vld [vmem:[#allocation8 + $0x3a0] sm:$0xf]  ;;  %v2503_v13 = vadd.f32 %v9538_v54, %v1085_v27  ;;  %v8846_v19 = vld [vmem:[#allocation8 + $0x24c] sm:$0xf0] }
 0x29e   :  { %v2835_v63 = vmax.f32 %v9554_v44, 0.0  ;;  %v7509_v57 = vor.u32 %v8890_v47, %v7508_v45  ;;  %v7332_v16 = vld [vmem:[#allocation8 + $0x240] sm:$0xf]  ;;  %v8922_v44 = vld [vmem:[#allocation8 + $0x4ac] sm:$0xf0] }
 0x29f   :  { %v7476_v14 = vld [vmem:[#allocation8 + $0x360] sm:$0xf]  ;;  %v2558_v54 = vpop.f32.mrf.mxu3  ;;  %v7637_v35 = vor.u32 %v8922_v44, %v7636_v25  ;;  %v8878_v47 = vld [vmem:[#allocation8 + $0x34c] sm:$0xf0] }
 0x2a0   :  { %4401 = vmatpush.bf16.msra.mxu3 %v7093_v48  ;;  %4414 = vmatpush.bf16.msrb.mxu0 %v7237_v49  ;;  %v2827_v48 = vmax.f32 %v9550_v24, 0.0  ;;  %v2487_v49 = vadd.f32 %v9513_v22, %v2473_v62  ;;  %v9572_v56 = vpop.f32.mrf.mxu2  ;;  %v8850_v22 = vld [vmem:[#allocation8 + $0x26c] sm:$0xf0]  ;;  %v7333_v62 = vor.u32 %v8846_v19, %v7332_v16  ;;  %v7588_v16 = vld [vmem:[#allocation8 + $0x440] sm:$0xf] }
 0x2a1   :  { %4425 = vmatpush.bf16.msrb.mxu1 %v7413_v21  ;;  %2820 = vmatpush.bf16.msra.mxu2 %v6817_v5  ;;  %v1086_v21 = vperm.slane %v9523_v59, 3  ;;  %v2501_v5 = vadd.f32 %v9525_v60, %v1085_v27  ;;  %v7349_v15 = vor.u32 %v8850_v22, %v7348_v0  ;;  %v7493_v60 = vor.u32 %v8886_v36, %v7492_v2  ;;  %v8882_v24 = vld [vmem:[#allocation8 + $0x36c] sm:$0xf0]  ;;  %v7780_v27 = vld [vmem:[#allocation8 + $0x5c0] sm:$0xf] }
 0x2a2   :  { %2807 = vmatmul.bf16.vlgmr.msra.gmra.mxu1 %v9459_v23  ;;  %v2461_v23 = vadd.f32 %v9515_v40, %v2447_v6  ;;  %v8854_v40 = vld [vmem:[#allocation8 + $0x28c] sm:$0xf0]  ;;  %v9575_v6 = vpop.f32.mrf.mxu0  ;;  %v2828_v12 = vmax.f32 %v2487_v49, 0.0  ;;  %v9580_v11 = vpack.c.bf16 %v2835_v63, %v2827_v48  ;;  %v7764_v49 = vld [vmem:[#allocation8 + $0x5a0] sm:$0xf] }
 0x2a3   :  { %v7365_v58 = vor.u32 %v8854_v40, %v7364_v38  ;;  %v8842_v38 = vld [vmem:[#allocation8 + $0x22c] sm:$0xf0]  ;;  %v2557_v40 = vadd.f32 %v9563_v32, %v1086_v21  ;;  %v2559_v45 = vadd.f32 %v2558_v54, %v1086_v21  ;;  %v7748_v36 = vld [vmem:[#allocation8 + $0x580] sm:$0xf] }
 0x2a4   :  { %4402 = vmatpush.bf16.msra.mxu3 %v7077_v7  ;;  %4415 = vmatpush.bf16.msrb.mxu0 %v7221_v9  ;;  %v2475_v42 = vadd.f32 %v9517_v41, %v2461_v23  ;;  %v7045_v41 = vor.u32 %v8774_v31, %v7044_v4  ;;  %v9577_v7 = vpop.f32.mrf.mxu1  ;;  %v8926_v9 = vld [vmem:[#allocation8 + $0x4cc] sm:$0xf0]  ;;  %v7797_v23 = vor.u32 %v8962_v43, %v7796_v10  ;;  %v7572_v44 = vld [vmem:[#allocation8 + $0x420] sm:$0xf] }
 0x2a5   :  { %4426 = vmatpush.bf16.msrb.mxu1 %v7397_v34  ;;  %4439 = vmatpush.bf16.msrb.mxu2 %v7541_v17  ;;  %v2517_v31 = vadd.f32 %v9556_v18, %v2503_v13  ;;  %v8918_v48 = vld [vmem:[#allocation8 + $0x48c] sm:$0xf0] }
 0x2a6   :  { %2821 = vmatmul.bf16.vlgmr.msra.gmra.mxu2 %v9463_v39  ;;  %v2489_v53 = vadd.f32 %v9527_v8, %v2475_v42  ;;  %v7172_v39 = vld [vmem:[#allocation8 + $0x100] sm:$0xf]  ;;  %v8874_v22 = vld [vmem:[#allocation8 + $0x32c] sm:$0xf0] }
 0x2a7   :  { %v7652_v8 = vld [vmem:[#allocation8 + $0x4c0] sm:$0xf]  ;;  %v7173_v17 = vor.u32 %v8806_v61, %v7172_v39  ;;  %v2531_v18 = vadd.f32 %v9558_v26, %v2517_v31  ;;  %v2571_v26 = vadd.f32 %v9575_v6, %v2557_v40  ;;  %v8914_v2 = vld [vmem:[#allocation8 + $0x46c] sm:$0xf0] }
 0x2a8   :  { %4403 = vmatpush.bf16.msra.mxu3 %v7061_v29  ;;  %4416 = vmatpush.bf16.msrb.mxu0 %v7205_v30  ;;  %v2836_v34 = vmax.f32 %v2489_v53, 0.0  ;;  %v7653_v20 = vor.u32 %v8926_v9, %v7652_v8  ;;  %v8958_v29 = vld [vmem:[#allocation8 + $0x5cc] sm:$0xf0]  ;;  %v2515_v30 = vadd.f32 %v9531_v28, %v2501_v5  ;;  %v7460_v42 = vld [vmem:[#allocation8 + $0x340] sm:$0xf]  ;;  %v7317_v53 = vor.u32 %v8842_v38, %v7316_v37 }
 0x2a9   :  { %4427 = vmatpush.bf16.msrb.mxu1 %v7381_v46  ;;  %4440 = vmatpush.bf16.msrb.mxu2 %v7525_v33  ;;  %v2598_v46 = vpop.f32.mrf.mxu2  ;;  %v7477_v33 = vor.u32 %v8882_v24, %v7476_v14  ;;  %v7620_v28 = vld [vmem:[#allocation8 + $0x480] sm:$0xf]  ;;  %v7781_v63 = vor.u32 %v8958_v29, %v7780_v27  ;;  %v7461_v21 = vor.u32 %v8878_v47, %v7460_v42  ;;  %v8910_v14 = vld [vmem:[#allocation8 + $0x44c] sm:$0xf0] }
 0x2aa   :  { %v9584_v4 = vpack.c.bf16 %v2836_v34, %v2828_v12  ;;  %v2529_v52 = vadd.f32 %v9533_v50, %v2515_v30  ;;  %v7621_v39 = vor.u32 %v8918_v48, %v7620_v28  ;;  %v7444_v61 = vld [vmem:[#allocation8 + $0x320] sm:$0xf]  ;;  %v7765_v50 = vor.u32 %v8954_v51, %v7764_v49  ;;  %v8906_v29 = vld [vmem:[#allocation8 + $0x42c] sm:$0xf0]  ;;  %v8800_v49 = vld [vmem:[#allocation8 + $0xe4] sm:$0xf] }
 0x2ab   :  { %v2585_v5 = vadd.f32 %v9577_v7, %v2571_v26  ;;  %v7445_v6 = vor.u32 %v8874_v22, %v7444_v61  ;;  %v7589_v27 = vor.u32 %v8910_v14, %v7588_v16  ;;  %v7716_v31 = vld [vmem:[#allocation8 + $0x540] sm:$0xf]  ;;  %v7573_v38 = vor.u32 %v8906_v29, %v7572_v44  ;;  %v8902_v40 = vld [vmem:[#allocation8 + $0x40c] sm:$0xf0]  ;;  %v7158_v51 = vld [vmem:[#allocation8 + $0xf0] sm:$0xf0] }
 0x2ac   :  { %4404 = vmatpush.bf16.msra.mxu3 %v7045_v41  ;;  %4417 = vmatpush.bf16.msrb.mxu0 %v7189_v55  ;;  %v2545_v41 = vadd.f32 %v9572_v56, %v2531_v18  ;;  %v2572_v55 = vpop.f32.mrf.mxu0  ;;  %v2586_v32 = vpop.f32.mrf.mxu1  ;;  %v8950_v56 = vld [vmem:[#allocation8 + $0x58c] sm:$0xf0]  ;;  %v2543_v8 = vadd.f32 %v9543_v3, %v2529_v52  ;;  %v7732_v3 = vld [vmem:[#allocation8 + $0x560] sm:$0xf]  ;;  %v7142_v61 = vld [vmem:[#allocation8 + $0xd0] sm:$0xf0] }
 0x2ad   :  { %4428 = vmatpush.bf16.msrb.mxu1 %v7365_v58  ;;  %4441 = vmatpush.bf16.msrb.mxu2 %v7509_v57  ;;  %v7300_v58 = vld [vmem:[#allocation8 + $0x200] sm:$0xf]  ;;  %v8838_v57 = vld [vmem:[#allocation8 + $0x20c] sm:$0xf0]  ;;  %v2573_v0 = vadd.f32 %v2572_v55, %v2559_v45  ;;  %v2599_v34 = vadd.f32 %v2598_v46, %v2585_v5  ;;  %v7749_v19 = vor.u32 %v8950_v56, %v7748_v36  ;;  %v8832_v26 = vld [vmem:[#allocation8 + $0x1e4] sm:$0xf] }
 0x2ae   :  { %v2837_v10 = vmax.f32 %v2545_v41, 0.0  ;;  %v7301_v43 = vor.u32 %v8838_v57, %v7300_v58  ;;  %v2829_v7 = vmax.f32 %v2543_v8, 0.0  ;;  %v7924_v46 = vld [vmem:[#allocation8 + $0x6e0] sm:$0xf]  ;;  %v8938_v48 = vld [vmem:[#allocation8 + $0x52c] sm:$0xf0] }
 0x2af   :  { %4405 = vmatmul.bf16.vlgmr.msra.gmra.mxu3 %v9580_v11  ;;  %v2587_v9 = vadd.f32 %v2586_v32, %v2573_v0  ;;  %v2830_v54 = vmax.f32 %v2599_v34, 0.0  ;;  %v7556_v42 = vld [vmem:[#allocation8 + $0x400] sm:$0xf]  ;;  %v8990_v18 = vld [vmem:[#allocation8 + $0x6cc] sm:$0xf0] }
 0x2b0   :  { %4453 = vmatpush.bf16.msrb.mxu3 %v7669_v1  ;;  %4418 = vmatpush.bf16.msrb.mxu0 %v7173_v17  ;;  %v7604_v1 = vld [vmem:[#allocation8 + $0x460] sm:$0xf]  ;;  %v8796_v41 = vld [vmem:[#allocation8 + $0xc4] sm:$0xf]  ;;  %v8986_v57 = vld [vmem:[#allocation8 + $0x6ac] sm:$0xf0] }
 0x2b1   :  { %4429 = vmatpush.bf16.msrb.mxu1 %v7349_v15  ;;  %4442 = vmatpush.bf16.msrb.mxu2 %v7493_v60  ;;  %v2600_v12 = vpop.f32.mrf.mxu2  ;;  %v7605_v13 = vor.u32 %v8914_v2, %v7604_v1  ;;  %v7428_v15 = vld [vmem:[#allocation8 + $0x300] sm:$0xf]  ;;  %v8870_v60 = vld [vmem:[#allocation8 + $0x30c] sm:$0xf0]  ;;  %v7286_v0 = vld [vmem:[#allocation8 + $0x1f0] sm:$0xf0]  ;;  %v7145_v56 = vor.u32 %v8796_v41, %v7142_v61 }
 0x2b2   :  { %v2601_v17 = vadd.f32 %v2600_v12, %v2587_v9  ;;  %v7429_v25 = vor.u32 %v8870_v60, %v7428_v15  ;;  %v7700_v47 = vld [vmem:[#allocation8 + $0x520] sm:$0xf]  ;;  %v2612_v28 = vpop.f32.mrf.mxu3  ;;  %v8792_v8 = vld [vmem:[#allocation8 + $0xa4] sm:$0xf]  ;;  %v7289_v5 = vor.u32 %v8832_v26, %v7286_v0  ;;  %v7062_v26 = vld [vmem:[#allocation8 + $0x30] sm:$0xf0] }
 0x2b3   :  { %4419 = vmatmul.bf16.vlgmr.msrb.gmra.mxu0 %v9584_v4  ;;  %v7701_v55 = vor.u32 %v8938_v48, %v7700_v47  ;;  %v7684_v32 = vld [vmem:[#allocation8 + $0x500] sm:$0xf]  ;;  %v8828_v12 = vld [vmem:[#allocation8 + $0x1c4] sm:$0xf] }
 0x2b4   :  { %4454 = vmatpush.bf16.msrb.mxu3 %v7653_v20  ;;  %4467 = vmatpush.bf16.msra.mxu0 %v7797_v23  ;;  %v8946_v20 = vld [vmem:[#allocation8 + $0x56c] sm:$0xf0]  ;;  %v2838_v24 = vmax.f32 %v2601_v17, 0.0  ;;  %v9595_v23 = vpack.c.bf16 %v2837_v10, %v2829_v7  ;;  %v7892_v58 = vld [vmem:[#allocation8 + $0x6a0] sm:$0xf]  ;;  %v2626_v1 = vpop.f32.mrf.mxu0 }
 0x2b5   :  { %4430 = vmatpush.bf16.msrb.mxu1 %v7333_v62  ;;  %4443 = vmatpush.bf16.msrb.mxu2 %v7477_v33  ;;  %v7733_v30 = vor.u32 %v8946_v20, %v7732_v3  ;;  %v8942_v62 = vld [vmem:[#allocation8 + $0x54c] sm:$0xf0]  ;;  %v7893_v22 = vor.u32 %v8986_v57, %v7892_v58  ;;  %v7876_v9 = vld [vmem:[#allocation8 + $0x680] sm:$0xf]  ;;  %v8788_v16 = vld [vmem:[#allocation8 + $0x84] sm:$0xf] }
 0x2b6   :  { %v8994_v33 = vld [vmem:[#allocation8 + $0x6ec] sm:$0xf0]  ;;  %v7717_v45 = vor.u32 %v8942_v62, %v7716_v31  ;;  %v7860_v14 = vld [vmem:[#allocation8 + $0x660] sm:$0xf]  ;;  %v7110_v7 = vld [vmem:[#allocation8 + $0x90] sm:$0xf0] }
 0x2b7   :  { %v7925_v37 = vor.u32 %v8994_v33, %v7924_v46  ;;  %v8982_v10 = vld [vmem:[#allocation8 + $0x68c] sm:$0xf0]  ;;  %v8784_v31 = vld [vmem:[#allocation8 + $0x64] sm:$0xf]  ;;  %v7844_v46 = vld [vmem:[#allocation8 + $0x640] sm:$0xf] }
 0x2b8   :  { %4455 = vmatpush.bf16.msrb.mxu3 %v7637_v35  ;;  %4468 = vmatpush.bf16.msra.mxu0 %v7781_v63  ;;  %v9597_v35 = vpack.c.bf16 %v2838_v24, %v2830_v54  ;;  %v7908_v63 = vld [vmem:[#allocation8 + $0x6c0] sm:$0xf]  ;;  %v8978_v3 = vld [vmem:[#allocation8 + $0x66c] sm:$0xf0]  ;;  %v8824_v24 = vld [vmem:[#allocation8 + $0x1a4] sm:$0xf] }
 0x2b9   :  { %4431 = vmatpush.bf16.msrb.mxu1 %v7317_v53  ;;  %4444 = vmatpush.bf16.msrb.mxu2 %v7461_v21  ;;  %v7909_v52 = vor.u32 %v8990_v18, %v7908_v63  ;;  %v7557_v53 = vor.u32 %v8902_v40, %v7556_v42  ;;  %v7161_v21 = vor.u32 %v8800_v49, %v7158_v51  ;;  %v8974_v33 = vld [vmem:[#allocation8 + $0x64c] sm:$0xf0]  ;;  %v7094_v42 = vld [vmem:[#allocation8 + $0x70] sm:$0xf0]  ;;  %v8820_v40 = vld [vmem:[#allocation8 + $0x184] sm:$0xf] }
 0x2ba   :  { %v2614_v34 = vpop.f32.mrf.mxu3  ;;  %v7861_v44 = vor.u32 %v8978_v3, %v7860_v14  ;;  %v7845_v47 = vor.u32 %v8974_v33, %v7844_v46  ;;  %v7097_v18 = vor.u32 %v8784_v31, %v7094_v42  ;;  %v8780_v49 = vld [vmem:[#allocation8 + $0x44] sm:$0xf]  ;;  %v9022_v14 = vld [vmem:[#allocation8 + $0x7cc] sm:$0xf0]  ;;  %v7174_v31 = vld [vmem:[#allocation8 + $0x110] sm:$0xf0] }
 0x2bb   :  { %v8776_v61 = vld [vmem:[#allocation8 + $0x24] sm:$0xf]  ;;  %v8020_v46 = vld [vmem:[#allocation8 + $0x7a0] sm:$0xf]  ;;  %v9018_v33 = vld [vmem:[#allocation8 + $0x7ac] sm:$0xf0] }
 0x2bc   :  { %4456 = vmatpush.bf16.msrb.mxu3 %v7621_v39  ;;  %4469 = vmatpush.bf16.msra.mxu0 %v7765_v50  ;;  %v8934_v39 = vld [vmem:[#allocation8 + $0x50c] sm:$0xf0]  ;;  %v1087_v50 = vperm.slane %v9523_v59, 4  ;;  %v8860_v3 = vld [vmem:[#allocation8 + $0x2c4] sm:$0xf] }
 0x2bd   :  { %4432 = vmatpush.bf16.msrb.mxu1 %v7301_v43  ;;  %4445 = vmatpush.bf16.msrb.mxu2 %v7445_v6  ;;  %v7685_v36 = vor.u32 %v8934_v39, %v7684_v32  ;;  %v7126_v43 = vld [vmem:[#allocation8 + $0xb0] sm:$0xf0]  ;;  %v8816_v32 = vld [vmem:[#allocation8 + $0x164] sm:$0xf] }
 0x2be   :  { %v7270_v6 = vld [vmem:[#allocation8 + $0x1d0] sm:$0xf0]  ;;  %v2613_v17 = vadd.f32 %v2612_v28, %v1087_v50  ;;  %v7129_v60 = vor.u32 %v8792_v8, %v7126_v43  ;;  %v2615_v20 = vadd.f32 %v2614_v34, %v1087_v50  ;;  %v8966_v50 = vld [vmem:[#allocation8 + $0x60c] sm:$0xf0]  ;;  %v8864_v43 = vld [vmem:[#allocation8 + $0x2e4] sm:$0xf]  ;;  %v7065_v34 = vor.u32 %v8776_v61, %v7062_v26 }
 0x2bf   :  { %v2640_v2 = vpop.f32.mrf.mxu1  ;;  %v7654_v42 = vld [vmem:[#allocation8 + $0x4d0] sm:$0xf0]  ;;  %v7988_v61 = vld [vmem:[#allocation8 + $0x760] sm:$0xf]  ;;  %v9010_v26 = vld [vmem:[#allocation8 + $0x76c] sm:$0xf0] }
 0x2c0   :  { %4457 = vmatpush.bf16.msrb.mxu3 %v7605_v13  ;;  %4470 = vmatpush.bf16.msra.mxu0 %v7749_v19  ;;  %v7877_v13 = vor.u32 %v8982_v10, %v7876_v9  ;;  %v7273_v19 = vor.u32 %v8828_v12, %v7270_v6  ;;  %v2627_v54 = vadd.f32 %v2626_v1, %v2613_v17  ;;  %v8812_v1 = vld [vmem:[#allocation8 + $0x144] sm:$0xf]  ;;  %v9026_v9 = vld [vmem:[#allocation8 + $0x7ec] sm:$0xf0]  ;;  %v7414_v12 = vld [vmem:[#allocation8 + $0x2f0] sm:$0xf0] }
 0x2c1   :  { %4433 = vmatmul.bf16.vlgmr.msrb.gmra.mxu1 %v9595_v23  ;;  %4446 = vmatpush.bf16.msrb.mxu2 %v7429_v25  ;;  %v7254_v25 = vld [vmem:[#allocation8 + $0x1b0] sm:$0xf0]  ;;  %v8772_v6 = vld [vmem:[#allocation8 + $0x4] sm:$0xf] }
 0x2c2   :  { %4481 = vmatpush.bf16.msra.mxu1 %v7925_v37  ;;  %v7257_v62 = vor.u32 %v8824_v24, %v7254_v25  ;;  %v2641_v37 = vadd.f32 %v2640_v2, %v2627_v54  ;;  %v7812_v2 = vld [vmem:[#allocation8 + $0x600] sm:$0xf]  ;;  %v7046_v17 = vld [vmem:[#allocation8 + $0x10] sm:$0xf0] }
 0x2c3   :  { %v7813_v8 = vor.u32 %v8966_v50, %v7812_v2  ;;  %v7670_v24 = vld [vmem:[#allocation8 + $0x4f0] sm:$0xf0]  ;;  %v7989_v50 = vor.u32 %v9010_v26, %v7988_v61 }
 0x2c4   :  { %4458 = vmatpush.bf16.msrb.mxu3 %v7589_v27  ;;  %4471 = vmatpush.bf16.msra.mxu0 %v7733_v30  ;;  %v2628_v27 = vpop.f32.mrf.mxu0  ;;  %v7113_v30 = vor.u32 %v8788_v16, %v7110_v7  ;;  %v7190_v16 = vld [vmem:[#allocation8 + $0x130] sm:$0xf0]  ;;  %v8928_v7 = vld [vmem:[#allocation8 + $0x4e4] sm:$0xf] }
 0x2c5   :  { %4447 = vmatmul.bf16.vlgmr.msrb.gmra.mxu2 %v9597_v35  ;;  %v7622_v2 = vld [vmem:[#allocation8 + $0x490] sm:$0xf0] }
 0x2c6   :  { %4482 = vmatpush.bf16.msra.mxu1 %v7909_v52  ;;  %v7828_v52 = vld [vmem:[#allocation8 + $0x620] sm:$0xf]  ;;  %v7558_v61 = vld [vmem:[#allocation8 + $0x410] sm:$0xf0] }
 0x2c7   :  { %v2642_v29 = vpop.f32.mrf.mxu1 }
 0x2c8   :  { %4459 = vmatpush.bf16.msrb.mxu3 %v7573_v38  ;;  %4472 = vmatpush.bf16.msra.mxu0 %v7717_v45  ;;  %v2629_v38 = vadd.f32 %v2628_v27, %v2615_v20  ;;  %v7238_v45 = vld [vmem:[#allocation8 + $0x190] sm:$0xf0]  ;;  %v7049_v27 = vor.u32 %v8772_v6, %v7046_v17  ;;  %v9006_v6 = vld [vmem:[#allocation8 + $0x74c] sm:$0xf0] }
 0x2c9   :  { %v2654_v15 = vpop.f32.mrf.mxu2  ;;  %v7241_v51 = vor.u32 %v8820_v40, %v7238_v45  ;;  %v8021_v40 = vor.u32 %v9018_v33, %v8020_v46  ;;  %v7382_v45 = vld [vmem:[#allocation8 + $0x2b0] sm:$0xf0]  ;;  %v8960_v33 = vld [vmem:[#allocation8 + $0x5e4] sm:$0xf] }
 0x2ca   :  { %4483 = vmatpush.bf16.msra.mxu1 %v7893_v22  ;;  %v2643_v28 = vadd.f32 %v2642_v29, %v2629_v38  ;;  %v2655_v48 = vadd.f32 %v2654_v15, %v2641_v37  ;;  %v8856_v37 = vld [vmem:[#allocation8 + $0x2a4] sm:$0xf]  ;;  %v7606_v17 = vld [vmem:[#allocation8 + $0x470] sm:$0xf0] }
 0x2cb   :  { %v8924_v38 = vld [vmem:[#allocation8 + $0x4c4] sm:$0xf] }
 0x2cc   :  { %4460 = vmatpush.bf16.msrb.mxu3 %v7557_v53  ;;  %4473 = vmatpush.bf16.msra.mxu0 %v7701_v55  ;;  %v8970_v53 = vld [vmem:[#allocation8 + $0x62c] sm:$0xf0]  ;;  %v7078_v55 = vld [vmem:[#allocation8 + $0x50] sm:$0xf0]  ;;  %v2831_v58 = vmax.f32 %v2655_v48, 0.0  ;;  %v1088_v48 = vperm.slane %v9523_v59, 5 }
 0x2cd   :  { %v7829_v39 = vor.u32 %v8970_v53, %v7828_v52  ;;  %v7081_v0 = vor.u32 %v8780_v49, %v7078_v55  ;;  %v7657_v49 = vor.u32 %v8924_v38, %v7654_v42  ;;  %v9014_v52 = vld [vmem:[#allocation8 + $0x78c] sm:$0xf0]  ;;  %v8852_v53 = vld [vmem:[#allocation8 + $0x284] sm:$0xf]  ;;  %v7638_v55 = vld [vmem:[#allocation8 + $0x4b0] sm:$0xf0] }
 0x2ce   :  { %4484 = vmatpush.bf16.msra.mxu1 %v7877_v13  ;;  %v7417_v13 = vor.u32 %v8864_v43, %v7414_v12  ;;  %v8912_v43 = vld [vmem:[#allocation8 + $0x464] sm:$0xf]  ;;  %v7972_v12 = vld [vmem:[#allocation8 + $0x740] sm:$0xf] }
 0x2cf   :  { %v8904_v42 = vld [vmem:[#allocation8 + $0x424] sm:$0xf] }
 0x2d0   :  { %4509 = vmatpush.bf16.msra.mxu3 %v7161_v21  ;;  %4474 = vmatpush.bf16.msra.mxu0 %v7685_v36  ;;  %v7222_v21 = vld [vmem:[#allocation8 + $0x170] sm:$0xf0] }
 0x2d1   :  { %v2656_v63 = vpop.f32.mrf.mxu2  ;;  %v7225_v22 = vor.u32 %v8816_v32, %v7222_v21  ;;  %v7366_v21 = vld [vmem:[#allocation8 + $0x290] sm:$0xf0] }
 0x2d2   :  { %4485 = vmatpush.bf16.msra.mxu1 %v7861_v44  ;;  %v2657_v41 = vadd.f32 %v2656_v63, %v2643_v28  ;;  %v2668_v20 = vpop.f32.mrf.mxu3  ;;  %v7398_v44 = vld [vmem:[#allocation8 + $0x2d0] sm:$0xf0]  ;;  %v2682_v28 = vpop.f32.mrf.mxu0 }
 0x2d3   :  { %v7401_v54 = vor.u32 %v8860_v3, %v7398_v44  ;;  %v9002_v44 = vld [vmem:[#allocation8 + $0x72c] sm:$0xf0] }
 0x2d4   :  { %4510 = vmatpush.bf16.msra.mxu3 %v7145_v56  ;;  %4523 = vmatpush.bf16.msrb.mxu0 %v7289_v5  ;;  %v2839_v57 = vmax.f32 %v2657_v41, 0.0  ;;  %v7206_v56 = vld [vmem:[#allocation8 + $0x150] sm:$0xf0]  ;;  %v8052_v5 = vld [vmem:[#allocation8 + $0x7e0] sm:$0xf] }
 0x2d5   :  { %v8053_v10 = vor.u32 %v9026_v9, %v8052_v5  ;;  %v7209_v15 = vor.u32 %v8812_v1, %v7206_v56  ;;  %v8920_v41 = vld [vmem:[#allocation8 + $0x4a4] sm:$0xf]  ;;  %v7350_v56 = vld [vmem:[#allocation8 + $0x270] sm:$0xf0] }
 0x2d6   :  { %4486 = vmatpush.bf16.msra.mxu1 %v7845_v47  ;;  %v9602_v36 = vpack.c.bf16 %v2839_v57, %v2831_v58  ;;  %v7385_v47 = vor.u32 %v8856_v37, %v7382_v45  ;;  %v2669_v57 = vadd.f32 %v2668_v20, %v1088_v48  ;;  %v7641_v59 = vor.u32 %v8920_v41, %v7638_v55  ;;  %v8916_v1 = vld [vmem:[#allocation8 + $0x484] sm:$0xf]  ;;  %v7798_v37 = vld [vmem:[#allocation8 + $0x5f0] sm:$0xf0] }
 0x2d7   :  { %4495 = vmatpush.bf16.msra.mxu2 %v8053_v10  ;;  %v7625_v10 = vor.u32 %v8916_v1, %v7622_v2  ;;  %v7782_v55 = vld [vmem:[#allocation8 + $0x5d0] sm:$0xf0]  ;;  %v8803_v2 = vld [vmem:[#allocation8 + $0xf4] sm:$0xf0] }
 0x2d8   :  { %4511 = vmatpush.bf16.msra.mxu3 %v7129_v60  ;;  %4524 = vmatpush.bf16.msrb.mxu0 %v7273_v19  ;;  %v8808_v60 = vld [vmem:[#allocation8 + $0x124] sm:$0xf]  ;;  %v8036_v19 = vld [vmem:[#allocation8 + $0x7c0] sm:$0xf]  ;;  %v2683_v9 = vadd.f32 %v2682_v28, %v2669_v57  ;;  %v7526_v1 = vld [vmem:[#allocation8 + $0x3d0] sm:$0xf0] }
 0x2d9   :  { %4461 = vmatmul.bf16.vlgmr.msrb.gmra.mxu3 %v9602_v36  ;;  %v8037_v25 = vor.u32 %v9022_v14, %v8036_v19  ;;  %v7193_v29 = vor.u32 %v8808_v60, %v7190_v16  ;;  %v8844_v60 = vld [vmem:[#allocation8 + $0x244] sm:$0xf]  ;;  %v7334_v16 = vld [vmem:[#allocation8 + $0x250] sm:$0xf0] }
 0x2da   :  { %4487 = vmatpush.bf16.msra.mxu1 %v7829_v39  ;;  %v7369_v39 = vor.u32 %v8852_v53, %v7366_v21  ;;  %v2670_v58 = vpop.f32.mrf.mxu3  ;;  %v7337_v3 = vor.u32 %v8844_v60, %v7334_v16  ;;  %v7302_v53 = vld [vmem:[#allocation8 + $0x210] sm:$0xf0]  ;;  %v8896_v21 = vld [vmem:[#allocation8 + $0x3e4] sm:$0xf] }
 0x2db   :  { %4496 = vmatpush.bf16.msra.mxu2 %v8037_v25  ;;  %v7956_v25 = vld [vmem:[#allocation8 + $0x720] sm:$0xf]  ;;  %v9613_v16 = vld [vmem:[%s9740_s1 + $0x7] sm:$0xff] }
 0x2dc   :  { %4512 = vmatpush.bf16.msra.mxu3 %v7113_v30  ;;  %4525 = vmatpush.bf16.msrb.mxu0 %v7257_v62  ;;  %v8804_v30 = vld [vmem:[#allocation8 + $0x104] sm:$0xf]  ;;  %v7673_v62 = vor.u32 %v8928_v7, %v7670_v24  ;;  %v7609_v24 = vor.u32 %v8912_v43, %v7606_v17 }
 0x2dd   :  { %v8948_v17 = vld [vmem:[#allocation8 + $0x584] sm:$0xf] }
 0x2de   :  { %4488 = vmatpush.bf16.msra.mxu1 %v7813_v8  ;;  %v2671_v8 = vadd.f32 %v2670_v58, %v1088_v48  ;;  %v7940_v48 = vld [vmem:[#allocation8 + $0x700] sm:$0xf] }
 0x2df   :  { %v2696_v63 = vpop.f32.mrf.mxu1  ;;  %4497 = vmatpush.bf16.msra.mxu2 %v8021_v40  ;;  %v7574_v40 = vld [vmem:[#allocation8 + $0x430] sm:$0xf0] }
 0x2e0   :  { %4513 = vmatpush.bf16.msra.mxu3 %v7097_v18  ;;  %4526 = vmatpush.bf16.msrb.mxu0 %v7241_v51  ;;  %v7177_v18 = vor.u32 %v8804_v30, %v7174_v31  ;;  %v8004_v51 = vld [vmem:[#allocation8 + $0x780] sm:$0xf]  ;;  %v2697_v19 = vadd.f32 %v2696_v63, %v2683_v9  ;;  %v7590_v30 = vld [vmem:[#allocation8 + $0x450] sm:$0xf0]  ;;  %v7957_v31 = vor.u32 %v9002_v44, %v7956_v25  ;;  %v8998_v63 = vld [vmem:[#allocation8 + $0x70c] sm:$0xf0] }
 0x2e1   :  { %v8005_v32 = vor.u32 %v9014_v52, %v8004_v51  ;;  %v7941_v51 = vor.u32 %v8998_v63, %v7940_v48  ;;  %v8836_v52 = vld [vmem:[#allocation8 + $0x204] sm:$0xf]  ;;  %v7577_v57 = vor.u32 %v8904_v42, %v7574_v40  ;;  %v7494_v44 = vld [vmem:[#allocation8 + $0x390] sm:$0xf0]  ;;  %v8791_v40 = vld [vmem:[#allocation8 + $0x94] sm:$0xf0] }
 0x2e2   :  { %4537 = vmatpush.bf16.msrb.mxu1 %v7417_v13  ;;  %v2684_v13 = vpop.f32.mrf.mxu0  ;;  %v8884_v25 = vld [vmem:[#allocation8 + $0x384] sm:$0xf] }
 0x2e3   :  { %4498 = vmatpush.bf16.msra.mxu2 %v8005_v32  ;;  %v2685_v14 = vadd.f32 %v2684_v13, %v2671_v8  ;;  %v7305_v32 = vor.u32 %v8836_v52, %v7302_v53  ;;  %v7510_v13 = vld [vmem:[#allocation8 + $0x3b0] sm:$0xf0]  ;;  %v8876_v52 = vld [vmem:[#allocation8 + $0x344] sm:$0xf] }
 0x2e4   :  { %4514 = vmatpush.bf16.msra.mxu3 %v7081_v0  ;;  %4527 = vmatpush.bf16.msrb.mxu0 %v7225_v22  ;;  %v8848_v0 = vld [vmem:[#allocation8 + $0x264] sm:$0xf]  ;;  %v7462_v53 = vld [vmem:[#allocation8 + $0x350] sm:$0xf0] }
 0x2e5   :  { %v7353_v5 = vor.u32 %v8848_v0, %v7350_v56  ;;  %v7164_v0 = vld [vmem:[#allocation8 + $0xe8] sm:$0xf]  ;;  %v7766_v56 = vld [vmem:[#allocation8 + $0x5b0] sm:$0xf0] }
 0x2e6   :  { %4538 = vmatpush.bf16.msrb.mxu1 %v7401_v54  ;;  %v8840_v54 = vld [vmem:[#allocation8 + $0x224] sm:$0xf] }
 0x2e7   :  { %4499 = vmatpush.bf16.msra.mxu2 %v7989_v50  ;;  %v8952_v50 = vld [vmem:[#allocation8 + $0x5a4] sm:$0xf] }
 0x2e8   :  { %4515 = vmatpush.bf16.msra.mxu3 %v7065_v34  ;;  %4528 = vmatpush.bf16.msrb.mxu0 %v7209_v15  ;;  %v2698_v34 = vpop.f32.mrf.mxu1  ;;  %v7973_v15 = vor.u32 %v9006_v6, %v7972_v12  ;;  %v7769_v43 = vor.u32 %v8952_v50, %v7766_v56  ;;  %v7148_v12 = vld [vmem:[#allocation8 + $0xc8] sm:$0xf]  ;;  %v8888_v6 = vld [vmem:[#allocation8 + $0x3a4] sm:$0xf]  ;;  %v7446_v50 = vld [vmem:[#allocation8 + $0x330] sm:$0xf0] }
 0x2e9   :  { %v2710_v22 = vpop.f32.mrf.mxu2  ;;  %v2699_v20 = vadd.f32 %v2698_v34, %v2685_v14  ;;  %v8799_v34 = vld [vmem:[#allocation8 + $0xd4] sm:$0xf0]  ;;  %v7513_v60 = vor.u32 %v8888_v6, %v7510_v13  ;;  %v7292_v6 = vld [vmem:[#allocation8 + $0x1e8] sm:$0xf] }
 0x2ea   :  { %4539 = vmatpush.bf16.msrb.mxu1 %v7385_v47  ;;  %v2711_v7 = vadd.f32 %v2710_v22, %v2697_v19  ;;  %v8892_v22 = vld [vmem:[#allocation8 + $0x3c4] sm:$0xf]  ;;  %v1089_v19 = vperm.slane %v9613_v16, 6  ;;  %v8835_v13 = vld [vmem:[#allocation8 + $0x1f4] sm:$0xf0] }
 0x2eb   :  { %4500 = vmatpush.bf16.msra.mxu2 %v7973_v15  ;;  %v7529_v8 = vor.u32 %v8892_v22, %v7526_v1  ;;  %v7750_v15 = vld [vmem:[#allocation8 + $0x590] sm:$0xf0]  ;;  %v7084_v1 = vld [vmem:[#allocation8 + $0x48] sm:$0xf] }
 0x2ec   :  { %4516 = vmatpush.bf16.msra.mxu3 %v7049_v27  ;;  %4529 = vmatpush.bf16.msrb.mxu0 %v7193_v29  ;;  %v8908_v29 = vld [vmem:[#allocation8 + $0x444] sm:$0xf]  ;;  %v2832_v45 = vmax.f32 %v2711_v7, 0.0  ;;  %v7753_v7 = vor.u32 %v8948_v17, %v7750_v15  ;;  %v7926_v15 = vld [vmem:[#allocation8 + $0x6f0] sm:$0xf0] }
 0x2ed   :  { %v7593_v28 = vor.u32 %v8908_v29, %v7590_v30  ;;  %v7734_v29 = vld [vmem:[#allocation8 + $0x570] sm:$0xf0]  ;;  %v7497_v30 = vor.u32 %v8884_v25, %v7494_v44  ;;  %v8992_v17 = vld [vmem:[#allocation8 + $0x6e4] sm:$0xf]  ;;  %v7068_v25 = vld [vmem:[#allocation8 + $0x28] sm:$0xf] }
 0x2ee   :  { %4540 = vmatpush.bf16.msrb.mxu1 %v7369_v39  ;;  %v7542_v39 = vld [vmem:[#allocation8 + $0x3f0] sm:$0xf0]  ;;  %v8779_v44 = vld [vmem:[#allocation8 + $0x34] sm:$0xf0] }
 0x2ef   :  { %4517 = vmatmul.bf16.vlgmr.msra.gmra.mxu3 %v9580_v11  ;;  %4501 = vmatpush.bf16.msra.mxu2 %v7957_v31  ;;  %v7545_v58 = vor.u32 %v8896_v21, %v7542_v39  ;;  %v8936_v21 = vld [vmem:[#allocation8 + $0x524] sm:$0xf]  ;;  %v7702_v39 = vld [vmem:[#allocation8 + $0x530] sm:$0xf0] }
 0x2f0   :  { %4565 = vmatpush.bf16.msrb.mxu3 %v7673_v62  ;;  %4530 = vmatpush.bf16.msrb.mxu0 %v7177_v18  ;;  %v7318_v62 = vld [vmem:[#allocation8 + $0x230] sm:$0xf0]  ;;  %v7801_v18 = vor.u32 %v8960_v33, %v7798_v37  ;;  %v2738_v14 = vpop.f32.mrf.mxu0  ;;  %v7116_v33 = vld [vmem:[#allocation8 + $0x88] sm:$0xf]  ;;  %v8880_v37 = vld [vmem:[#allocation8 + $0x364] sm:$0xf]  ;;  %v7705_v22 = vor.u32 %v8936_v21, %v7702_v39 }
 0x2f1   :  { %v2712_v27 = vpop.f32.mrf.mxu2  ;;  %v7321_v38 = vor.u32 %v8840_v54, %v7318_v62  ;;  %v8795_v54 = vld [vmem:[#allocation8 + $0xb4] sm:$0xf0]  ;;  %v7244_v39 = vld [vmem:[#allocation8 + $0x188] sm:$0xf] }
 0x2f2   :  { %4541 = vmatpush.bf16.msrb.mxu1 %v7353_v5  ;;  %v2713_v46 = vadd.f32 %v2712_v27, %v2699_v20  ;;  %v2724_v5 = vpop.f32.mrf.mxu3  ;;  %v7149_v20 = vor.u32 %v8799_v34, %v7148_v12  ;;  %v8944_v27 = vld [vmem:[#allocation8 + $0x564] sm:$0xf]  ;;  %v8927_v21 = vld [vmem:[#allocation8 + $0x4d4] sm:$0xf0] }
 0x2f3   :  { %4502 = vmatpush.bf16.msra.mxu2 %v7941_v51  ;;  %v2725_v42 = vadd.f32 %v2724_v5, %v1089_v19  ;;  %v7100_v51 = vld [vmem:[#allocation8 + $0x68] sm:$0xf]  ;;  %v8783_v5 = vld [vmem:[#allocation8 + $0x54] sm:$0xf0] }
 0x2f4   :  { %4566 = vmatpush.bf16.msrb.mxu3 %v7657_v49  ;;  %v2840_v47 = vmax.f32 %v2713_v46, 0.0  ;;  %v8956_v49 = vld [vmem:[#allocation8 + $0x5c4] sm:$0xf]  ;;  %v7737_v46 = vor.u32 %v8944_v27, %v7734_v29  ;;  %v7276_v27 = vld [vmem:[#allocation8 + $0x1c8] sm:$0xf] }
 0x2f5   :  { %v7785_v26 = vor.u32 %v8956_v49, %v7782_v55  ;;  %v2739_v55 = vadd.f32 %v2738_v14, %v2725_v42  ;;  %v8868_v14 = vld [vmem:[#allocation8 + $0x304] sm:$0xf]  ;;  %v8831_v29 = vld [vmem:[#allocation8 + $0x1d4] sm:$0xf0] }
 0x2f6   :  { %4542 = vmatpush.bf16.msrb.mxu1 %v7337_v3  ;;  %v9607_v41 = vpack.c.bf16 %v2840_v47, %v2832_v45  ;;  %v8940_v45 = vld [vmem:[#allocation8 + $0x544] sm:$0xf]  ;;  %v7718_v47 = vld [vmem:[#allocation8 + $0x550] sm:$0xf0]  ;;  %v8775_v42 = vld [vmem:[#allocation8 + $0x14] sm:$0xf0] }
 0x2f7   :  { %4551 = vmatpush.bf16.msrb.mxu2 %v7545_v58  ;;  %v7721_v49 = vor.u32 %v8940_v45, %v7718_v47  ;;  %v7465_v58 = vor.u32 %v8876_v52, %v7462_v53  ;;  %v8931_v47 = vld [vmem:[#allocation8 + $0x4f4] sm:$0xf0] }
 0x2f8   :  { %4567 = vmatpush.bf16.msrb.mxu3 %v7641_v59  ;;  %4475 = vmatmul.bf16.vlgmr.msra.gmra.mxu0 %v9607_v41  ;;  %v8900_v59 = vld [vmem:[#allocation8 + $0x404] sm:$0xf] }
 0x2f9   :  { %4579 = vmatpush.bf16.msra.mxu0 %v7801_v18  ;;  %v7561_v9 = vor.u32 %v8900_v59, %v7558_v61  ;;  %v7117_v18 = vor.u32 %v8791_v40, %v7116_v33  ;;  %v7069_v33 = vor.u32 %v8779_v44, %v7068_v25  ;;  %v7676_v40 = vld [vmem:[#allocation8 + $0x4e8] sm:$0xf] }
 0x2fa   :  { %4543 = vmatpush.bf16.msrb.mxu1 %v7321_v38  ;;  %v2726_v31 = vpop.f32.mrf.mxu3  ;;  %v7478_v38 = vld [vmem:[#allocation8 + $0x370] sm:$0xf0]  ;;  %v7677_v52 = vor.u32 %v8931_v47, %v7676_v40  ;;  %v7612_v44 = vld [vmem:[#allocation8 + $0x468] sm:$0xf] }
 0x2fb   :  { %4552 = vmatpush.bf16.msrb.mxu2 %v7529_v8  ;;  %v2727_v63 = vadd.f32 %v2726_v31, %v1089_v19 }
 0x2fc   :  { %4568 = vmatpush.bf16.msrb.mxu3 %v7625_v10  ;;  %v7165_v10 = vor.u32 %v8803_v2, %v7164_v0  ;;  %v8872_v2 = vld [vmem:[#allocation8 + $0x324] sm:$0xf] }
 0x2fd   :  { %4580 = vmatpush.bf16.msra.mxu0 %v7785_v26 }
 0x2fe   :  { %4544 = vmatpush.bf16.msrb.mxu1 %v7305_v32  ;;  %v8787_v32 = vld [vmem:[#allocation8 + $0x74] sm:$0xf0] }
 0x2ff   :  { %v2752_v3 = vpop.f32.mrf.mxu1  ;;  %4553 = vmatpush.bf16.msrb.mxu2 %v7513_v60  ;;  %v7101_v0 = vor.u32 %v8787_v32, %v7100_v51  ;;  %v7085_v60 = vor.u32 %v8783_v5, %v7084_v1  ;;  %v7862_v5 = vld [vmem:[#allocation8 + $0x670] sm:$0xf0] }
 0x300   :  { %4569 = vmatpush.bf16.msrb.mxu3 %v7609_v24  ;;  %v7132_v24 = vld [vmem:[#allocation8 + $0xa8] sm:$0xf]  ;;  %v2753_v61 = vadd.f32 %v2752_v3, %v2739_v55  ;;  %v7430_v3 = vld [vmem:[#allocation8 + $0x310] sm:$0xf0] }
 0x301   :  { %4581 = vmatpush.bf16.msra.mxu0 %v7769_v43  ;;  %v7133_v62 = vor.u32 %v8795_v54, %v7132_v24  ;;  %v7449_v43 = vor.u32 %v8872_v2, %v7446_v50  ;;  %v7293_v24 = vor.u32 %v8835_v13, %v7292_v6  ;;  %v7929_v54 = vor.u32 %v8992_v17, %v7926_v15  ;;  %v7660_v55 = vld [vmem:[#allocation8 + $0x4c8] sm:$0xf]  ;;  %v8972_v17 = vld [vmem:[#allocation8 + $0x644] sm:$0xf] }
 0x302   :  { %v7644_v50 = vld [vmem:[#allocation8 + $0x4a8] sm:$0xf] }
 0x303   :  { %4554 = vmatpush.bf16.msrb.mxu2 %v7497_v30  ;;  %v7433_v30 = vor.u32 %v8868_v14, %v7430_v3  ;;  %v7628_v13 = vld [vmem:[#allocation8 + $0x488] sm:$0xf]  ;;  %v8815_v14 = vld [vmem:[#allocation8 + $0x154] sm:$0xf0] }
 0x304   :  { %4570 = vmatpush.bf16.msrb.mxu3 %v7593_v28  ;;  %v7481_v28 = vor.u32 %v8880_v37, %v7478_v38  ;;  %v7277_v37 = vor.u32 %v8831_v29, %v7276_v27  ;;  %v7052_v38 = vld [vmem:[#allocation8 + $0x8] sm:$0xf]  ;;  %v8968_v27 = vld [vmem:[#allocation8 + $0x624] sm:$0xf] }
 0x305   :  { %4582 = vmatpush.bf16.msra.mxu0 %v7753_v7  ;;  %v7053_v51 = vor.u32 %v8775_v42, %v7052_v38 }
 0x307   :  { %4555 = vmatpush.bf16.msrb.mxu2 %v7481_v28  ;;  %v2754_v59 = vpop.f32.mrf.mxu1  ;;  %v7260_v28 = vld [vmem:[#allocation8 + $0x1a8] sm:$0xf] }
 0x308   :  { %4571 = vmatpush.bf16.msrb.mxu3 %v7577_v57  ;;  %4531 = vmatmul.bf16.vlgmr.msrb.gmra.mxu0 %v9584_v4  ;;  %v2740_v57 = vpop.f32.mrf.mxu0 }
 0x309   :  { %v2766_v48 = vpop.f32.mrf.mxu2  ;;  %4583 = vmatpush.bf16.msra.mxu0 %v7737_v46  ;;  %v2741_v26 = vadd.f32 %v2740_v57, %v2727_v63  ;;  %v7910_v46 = vld [vmem:[#allocation8 + $0x6d0] sm:$0xf0]  ;;  %v8984_v63 = vld [vmem:[#allocation8 + $0x6a4] sm:$0xf] }
 0x30a   :  { %v2767_v8 = vadd.f32 %v2766_v48, %v2753_v61  ;;  %v8827_v48 = vld [vmem:[#allocation8 + $0x1b4] sm:$0xf0]  ;;  %v8980_v57 = vld [vmem:[#allocation8 + $0x684] sm:$0xf]  ;;  %v1090_v61 = vperm.slane %v9613_v16, 7 }
 0x30b   :  { %v2755_v56 = vadd.f32 %v2754_v59, %v2741_v26  ;;  %4556 = vmatpush.bf16.msrb.mxu2 %v7465_v58  ;;  %v7261_v53 = vor.u32 %v8827_v48, %v7260_v28  ;;  %v8823_v58 = vld [vmem:[#allocation8 + $0x194] sm:$0xf0]  ;;  %v7878_v59 = vld [vmem:[#allocation8 + $0x690] sm:$0xf0]  ;;  %v7661_v26 = vor.u32 %v8927_v21, %v7660_v55  ;;  %v7596_v28 = vld [vmem:[#allocation8 + $0x448] sm:$0xf] }
 0x30c   :  { %4572 = vmatpush.bf16.msrb.mxu3 %v7561_v9  ;;  %v8932_v9 = vld [vmem:[#allocation8 + $0x504] sm:$0xf]  ;;  %v7881_v2 = vor.u32 %v8980_v57, %v7878_v59  ;;  %v8911_v48 = vld [vmem:[#allocation8 + $0x454] sm:$0xf0]  ;;  %v7420_v21 = vld [vmem:[#allocation8 + $0x2e8] sm:$0xf] }
 0x30d   :  { %4584 = vmatpush.bf16.msra.mxu0 %v7721_v49  ;;  %v7597_v57 = vor.u32 %v8911_v48, %v7596_v28  ;;  %v8054_v59 = vld [vmem:[#allocation8 + $0x7f0] sm:$0xf0] }
 0x30e   :  { %v8006_v28 = vld [vmem:[#allocation8 + $0x790] sm:$0xf0] }
 0x30f   :  { %4573 = vmatmul.bf16.vlgmr.msrb.gmra.mxu3 %v9602_v36  ;;  %4557 = vmatpush.bf16.msrb.mxu2 %v7449_v43 }
 0x310   :  { %4621 = vmatpush.bf16.msra.mxu3 %v7165_v10  ;;  %v7686_v10 = vld [vmem:[#allocation8 + $0x510] sm:$0xf0] }
 0x311   :  { %v2768_v12 = vpop.f32.mrf.mxu2  ;;  %4585 = vmatpush.bf16.msra.mxu0 %v7705_v22  ;;  %v7689_v19 = vor.u32 %v8932_v9, %v7686_v10  ;;  %v2794_v22 = vpop.f32.mrf.mxu0  ;;  %v7228_v9 = vld [vmem:[#allocation8 + $0x168] sm:$0xf]  ;;  %v8819_v10 = vld [vmem:[#allocation8 + $0x174] sm:$0xf0] }
 0x312   :  { %v2769_v34 = vadd.f32 %v2768_v12, %v2755_v56  ;;  %v2780_v49 = vpop.f32.mrf.mxu3  ;;  %v8923_v56 = vld [vmem:[#allocation8 + $0x4b4] sm:$0xf0]  ;;  %v7229_v6 = vor.u32 %v8819_v10, %v7228_v9  ;;  %v9020_v10 = vld [vmem:[#allocation8 + $0x7c4] sm:$0xf] }
 0x313   :  { %4558 = vmatpush.bf16.msrb.mxu2 %v7433_v30  ;;  %v7645_v43 = vor.u32 %v8923_v56, %v7644_v50  ;;  %v2781_v15 = vadd.f32 %v2780_v49, %v1090_v61  ;;  %v7830_v30 = vld [vmem:[#allocation8 + $0x630] sm:$0xf0] }
 0x314   :  { %4622 = vmatpush.bf16.msra.mxu3 %v7149_v20  ;;  %v2833_v20 = vmax.f32 %v2767_v8, 0.0  ;;  %v2841_v7 = vmax.f32 %v2769_v34, 0.0  ;;  %v8976_v8 = vld [vmem:[#allocation8 + $0x664] sm:$0xf]  ;;  %v8919_v34 = vld [vmem:[#allocation8 + $0x494] sm:$0xf0] }
 0x315   :  { %4586 = vmatpush.bf16.msra.mxu0 %v7689_v19  ;;  %v7865_v12 = vor.u32 %v8976_v8, %v7862_v5  ;;  %v7212_v19 = vld [vmem:[#allocation8 + $0x148] sm:$0xf]  ;;  %v2795_v29 = vadd.f32 %v2794_v22, %v2781_v15 }
 0x316   :  { %v9618_v31 = vpack.c.bf16 %v2841_v7, %v2833_v20  ;;  %v7629_v7 = vor.u32 %v8919_v34, %v7628_v13  ;;  %v7213_v25 = vor.u32 %v8815_v14, %v7212_v19  ;;  %v8038_v13 = vld [vmem:[#allocation8 + $0x7d0] sm:$0xf0]  ;;  %v7788_v34 = vld [vmem:[#allocation8 + $0x5c8] sm:$0xf]  ;;  %v8801_v14 = vld [vmem:[#allocation8 + $0xec] sm:$0xf] }
 0x317   :  { %v7564_v15 = vld [vmem:[#allocation8 + $0x408] sm:$0xf] }
 0x318   :  { %4623 = vmatpush.bf16.msra.mxu3 %v7133_v62  ;;  %v8988_v62 = vld [vmem:[#allocation8 + $0x6c4] sm:$0xf]  ;;  %4489 = vmatmul.bf16.vlgmr.msra.gmra.mxu1 %v9618_v31 }
 0x319   :  { %4635 = vmatpush.bf16.msrb.mxu0 %v7293_v24  ;;  %4593 = vmatpush.bf16.msra.mxu1 %v7929_v54  ;;  %v7913_v45 = vor.u32 %v8988_v62, %v7910_v46  ;;  %v8915_v54 = vld [vmem:[#allocation8 + $0x474] sm:$0xf0]  ;;  %v7196_v62 = vld [vmem:[#allocation8 + $0x128] sm:$0xf] }
 0x31a   :  { %4587 = vmatmul.bf16.vlgmr.msra.gmra.mxu0 %v9607_v41  ;;  %v2782_v16 = vpop.f32.mrf.mxu3  ;;  %v8811_v46 = vld [vmem:[#allocation8 + $0x134] sm:$0xf0]  ;;  %v7613_v40 = vor.u32 %v8915_v54, %v7612_v44  ;;  %v9016_v54 = vld [vmem:[#allocation8 + $0x7a4] sm:$0xf] }
 0x31b   :  { %v2783_v20 = vadd.f32 %v2782_v16, %v1090_v61  ;;  %v7197_v47 = vor.u32 %v8811_v46, %v7196_v62  ;;  %v7804_v61 = vld [vmem:[#allocation8 + $0x5e8] sm:$0xf]  ;;  %v8863_v16 = vld [vmem:[#allocation8 + $0x2d4] sm:$0xf0] }
 0x31c   :  { %4624 = vmatpush.bf16.msra.mxu3 %v7117_v18  ;;  %v7894_v18 = vld [vmem:[#allocation8 + $0x6b0] sm:$0xf0]  ;;  %v8955_v62 = vld [vmem:[#allocation8 + $0x5b4] sm:$0xf0] }
 0x31d   :  { %4636 = vmatpush.bf16.msrb.mxu0 %v7277_v37  ;;  %4594 = vmatpush.bf16.msra.mxu1 %v7913_v45  ;;  %v7897_v32 = vor.u32 %v8984_v63, %v7894_v18  ;;  %v7833_v45 = vor.u32 %v8968_v27, %v7830_v30  ;;  %v8964_v63 = vld [vmem:[#allocation8 + $0x604] sm:$0xf]  ;;  %v8022_v27 = vld [vmem:[#allocation8 + $0x7b0] sm:$0xf0]  ;;  %v7772_v30 = vld [vmem:[#allocation8 + $0x5a8] sm:$0xf] }
 0x31f   :  { %v2808_v1 = vpop.f32.mrf.mxu1 }
 0x320   :  { %4625 = vmatpush.bf16.msra.mxu3 %v7101_v0  ;;  %v7245_v0 = vor.u32 %v8823_v58, %v7244_v39  ;;  %v2809_v38 = vadd.f32 %v2808_v1, %v2795_v29  ;;  %v8867_v39 = vld [vmem:[#allocation8 + $0x2f4] sm:$0xf0]  ;;  %v7580_v1 = vld [vmem:[#allocation8 + $0x428] sm:$0xf] }
 0x321   :  { %4637 = vmatpush.bf16.msrb.mxu0 %v7261_v53  ;;  %4595 = vmatpush.bf16.msra.mxu1 %v7897_v32  ;;  %v8807_v53 = vld [vmem:[#allocation8 + $0x114] sm:$0xf0]  ;;  %v9024_v32 = vld [vmem:[#allocation8 + $0x7e4] sm:$0xf]  ;;  %v7421_v8 = vor.u32 %v8867_v39, %v7420_v21 }
 0x322   :  { %v8057_v5 = vor.u32 %v9024_v32, %v8054_v59  ;;  %v8851_v32 = vld [vmem:[#allocation8 + $0x274] sm:$0xf0]  ;;  %v9008_v39 = vld [vmem:[#allocation8 + $0x764] sm:$0xf]  ;;  %v7740_v59 = vld [vmem:[#allocation8 + $0x568] sm:$0xf] }
 0x324   :  { %4626 = vmatpush.bf16.msra.mxu3 %v7085_v60  ;;  %v7846_v60 = vld [vmem:[#allocation8 + $0x650] sm:$0xf0] }
 0x325   :  { %4638 = vmatpush.bf16.msrb.mxu0 %v7245_v0  ;;  %4596 = vmatpush.bf16.msra.mxu1 %v7881_v2  ;;  %v7849_v24 = vor.u32 %v8972_v17, %v7846_v60  ;;  %v8907_v2 = vld [vmem:[#allocation8 + $0x434] sm:$0xf0] }
 0x326   :  { %v8959_v17 = vld [vmem:[#allocation8 + $0x5d4] sm:$0xf0] }
 0x327   :  { %v2810_v37 = vpop.f32.mrf.mxu1  ;;  %v8903_v60 = vld [vmem:[#allocation8 + $0x414] sm:$0xf0] }
 0x328   :  { %4627 = vmatpush.bf16.msra.mxu3 %v7069_v33  ;;  %4545 = vmatmul.bf16.vlgmr.msrb.gmra.mxu1 %v9595_v23  ;;  %v2796_v33 = vpop.f32.mrf.mxu0  ;;  %v7565_v44 = vor.u32 %v8903_v60, %v7564_v15  ;;  %v8843_v15 = vld [vmem:[#allocation8 + $0x234] sm:$0xf0] }
 0x329   :  { %v2822_v3 = vpop.f32.mrf.mxu2  ;;  %4597 = vmatpush.bf16.msra.mxu1 %v7865_v12  ;;  %4639 = vmatpush.bf16.msrb.mxu0 %v7229_v6  ;;  %v2797_v42 = vadd.f32 %v2796_v33, %v2783_v20  ;;  %v7581_v6 = vor.u32 %v8907_v2, %v7580_v1  ;;  %v8041_v20 = vor.u32 %v9020_v10, %v8038_v13  ;;  %v8797_v33 = vld [vmem:[#allocation8 + $0xcc] sm:$0xf]  ;;  %v7340_v2 = vld [vmem:[#allocation8 + $0x248] sm:$0xf]  ;;  %v7102_v13 = vld [vmem:[#allocation8 + $0x78] sm:$0xf0] }
 0x32a   :  { %v2823_v49 = vadd.f32 %v2822_v3, %v2809_v38  ;;  %v7166_v3 = vld [vmem:[#allocation8 + $0xf8] sm:$0xf0]  ;;  %v8025_v38 = vor.u32 %v9016_v54, %v8022_v27  ;;  %v7724_v10 = vld [vmem:[#allocation8 + $0x548] sm:$0xf]  ;;  %v8996_v54 = vld [vmem:[#allocation8 + $0x704] sm:$0xf] }
 0x32b   :  { %v2811_v18 = vadd.f32 %v2810_v37, %v2797_v42  ;;  %v7169_v29 = vor.u32 %v8801_v14, %v7166_v3  ;;  %v7150_v37 = vld [vmem:[#allocation8 + $0xd8] sm:$0xf0]  ;;  %v7372_v42 = vld [vmem:[#allocation8 + $0x288] sm:$0xf]  ;;  %v7958_v14 = vld [vmem:[#allocation8 + $0x730] sm:$0xf0] }
 0x32c   :  { %4628 = vmatpush.bf16.msra.mxu3 %v7053_v51  ;;  %v7814_v51 = vld [vmem:[#allocation8 + $0x610] sm:$0xf0]  ;;  %v2834_v50 = vmax.f32 %v2823_v49, 0.0  ;;  %v7153_v48 = vor.u32 %v8797_v33, %v7150_v37  ;;  %v8935_v37 = vld [vmem:[#allocation8 + $0x514] sm:$0xf0] }
 0x32d   :  { %4598 = vmatpush.bf16.msra.mxu1 %v7849_v24  ;;  %4640 = vmatpush.bf16.msrb.mxu0 %v7213_v25  ;;  %v7817_v0 = vor.u32 %v8964_v63, %v7814_v51  ;;  %v7388_v24 = vld [vmem:[#allocation8 + $0x2a8] sm:$0xf]  ;;  %v8859_v25 = vld [vmem:[#allocation8 + $0x2b4] sm:$0xf0]  ;;  %v8793_v51 = vld [vmem:[#allocation8 + $0xac] sm:$0xf] }
 0x32e   :  { %v7389_v46 = vor.u32 %v8859_v25, %v7388_v24  ;;  %v7756_v63 = vld [vmem:[#allocation8 + $0x588] sm:$0xf]  ;;  %v8781_v24 = vld [vmem:[#allocation8 + $0x4c] sm:$0xf]  ;;  %v7942_v27 = vld [vmem:[#allocation8 + $0x710] sm:$0xf0] }
 0x32f   :  { %4629 = vmatmul.bf16.vlgmr.msra.gmra.mxu3 %v9580_v11 }
 0x330   :  { %4677 = vmatpush.bf16.msrb.mxu3 %v7677_v52  ;;  %v7180_v52 = vld [vmem:[#allocation8 + $0x108] sm:$0xf] }
 0x331   :  { %v2824_v55 = vpop.f32.mrf.mxu2  ;;  %4599 = vmatpush.bf16.msra.mxu1 %v7833_v45  ;;  %4641 = vmatpush.bf16.msrb.mxu0 %v7197_v47  ;;  %v7181_v22 = vor.u32 %v8807_v53, %v7180_v52  ;;  %v7773_v45 = vor.u32 %v8955_v62, %v7772_v30  ;;  %v9012_v47 = vld [vmem:[#allocation8 + $0x784] sm:$0xf]  ;;  %v7134_v52 = vld [vmem:[#allocation8 + $0xb8] sm:$0xf0]  ;;  %v7308_v30 = vld [vmem:[#allocation8 + $0x208] sm:$0xf] }
 0x332   :  { %v2825_v58 = vadd.f32 %v2824_v55, %v2811_v18  ;;  %v8951_v18 = vld [vmem:[#allocation8 + $0x594] sm:$0xf0]  ;;  %v8009_v53 = vor.u32 %v9012_v47, %v8006_v28  ;;  %v7356_v55 = vld [vmem:[#allocation8 + $0x268] sm:$0xf]  ;;  %v8833_v28 = vld [vmem:[#allocation8 + $0x1ec] sm:$0xf] }
 0x333   :  { %v7757_v21 = vor.u32 %v8951_v18, %v7756_v63  ;;  %v8839_v62 = vld [vmem:[#allocation8 + $0x214] sm:$0xf0]  ;;  %v7294_v63 = vld [vmem:[#allocation8 + $0x1f8] sm:$0xf0]  ;;  %v8777_v18 = vld [vmem:[#allocation8 + $0x2c] sm:$0xf] }
 0x334   :  { %4678 = vmatpush.bf16.msrb.mxu3 %v7661_v26  ;;  %v8963_v26 = vld [vmem:[#allocation8 + $0x5f4] sm:$0xf0]  ;;  %v2842_v56 = vmax.f32 %v2825_v58, 0.0  ;;  %v7990_v58 = vld [vmem:[#allocation8 + $0x770] sm:$0xf0] }
 0x335   :  { %v7805_v9 = vor.u32 %v8963_v26, %v7804_v61  ;;  %4600 = vmatpush.bf16.msra.mxu1 %v7817_v0  ;;  %4642 = vmatpush.bf16.msrb.mxu0 %v7181_v22  ;;  %v8947_v61 = vld [vmem:[#allocation8 + $0x574] sm:$0xf0]  ;;  %v7357_v26 = vor.u32 %v8851_v32, %v7356_v55  ;;  %v8789_v0 = vld [vmem:[#allocation8 + $0x8c] sm:$0xf]  ;;  %v7118_v22 = vld [vmem:[#allocation8 + $0x98] sm:$0xf0]  ;;  %v7993_v1 = vor.u32 %v9008_v39, %v7990_v58 }
 0x336   :  { %v9625_v12 = vpack.c.bf16 %v2842_v56, %v2834_v50  ;;  %v8847_v50 = vld [vmem:[#allocation8 + $0x254] sm:$0xf0]  ;;  %v7741_v56 = vor.u32 %v8947_v61, %v7740_v59  ;;  %v7916_v32 = vld [vmem:[#allocation8 + $0x6c8] sm:$0xf]  ;;  %v7297_v39 = vor.u32 %v8833_v28, %v7294_v63  ;;  %v8829_v61 = vld [vmem:[#allocation8 + $0x1cc] sm:$0xf] }
 0x337   :  { %v8899_v47 = vld [vmem:[#allocation8 + $0x3f4] sm:$0xf0]  ;;  %v7630_v63 = vld [vmem:[#allocation8 + $0x498] sm:$0xf0] }
 0x338   :  { %4679 = vmatpush.bf16.msrb.mxu3 %v7645_v43  ;;  %v7404_v43 = vld [vmem:[#allocation8 + $0x2c8] sm:$0xf]  ;;  %4503 = vmatmul.bf16.vlgmr.msra.gmra.mxu2 %v9625_v12  ;;  %v8895_v59 = vld [vmem:[#allocation8 + $0x3d4] sm:$0xf0] }
 0x339   :  { %4649 = vmatpush.bf16.msrb.mxu1 %v7421_v8  ;;  %v7405_v19 = vor.u32 %v8863_v16, %v7404_v43  ;;  %4607 = vmatpush.bf16.msra.mxu2 %v8057_v5  ;;  %v9004_v8 = vld [vmem:[#allocation8 + $0x744] sm:$0xf]  ;;  %v7974_v5 = vld [vmem:[#allocation8 + $0x750] sm:$0xf0]  ;;  %v8943_v43 = vld [vmem:[#allocation8 + $0x554] sm:$0xf0]  ;;  %v7341_v16 = vor.u32 %v8847_v50, %v7340_v2 }
 0x33a   :  { %4691 = vmatpush.bf16.msra.mxu0 %v7805_v9  ;;  %4601 = vmatmul.bf16.vlgmr.msra.gmra.mxu1 %v9618_v31  ;;  %v7121_v9 = vor.u32 %v8789_v0, %v7118_v22  ;;  %v7725_v60 = vor.u32 %v8943_v43, %v7724_v10  ;;  %v8773_v0 = vld [vmem:[#allocation8 + $0xc] sm:$0xf]  ;;  %v7054_v22 = vld [vmem:[#allocation8 + $0x18] sm:$0xf0]  ;;  %v7516_v43 = vld [vmem:[#allocation8 + $0x3a8] sm:$0xf] }
 0x33b   :  { %4643 = vmatmul.bf16.vlgmr.msrb.gmra.mxu0 %v9584_v4  ;;  %v8929_v2 = vld [vmem:[#allocation8 + $0x4ec] sm:$0xf]  ;;  %v7678_v50 = vld [vmem:[#allocation8 + $0x4f8] sm:$0xf0]  ;;  %v7057_v10 = vor.u32 %v8773_v0, %v7054_v22  ;;  %v7452_v22 = vld [vmem:[#allocation8 + $0x328] sm:$0xf] }
 0x33c   :  { %4680 = vmatpush.bf16.msrb.mxu3 %v7629_v7  ;;  %v7789_v7 = vor.u32 %v8959_v17, %v7788_v34  ;;  %v7977_v34 = vor.u32 %v9004_v8, %v7974_v5  ;;  %v7324_v17 = vld [vmem:[#allocation8 + $0x228] sm:$0xf]  ;;  %v8987_v5 = vld [vmem:[#allocation8 + $0x6b4] sm:$0xf0] }
 0x33d   :  { %4650 = vmatpush.bf16.msrb.mxu1 %v7405_v19  ;;  %4608 = vmatpush.bf16.msra.mxu2 %v8041_v20  ;;  %v9000_v19 = vld [vmem:[#allocation8 + $0x724] sm:$0xf]  ;;  %v7708_v20 = vld [vmem:[#allocation8 + $0x528] sm:$0xf]  ;;  %v7325_v25 = vor.u32 %v8843_v15, %v7324_v17  ;;  %v8925_v15 = vld [vmem:[#allocation8 + $0x4cc] sm:$0xf] }
 0x33e   :  { %4692 = vmatpush.bf16.msra.mxu0 %v7789_v7  ;;  %v8939_v7 = vld [vmem:[#allocation8 + $0x534] sm:$0xf0]  ;;  %v7900_v8 = vld [vmem:[#allocation8 + $0x6a8] sm:$0xf] }
 0x33f   :  { %v7709_v33 = vor.u32 %v8939_v7, %v7708_v20  ;;  %v7901_v17 = vor.u32 %v8987_v5, %v7900_v8  ;;  %v7500_v7 = vld [vmem:[#allocation8 + $0x388] sm:$0xf]  ;;  %v8909_v8 = vld [vmem:[#allocation8 + $0x44c] sm:$0xf] }
 0x340   :  { %4681 = vmatpush.bf16.msrb.mxu3 %v7613_v40  ;;  %v8855_v40 = vld [vmem:[#allocation8 + $0x294] sm:$0xf0] }
 0x341   :  { %4651 = vmatpush.bf16.msrb.mxu1 %v7389_v46  ;;  %v7373_v49 = vor.u32 %v8855_v40, %v7372_v42  ;;  %4609 = vmatpush.bf16.msra.mxu2 %v8025_v38  ;;  %v7692_v46 = vld [vmem:[#allocation8 + $0x508] sm:$0xf]  ;;  %v8995_v42 = vld [vmem:[#allocation8 + $0x6f4] sm:$0xf0] }
 0x342   :  { %4693 = vmatpush.bf16.msra.mxu0 %v7773_v45  ;;  %v7932_v38 = vld [vmem:[#allocation8 + $0x6e8] sm:$0xf] }
 0x343   :  { %v7548_v45 = vld [vmem:[#allocation8 + $0x3e8] sm:$0xf] }
 0x344   :  { %4682 = vmatpush.bf16.msrb.mxu3 %v7597_v57  ;;  %v7137_v57 = vor.u32 %v8793_v51, %v7134_v52  ;;  %v7945_v51 = vor.u32 %v8996_v54, %v7942_v27  ;;  %v7933_v52 = vor.u32 %v8995_v42, %v7932_v38  ;;  %v7549_v55 = vor.u32 %v8899_v47, %v7548_v45  ;;  %v7246_v54 = vld [vmem:[#allocation8 + $0x198] sm:$0xf0]  ;;  %v7484_v38 = vld [vmem:[#allocation8 + $0x368] sm:$0xf]  ;;  %v8883_v42 = vld [vmem:[#allocation8 + $0x374] sm:$0xf0] }
 0x345   :  { %4652 = vmatpush.bf16.msrb.mxu1 %v7373_v49  ;;  %4610 = vmatpush.bf16.msra.mxu2 %v8009_v53  ;;  %v7070_v49 = vld [vmem:[#allocation8 + $0x38] sm:$0xf0]  ;;  %v7693_v53 = vor.u32 %v8935_v37, %v7692_v46  ;;  %v7868_v46 = vld [vmem:[#allocation8 + $0x668] sm:$0xf]  ;;  %v8817_v45 = vld [vmem:[#allocation8 + $0x16c] sm:$0xf] }
 0x346   :  { %4694 = vmatpush.bf16.msra.mxu0 %v7757_v21  ;;  %v8991_v21 = vld [vmem:[#allocation8 + $0x6d4] sm:$0xf0]  ;;  %v7073_v58 = vor.u32 %v8777_v18, %v7070_v49  ;;  %v7230_v47 = vld [vmem:[#allocation8 + $0x178] sm:$0xf0]  ;;  %v7485_v18 = vor.u32 %v8883_v42, %v7484_v38  ;;  %v7852_v49 = vld [vmem:[#allocation8 + $0x648] sm:$0xf] }
 0x347   :  { %v8044_v42 = vld [vmem:[#allocation8 + $0x7c8] sm:$0xf] }
 0x348   :  { %4683 = vmatpush.bf16.msrb.mxu3 %v7581_v6  ;;  %4559 = vmatmul.bf16.vlgmr.msrb.gmra.mxu2 %v9597_v35  ;;  %v8785_v6 = vld [vmem:[#allocation8 + $0x6c] sm:$0xf] }
 0x349   :  { %4653 = vmatpush.bf16.msrb.mxu1 %v7357_v26  ;;  %4611 = vmatpush.bf16.msra.mxu2 %v7993_v1  ;;  %v7105_v3 = vor.u32 %v8785_v6, %v7102_v13  ;;  %v7278_v26 = vld [vmem:[#allocation8 + $0x1d8] sm:$0xf0]  ;;  %v7917_v1 = vor.u32 %v8991_v21, %v7916_v32  ;;  %v7681_v6 = vor.u32 %v8929_v2, %v7678_v50  ;;  %v8825_v13 = vld [vmem:[#allocation8 + $0x1ac] sm:$0xf] }
 0x34a   :  { %4695 = vmatpush.bf16.msra.mxu0 %v7741_v56  ;;  %v8813_v32 = vld [vmem:[#allocation8 + $0x14c] sm:$0xf]  ;;  %v7214_v21 = vld [vmem:[#allocation8 + $0x158] sm:$0xf0] }
 0x34b   :  { %v7217_v0 = vor.u32 %v8813_v32, %v7214_v21  ;;  %v8809_v50 = vld [vmem:[#allocation8 + $0x12c] sm:$0xf]  ;;  %v7774_v21 = vld [vmem:[#allocation8 + $0x5b8] sm:$0xf0] }
 0x34c   :  { %4684 = vmatpush.bf16.msrb.mxu3 %v7565_v44  ;;  %v7086_v44 = vld [vmem:[#allocation8 + $0x58] sm:$0xf0]  ;;  %v8953_v32 = vld [vmem:[#allocation8 + $0x5ac] sm:$0xf] }
 0x34d   :  { %4654 = vmatpush.bf16.msrb.mxu1 %v7341_v16  ;;  %4612 = vmatpush.bf16.msra.mxu2 %v7977_v34  ;;  %v7089_v40 = vor.u32 %v8781_v24, %v7086_v44  ;;  %v8891_v16 = vld [vmem:[#allocation8 + $0x3b4] sm:$0xf0]  ;;  %v7262_v34 = vld [vmem:[#allocation8 + $0x1b8] sm:$0xf0]  ;;  %v8821_v44 = vld [vmem:[#allocation8 + $0x18c] sm:$0xf] }
 0x34e   :  { %4696 = vmatpush.bf16.msra.mxu0 %v7725_v60  ;;  %v7662_v60 = vld [vmem:[#allocation8 + $0x4d8] sm:$0xf0]  ;;  %v7265_v20 = vor.u32 %v8825_v13, %v7262_v34  ;;  %v8887_v24 = vld [vmem:[#allocation8 + $0x394] sm:$0xf0]  ;;  %v7249_v37 = vor.u32 %v8821_v44, %v7246_v54  ;;  %v8805_v34 = vld [vmem:[#allocation8 + $0x10c] sm:$0xf] }
 0x34f   :  { %4685 = vmatmul.bf16.vlgmr.msrb.gmra.mxu3 %v9602_v36  ;;  %v8967_v13 = vld [vmem:[#allocation8 + $0x614] sm:$0xf0]  ;;  %v8905_v44 = vld [vmem:[#allocation8 + $0x42c] sm:$0xf]  ;;  %v7582_v54 = vld [vmem:[#allocation8 + $0x438] sm:$0xf0] }
 0x350   :  { %4733 = vmatpush.bf16.msra.mxu3 %v7169_v29  ;;  %v7961_v29 = vor.u32 %v9000_v19, %v7958_v14  ;;  %v7517_v19 = vor.u32 %v8891_v16, %v7516_v43  ;;  %v7884_v14 = vld [vmem:[#allocation8 + $0x688] sm:$0xf]  ;;  %v8871_v43 = vld [vmem:[#allocation8 + $0x314] sm:$0xf0]  ;;  %v7585_v38 = vor.u32 %v8905_v44, %v7582_v54 }
 0x351   :  { %4655 = vmatpush.bf16.msrb.mxu1 %v7325_v25  ;;  %v7665_v25 = vor.u32 %v8925_v15, %v7662_v60  ;;  %v7182_v15 = vld [vmem:[#allocation8 + $0x118] sm:$0xf0]  ;;  %v8865_v60 = vld [vmem:[#allocation8 + $0x2ec] sm:$0xf] }
 0x352   :  { %4613 = vmatpush.bf16.msra.mxu2 %v7961_v29  ;;  %4697 = vmatpush.bf16.msra.mxu0 %v7709_v33  ;;  %v8921_v29 = vld [vmem:[#allocation8 + $0x4ac] sm:$0xf]  ;;  %v8979_v33 = vld [vmem:[#allocation8 + $0x674] sm:$0xf0] }
 0x353   :  { %v7869_v28 = vor.u32 %v8979_v33, %v7868_v46  ;;  %v8861_v46 = vld [vmem:[#allocation8 + $0x2cc] sm:$0xf]  ;;  %v7406_v33 = vld [vmem:[#allocation8 + $0x2d8] sm:$0xf0] }
 0x354   :  { %4734 = vmatpush.bf16.msra.mxu3 %v7153_v48  ;;  %v7309_v48 = vor.u32 %v8839_v62, %v7308_v30  ;;  %v7646_v30 = vld [vmem:[#allocation8 + $0x4b8] sm:$0xf0]  ;;  %v7501_v62 = vor.u32 %v8887_v24, %v7500_v7  ;;  %v8961_v7 = vld [vmem:[#allocation8 + $0x5ec] sm:$0xf] }
 0x356   :  { %4656 = vmatpush.bf16.msrb.mxu1 %v7309_v48  ;;  %4614 = vmatpush.bf16.msra.mxu2 %v7945_v51  ;;  %v8917_v48 = vld [vmem:[#allocation8 + $0x48c] sm:$0xf]  ;;  %v8975_v51 = vld [vmem:[#allocation8 + $0x654] sm:$0xf0] }
 0x357   :  { %4698 = vmatpush.bf16.msra.mxu0 %v7693_v53  ;;  %v8879_v53 = vld [vmem:[#allocation8 + $0x354] sm:$0xf0] }
 0x358   :  { %4735 = vmatpush.bf16.msra.mxu3 %v7137_v57  ;;  %v7532_v57 = vld [vmem:[#allocation8 + $0x3c8] sm:$0xf] }
 0x359   :  { %v7533_v56 = vor.u32 %v8895_v59, %v7532_v57  ;;  %4657 = vmatmul.bf16.vlgmr.msrb.gmra.mxu1 %v9595_v23  ;;  %4615 = vmatmul.bf16.vlgmr.msra.gmra.mxu2 %v9625_v12  ;;  %v7614_v57 = vld [vmem:[#allocation8 + $0x478] sm:$0xf0] }
 0x35a   :  { %4705 = vmatpush.bf16.msra.mxu1 %v7933_v52  ;;  %4663 = vmatpush.bf16.msrb.mxu2 %v7549_v55  ;;  %v7468_v52 = vld [vmem:[#allocation8 + $0x348] sm:$0xf]  ;;  %v7633_v55 = vor.u32 %v8917_v48, %v7630_v63  ;;  %v7566_v48 = vld [vmem:[#allocation8 + $0x418] sm:$0xf0]  ;;  %v7409_v63 = vor.u32 %v8861_v46, %v7406_v33  ;;  %v9003_v46 = vld [vmem:[#allocation8 + $0x734] sm:$0xf0] }
 0x35b   :  { %4747 = vmatpush.bf16.msrb.mxu0 %v7297_v39  ;;  %v7853_v39 = vor.u32 %v8975_v51, %v7852_v49  ;;  %v7469_v59 = vor.u32 %v8879_v53, %v7468_v52  ;;  %v8857_v49 = vld [vmem:[#allocation8 + $0x2ac] sm:$0xf]  ;;  %v7390_v51 = vld [vmem:[#allocation8 + $0x2b8] sm:$0xf0]  ;;  %v8028_v53 = vld [vmem:[#allocation8 + $0x7a8] sm:$0xf] }
 0x35c   :  { %4736 = vmatpush.bf16.msra.mxu3 %v7121_v9  ;;  %v7281_v9 = vor.u32 %v8829_v61, %v7278_v26  ;;  %4699 = vmatmul.bf16.vlgmr.msra.gmra.mxu0 %v9607_v41  ;;  %v7836_v61 = vld [vmem:[#allocation8 + $0x628] sm:$0xf]  ;;  %v8971_v26 = vld [vmem:[#allocation8 + $0x634] sm:$0xf0]  ;;  %v8937_v33 = vld [vmem:[#allocation8 + $0x52c] sm:$0xf] }
 0x35d   :  { %v7837_v5 = vor.u32 %v8971_v26, %v7836_v61  ;;  %v7777_v61 = vor.u32 %v8953_v32, %v7774_v21  ;;  %v8012_v26 = vld [vmem:[#allocation8 + $0x788] sm:$0xf]  ;;  %v7694_v32 = vld [vmem:[#allocation8 + $0x518] sm:$0xf0]  ;;  %v8897_v21 = vld [vmem:[#allocation8 + $0x3ec] sm:$0xf] }
 0x35e   :  { %4706 = vmatpush.bf16.msra.mxu1 %v7917_v1  ;;  %4664 = vmatpush.bf16.msrb.mxu2 %v7533_v56  ;;  %v8875_v1 = vld [vmem:[#allocation8 + $0x334] sm:$0xf0]  ;;  %v7198_v56 = vld [vmem:[#allocation8 + $0x138] sm:$0xf0] }
 0x35f   :  { %4748 = vmatpush.bf16.msrb.mxu0 %v7281_v9  ;;  %v7598_v9 = vld [vmem:[#allocation8 + $0x458] sm:$0xf0]  ;;  %v7453_v16 = vor.u32 %v8875_v1, %v7452_v22  ;;  %v8949_v22 = vld [vmem:[#allocation8 + $0x58c] sm:$0xf] }
 0x360   :  { %4737 = vmatpush.bf16.msra.mxu3 %v7105_v3  ;;  %v8983_v3 = vld [vmem:[#allocation8 + $0x694] sm:$0xf0]  ;;  %v7758_v1 = vld [vmem:[#allocation8 + $0x598] sm:$0xf0] }
 0x361   :  { %v7885_v27 = vor.u32 %v8983_v3, %v7884_v14  ;;  %v7601_v14 = vor.u32 %v8909_v8, %v7598_v9  ;;  %v8060_v3 = vld [vmem:[#allocation8 + $0x7e8] sm:$0xf]  ;;  %v7358_v8 = vld [vmem:[#allocation8 + $0x278] sm:$0xf0]  ;;  %v9011_v9 = vld [vmem:[#allocation8 + $0x774] sm:$0xf0] }
 0x362   :  { %4707 = vmatpush.bf16.msra.mxu1 %v7901_v17  ;;  %4665 = vmatpush.bf16.msrb.mxu2 %v7517_v19  ;;  %v7201_v17 = vor.u32 %v8809_v50, %v7198_v56  ;;  %v7422_v19 = vld [vmem:[#allocation8 + $0x2f8] sm:$0xf0]  ;;  %v8849_v56 = vld [vmem:[#allocation8 + $0x26c] sm:$0xf] }
 0x363   :  { %4749 = vmatpush.bf16.msrb.mxu0 %v7265_v20  ;;  %v9027_v20 = vld [vmem:[#allocation8 + $0x7f4] sm:$0xf0] }
 0x364   :  { %4738 = vmatpush.bf16.msra.mxu3 %v7089_v40  ;;  %v7649_v40 = vor.u32 %v8921_v29, %v7646_v30  ;;  %v7425_v29 = vor.u32 %v8865_v60, %v7422_v19  ;;  %v7185_v30 = vor.u32 %v8805_v34, %v7182_v15  ;;  %v7361_v34 = vor.u32 %v8849_v56, %v7358_v8  ;;  %v7980_v15 = vld [vmem:[#allocation8 + $0x748] sm:$0xf]  ;;  %v8845_v60 = vld [vmem:[#allocation8 + $0x24c] sm:$0xf]  ;;  %v7342_v19 = vld [vmem:[#allocation8 + $0x258] sm:$0xf0] }
 0x365   :  { %v7345_v44 = vor.u32 %v8845_v60, %v7342_v19  ;;  %v9035_v56 = vld [vmem:[#allocation10 + $0x34] sm:$0xf0]  ;;  %v8885_v19 = vld [vmem:[#allocation8 + $0x38c] sm:$0xf] }
 0x366   :  { %4708 = vmatpush.bf16.msra.mxu1 %v7885_v27  ;;  %4666 = vmatpush.bf16.msrb.mxu2 %v7501_v62  ;;  %v8061_v62 = vor.u32 %v9027_v20, %v8060_v3  ;;  %v8116_v3 = vld [vmem:[#allocation10 + $0x60] sm:$0xf]  ;;  %v9041_v20 = vld [vmem:[#allocation10 + $0x64] sm:$0xf0] }
 0x367   :  { %4750 = vmatpush.bf16.msrb.mxu0 %v7249_v37 }
 0x368   :  { %4739 = vmatpush.bf16.msra.mxu3 %v7073_v58  ;;  %v8913_v58 = vld [vmem:[#allocation8 + $0x46c] sm:$0xf] }
 0x369   :  { %v7617_v2 = vor.u32 %v8913_v58, %v7614_v57  ;;  %v8853_v57 = vld [vmem:[#allocation8 + $0x28c] sm:$0xf] }
 0x36a   :  { %4709 = vmatpush.bf16.msra.mxu1 %v7869_v28  ;;  %4667 = vmatpush.bf16.msrb.mxu2 %v7485_v18  ;;  %v8901_v28 = vld [vmem:[#allocation8 + $0x40c] sm:$0xf] }
 0x36b   :  { %v7569_v52 = vor.u32 %v8901_v28, %v7566_v48  ;;  %v8837_v28 = vld [vmem:[#allocation8 + $0x20c] sm:$0xf] }
 0x36c   :  { %4740 = vmatpush.bf16.msra.mxu3 %v7057_v10  ;;  %v7436_v10 = vld [vmem:[#allocation8 + $0x308] sm:$0xf] }
 0x36d   :  { %v7437_v27 = vor.u32 %v8871_v43, %v7436_v10  ;;  %v8124_v10 = vld [vmem:[#allocation10 + $0x70] sm:$0xf]  ;;  %v9043_v43 = vld [vmem:[#allocation10 + $0x74] sm:$0xf0] }
 0x36e   :  { %4710 = vmatpush.bf16.msra.mxu1 %v7853_v39  ;;  %4668 = vmatpush.bf16.msrb.mxu2 %v7469_v59  ;;  %v7393_v39 = vor.u32 %v8857_v49, %v7390_v51  ;;  %v7374_v59 = vld [vmem:[#allocation8 + $0x298] sm:$0xf0]  ;;  %v8933_v49 = vld [vmem:[#allocation8 + $0x50c] sm:$0xf] }
 0x36f   :  { %4741 = vmatmul.bf16.vlgmr.msra.gmra.mxu3 %v9580_v11  ;;  %v7233_v11 = vor.u32 %v8817_v45, %v7230_v47  ;;  %v8957_v45 = vld [vmem:[#allocation8 + $0x5cc] sm:$0xf]  ;;  %v7790_v47 = vld [vmem:[#allocation8 + $0x5d8] sm:$0xf0] }
 0x370   :  { %4789 = vmatpush.bf16.msrb.mxu3 %v7681_v6  ;;  %v7820_v6 = vld [vmem:[#allocation8 + $0x608] sm:$0xf]  ;;  %v8993_v51 = vld [vmem:[#allocation8 + $0x6ec] sm:$0xf] }
 0x371   :  { %4751 = vmatpush.bf16.msrb.mxu0 %v7233_v11  ;;  %v7821_v24 = vor.u32 %v8967_v13, %v7820_v6  ;;  %v7793_v11 = vor.u32 %v8957_v45, %v7790_v47  ;;  %v7742_v6 = vld [vmem:[#allocation8 + $0x578] sm:$0xf0]  ;;  %v8125_v13 = vor.u32 %v9043_v43, %v8124_v10  ;;  %v7948_v45 = vld [vmem:[#allocation8 + $0x708] sm:$0xf]  ;;  %v8999_v47 = vld [vmem:[#allocation8 + $0x714] sm:$0xf0] }
 0x372   :  { %4711 = vmatpush.bf16.msra.mxu1 %v7837_v5  ;;  %4669 = vmatpush.bf16.msrb.mxu2 %v7453_v16  ;;  %v7761_v5 = vor.u32 %v8949_v22, %v7758_v1  ;;  %v8945_v16 = vld [vmem:[#allocation8 + $0x56c] sm:$0xf] }
 0x373   :  { %v8893_v22 = vld [vmem:[#allocation8 + $0x3cc] sm:$0xf] }
 0x374   :  { %4790 = vmatpush.bf16.msrb.mxu3 %v7665_v25  ;;  %v7806_v25 = vld [vmem:[#allocation8 + $0x5f8] sm:$0xf0]  ;;  %v8989_v1 = vld [vmem:[#allocation8 + $0x6cc] sm:$0xf] }
 0x375   :  { %4752 = vmatpush.bf16.msrb.mxu0 %v7217_v0  ;;  %v7809_v37 = vor.u32 %v8961_v7, %v7806_v25  ;;  %v9015_v0 = vld [vmem:[#allocation8 + $0x794] sm:$0xf0]  ;;  %v8941_v7 = vld [vmem:[#allocation8 + $0x54c] sm:$0xf]  ;;  %v8117_v25 = vor.u32 %v9041_v20, %v8116_v3  ;;  %v7502_v3 = vld [vmem:[#allocation8 + $0x398] sm:$0xf0] }
 0x376   :  { %4712 = vmatpush.bf16.msra.mxu1 %v7821_v24  ;;  %4670 = vmatpush.bf16.msrb.mxu2 %v7437_v27  ;;  %v8013_v50 = vor.u32 %v9015_v0, %v8012_v26  ;;  %v7726_v24 = vld [vmem:[#allocation8 + $0x558] sm:$0xf0]  ;;  %v8841_v27 = vld [vmem:[#allocation8 + $0x22c] sm:$0xf]  ;;  %v7697_v26 = vor.u32 %v8933_v49, %v7694_v32  ;;  %v8076_v20 = vld [vmem:[#allocation10 + $0x10] sm:$0xf] }
 0x377   :  { %v8889_v10 = vld [vmem:[#allocation8 + $0x3ac] sm:$0xf]  ;;  %v8188_v49 = vld [vmem:[#allocation10 + $0xf0] sm:$0xf] }
 0x378   :  { %4791 = vmatpush.bf16.msrb.mxu3 %v7649_v40  ;;  %v9023_v40 = vld [vmem:[#allocation8 + $0x7d4] sm:$0xf0]  ;;  %v8985_v43 = vld [vmem:[#allocation8 + $0x6ac] sm:$0xf] }
 0x379   :  { %4753 = vmatpush.bf16.msrb.mxu0 %v7201_v17  ;;  %v8045_v18 = vor.u32 %v9023_v40, %v8044_v42  ;;  %4671 = vmatmul.bf16.vlgmr.msrb.gmra.mxu2 %v9597_v35  ;;  %v9039_v42 = vld [vmem:[#allocation10 + $0x54] sm:$0xf0] }
 0x37a   :  { %4761 = vmatpush.bf16.msrb.mxu1 %v7425_v29  ;;  %4719 = vmatpush.bf16.msra.mxu2 %v8061_v62  ;;  %v7326_v29 = vld [vmem:[#allocation8 + $0x238] sm:$0xf0]  ;;  %v7964_v62 = vld [vmem:[#allocation8 + $0x728] sm:$0xf] }
 0x37b   :  { %4713 = vmatmul.bf16.vlgmr.msra.gmra.mxu1 %v9618_v31  ;;  %v7329_v40 = vor.u32 %v8841_v27, %v7326_v29  ;;  %v7870_v27 = vld [vmem:[#allocation8 + $0x678] sm:$0xf0]  ;;  %v9645_v29 = vpop.f32.mrf.mxu0 }
 0x37c   :  { %4792 = vmatpush.bf16.msrb.mxu3 %v7633_v55  ;;  %v9019_v55 = vld [vmem:[#allocation8 + $0x7b4] sm:$0xf0] }
 0x37d   :  { %4754 = vmatpush.bf16.msrb.mxu0 %v7185_v30  ;;  %v8029_v58 = vor.u32 %v9019_v55, %v8028_v53  ;;  %v7729_v30 = vor.u32 %v8941_v7, %v7726_v24  ;;  %v8100_v53 = vld [vmem:[#allocation10 + $0x40] sm:$0xf]  ;;  %v9037_v55 = vld [vmem:[#allocation10 + $0x44] sm:$0xf0]  ;;  %v9643_v24 = vpop.f32.mrf.mxu3 }
 0x37e   :  { %4762 = vmatpush.bf16.msrb.mxu1 %v7409_v63  ;;  %4720 = vmatpush.bf16.msra.mxu2 %v8045_v18  ;;  %v7965_v63 = vor.u32 %v9003_v46, %v7964_v62  ;;  %v7310_v18 = vld [vmem:[#allocation8 + $0x218] sm:$0xf0]  ;;  %v8068_v62 = vld [vmem:[#allocation10] sm:$0xf]  ;;  %v9029_v46 = vld [vmem:[#allocation10 + $0x4] sm:$0xf0] }
 0x380   :  { %4793 = vmatpush.bf16.msrb.mxu3 %v7617_v2  ;;  %4755 = vmatmul.bf16.vlgmr.msrb.gmra.mxu0 %v9584_v4  ;;  %v7377_v2 = vor.u32 %v8853_v57, %v7374_v59  ;;  %v7996_v4 = vld [vmem:[#allocation8 + $0x768] sm:$0xf]  ;;  %v7313_v57 = vor.u32 %v8837_v28, %v7310_v18  ;;  %v7949_v59 = vor.u32 %v8999_v47, %v7948_v45  ;;  %v8877_v47 = vld [vmem:[#allocation8 + $0x34c] sm:$0xf]  ;;  %v7470_v18 = vld [vmem:[#allocation8 + $0x358] sm:$0xf0] }
 0x381   :  { %4803 = vmatpush.bf16.msra.mxu0 %v7809_v37  ;;  %v7997_v17 = vor.u32 %v9011_v9, %v7996_v4  ;;  %v7710_v37 = vld [vmem:[#allocation8 + $0x538] sm:$0xf0]  ;;  %v8092_v4 = vld [vmem:[#allocation10 + $0x30] sm:$0xf]  ;;  %v8973_v28 = vld [vmem:[#allocation8 + $0x64c] sm:$0xf] }
 0x382   :  { %4763 = vmatpush.bf16.msrb.mxu1 %v7393_v39  ;;  %4721 = vmatpush.bf16.msra.mxu2 %v8029_v58  ;;  %v7550_v39 = vld [vmem:[#allocation8 + $0x3f8] sm:$0xf0]  ;;  %v8101_v58 = vor.u32 %v9037_v55, %v8100_v53  ;;  %v8093_v8 = vor.u32 %v9035_v56, %v8092_v4  ;;  %v8118_v53 = vld [vmem:[#allocation10 + $0x68] sm:$0xf0] }
 0x383   :  { %v7553_v0 = vor.u32 %v8897_v21, %v7550_v39  ;;  %v7473_v21 = vor.u32 %v8877_v47, %v7470_v18  ;;  %v8873_v39 = vld [vmem:[#allocation8 + $0x32c] sm:$0xf]  ;;  %v8156_v47 = vld [vmem:[#allocation10 + $0xb0] sm:$0xf]  ;;  %v9032_v18 = vld [vmem:[#allocation10 + $0x24] sm:$0xf] }
 0x384   :  { %4794 = vmatpush.bf16.msrb.mxu3 %v7601_v14  ;;  %v9007_v14 = vld [vmem:[#allocation8 + $0x754] sm:$0xf0]  ;;  %v8869_v56 = vld [vmem:[#allocation8 + $0x30c] sm:$0xf] }
 0x385   :  { %4804 = vmatpush.bf16.msra.mxu0 %v7793_v11  ;;  %v7981_v54 = vor.u32 %v9007_v14, %v7980_v15  ;;  %v7713_v11 = vor.u32 %v8937_v33, %v7710_v37  ;;  %v7886_v14 = vld [vmem:[#allocation8 + $0x698] sm:$0xf0]  ;;  %v8069_v33 = vor.u32 %v9029_v46, %v8068_v62  ;;  %v9042_v37 = vld [vmem:[#allocation10 + $0x74] sm:$0xf] }
 0x386   :  { %4764 = vmatpush.bf16.msrb.mxu1 %v7377_v2  ;;  %4722 = vmatpush.bf16.msra.mxu2 %v8013_v50  ;;  %v7918_v2 = vld [vmem:[#allocation8 + $0x6d8] sm:$0xf0]  ;;  %v9034_v62 = vld [vmem:[#allocation10 + $0x34] sm:$0xf] }
 0x387   :  { %v7534_v50 = vld [vmem:[#allocation8 + $0x3d8] sm:$0xf0] }
 0x388   :  { %4795 = vmatpush.bf16.msrb.mxu3 %v7585_v38  ;;  %v8108_v38 = vld [vmem:[#allocation10 + $0x50] sm:$0xf]  ;;  %v7537_v9 = vor.u32 %v8893_v22, %v7534_v50  ;;  %v9651_v50 = vpop.f32.mrf.mxu0  ;;  %v8094_v46 = vld [vmem:[#allocation10 + $0x38] sm:$0xf0] }
 0x389   :  { %4805 = vmatpush.bf16.msra.mxu0 %v7777_v61  ;;  %v8109_v48 = vor.u32 %v9039_v42, %v8108_v38  ;;  %v8126_v38 = vld [vmem:[#allocation10 + $0x78] sm:$0xf0] }
 0x38a   :  { %4765 = vmatpush.bf16.msrb.mxu1 %v7361_v34  ;;  %4723 = vmatpush.bf16.msra.mxu2 %v7997_v17  ;;  %v9033_v34 = vld [vmem:[#allocation10 + $0x24] sm:$0xf0] }
 0x38c   :  { %4796 = vmatpush.bf16.msrb.mxu3 %v7569_v52  ;;  %v7934_v52 = vld [vmem:[#allocation8 + $0x6f8] sm:$0xf0] }
 0x38d   :  { %4806 = vmatpush.bf16.msra.mxu0 %v7761_v5  ;;  %v7937_v61 = vor.u32 %v8993_v51, %v7934_v52  ;;  %v7921_v5 = vor.u32 %v8989_v1, %v7918_v2  ;;  %v9059_v51 = vld [vmem:[#allocation10 + $0xf4] sm:$0xf0]  ;;  %v9040_v52 = vld [vmem:[#allocation10 + $0x64] sm:$0xf]  ;;  %v9038_v1 = vld [vmem:[#allocation10 + $0x54] sm:$0xf] }
 0x38e   :  { %4766 = vmatpush.bf16.msrb.mxu1 %v7345_v44  ;;  %4724 = vmatpush.bf16.msra.mxu2 %v7981_v54  ;;  %v7505_v44 = vor.u32 %v8885_v19, %v7502_v3  ;;  %v8881_v54 = vld [vmem:[#allocation8 + $0x36c] sm:$0xf]  ;;  %v8121_v32 = vor.u32 %v9040_v52, %v8118_v53  ;;  %v8110_v2 = vld [vmem:[#allocation10 + $0x58] sm:$0xf0]  ;;  %v9049_v53 = vld [vmem:[#allocation10 + $0xa4] sm:$0xf0] }
 0x38f   :  { %4797 = vmatmul.bf16.vlgmr.msrb.gmra.mxu3 %v9602_v36  ;;  %v7745_v36 = vor.u32 %v8945_v16, %v7742_v6  ;;  %v7902_v16 = vld [vmem:[#allocation8 + $0x6b8] sm:$0xf0]  ;;  %v9658_v3 = vld [vmem:[%s9740_s1 + $0xf] sm:$0xf] }
 0x390   :  { %5247 = vmatpush.bf16.msra.mxu3 %v8125_v13  ;;  %v7518_v6 = vld [vmem:[#allocation8 + $0x3b8] sm:$0xf0]  ;;  %v8084_v13 = vld [vmem:[#allocation10 + $0x20] sm:$0xf]  ;;  %v7905_v15 = vor.u32 %v8985_v43, %v7902_v16  ;;  %v9025_v16 = vld [vmem:[#allocation8 + $0x7ec] sm:$0xf] }
 0x391   :  { %4807 = vmatpush.bf16.msra.mxu0 %v7745_v36  ;;  %v8085_v17 = vor.u32 %v9033_v34, %v8084_v13  ;;  %v7521_v60 = vor.u32 %v8889_v10, %v7518_v6  ;;  %v8981_v36 = vld [vmem:[#allocation8 + $0x68c] sm:$0xf]  ;;  %v7822_v43 = vld [vmem:[#allocation8 + $0x618] sm:$0xf0]  ;;  %v8172_v6 = vld [vmem:[#allocation10 + $0xd0] sm:$0xf] }
 0x392   :  { %4767 = vmatpush.bf16.msrb.mxu1 %v7329_v40  ;;  %4725 = vmatpush.bf16.msra.mxu2 %v7965_v63  ;;  %v8129_v40 = vor.u32 %v9042_v37, %v8126_v38  ;;  %v9647_v63 = vpop.f32.mrf.mxu1  ;;  %v8965_v10 = vld [vmem:[#allocation8 + $0x60c] sm:$0xf]  ;;  %v9055_v13 = vld [vmem:[#allocation10 + $0xd4] sm:$0xf0]  ;;  %v8062_v34 = vld [vmem:[#allocation8 + $0x7f8] sm:$0xf0]  ;;  %v8097_v37 = vor.u32 %v9034_v62, %v8094_v46 }
 0x393   :  { %v3109_v38 = vperm.slane %v9658_v3, 0  ;;  %v7966_v46 = vld [vmem:[#allocation8 + $0x738] sm:$0xf0] }
 0x394   :  { %5248 = vmatpush.bf16.msra.mxu3 %v8117_v25  ;;  %v7889_v25 = vor.u32 %v8981_v36, %v7886_v14  ;;  %v7825_v36 = vor.u32 %v8965_v10, %v7822_v43  ;;  %v8070_v10 = vld [vmem:[#allocation10 + $0x8] sm:$0xf0]  ;;  %v8132_v43 = vld [vmem:[#allocation10 + $0x80] sm:$0xf] }
 0x395   :  { %4808 = vmatpush.bf16.msra.mxu0 %v7729_v30  ;;  %v7486_v30 = vld [vmem:[#allocation8 + $0x378] sm:$0xf0] }
 0x396   :  { %4768 = vmatpush.bf16.msrb.mxu1 %v7313_v57  ;;  %4726 = vmatpush.bf16.msra.mxu2 %v7949_v59  ;;  %v7489_v45 = vor.u32 %v8881_v54, %v7486_v30  ;;  %v7838_v57 = vld [vmem:[#allocation8 + $0x638] sm:$0xf0]  ;;  %v9649_v59 = vpop.f32.mrf.mxu3  ;;  %v8164_v54 = vld [vmem:[#allocation10 + $0xc0] sm:$0xf] }
 0x398   :  { %5249 = vmatpush.bf16.msra.mxu3 %v8109_v48  ;;  %v7854_v48 = vld [vmem:[#allocation8 + $0x658] sm:$0xf0] }
 0x399   :  { %4809 = vmatpush.bf16.msra.mxu0 %v7713_v11  ;;  %4769 = vmatmul.bf16.vlgmr.msrb.gmra.mxu1 %v9595_v23  ;;  %v9031_v23 = vld [vmem:[#allocation10 + $0x14] sm:$0xf0]  ;;  %v8189_v11 = vor.u32 %v9059_v51, %v8188_v49  ;;  %v7857_v55 = vor.u32 %v8973_v28, %v7854_v48  ;;  %v8086_v49 = vld [vmem:[#allocation10 + $0x28] sm:$0xf0]  ;;  %v8148_v51 = vld [vmem:[#allocation10 + $0xa0] sm:$0xf] }
 0x39a   :  { %4817 = vmatpush.bf16.msra.mxu1 %v7937_v61  ;;  %4775 = vmatpush.bf16.msrb.mxu2 %v7553_v0  ;;  %v8077_v7 = vor.u32 %v9031_v23, %v8076_v20  ;;  %v7454_v61 = vld [vmem:[#allocation8 + $0x338] sm:$0xf0]  ;;  %v9057_v0 = vld [vmem:[#allocation10 + $0xe4] sm:$0xf0]  ;;  %v9653_v19 = vpop.f32.mrf.mxu1  ;;  %v9660_v23 = vpop.f32.mrf.mxu2  ;;  %v9051_v28 = vld [vmem:[#allocation10 + $0xb4] sm:$0xf0]  ;;  %v8089_v52 = vor.u32 %v9032_v18, %v8086_v49 }
 0x39b   :  { %4727 = vmatmul.bf16.vlgmr.msra.gmra.mxu2 %v9625_v12  ;;  %v8157_v48 = vor.u32 %v9051_v28, %v8156_v47  ;;  %v7950_v18 = vld [vmem:[#allocation8 + $0x718] sm:$0xf0]  ;;  %v9054_v49 = vld [vmem:[#allocation10 + $0xd4] sm:$0xf] }
 0x39c   :  { %5250 = vmatpush.bf16.msra.mxu3 %v8101_v58  ;;  %v8969_v58 = vld [vmem:[#allocation8 + $0x62c] sm:$0xf] }
 0x39d   :  { %4810 = vmatpush.bf16.msra.mxu0 %v7697_v26  ;;  %v8180_v26 = vld [vmem:[#allocation10 + $0xe0] sm:$0xf]  ;;  %v7841_v4 = vor.u32 %v8969_v58, %v7838_v57  ;;  %v8014_v58 = vld [vmem:[#allocation8 + $0x798] sm:$0xf0] }
 0x39e   :  { %4818 = vmatpush.bf16.msra.mxu1 %v7921_v5  ;;  %4776 = vmatpush.bf16.msrb.mxu2 %v7537_v9  ;;  %v8181_v22 = vor.u32 %v9057_v0, %v8180_v26  ;;  %v7457_v5 = vor.u32 %v8873_v39, %v7454_v61  ;;  %v7438_v9 = vld [vmem:[#allocation8 + $0x318] sm:$0xf0]  ;;  %v4407_v39 = vadd.f32 %v9643_v24, %v3109_v38 }
 0x39f   :  { %v7441_v20 = vor.u32 %v8869_v56, %v7438_v9  ;;  %v8078_v57 = vld [vmem:[#allocation10 + $0x18] sm:$0xf0]  ;;  %v8140_v56 = vld [vmem:[#allocation10 + $0x90] sm:$0xf]  ;;  %v9028_v9 = vld [vmem:[#allocation10 + $0x4] sm:$0xf] }
 0x3a0   :  { %5251 = vmatpush.bf16.msra.mxu3 %v8093_v8  ;;  %4811 = vmatmul.bf16.vlgmr.msra.gmra.mxu0 %v9607_v41  ;;  %v8977_v41 = vld [vmem:[#allocation8 + $0x66c] sm:$0xf]  ;;  %v8113_v8 = vor.u32 %v9038_v1, %v8110_v2 }
 0x3a1   :  { %v7873_v42 = vor.u32 %v8977_v41, %v7870_v27  ;;  %5261 = vmatpush.bf16.msrb.mxu0 %v8189_v11  ;;  %v9053_v41 = vld [vmem:[#allocation10 + $0xc4] sm:$0xf0]  ;;  %v8046_v27 = vld [vmem:[#allocation8 + $0x7d8] sm:$0xf0]  ;;  %v9009_v1 = vld [vmem:[#allocation8 + $0x76c] sm:$0xf] }
 0x3a2   :  { %4819 = vmatpush.bf16.msra.mxu1 %v7905_v15  ;;  %4777 = vmatpush.bf16.msrb.mxu2 %v7521_v60  ;;  %v9036_v15 = vld [vmem:[#allocation10 + $0x44] sm:$0xf]  ;;  %v8102_v60 = vld [vmem:[#allocation10 + $0x48] sm:$0xf0]  ;;  %v8165_v30 = vor.u32 %v9053_v41, %v8164_v54  ;;  %v9668_v11 = vpop.f32.mrf.mxu1  ;;  %v4450_v61 = vpop.f32.mrf.mxu2 }
 0x3a3   :  { %v8105_v14 = vor.u32 %v9036_v15, %v8102_v60  ;;  %v9005_v60 = vld [vmem:[#allocation8 + $0x74c] sm:$0xf] }
 0x3a4   :  { %5252 = vmatpush.bf16.msra.mxu3 %v8085_v17  ;;  %v8173_v17 = vor.u32 %v9055_v13, %v8172_v6  ;;  %v9045_v6 = vld [vmem:[#allocation10 + $0x84] sm:$0xf0] }
 0x3a5   :  { %5262 = vmatpush.bf16.msrb.mxu0 %v8181_v22  ;;  %v4409_v22 = vadd.f32 %v9649_v59, %v3109_v38 }
 0x3a6   :  { %4820 = vmatpush.bf16.msra.mxu1 %v7889_v25  ;;  %4778 = vmatpush.bf16.msrb.mxu2 %v7505_v44  ;;  %v8065_v25 = vor.u32 %v9025_v16, %v8062_v34  ;;  %v9021_v44 = vld [vmem:[#allocation8 + $0x7cc] sm:$0xf]  ;;  %v8073_v16 = vor.u32 %v9028_v9, %v8070_v10  ;;  %v8133_v34 = vor.u32 %v9045_v6, %v8132_v43 }
 0x3a7   :  { %v4423_v59 = vadd.f32 %v9651_v50, %v4409_v22  ;;  %v9050_v22 = vld [vmem:[#allocation10 + $0xb4] sm:$0xf] }
 0x3a8   :  { %5253 = vmatpush.bf16.msra.mxu3 %v8077_v7  ;;  %v9662_v7 = vpop.f32.mrf.mxu3 }
 0x3a9   :  { %5263 = vmatpush.bf16.msrb.mxu0 %v8173_v17 }
 0x3aa   :  { %4821 = vmatpush.bf16.msra.mxu1 %v7873_v42  ;;  %4779 = vmatpush.bf16.msrb.mxu2 %v7489_v45  ;;  %v9017_v42 = vld [vmem:[#allocation8 + $0x7ac] sm:$0xf]  ;;  %v8030_v45 = vld [vmem:[#allocation8 + $0x7b8] sm:$0xf0]  ;;  %v4492_v17 = vpop.f32.mrf.mxu1 }
 0x3ac   :  { %5254 = vmatpush.bf16.msra.mxu3 %v8069_v33  ;;  %v9664_v33 = vpop.f32.mrf.mxu0 }
 0x3ad   :  { %5264 = vmatpush.bf16.msrb.mxu0 %v8165_v30  ;;  %v9001_v30 = vld [vmem:[#allocation8 + $0x72c] sm:$0xf] }
 0x3ae   :  { %4822 = vmatpush.bf16.msra.mxu1 %v7857_v55  ;;  %4780 = vmatpush.bf16.msrb.mxu2 %v7473_v21  ;;  %v8149_v55 = vor.u32 %v9049_v53, %v8148_v51  ;;  %v9013_v21 = vld [vmem:[#allocation8 + $0x78c] sm:$0xf]  ;;  %v7969_v47 = vor.u32 %v9001_v30, %v7966_v46  ;;  %v8174_v51 = vld [vmem:[#allocation10 + $0xd8] sm:$0xf0]  ;;  %v8244_v30 = vld [vmem:[#allocation10 + $0x160] sm:$0xf] }
 0x3af   :  { %v8017_v2 = vor.u32 %v9013_v21, %v8014_v58  ;;  %v9052_v58 = vld [vmem:[#allocation10 + $0xc4] sm:$0xf] }
 0x3b0   :  { %5303 = vmatpush.bf16.msrb.mxu3 %v8129_v40  ;;  %v8049_v40 = vor.u32 %v9021_v44, %v8046_v27  ;;  %v4464_v26 = vpop.f32.mrf.mxu3 }
 0x3b1   :  { %5265 = vmatpush.bf16.msrb.mxu0 %v8157_v48 }
 0x3b2   :  { %4823 = vmatpush.bf16.msra.mxu1 %v7841_v4  ;;  %4781 = vmatpush.bf16.msrb.mxu2 %v7457_v5  ;;  %v7998_v4 = vld [vmem:[#allocation8 + $0x778] sm:$0xf0]  ;;  %v4421_v5 = vadd.f32 %v9645_v29, %v4407_v39 }
 0x3b3   :  { %v8001_v15 = vor.u32 %v9009_v1, %v7998_v4  ;;  %v8158_v1 = vld [vmem:[#allocation10 + $0xb8] sm:$0xf0] }
 0x3b4   :  { %5304 = vmatpush.bf16.msrb.mxu3 %v8121_v32  ;;  %v8033_v32 = vor.u32 %v9017_v42, %v8030_v45  ;;  %v4435_v13 = vadd.f32 %v9647_v63, %v4421_v5  ;;  %v8161_v4 = vor.u32 %v9050_v22, %v8158_v1  ;;  %v8196_v22 = vld [vmem:[#allocation10 + $0x100] sm:$0xf]  ;;  %v9061_v1 = vld [vmem:[#allocation10 + $0x104] sm:$0xf0] }
 0x3b5   :  { %5266 = vmatpush.bf16.msrb.mxu0 %v8149_v55 }
 0x3b6   :  { %4824 = vmatpush.bf16.msra.mxu1 %v7825_v36  ;;  %4782 = vmatpush.bf16.msrb.mxu2 %v7441_v20  ;;  %v4437_v36 = vadd.f32 %v9653_v19, %v4423_v59  ;;  %v4449_v29 = vadd.f32 %v9660_v23, %v4435_v13  ;;  %v9058_v20 = vld [vmem:[#allocation10 + $0xf4] sm:$0xf]  ;;  %v9056_v23 = vld [vmem:[#allocation10 + $0xe4] sm:$0xf]  ;;  %v8142_v59 = vld [vmem:[#allocation10 + $0x98] sm:$0xf0] }
 0x3b7   :  { %v9046_v13 = vld [vmem:[#allocation10 + $0x94] sm:$0xf] }
 0x3b8   :  { %5305 = vmatpush.bf16.msrb.mxu3 %v8113_v8  ;;  %v9047_v8 = vld [vmem:[#allocation10 + $0x94] sm:$0xf0]  ;;  %v4451_v41 = vadd.f32 %v4450_v61, %v4437_v36  ;;  %v4463_v63 = vadd.f32 %v9662_v7, %v4449_v29  ;;  %v4518_v50 = vpop.f32.mrf.mxu3  ;;  %v8997_v7 = vld [vmem:[#allocation8 + $0x70c] sm:$0xf] }
 0x3b9   :  { %4825 = vmatmul.bf16.vlgmr.msra.gmra.mxu1 %v9618_v31  ;;  %4783 = vmatmul.bf16.vlgmr.msrb.gmra.mxu2 %v9597_v35  ;;  %v9030_v31 = vld [vmem:[#allocation10 + $0x14] sm:$0xf]  ;;  %v4478_v35 = vpop.f32.mrf.mxu0  ;;  %v8141_v24 = vor.u32 %v9047_v8, %v8140_v56  ;;  %v8150_v56 = vld [vmem:[#allocation10 + $0xa8] sm:$0xf0] }
 0x3ba   :  { %4831 = vmatpush.bf16.msra.mxu2 %v8065_v25  ;;  %v8081_v0 = vor.u32 %v9030_v31, %v8078_v57  ;;  %v8190_v25 = vld [vmem:[#allocation10 + $0xf8] sm:$0xf0]  ;;  %v4465_v62 = vadd.f32 %v4464_v26, %v4451_v41  ;;  %v4477_v19 = vadd.f32 %v9664_v33, %v4463_v63  ;;  %v8177_v33 = vor.u32 %v9054_v49, %v8174_v51  ;;  %v9069_v49 = vld [vmem:[#allocation10 + $0x144] sm:$0xf0] }
 0x3bb   :  { %5267 = vmatpush.bf16.msrb.mxu0 %v8141_v24  ;;  %v4504_v44 = vpop.f32.mrf.mxu2  ;;  %v8193_v54 = vor.u32 %v9058_v20, %v8190_v25  ;;  %v3110_v26 = vperm.slane %v9658_v3, 1  ;;  %v9044_v20 = vld [vmem:[#allocation10 + $0x84] sm:$0xf] }
 0x3bc   :  { %5306 = vmatpush.bf16.msrb.mxu3 %v8105_v14  ;;  %v7982_v14 = vld [vmem:[#allocation8 + $0x758] sm:$0xf0]  ;;  %v4491_v45 = vadd.f32 %v9668_v11, %v4477_v19  ;;  %v8166_v11 = vld [vmem:[#allocation10 + $0xc8] sm:$0xf0] }
 0x3bd   :  { %v7985_v27 = vor.u32 %v9005_v60, %v7982_v14  ;;  %v8169_v57 = vor.u32 %v9052_v58, %v8166_v11  ;;  %v4519_v24 = vadd.f32 %v4518_v50, %v3110_v26  ;;  %v9075_v14 = vld [vmem:[#allocation10 + $0x174] sm:$0xf0]  ;;  %v8212_v58 = vld [vmem:[#allocation10 + $0x120] sm:$0xf]  ;;  %v9065_v11 = vld [vmem:[#allocation10 + $0x124] sm:$0xf0] }
 0x3be   :  { %4832 = vmatpush.bf16.msra.mxu2 %v8049_v40  ;;  %v4479_v40 = vadd.f32 %v4478_v35, %v4465_v62  ;;  %v4505_v48 = vadd.f32 %v4504_v44, %v4491_v45  ;;  %v9048_v35 = vld [vmem:[#allocation10 + $0xa4] sm:$0xf]  ;;  %v9073_v62 = vld [vmem:[#allocation10 + $0x164] sm:$0xf0] }
 0x3bf   :  { %5268 = vmatpush.bf16.msrb.mxu0 %v8133_v34  ;;  %v8153_v5 = vor.u32 %v9048_v35, %v8150_v56  ;;  %v8245_v46 = vor.u32 %v9073_v62, %v8244_v30  ;;  %v8197_v35 = vor.u32 %v9061_v1, %v8196_v22  ;;  %v9062_v62 = vld [vmem:[#allocation10 + $0x114] sm:$0xf] }
 0x3c0   :  { %5307 = vmatpush.bf16.msrb.mxu3 %v8097_v37  ;;  %v8182_v37 = vld [vmem:[#allocation10 + $0xe8] sm:$0xf0]  ;;  %v4493_v28 = vadd.f32 %v4492_v17, %v4479_v40  ;;  %v4845_v21 = vmax.f32 %v4505_v48, 0.0  ;;  %v4520_v31 = vpop.f32.mrf.mxu3  ;;  %v9071_v40 = vld [vmem:[#allocation10 + $0x154] sm:$0xf0] }
 0x3c1   :  { %v4532_v38 = vpop.f32.mrf.mxu0  ;;  %v8185_v42 = vor.u32 %v9056_v23, %v8182_v37  ;;  %v4521_v10 = vadd.f32 %v4520_v31, %v3110_v26  ;;  %v9063_v26 = vld [vmem:[#allocation10 + $0x114] sm:$0xf0] }
 0x3c2   :  { %4833 = vmatpush.bf16.msra.mxu2 %v8033_v32  ;;  %v7953_v32 = vor.u32 %v8997_v7, %v7950_v18  ;;  %v4533_v43 = vadd.f32 %v4532_v38, %v4519_v24  ;;  %v8228_v18 = vld [vmem:[#allocation10 + $0x140] sm:$0xf]  ;;  %v8246_v24 = vld [vmem:[#allocation10 + $0x168] sm:$0xf0] }
 0x3c3   :  { %5317 = vmatpush.bf16.msra.mxu0 %v8193_v54  ;;  %v4506_v53 = vpop.f32.mrf.mxu2  ;;  %v8134_v54 = vld [vmem:[#allocation10 + $0x88] sm:$0xf0] }
 0x3c4   :  { %5308 = vmatpush.bf16.msrb.mxu3 %v8089_v52  ;;  %v4546_v52 = vpop.f32.mrf.mxu1  ;;  %v4507_v55 = vadd.f32 %v4506_v53, %v4493_v28  ;;  %v8137_v63 = vor.u32 %v9044_v20, %v8134_v54  ;;  %v9064_v20 = vld [vmem:[#allocation10 + $0x124] sm:$0xf] }
 0x3c5   :  { %v4547_v6 = vadd.f32 %v4546_v52, %v4533_v43  ;;  %v8229_v52 = vor.u32 %v9069_v49, %v8228_v18  ;;  %v9070_v43 = vld [vmem:[#allocation10 + $0x154] sm:$0xf]  ;;  %v8316_v18 = vld [vmem:[#allocation10 + $0x1f0] sm:$0xf]  ;;  %v9091_v49 = vld [vmem:[#allocation10 + $0x1f4] sm:$0xf0] }
 0x3c6   :  { %4834 = vmatpush.bf16.msra.mxu2 %v8017_v2  ;;  %v4849_v39 = vmax.f32 %v4507_v55, 0.0 }
 0x3c7   :  { %5318 = vmatpush.bf16.msra.mxu0 %v8185_v42  ;;  %v8236_v42 = vld [vmem:[#allocation10 + $0x150] sm:$0xf] }
 0x3c8   :  { %5309 = vmatpush.bf16.msrb.mxu3 %v8081_v0  ;;  %v4853_v61 = vpack.c.bf16 %v4849_v39, %v4845_v21  ;;  %v4574_v9 = vpop.f32.mrf.mxu3  ;;  %v8237_v45 = vor.u32 %v9071_v40, %v8236_v42  ;;  %v9067_v21 = vld [vmem:[#allocation10 + $0x134] sm:$0xf0]  ;;  %v8198_v42 = vld [vmem:[#allocation10 + $0x108] sm:$0xf0] }
 0x3c9   :  { %v4534_v0 = vpop.f32.mrf.mxu0 }
 0x3ca   :  { %4835 = vmatpush.bf16.msra.mxu2 %v8001_v15  ;;  %5255 = vmatmul.bf16.vlgmr.msra.gmra.mxu3 %v4853_v61  ;;  %v8145_v15 = vor.u32 %v9046_v13, %v8142_v59  ;;  %v9068_v59 = vld [vmem:[#allocation10 + $0x144] sm:$0xf] }
 0x3cb   :  { %5319 = vmatpush.bf16.msra.mxu0 %v8177_v33  ;;  %v4560_v2 = vpop.f32.mrf.mxu2 }
 0x3cc   :  { %5310 = vmatpush.bf16.msrb.mxu3 %v8073_v16  ;;  %v4548_v8 = vpop.f32.mrf.mxu1  ;;  %v4535_v16 = vadd.f32 %v4534_v0, %v4521_v10  ;;  %v4561_v36 = vadd.f32 %v4560_v2, %v4547_v6  ;;  %v9074_v2 = vld [vmem:[#allocation10 + $0x174] sm:$0xf] }
 0x3ce   :  { %4836 = vmatpush.bf16.msra.mxu2 %v7985_v27  ;;  %v4549_v60 = vadd.f32 %v4548_v8, %v4535_v16  ;;  %v4575_v41 = vadd.f32 %v4574_v9, %v4561_v36  ;;  %v8238_v16 = vld [vmem:[#allocation10 + $0x158] sm:$0xf0]  ;;  %v9066_v36 = vld [vmem:[#allocation10 + $0x134] sm:$0xf] }
 0x3cf   :  { %5320 = vmatpush.bf16.msra.mxu0 %v8169_v57  ;;  %v8213_v57 = vor.u32 %v9065_v11, %v8212_v58  ;;  %v8241_v6 = vor.u32 %v9070_v43, %v8238_v16 }
 0x3d0   :  { %v4576_v50 = vpop.f32.mrf.mxu3 }
 0x3d1   :  { %v4588_v34 = vpop.f32.mrf.mxu0 }
 0x3d2   :  { %4837 = vmatpush.bf16.msra.mxu2 %v7969_v47  ;;  %v4589_v23 = vadd.f32 %v4588_v34, %v4575_v41  ;;  %v8230_v34 = vld [vmem:[#allocation10 + $0x148] sm:$0xf0] }
 0x3d3   :  { %5321 = vmatpush.bf16.msra.mxu0 %v8161_v4  ;;  %v4562_v17 = vpop.f32.mrf.mxu2  ;;  %v8254_v4 = vld [vmem:[#allocation10 + $0x178] sm:$0xf0] }
 0x3d4   :  { %v4563_v29 = vadd.f32 %v4562_v17, %v4549_v60  ;;  %v4602_v25 = vpop.f32.mrf.mxu1  ;;  %v8257_v56 = vor.u32 %v9074_v2, %v8254_v4  ;;  %v8233_v17 = vor.u32 %v9068_v59, %v8230_v34  ;;  %v8292_v4 = vld [vmem:[#allocation10 + $0x1c0] sm:$0xf]  ;;  %v9081_v59 = vld [vmem:[#allocation10 + $0x1a4] sm:$0xf0] }
 0x3d5   :  { %v4603_v47 = vadd.f32 %v4602_v25, %v4589_v23  ;;  %v8214_v25 = vld [vmem:[#allocation10 + $0x128] sm:$0xf0] }
 0x3d6   :  { %4838 = vmatpush.bf16.msra.mxu2 %v7953_v32  ;;  %v4577_v27 = vadd.f32 %v4576_v50, %v4563_v29  ;;  %v8220_v32 = vld [vmem:[#allocation10 + $0x130] sm:$0xf]  ;;  %v8222_v29 = vld [vmem:[#allocation10 + $0x138] sm:$0xf0]  ;;  %v8217_v54 = vor.u32 %v9064_v20, %v8214_v25  ;;  %v9090_v20 = vld [vmem:[#allocation10 + $0x1f4] sm:$0xf] }
 0x3d7   :  { %5322 = vmatpush.bf16.msra.mxu0 %v8153_v5  ;;  %v8221_v39 = vor.u32 %v9067_v21, %v8220_v32  ;;  %v9072_v5 = vld [vmem:[#allocation10 + $0x164] sm:$0xf]  ;;  %v8308_v32 = vld [vmem:[#allocation10 + $0x1e0] sm:$0xf]  ;;  %v9089_v21 = vld [vmem:[#allocation10 + $0x1e4] sm:$0xf0] }
 0x3d8   :  { %v4630_v8 = vpop.f32.mrf.mxu3  ;;  %v8249_v9 = vor.u32 %v9072_v5, %v8246_v24  ;;  %v8309_v58 = vor.u32 %v9089_v21, %v8308_v32  ;;  %v8284_v24 = vld [vmem:[#allocation10 + $0x1b0] sm:$0xf]  ;;  %v8318_v25 = vld [vmem:[#allocation10 + $0x1f8] sm:$0xf0]  ;;  %v9078_v21 = vld [vmem:[#allocation10 + $0x194] sm:$0xf] }
 0x3d9   :  { %4839 = vmatmul.bf16.vlgmr.msra.gmra.mxu2 %v9625_v12  ;;  %v8252_v12 = vld [vmem:[#allocation10 + $0x170] sm:$0xf]  ;;  %v4590_v37 = vpop.f32.mrf.mxu0 }
 0x3da   :  { %v8253_v44 = vor.u32 %v9075_v14, %v8252_v12  ;;  %5311 = vmatmul.bf16.vlgmr.msrb.gmra.mxu3 %v4853_v61  ;;  %v4591_v38 = vadd.f32 %v4590_v37, %v4577_v27  ;;  %v8204_v61 = vld [vmem:[#allocation10 + $0x110] sm:$0xf]  ;;  %v3111_v12 = vperm.slane %v9658_v3, 2  ;;  %v8225_v14 = vor.u32 %v9066_v36, %v8222_v29  ;;  %v8260_v29 = vld [vmem:[#allocation10 + $0x180] sm:$0xf] }
 0x3db   :  { %5323 = vmatpush.bf16.msra.mxu0 %v8145_v15  ;;  %v8205_v0 = vor.u32 %v9063_v26, %v8204_v61  ;;  %v8300_v61 = vld [vmem:[#allocation10 + $0x1d0] sm:$0xf]  ;;  %v9087_v26 = vld [vmem:[#allocation10 + $0x1d4] sm:$0xf0] }
 0x3dc   :  { %5275 = vmatpush.bf16.msrb.mxu1 %v8253_v44  ;;  %v4616_v19 = vpop.f32.mrf.mxu2  ;;  %v4604_v7 = vpop.f32.mrf.mxu1  ;;  %v4631_v41 = vadd.f32 %v4630_v8, %v3111_v12 }
 0x3dd   :  { %v4617_v28 = vadd.f32 %v4616_v19, %v4603_v47  ;;  %v4605_v48 = vadd.f32 %v4604_v7, %v4591_v38  ;;  %v8206_v19 = vld [vmem:[#allocation10 + $0x118] sm:$0xf0] }
 0x3de   :  { %v8209_v38 = vor.u32 %v9062_v62, %v8206_v19  ;;  %v8302_v62 = vld [vmem:[#allocation10 + $0x1d8] sm:$0xf0] }
 0x3df   :  { %5324 = vmatpush.bf16.msra.mxu0 %v8137_v63  ;;  %v4846_v33 = vmax.f32 %v4617_v28, 0.0 }
 0x3e0   :  { %5276 = vmatpush.bf16.msrb.mxu1 %v8245_v46  ;;  %v4632_v15 = vpop.f32.mrf.mxu3  ;;  %v9060_v46 = vld [vmem:[#allocation10 + $0x104] sm:$0xf] }
 0x3e1   :  { %v4644_v10 = vpop.f32.mrf.mxu0  ;;  %v4633_v27 = vadd.f32 %v4632_v15, %v3111_v12  ;;  %v8201_v28 = vor.u32 %v9060_v46, %v8198_v42  ;;  %v8268_v15 = vld [vmem:[#allocation10 + $0x190] sm:$0xf]  ;;  %v9077_v12 = vld [vmem:[#allocation10 + $0x184] sm:$0xf0] }
 0x3e2   :  { %v4645_v30 = vadd.f32 %v4644_v10, %v4631_v41  ;;  %v9088_v41 = vld [vmem:[#allocation10 + $0x1e4] sm:$0xf] }
 0x3e4   :  { %5277 = vmatpush.bf16.msrb.mxu1 %v8237_v45  ;;  %v4618_v51 = vpop.f32.mrf.mxu2  ;;  %v4658_v13 = vpop.f32.mrf.mxu1 }
 0x3e5   :  { %v4619_v53 = vadd.f32 %v4618_v51, %v4605_v48  ;;  %v4659_v37 = vadd.f32 %v4658_v13, %v4645_v30  ;;  %v8276_v13 = vld [vmem:[#allocation10 + $0x1a0] sm:$0xf]  ;;  %v9086_v30 = vld [vmem:[#allocation10 + $0x1d4] sm:$0xf] }
 0x3e6   :  { %v8305_v19 = vor.u32 %v9086_v30, %v8302_v62  ;;  %v9103_v30 = vld [vmem:[#allocation11 + $0x58] sm:$0xff] }
 0x3e7   :  { %v4850_v55 = vmax.f32 %v4619_v53, 0.0 }
 0x3e8   :  { %5278 = vmatpush.bf16.msrb.mxu1 %v8229_v52  ;;  %v4686_v63 = vpop.f32.mrf.mxu3  ;;  %v8317_v52 = vor.u32 %v9091_v49, %v8316_v18  ;;  %v8278_v18 = vld [vmem:[#allocation10 + $0x1a8] sm:$0xf0] }
 0x3e9   :  { %v4854_v31 = vpack.c.bf16 %v4850_v55, %v4846_v33  ;;  %v4646_v44 = vpop.f32.mrf.mxu0 }
 0x3ea   :  { %v4647_v23 = vadd.f32 %v4646_v44, %v4633_v27  ;;  %5289 = vmatpush.bf16.msrb.mxu2 %v8317_v52  ;;  %v8321_v44 = vor.u32 %v9090_v20, %v8318_v25  ;;  %v9095_v20 = vld [vmem:[#allocation11 + $0x18] sm:$0xff] }
 0x3eb   :  { %5269 = vmatmul.bf16.vlgmr.msrb.gmra.mxu0 %v4854_v31  ;;  %v9107_v25 = vld [vmem:[#allocation11 + $0x78] sm:$0xff] }
 0x3ec   :  { %5279 = vmatpush.bf16.msrb.mxu1 %v8221_v39  ;;  %v4660_v50 = vpop.f32.mrf.mxu1  ;;  %5511 = vmatpush.bf16.msrb.mxu0 %v9107_v25 }
 0x3ed   :  { %v4661_v47 = vadd.f32 %v4660_v50, %v4647_v23  ;;  %v9084_v23 = vld [vmem:[#allocation10 + $0x1c4] sm:$0xf] }
 0x3ee   :  { %5290 = vmatpush.bf16.msrb.mxu2 %v8309_v58 }
 0x3f0   :  { %5280 = vmatpush.bf16.msrb.mxu1 %v8213_v57  ;;  %v4688_v33 = vpop.f32.mrf.mxu3 }
 0x3f1   :  { %v4700_v40 = vpop.f32.mrf.mxu0 }
 0x3f4   :  { %5281 = vmatpush.bf16.msrb.mxu1 %v8205_v0  ;;  %v8301_v0 = vor.u32 %v9087_v26, %v8300_v61 }
 0x3f6   :  { %5291 = vmatpush.bf16.msrb.mxu2 %v8301_v0  ;;  %v9076_v0 = vld [vmem:[#allocation10 + $0x184] sm:$0xf] }
 0x3f8   :  { %5282 = vmatpush.bf16.msrb.mxu1 %v8197_v35  ;;  %v4714_v51 = vpop.f32.mrf.mxu1 }
 0x3fb   :  { %5325 = vmatmul.bf16.vlgmr.msra.gmra.mxu0 %v4854_v31  ;;  %v4702_v31 = vpop.f32.mrf.mxu0 }
 0x3fc   :  { %5331 = vmatpush.bf16.msra.mxu1 %v8257_v56  ;;  %v4672_v60 = vpop.f32.mrf.mxu2  ;;  %v9085_v56 = vld [vmem:[#allocation10 + $0x1c4] sm:$0xf0] }
 0x3fd   :  { %v4673_v7 = vadd.f32 %v4672_v60, %v4659_v37  ;;  %v8293_v5 = vor.u32 %v9085_v56, %v8292_v4  ;;  %v9079_v60 = vld [vmem:[#allocation10 + $0x194] sm:$0xf0]  ;;  %v8294_v37 = vld [vmem:[#allocation10 + $0x1c8] sm:$0xf0] }
 0x3fe   :  { %v8269_v36 = vor.u32 %v9079_v60, %v8268_v15 }
 0x3ff   :  { %v4687_v53 = vadd.f32 %v4686_v63, %v4673_v7  ;;  %5292 = vmatpush.bf16.msrb.mxu2 %v8293_v5  ;;  %v8310_v63 = vld [vmem:[#allocation10 + $0x1e8] sm:$0xf0]  ;;  %v3112_v7 = vperm.slane %v9658_v3, 3 }
 0x400   :  { %5332 = vmatpush.bf16.msra.mxu1 %v8249_v9  ;;  %v4716_v1 = vpop.f32.mrf.mxu1  ;;  %v9083_v9 = vld [vmem:[#allocation10 + $0x1b4] sm:$0xf0]  ;;  %v8313_v50 = vor.u32 %v9088_v41, %v8310_v63  ;;  %v9093_v41 = vld [vmem:[#allocation11 + $0x8] sm:$0xff] }
 0x401   :  { %v4701_v11 = vadd.f32 %v4700_v40, %v4687_v53  ;;  %v8285_v43 = vor.u32 %v9083_v9, %v8284_v24  ;;  %v9105_v63 = vld [vmem:[#allocation11 + $0x68] sm:$0xff] }
 0x403   :  { %v4715_v22 = vadd.f32 %v4714_v51, %v4701_v11  ;;  %5293 = vmatpush.bf16.msrb.mxu2 %v8285_v43  ;;  %v4756_v27 = vpop.f32.mrf.mxu0 }
 0x404   :  { %5333 = vmatpush.bf16.msra.mxu1 %v8241_v6  ;;  %v4674_v45 = vpop.f32.mrf.mxu2 }
 0x405   :  { %v4675_v48 = vadd.f32 %v4674_v45, %v4661_v47  ;;  %v9082_v45 = vld [vmem:[#allocation10 + $0x1b4] sm:$0xf]  ;;  %v8286_v47 = vld [vmem:[#allocation10 + $0x1b8] sm:$0xf0] }
 0x407   :  { %v4689_v55 = vadd.f32 %v4688_v33, %v4675_v48  ;;  %v9080_v48 = vld [vmem:[#allocation10 + $0x1a4] sm:$0xf] }
 0x408   :  { %5334 = vmatpush.bf16.msra.mxu1 %v8233_v17  ;;  %v8277_v17 = vor.u32 %v9081_v59, %v8276_v13  ;;  %v8281_v51 = vor.u32 %v9080_v48, %v8278_v18 }
 0x409   :  { %v4703_v57 = vadd.f32 %v4702_v31, %v4689_v55 }
 0x40a   :  { %5294 = vmatpush.bf16.msrb.mxu2 %v8277_v17 }
 0x40b   :  { %v4717_v2 = vadd.f32 %v4716_v1, %v4703_v57  ;;  %v4758_v49 = vpop.f32.mrf.mxu0 }
 0x40c   :  { %5335 = vmatpush.bf16.msra.mxu1 %v8225_v14  ;;  %v8261_v14 = vor.u32 %v9077_v12, %v8260_v29  ;;  %v9098_v29 = vld [vmem:[#allocation11 + $0x30] sm:$0xff]  ;;  %v9097_v12 = vld [vmem:[#allocation11 + $0x28] sm:$0xff] }
 0x40e   :  { %5295 = vmatpush.bf16.msrb.mxu2 %v8269_v36  ;;  %v9099_v36 = vld [vmem:[#allocation11 + $0x38] sm:$0xff] }
 0x40f   :  { %5497 = vmatpush.bf16.msra.mxu3 %v9099_v36  ;;  %v9108_v36 = vld [vmem:[%s9748_s9] sm:$0xff] }
 0x410   :  { %5336 = vmatpush.bf16.msra.mxu1 %v8217_v54  ;;  %v4742_v54 = vpop.f32.mrf.mxu3 }
 0x411   :  { %v4743_v52 = vadd.f32 %v4742_v54, %v3112_v7  ;;  %v9106_v54 = vld [vmem:[#allocation11 + $0x70] sm:$0xff] }
 0x412   :  { %5296 = vmatpush.bf16.msrb.mxu2 %v8261_v14  ;;  %v9096_v14 = vld [vmem:[#allocation11 + $0x20] sm:$0xff]  ;;  %5512 = vmatpush.bf16.msrb.mxu0 %v9106_v54 }
 0x413   :  { %v4757_v32 = vadd.f32 %v4756_v27, %v4743_v52  ;;  %5498 = vmatpush.bf16.msra.mxu3 %v9098_v29  ;;  %v9104_v27 = vld [vmem:[#allocation11 + $0x60] sm:$0xff]  ;;  %v9119_v29 = vld [vmem:[%s9749_s10 + $0x18] sm:$0xff] }
 0x414   :  { %5337 = vmatpush.bf16.msra.mxu1 %v8209_v38  ;;  %v8297_v38 = vor.u32 %v9084_v23, %v8294_v37  ;;  %v9101_v37 = vld [vmem:[#allocation11 + $0x48] sm:$0xff] }
 0x416   :  { %5345 = vmatpush.bf16.msra.mxu2 %v8321_v44  ;;  %v4770_v46 = vpop.f32.mrf.mxu1  ;;  %v9094_v44 = vld [vmem:[#allocation11 + $0x10] sm:$0xff]  ;;  %5513 = vmatpush.bf16.msrb.mxu0 %v9105_v63 }
 0x417   :  { %v4771_v11 = vadd.f32 %v4770_v46, %v4757_v32  ;;  %5499 = vmatpush.bf16.msra.mxu3 %v9097_v12 }
 0x418   :  { %5338 = vmatpush.bf16.msra.mxu1 %v8201_v28  ;;  %v4744_v42 = vpop.f32.mrf.mxu3  ;;  %v8289_v28 = vor.u32 %v9082_v45, %v8286_v47 }
 0x419   :  { %v4745_v55 = vadd.f32 %v4744_v42, %v3112_v7  ;;  %v9100_v42 = vld [vmem:[#allocation11 + $0x40] sm:$0xff]  ;;  %v9115_v7 = vld [vmem:[%s9748_s9 + $0x38] sm:$0xff] }
 0x41a   :  { %5346 = vmatpush.bf16.msra.mxu2 %v8313_v50  ;;  %v9092_v50 = vld [vmem:[#allocation11] sm:$0xff]  ;;  %5514 = vmatpush.bf16.msrb.mxu0 %v9104_v27 }
 0x41b   :  { %v4759_v58 = vadd.f32 %v4758_v49, %v4745_v55  ;;  %5500 = vmatpush.bf16.msra.mxu3 %v9096_v14  ;;  %v9114_v49 = vld [vmem:[%s9748_s9 + $0x30] sm:$0xff] }
 0x41d   :  { %v4812_v57 = vpop.f32.mrf.mxu0 }
 0x41e   :  { %v4728_v39 = vpop.f32.mrf.mxu2  ;;  %5347 = vmatpush.bf16.msra.mxu2 %v8305_v19  ;;  %v4772_v33 = vpop.f32.mrf.mxu1  ;;  %5515 = vmatpush.bf16.msrb.mxu0 %v9103_v30  ;;  %v9102_v19 = vld [vmem:[#allocation11 + $0x50] sm:$0xff] }
 0x41f   :  { %v4729_v35 = vadd.f32 %v4728_v39, %v4715_v22  ;;  %v8270_v39 = vld [vmem:[#allocation10 + $0x198] sm:$0xf0]  ;;  %v4773_v3 = vadd.f32 %v4772_v33, %v4759_v58  ;;  %v8262_v22 = vld [vmem:[#allocation10 + $0x188] sm:$0xf0]  ;;  %5501 = vmatpush.bf16.msra.mxu3 %v9095_v20  ;;  %v9141_v20 = vld [vmem:[%s9740_s1 + $0x15] ss:$0 sm:$0xff] }
 0x420   :  { %v4798_v53 = vpop.f32.mrf.mxu3  ;;  %v8273_v31 = vor.u32 %v9078_v21, %v8270_v39  ;;  %v8265_v1 = vor.u32 %v9076_v0, %v8262_v22 }
 0x421   :  { %v4847_v16 = vmax.f32 %v4729_v35, 0.0 }
 0x422   :  { %5348 = vmatpush.bf16.msra.mxu2 %v8297_v38  ;;  %5516 = vmatpush.bf16.msrb.mxu0 %v9102_v19  ;;  %v4857_v38 = vld [vmem:[%s9740_s1 + $0x13] sm:$0x3] }
 0x423   :  { %5502 = vmatpush.bf16.msra.mxu3 %v9094_v44  ;;  %v4923_v45 = vperm.slane %v4857_v38, 0  ;;  %v9118_v19 = vld [vmem:[%s9749_s10 + $0x10] sm:$0xff] }
 0x425   :  { %v4814_v9 = vpop.f32.mrf.mxu0 }
 0x426   :  { %v4730_v8 = vpop.f32.mrf.mxu2  ;;  %5349 = vmatpush.bf16.msra.mxu2 %v8289_v28  ;;  %5517 = vmatpush.bf16.msrb.mxu0 %v9101_v37 }
 0x427   :  { %v4731_v10 = vadd.f32 %v4730_v8, %v4717_v2  ;;  %5503 = vmatpush.bf16.msra.mxu3 %v9093_v41 }
 0x428   :  { %v4800_v56 = vpop.f32.mrf.mxu3 }
 0x429   :  { %v4851_v6 = vmax.f32 %v4731_v10, 0.0 }
 0x42a   :  { %5350 = vmatpush.bf16.msra.mxu2 %v8281_v51  ;;  %5518 = vmatpush.bf16.msrb.mxu0 %v9100_v42 }
 0x42b   :  { %v4855_v34 = vpack.c.bf16 %v4851_v6, %v4847_v16  ;;  %5504 = vmatpush.bf16.msra.mxu3 %v9092_v50 }
 0x42d   :  { %5283 = vmatmul.bf16.vlgmr.msrb.gmra.mxu1 %v4855_v34 }
 0x42e   :  { %5351 = vmatpush.bf16.msra.mxu2 %v8273_v31  ;;  %5596 = vmatpush.bf16.msrb.mxu1 %v9115_v7 }
 0x432   :  { %5352 = vmatpush.bf16.msra.mxu2 %v8265_v1  ;;  %5597 = vmatpush.bf16.msrb.mxu1 %v9114_v49 }
 0x436   :  { %v4826_v2 = vpop.f32.mrf.mxu1 }
 0x43c   :  { %v4784_v40 = vpop.f32.mrf.mxu2 }
 0x43d   :  { %5339 = vmatmul.bf16.vlgmr.msra.gmra.mxu1 %v4855_v34  ;;  %v4785_v26 = vadd.f32 %v4784_v40, %v4771_v11 }
 0x43e   :  { %v4828_v16 = vpop.f32.mrf.mxu1 }
 0x43f   :  { %v4799_v4 = vadd.f32 %v4798_v53, %v4785_v26 }
 0x441   :  { %v4813_v24 = vadd.f32 %v4812_v57, %v4799_v4 }
 0x443   :  { %v4827_v43 = vadd.f32 %v4826_v2, %v4813_v24 }
 0x444   :  { %v4786_v61 = vpop.f32.mrf.mxu2 }
 0x445   :  { %v4787_v35 = vadd.f32 %v4786_v61, %v4773_v3  ;;  %v4924_v3 = vperm.slane %v4857_v38, 1  ;;  %v9142_v38 = vld [vmem:[%s9740_s1 + $0x16] ss:$0 sm:$0xff] }
 0x447   :  { %v4801_v8 = vadd.f32 %v4800_v56, %v4787_v35 }
 0x449   :  { %v4815_v10 = vadd.f32 %v4814_v9, %v4801_v8 }
 0x44b   :  { %v4829_v13 = vadd.f32 %v4828_v16, %v4815_v10 }
 0x44d   :  { %v5256_v62 = vpop.f32.mrf.mxu3 }
 0x44e   :  { %v5257_v18 = vadd.f32 %v5256_v62, %v4923_v45 }
 0x455   :  { %v5258_v40 = vpop.f32.mrf.mxu3 }
 0x456   :  { %v5259_v51 = vadd.f32 %v5258_v40, %v4923_v45 }
 0x45c   :  { %v4840_v5 = vpop.f32.mrf.mxu2 }
 0x45d   :  { %v4841_v6 = vadd.f32 %v4840_v5, %v4827_v43  ;;  %v5312_v55 = vpop.f32.mrf.mxu3 }
 0x45e   :  { %v5313_v1 = vadd.f32 %v5312_v55, %v4924_v3 }
 0x45f   :  { %v4848_v17 = vmax.f32 %v4841_v6, 0.0 }
 0x464   :  { %v4842_v59 = vpop.f32.mrf.mxu2 }
 0x465   :  { %v4843_v34 = vadd.f32 %v4842_v59, %v4829_v13  ;;  %v5314_v0 = vpop.f32.mrf.mxu3  ;;  %v9113_v59 = vld [vmem:[%s9748_s9 + $0x28] sm:$0xff] }
 0x466   :  { %v5315_v2 = vadd.f32 %v5314_v0, %v4924_v3  ;;  %5598 = vmatpush.bf16.msrb.mxu1 %v9113_v59 }
 0x467   :  { %v4852_v15 = vmax.f32 %v4843_v34, 0.0  ;;  %v9112_v34 = vld [vmem:[%s9748_s9 + $0x20] sm:$0xff] }
 0x468   :  { %v5270_v46 = vpop.f32.mrf.mxu0 }
 0x469   :  { %v4856_v60 = vpack.c.bf16 %v4852_v15, %v4848_v17  ;;  %v5271_v52 = vadd.f32 %v5270_v46, %v5257_v18  ;;  %v9111_v17 = vld [vmem:[%s9748_s9 + $0x18] sm:$0xff]  ;;  %v9110_v15 = vld [vmem:[%s9748_s9 + $0x10] sm:$0xff]  ;;  %v9117_v46 = vld [vmem:[%s9749_s10 + $0x8] sm:$0xff] }
 0x46a   :  { %5599 = vmatpush.bf16.msrb.mxu1 %v9112_v34  ;;  %v9143_v18 = vld [vmem:[%s9740_s1 + $0x17] ss:$0 sm:$0xff] }
 0x46b   :  { %5297 = vmatmul.bf16.vlgmr.msrb.gmra.mxu2 %v4856_v60 }
 0x46c   :  { %5657 = vmatpush.bf16.msrb.mxu2 %v9119_v29 }
 0x46e   :  { %5600 = vmatpush.bf16.msrb.mxu1 %v9111_v17 }
 0x470   :  { %v5272_v47 = vpop.f32.mrf.mxu0  ;;  %5658 = vmatpush.bf16.msrb.mxu2 %v9118_v19 }
 0x471   :  { %v5273_v53 = vadd.f32 %v5272_v47, %v5259_v51 }
 0x472   :  { %5601 = vmatpush.bf16.msrb.mxu1 %v9110_v15 }
 0x474   :  { %5659 = vmatpush.bf16.msrb.mxu2 %v9117_v46 }
 0x478   :  { %v5326_v39 = vpop.f32.mrf.mxu0 }
 0x479   :  { %v5327_v4 = vadd.f32 %v5326_v39, %v5313_v1 }
 0x47b   :  { %5353 = vmatmul.bf16.vlgmr.msra.gmra.mxu2 %v4856_v60  ;;  %v9109_v60 = vld [vmem:[%s9748_s9 + $0x8] sm:$0xff] }
 0x47c   :  { %5602 = vmatpush.bf16.msrb.mxu1 %v9109_v60 }
 0x480   :  { %v5328_v35 = vpop.f32.mrf.mxu0  ;;  %5603 = vmatpush.bf16.msrb.mxu1 %v9108_v36 }
 0x481   :  { %v5329_v8 = vadd.f32 %v5328_v35, %v5315_v2 }
 0x4aa   :  { %v5284_v23 = vpop.f32.mrf.mxu1 }
 0x4ab   :  { %v5285_v33 = vadd.f32 %v5284_v23, %v5271_v52  ;;  %v9116_v23 = vld [vmem:[%s9749_s10] sm:$0xff]  ;;  %s9337_s10 = smov [#allocation13]  }
 0x4ac   :  { %5660 = vmatpush.bf16.msrb.mxu2 %v9116_v23  ;;  %s5675_s27 = sshll.u32 %s9337_s10, 4  ;;  %s5676_s27 = int_to_ptr.vmem [resolvable:$true] %s5675_s27 }
 0x4b2   :  { %v5286_v28 = vpop.f32.mrf.mxu1 }
 0x4b3   :  { %v5287_v32 = vadd.f32 %v5286_v28, %v5273_v53 }
 0x4ba   :  { %v5340_v31 = vpop.f32.mrf.mxu1 }
 0x4bb   :  { %v5341_v5 = vadd.f32 %v5340_v31, %v5327_v4 }
 0x4c2   :  { %v5342_v56 = vpop.f32.mrf.mxu1 }
 0x4c3   :  { %v5343_v24 = vadd.f32 %v5342_v56, %v5329_v8 }
 0x4ee   :  { %v5298_v48 = vpop.f32.mrf.mxu2 }
 0x4ef   :  { %v5299_v21 = vadd.f32 %v5298_v48, %v5285_v33 }
 0x4f1   :  { %v5359_v57 = vmax.f32 %v5299_v21, 0.0 }
 0x4f6   :  { %v5300_v58 = vpop.f32.mrf.mxu2 }
 0x4f7   :  { %v5301_v11 = vadd.f32 %v5300_v58, %v5287_v32 }
 0x4f9   :  { %v5361_v61 = vmax.f32 %v5301_v11, 0.0 }
 0x4fb   :  { %v5363_v26 = vpack.c.bf16 %v5361_v61, %v5359_v57 }
 0x4fd   :  { %5505 = vmatmul.bf16.vlgmr.msra.gmra.mxu3 %v5363_v26 }
 0x4fe   :  { %v5354_v22 = vpop.f32.mrf.mxu2 }
 0x4ff   :  { %v5355_v9 = vadd.f32 %v5354_v22, %v5341_v5 }
 0x501   :  { %v5360_v16 = vmax.f32 %v5355_v9, 0.0 }
 0x506   :  { %v5356_v10 = vpop.f32.mrf.mxu2 }
 0x507   :  { %v5357_v43 = vadd.f32 %v5356_v10, %v5343_v24 }
 0x509   :  { %v5362_v6 = vmax.f32 %v5357_v43, 0.0 }
 0x50b   :  { %v5364_v13 = vpack.c.bf16 %v5362_v6, %v5360_v16 }
 0x50d   :  { %5519 = vmatmul.bf16.vlgmr.msrb.gmra.mxu0 %v5364_v13 }
 0x580   :  { %v5506_v12 = vpop.f32.mrf.mxu3 }
 0x581   :  { %v5507_v44 = vadd.f32 %v9141_v20, %v5506_v12 }
 0x588   :  { %v5508_v25 = vpop.f32.mrf.mxu3 }
 0x589   :  { %v5509_v54 = vadd.f32 %v9141_v20, %v5508_v25 }
 0x58a   :  { %v5520_v14 = vpop.f32.mrf.mxu0 }
 0x58b   :  { %v5521_v41 = vadd.f32 %v5520_v14, %v5507_v44 }
 0x58d   :  { %v5525_v27 = vmax.f32 %v5521_v41, 0.0 }
 0x592   :  { %v5522_v63 = vpop.f32.mrf.mxu0 }
 0x593   :  { %v5523_v50 = vadd.f32 %v5522_v63, %v5509_v54 }
 0x595   :  { %v5526_v30 = vmax.f32 %v5523_v50, 0.0 }
 0x597   :  { %v5527_v62 = vpack.c.bf16 %v5526_v30, %v5525_v27 }
 0x599   :  { %5604 = vmatmul.bf16.vlgmr.msrb.gmra.mxu1 %v5527_v62 }
 0x616   :  { %v5605_v37 = vpop.f32.mrf.mxu1 }
 0x617   :  { %v5606_v42 = vadd.f32 %v9142_v38, %v5605_v37 }
 0x619   :  { %v5610_v47 = vmax.f32 %v5606_v42, 0.0 }
 0x61e   :  { %v5607_v40 = vpop.f32.mrf.mxu1 }
 0x61f   :  { %v5608_v45 = vadd.f32 %v9142_v38, %v5607_v40 }
 0x621   :  { %v5611_v7 = vmax.f32 %v5608_v45, 0.0 }
 0x623   :  { %v5612_v28 = vpack.c.bf16 %v5611_v7, %v5610_v47 }
 0x625   :  { %8434 = vmatmul.msk.bf16.vlgmr.msrb.gmra.mxu2 %vm5649_vm2, %v5612_v28 }
 0x6a8   :  { %v5662_v48 = vpop.f32.mrf.mxu2 }
 0x6a9   :  { %v5663_v51 = vadd.f32 %v9143_v18, %v5662_v48 }
 0x6b0   :  { %v5664_v49 = vpop.f32.mrf.mxu2 }
 0x6b1   :  { %v5665_v52 = vadd.f32 %v9143_v18, %v5664_v49 }
 0x6b3   :  { %v9123_v53 = vpack.c.bf16 %v5665_v52, %v5663_v51 }
 0x6b5   :  { %9124 = vst [vmem:[#allocation13] sm:$0xff] %v9123_v53  }
 0x6b6   :  { %5683 = dma.vmem_to_hbm [thread:$0]  %s5676_s27, 128, %s5678_s7, [#allocation4], %s9335_s30, %s9335_s30, %s9336_s12  }
 0x6b7   :  { %9321 = dma.done.wait [#allocation4], 128  }
 0x6b8   :  { %9322 = vsyncadd [#allocation4], 4294967168 }
 0x6b9   :  { %5688 = vsyncpa [#allocation3], 1 }
 0x6ba   :  { %5689 = vsyncpa [#allocation6], 1 }
 0x6bb   :  { %5690 = vsyncpa [#allocation9], 1 }
 0x6bc   :  { %5691 = vsyncpa [#allocation12], 1 }
 0x6bd   :  { %5692 = vsyncpa [#allocation4], 1 }

// kernel: tpu_custom_call.1
= control target key start
LH: loop header
LB: loop body
LE: loop exit
PB: predicated region body
PF: predicated region fallthrough
CT: control target
= control target key end

     0   :  { %16 = vsyncpa [#allocation3], 0  ;;  %s9739_s0 = inlined_call_operand.vmem [shape: bf16[16,4], index: 0, kind: input, shape index: {}]   ;;  %s9740_s1 = inlined_call_operand.vmem [shape: f32[1,3072], index: 1, kind: input, shape index: {}]   ;;  %s9741_s2 = inlined_call_operand.vmem [shape: bf16[4,128], index: 2, kind: input, shape index: {}]   ;;  %s9742_s3 = inlined_call_operand.hbm [shape: bf16[128,256], index: 3, kind: input, shape index: {}]   ;;  %s9743_s4 = inlined_call_operand.hbm [shape: bf16[256,512], index: 4, kind: input, shape index: {}]   ;;  %s9744_s5 = inlined_call_operand.hbm [shape: bf16[512,1024], index: 5, kind: input, shape index: {}]   ;;  %s9745_s6 = inlined_call_operand.hbm [shape: bf16[1024,512], index: 6, kind: input, shape index: {}]   ;;  %s9746_s7 = inlined_call_operand.hbm [shape: bf16[512,256], index: 7, kind: input, shape index: {}]   ;;  %s9747_s8 = inlined_call_operand.hbm [shape: bf16[256,128], index: 8, kind: input, shape index: {}]   ;;  %s9748_s9 = inlined_call_operand.vmem [shape: bf16[128,64], index: 9, kind: input, shape index: {}]   ;;  %s9749_s10 = inlined_call_operand.vmem [shape: bf16[64,128], index: 10, kind: input, shape index: {}]   ;;  %s9750_s11 = inlined_call_operand.hbm [shape: bf16[16,128], index: 11, kind: output, shape index: {}]  }
   0x1   :  { %17 = vsyncpa [#allocation6], 0 }
   0x2   :  { %18 = vsyncpa [#allocation9], 0 }
   0x3   :  { %19 = vsyncpa [#allocation12], 0  ;;  %s44_s19 = sshll.u32 %s9743_s4, 4  ;;  %s45_s19 = int_to_ptr.hbm [resolvable:$true] %s44_s19 }
   0x4   :  { %20 = vsyncpa [#allocation4], 0  ;;  %s9323_s20 = smov [#allocation5]   ;;  %s70_s24 = sshll.u32 %s9745_s6, 4  ;;  %s71_s24 = int_to_ptr.hbm [resolvable:$true] %s70_s24 }
   0x5   :  { %s46_s21 = sshll.u32 %s9323_s20, 4  ;;  %s9324_s25 = smov 256   ;;  %s47_s21 = int_to_ptr.vmem [resolvable:$true] %s46_s21 }
   0x6   :  { %s9325_s26 = smov 16   ;;  %s9326_s27 = smov [#allocation8]  }
   0x7   :  { %52 = dma.hbm_to_vmem [thread:$0]  %s45_s19, 8192, %s47_s21, [#allocation6], %s9324_s25, %s9324_s25, %s9325_s26  }
   0x8   :  { %s72_s28 = sshll.u32 %s9326_s27, 4  ;;  %s31_s12 = sshll.u32 %s9742_s3, 4  ;;  %s73_s28 = int_to_ptr.vmem [resolvable:$true] %s72_s28  ;;  %s32_s12 = int_to_ptr.hbm [resolvable:$true] %s31_s12 }
   0x9   :  { %78 = dma.hbm_to_vmem [thread:$0]  %s71_s24, 32768, %s73_s28, [#allocation9], %s9324_s25, %s9324_s25, %s9325_s26  }
   0xa   :  { %s9327_s4 = smov [#allocation2]   ;;  %s57_s6 = sshll.u32 %s9744_s5, 4  ;;  %s58_s6 = int_to_ptr.hbm [resolvable:$true] %s57_s6 }
   0xb   :  { %s33_s13 = sshll.u32 %s9327_s4, 4  ;;  %s9328_s16 = smov 128   ;;  %s34_s13 = int_to_ptr.vmem [resolvable:$true] %s33_s13 }
   0xc   :  { %s9329_s17 = smov 8   ;;  %s9330_s18 = smov [#allocation7]  }
   0xd   :  { %39 = dma.hbm_to_vmem [thread:$0]  %s32_s12, 2048, %s34_s13, [#allocation3], %s9328_s16, %s9328_s16, %s9329_s17  }
   0xe   :  { %s59_s19 = sshll.u32 %s9330_s18, 4  ;;  %s9331_s20 = smov 512   ;;  %s60_s19 = int_to_ptr.vmem [resolvable:$true] %s59_s19 }
   0xf   :  { %s9332_s21 = smov 32   ;;  %s83_s23 = sshll.u32 %s9746_s7, 4  ;;  %s84_s23 = int_to_ptr.hbm [resolvable:$true] %s83_s23 }
  0x10   :  { %65 = dma.hbm_to_vmem [thread:$0]  %s58_s6, 32768, %s60_s19, [#allocation6], %s9331_s20, %s9331_s20, %s9332_s21  }
  0x11   :  { %s9333_s24 = smov [#allocation10]   ;;  %s96_s27 = sshll.u32 %s9747_s8, 4  ;;  %s97_s27 = int_to_ptr.hbm [resolvable:$true] %s96_s27 }
  0x12   :  { %s85_s25 = sshll.u32 %s9333_s24, 4  ;;  %s9334_s28 = smov [#allocation11]   ;;  %s86_s25 = int_to_ptr.vmem [resolvable:$true] %s85_s25 }
  0x13   :  { %91 = dma.hbm_to_vmem [thread:$0]  %s84_s23, 8192, %s86_s25, [#allocation9], %s9328_s16, %s9328_s16, %s9329_s17  }
  0x14   :  { %s98_s29 = sshll.u32 %s9334_s28, 4  ;;  %s9335_s30 = smov 64   ;;  %s99_s29 = int_to_ptr.vmem [resolvable:$true] %s98_s29 }
  0x15   :  { %s9336_s12 = smov 4  }
  0x16   :  { %104 = dma.hbm_to_vmem [thread:$0]  %s97_s27, 2048, %s99_s29, [#allocation12], %s9335_s30, %s9335_s30, %s9336_s12  }
  0x17   :  { %9313 = dma.done.wait [#allocation3], 2048  }
  0x18   :  { %9314 = vsyncadd [#allocation3], 4294965248 }
  0x19   :  { %9315 = dma.done.wait [#allocation6], 40960  }
  0x1a   :  { %9316 = vsyncadd [#allocation6], 4294926336 }
  0x1b   :  { %9317 = dma.done.wait [#allocation9], 40960  }
  0x1c   :  { %9318 = vsyncadd [#allocation9], 4294926336 }
  0x1d   :  { %9319 = dma.done.wait [#allocation12], 2048  }
  0x1e   :  { %9320 = vsyncadd [#allocation12], 4294965248  ;;  %vm150_vm0 = vcmask 1041408   ;;  %v137_v0 = vld [vmem:[%s9741_s2] sm:$0x3]  ;;  %vm146_vm1 = vcmask 31744  }
  0x1f   :  { %v5756_v1 = vld [vmem:[#allocation2 + $0x70] sm:$0xf]  ;;  %v152_v2 = vsel %vm150_vm0, %v137_v0, 0  ;;  %v8435_v3 = vld [vmem:[%s9739_s0] sm:$0xff]  ;;  %v8451_v4 = vld [vmem:[#allocation2 + $0x74] sm:$0xf0] }
  0x20   :  { %v8450_v5 = vld [vmem:[#allocation2 + $0x74] sm:$0xf]  ;;  %161 = vmatpush.bf16.msra.mxu0 %v152_v2  ;;  %v5757_v6 = vor.u32 %v8451_v4, %v5756_v1  ;;  %v5758_v7 = vld [vmem:[#allocation2 + $0x78] sm:$0xf0]  ;;  %v5748_v8 = vld [vmem:[#allocation2 + $0x60] sm:$0xf] }
  0x21   :  { %v8449_v9 = vld [vmem:[#allocation2 + $0x64] sm:$0xf0]  ;;  %v5761_v10 = vor.u32 %v8450_v5, %v5758_v7  ;;  %v8448_v11 = vld [vmem:[#allocation2 + $0x64] sm:$0xf]  ;;  %v5750_v12 = vld [vmem:[#allocation2 + $0x68] sm:$0xf0] }
  0x22   :  { %273 = vmatpush.bf16.msra.mxu1 %v5757_v6  ;;  %v5749_v13 = vor.u32 %v8449_v9, %v5748_v8  ;;  %v5753_v14 = vor.u32 %v8448_v11, %v5750_v12  ;;  %v5740_v15 = vld [vmem:[#allocation2 + $0x50] sm:$0xf]  ;;  %v8447_v16 = vld [vmem:[#allocation2 + $0x54] sm:$0xf0]  ;;  %v8446_v17 = vld [vmem:[#allocation2 + $0x54] sm:$0xf] }
  0x23   :  { %5697 = vmatmul.msk.bf16.vlgmr.msra.gmra.mxu0 %vm146_vm1, %v8435_v3  ;;  %287 = vmatpush.bf16.msra.mxu2 %v5761_v10  ;;  %v5742_v18 = vld [vmem:[#allocation2 + $0x58] sm:$0xf0]  ;;  %v5741_v19 = vor.u32 %v8447_v16, %v5740_v15  ;;  %v5732_v21 = vld [vmem:[#allocation2 + $0x40] sm:$0xf]  ;;  %v8445_v22 = vld [vmem:[#allocation2 + $0x44] sm:$0xf0] }
  0x24   :  { %v5745_v20 = vor.u32 %v8446_v17, %v5742_v18  ;;  %v8444_v23 = vld [vmem:[#allocation2 + $0x44] sm:$0xf]  ;;  %v5734_v24 = vld [vmem:[#allocation2 + $0x48] sm:$0xf0]  ;;  %v5733_v25 = vor.u32 %v8445_v22, %v5732_v21  ;;  %v5724_v27 = vld [vmem:[#allocation2 + $0x30] sm:$0xf] }
  0x25   :  { %v5737_v26 = vor.u32 %v8444_v23, %v5734_v24  ;;  %v8443_v28 = vld [vmem:[#allocation2 + $0x34] sm:$0xf0]  ;;  %v8442_v29 = vld [vmem:[#allocation2 + $0x34] sm:$0xf]  ;;  %v5726_v31 = vld [vmem:[#allocation2 + $0x38] sm:$0xf0] }
  0x26   :  { %274 = vmatpush.bf16.msra.mxu1 %v5749_v13  ;;  %v5725_v30 = vor.u32 %v8443_v28, %v5724_v27  ;;  %v5729_v32 = vor.u32 %v8442_v29, %v5726_v31  ;;  %v5716_v33 = vld [vmem:[#allocation2 + $0x20] sm:$0xf]  ;;  %v8441_v34 = vld [vmem:[#allocation2 + $0x24] sm:$0xf0]  ;;  %v8440_v35 = vld [vmem:[#allocation2 + $0x24] sm:$0xf] }
  0x27   :  { %288 = vmatpush.bf16.msra.mxu2 %v5753_v14  ;;  %v5717_v36 = vor.u32 %v8441_v34, %v5716_v33  ;;  %v5718_v37 = vld [vmem:[#allocation2 + $0x28] sm:$0xf0]  ;;  %v5708_v39 = vld [vmem:[#allocation2 + $0x10] sm:$0xf]  ;;  %v8439_v40 = vld [vmem:[#allocation2 + $0x14] sm:$0xf0] }
  0x28   :  { %v5721_v38 = vor.u32 %v8440_v35, %v5718_v37  ;;  %v8438_v41 = vld [vmem:[#allocation2 + $0x14] sm:$0xf]  ;;  %v5709_v42 = vor.u32 %v8439_v40, %v5708_v39  ;;  %v5710_v43 = vld [vmem:[#allocation2 + $0x18] sm:$0xf0]  ;;  %v5700_v45 = vld [vmem:[#allocation2] sm:$0xf] }
  0x29   :  { %v5713_v44 = vor.u32 %v8438_v41, %v5710_v43  ;;  %v8437_v46 = vld [vmem:[#allocation2 + $0x4] sm:$0xf0]  ;;  %v8436_v47 = vld [vmem:[#allocation2 + $0x4] sm:$0xf]  ;;  %v5702_v49 = vld [vmem:[#allocation2 + $0x8] sm:$0xf0] }
  0x2a   :  { %275 = vmatpush.bf16.msra.mxu1 %v5741_v19  ;;  %v5701_v48 = vor.u32 %v8437_v46, %v5700_v45  ;;  %v5705_v50 = vor.u32 %v8436_v47, %v5702_v49  ;;  %v5876_v51 = vld [vmem:[#allocation5 + $0xe0] sm:$0xf]  ;;  %v8482_v52 = vld [vmem:[#allocation5 + $0xec] sm:$0xf0]  ;;  %v8480_v53 = vld [vmem:[#allocation5 + $0xe4] sm:$0xf] }
  0x2b   :  { %289 = vmatpush.bf16.msra.mxu2 %v5745_v20  ;;  %v5877_v54 = vor.u32 %v8482_v52, %v5876_v51  ;;  %v5878_v55 = vld [vmem:[#allocation5 + $0xf0] sm:$0xf0]  ;;  %v5860_v56 = vld [vmem:[#allocation5 + $0xc0] sm:$0xf]  ;;  %v8478_v57 = vld [vmem:[#allocation5 + $0xcc] sm:$0xf0] }
  0x2c   :  { %v5881_v58 = vor.u32 %v8480_v53, %v5878_v55  ;;  %v8476_v59 = vld [vmem:[#allocation5 + $0xc4] sm:$0xf]  ;;  %v5862_v60 = vld [vmem:[#allocation5 + $0xd0] sm:$0xf0]  ;;  %v6004_v61 = vld [vmem:[#allocation5 + $0x1e0] sm:$0xf]  ;;  %v5861_v62 = vor.u32 %v8478_v57, %v5860_v56 }
  0x2d   :  { %701 = vmatpush.bf16.msra.mxu3 %v5877_v54  ;;  %v8514_v63 = vld [vmem:[#allocation5 + $0x1ec] sm:$0xf0]  ;;  %v8512_v0 = vld [vmem:[#allocation5 + $0x1e4] sm:$0xf]  ;;  %v6006_v1 = vld [vmem:[#allocation5 + $0x1f0] sm:$0xf0]  ;;  %v5865_v2 = vor.u32 %v8476_v59, %v5862_v60 }
  0x2e   :  { %276 = vmatpush.bf16.msra.mxu1 %v5733_v25  ;;  %v6005_v3 = vor.u32 %v8514_v63, %v6004_v61  ;;  %v6009_v4 = vor.u32 %v8512_v0, %v6006_v1  ;;  %v5844_v5 = vld [vmem:[#allocation5 + $0xa0] sm:$0xf]  ;;  %v8474_v6 = vld [vmem:[#allocation5 + $0xac] sm:$0xf0]  ;;  %v8472_v7 = vld [vmem:[#allocation5 + $0xa4] sm:$0xf] }
  0x2f   :  { %290 = vmatpush.bf16.msra.mxu2 %v5737_v26  ;;  %v5846_v8 = vld [vmem:[#allocation5 + $0xb0] sm:$0xf0]  ;;  %v5988_v9 = vld [vmem:[#allocation5 + $0x1c0] sm:$0xf]  ;;  %v8510_v10 = vld [vmem:[#allocation5 + $0x1cc] sm:$0xf0]  ;;  %v5845_v14 = vor.u32 %v8474_v6, %v5844_v5 }
  0x30   :  { %715 = vmatpush.bf16.msrb.mxu0 %v6005_v3  ;;  %v5989_v11 = vor.u32 %v8510_v10, %v5988_v9  ;;  %v8508_v12 = vld [vmem:[#allocation5 + $0x1c4] sm:$0xf]  ;;  %v5990_v13 = vld [vmem:[#allocation5 + $0x1d0] sm:$0xf0]  ;;  %v5828_v16 = vld [vmem:[#allocation5 + $0x80] sm:$0xf]  ;;  %v5849_v18 = vor.u32 %v8472_v7, %v5846_v8 }
  0x31   :  { %702 = vmatpush.bf16.msra.mxu3 %v5861_v62  ;;  %v5993_v15 = vor.u32 %v8508_v12, %v5990_v13  ;;  %v8470_v17 = vld [vmem:[#allocation5 + $0x8c] sm:$0xf0]  ;;  %v5972_v19 = vld [vmem:[#allocation5 + $0x1a0] sm:$0xf]  ;;  %v8504_v21 = vld [vmem:[#allocation5 + $0x1a4] sm:$0xf] }
  0x32   :  { %277 = vmatpush.bf16.msra.mxu1 %v5725_v30  ;;  %v8506_v20 = vld [vmem:[#allocation5 + $0x1ac] sm:$0xf0]  ;;  %v8468_v22 = vld [vmem:[#allocation5 + $0x84] sm:$0xf]  ;;  %v5830_v23 = vld [vmem:[#allocation5 + $0x90] sm:$0xf0]  ;;  %v5829_v28 = vor.u32 %v8470_v17, %v5828_v16 }
  0x33   :  { %291 = vmatpush.bf16.msra.mxu2 %v5729_v32  ;;  %v5974_v24 = vld [vmem:[#allocation5 + $0x1b0] sm:$0xf0]  ;;  %v5973_v25 = vor.u32 %v8506_v20, %v5972_v19  ;;  %v5956_v27 = vld [vmem:[#allocation5 + $0x180] sm:$0xf]  ;;  %v8502_v29 = vld [vmem:[#allocation5 + $0x18c] sm:$0xf0]  ;;  %v5833_v32 = vor.u32 %v8468_v22, %v5830_v23 }
  0x34   :  { %716 = vmatpush.bf16.msrb.mxu0 %v5989_v11  ;;  %v5977_v26 = vor.u32 %v8504_v21, %v5974_v24  ;;  %v8500_v30 = vld [vmem:[#allocation5 + $0x184] sm:$0xf]  ;;  %v5958_v31 = vld [vmem:[#allocation5 + $0x190] sm:$0xf0]  ;;  %v5812_v33 = vld [vmem:[#allocation5 + $0x60] sm:$0xf]  ;;  %v5957_v37 = vor.u32 %v8502_v29, %v5956_v27 }
  0x35   :  { %703 = vmatpush.bf16.msra.mxu3 %v5845_v14  ;;  %v8466_v34 = vld [vmem:[#allocation5 + $0x6c] sm:$0xf0]  ;;  %v8464_v35 = vld [vmem:[#allocation5 + $0x64] sm:$0xf]  ;;  %v5940_v39 = vld [vmem:[#allocation5 + $0x160] sm:$0xf] }
  0x36   :  { %278 = vmatpush.bf16.msra.mxu1 %v5717_v36  ;;  %v5814_v36 = vld [vmem:[#allocation5 + $0x70] sm:$0xf0]  ;;  %v5813_v40 = vor.u32 %v8466_v34, %v5812_v33  ;;  %v8498_v41 = vld [vmem:[#allocation5 + $0x16c] sm:$0xf0]  ;;  %v5796_v45 = vld [vmem:[#allocation5 + $0x40] sm:$0xf] }
  0x37   :  { %292 = vmatpush.bf16.msra.mxu2 %v5721_v38  ;;  %v5961_v38 = vor.u32 %v8500_v30, %v5958_v31  ;;  %v5942_v43 = vld [vmem:[#allocation5 + $0x170] sm:$0xf0]  ;;  %v8462_v46 = vld [vmem:[#allocation5 + $0x4c] sm:$0xf0]  ;;  %v5924_v52 = vld [vmem:[#allocation5 + $0x140] sm:$0xf] }
  0x38   :  { %717 = vmatpush.bf16.msrb.mxu0 %v5973_v25  ;;  %v5798_v49 = vld [vmem:[#allocation5 + $0x50] sm:$0xf0]  ;;  %v5797_v53 = vor.u32 %v8462_v46, %v5796_v45  ;;  %v8494_v54 = vld [vmem:[#allocation5 + $0x14c] sm:$0xf0]  ;;  %v8492_v55 = vld [vmem:[#allocation5 + $0x144] sm:$0xf] }
  0x39   :  { %704 = vmatpush.bf16.msra.mxu3 %v5829_v28  ;;  %v5926_v56 = vld [vmem:[#allocation5 + $0x150] sm:$0xf0]  ;;  %v9140_v57 = vld [vmem:[%s9740_s1] ss:$0 sm:$0xff]  ;;  %v8458_v60 = vld [vmem:[#allocation5 + $0x2c] sm:$0xf0]  ;;  %v5925_v63 = vor.u32 %v8494_v54, %v5924_v52 }
  0x3a   :  { %279 = vmatpush.bf16.msra.mxu1 %v5709_v42  ;;  %v8496_v42 = vld [vmem:[#allocation5 + $0x164] sm:$0xf]  ;;  %v5780_v59 = vld [vmem:[#allocation5 + $0x20] sm:$0xf]  ;;  %v5782_v62 = vld [vmem:[#allocation5 + $0x30] sm:$0xf0]  ;;  %v5929_v0 = vor.u32 %v8492_v55, %v5926_v56 }
  0x3b   :  { %293 = vmatpush.bf16.msra.mxu2 %v5713_v44  ;;  %v5817_v44 = vor.u32 %v8464_v35, %v5814_v36  ;;  %v5945_v51 = vor.u32 %v8496_v42, %v5942_v43  ;;  %v8456_v61 = vld [vmem:[#allocation5 + $0x24] sm:$0xf]  ;;  %v5781_v1 = vor.u32 %v8458_v60, %v5780_v59  ;;  %v8454_v5 = vld [vmem:[#allocation5 + $0xc] sm:$0xf0]  ;;  %v5766_v9 = vld [vmem:[#allocation5 + $0x10] sm:$0xf0] }
  0x3c   :  { %718 = vmatpush.bf16.msrb.mxu0 %v5957_v37  ;;  %v5785_v3 = vor.u32 %v8456_v61, %v5782_v62  ;;  %v8452_v8 = vld [vmem:[#allocation5 + $0x4] sm:$0xf]  ;;  %v8483_v16 = vld [vmem:[#allocation5 + $0xf4] sm:$0xf0]  ;;  %v8481_v17 = vld [vmem:[#allocation5 + $0xec] sm:$0xf] }
  0x3d   :  { %705 = vmatpush.bf16.msra.mxu3 %v5813_v40  ;;  %v5769_v13 = vor.u32 %v8452_v8, %v5766_v9  ;;  %v5886_v19 = vld [vmem:[#allocation5 + $0xf8] sm:$0xf0]  ;;  %v5908_v20 = vld [vmem:[#allocation5 + $0x120] sm:$0xf]  ;;  %v8490_v21 = vld [vmem:[#allocation5 + $0x12c] sm:$0xf0] }
  0x3e   :  { %280 = vmatpush.bf16.msra.mxu1 %v5701_v48  ;;  %v8460_v48 = vld [vmem:[#allocation5 + $0x44] sm:$0xf]  ;;  %v5889_v22 = vor.u32 %v8481_v17, %v5886_v19  ;;  %v5909_v23 = vor.u32 %v8490_v21, %v5908_v20  ;;  %v5910_v25 = vld [vmem:[#allocation5 + $0x130] sm:$0xf0]  ;;  %v5868_v27 = vld [vmem:[#allocation5 + $0xc8] sm:$0xf] }
  0x3f   :  { %294 = vmatpush.bf16.msra.mxu2 %v5705_v50  ;;  %v5941_v50 = vor.u32 %v8498_v41, %v5940_v39  ;;  %v8488_v24 = vld [vmem:[#allocation5 + $0x124] sm:$0xf]  ;;  %v8479_v28 = vld [vmem:[#allocation5 + $0xd4] sm:$0xf0]  ;;  %v8477_v29 = vld [vmem:[#allocation5 + $0xcc] sm:$0xf] }
  0x40   :  { %v5869_v30 = vor.u32 %v8479_v28, %v5868_v27  ;;  %v5870_v31 = vld [vmem:[#allocation5 + $0xd8] sm:$0xf0]  ;;  %v8486_v33 = vld [vmem:[#allocation5 + $0x10c] sm:$0xf0]  ;;  %v8484_v36 = vld [vmem:[#allocation5 + $0x104] sm:$0xf] }
  0x41   :  { %719 = vmatpush.bf16.msrb.mxu0 %v5941_v50  ;;  %706 = vmatpush.bf16.msra.mxu3 %v5797_v53  ;;  %v5873_v34 = vor.u32 %v8477_v29, %v5870_v31  ;;  %v5894_v37 = vld [vmem:[#allocation5 + $0x110] sm:$0xf0]  ;;  %v6012_v39 = vld [vmem:[#allocation5 + $0x1e8] sm:$0xf]  ;;  %v8515_v40 = vld [vmem:[#allocation5 + $0x1f4] sm:$0xf0] }
  0x42   :  { %729 = vmatpush.bf16.msrb.mxu1 %v5881_v58  ;;  %v5801_v58 = vor.u32 %v8460_v48, %v5798_v49  ;;  %v8513_v41 = vld [vmem:[#allocation5 + $0x1ec] sm:$0xf]  ;;  %v6013_v42 = vor.u32 %v8515_v40, %v6012_v39  ;;  %v6014_v43 = vld [vmem:[#allocation5 + $0x1f8] sm:$0xf0]  ;;  %v8475_v45 = vld [vmem:[#allocation5 + $0xb4] sm:$0xf0] }
  0x43   :  { %743 = vmatpush.bf16.msrb.mxu2 %v6009_v4  ;;  %v5764_v4 = vld [vmem:[#allocation5] sm:$0xf]  ;;  %v6017_v46 = vor.u32 %v8513_v41, %v6014_v43  ;;  %v8473_v48 = vld [vmem:[#allocation5 + $0xac] sm:$0xf]  ;;  %v5854_v49 = vld [vmem:[#allocation5 + $0xb8] sm:$0xf0] }
  0x44   :  { %v5765_v10 = vor.u32 %v8454_v5, %v5764_v4  ;;  %v5857_v50 = vor.u32 %v8473_v48, %v5854_v49  ;;  %v8511_v52 = vld [vmem:[#allocation5 + $0x1d4] sm:$0xf0]  ;;  %v8509_v53 = vld [vmem:[#allocation5 + $0x1cc] sm:$0xf]  ;;  %v5998_v55 = vld [vmem:[#allocation5 + $0x1d8] sm:$0xf0] }
  0x45   :  { %720 = vmatpush.bf16.msrb.mxu0 %v5925_v63  ;;  %707 = vmatpush.bf16.msra.mxu3 %v5781_v1  ;;  %v6001_v56 = vor.u32 %v8509_v53, %v5998_v55  ;;  %v8469_v59 = vld [vmem:[#allocation5 + $0x8c] sm:$0xf]  ;;  %v5838_v61 = vld [vmem:[#allocation5 + $0x98] sm:$0xf0]  ;;  %v5980_v63 = vld [vmem:[#allocation5 + $0x1a8] sm:$0xf] }
  0x46   :  { %730 = vmatpush.bf16.msrb.mxu1 %v5865_v2  ;;  %v5841_v62 = vor.u32 %v8469_v59, %v5838_v61  ;;  %v8505_v1 = vld [vmem:[#allocation5 + $0x1ac] sm:$0xf]  ;;  %v5820_v5 = vld [vmem:[#allocation5 + $0x68] sm:$0xf]  ;;  %v5822_v9 = vld [vmem:[#allocation5 + $0x78] sm:$0xf0] }
  0x47   :  { %744 = vmatpush.bf16.msrb.mxu2 %v5993_v15  ;;  %v5884_v15 = vld [vmem:[#allocation5 + $0xe8] sm:$0xf]  ;;  %v8461_v19 = vld [vmem:[#allocation5 + $0x4c] sm:$0xf]  ;;  %v5806_v21 = vld [vmem:[#allocation5 + $0x58] sm:$0xf0] }
  0x48   :  { %v5804_v17 = vld [vmem:[#allocation5 + $0x48] sm:$0xf]  ;;  %v5950_v27 = vld [vmem:[#allocation5 + $0x178] sm:$0xf0]  ;;  %v8457_v31 = vld [vmem:[#allocation5 + $0x2c] sm:$0xf] }
  0x49   :  { %708 = vmatpush.bf16.msra.mxu3 %v5765_v10  ;;  %721 = vmatpush.bf16.msrb.mxu0 %v5909_v23  ;;  %v5948_v23 = vld [vmem:[#allocation5 + $0x168] sm:$0xf]  ;;  %v5934_v39 = vld [vmem:[#allocation5 + $0x158] sm:$0xf0]  ;;  %v8453_v43 = vld [vmem:[#allocation5 + $0xc] sm:$0xf] }
  0x4a   :  { %731 = vmatpush.bf16.msrb.mxu1 %v5849_v18  ;;  %v5885_v18 = vor.u32 %v8483_v16, %v5884_v15  ;;  %v5966_v15 = vld [vmem:[#allocation5 + $0x198] sm:$0xf0]  ;;  %v5788_v29 = vld [vmem:[#allocation5 + $0x28] sm:$0xf]  ;;  %v8491_v48 = vld [vmem:[#allocation5 + $0x134] sm:$0xf0] }
  0x4b   :  { %745 = vmatpush.bf16.msrb.mxu2 %v5977_v26  ;;  %v5913_v26 = vor.u32 %v8488_v24, %v5910_v25  ;;  %v8499_v24 = vld [vmem:[#allocation5 + $0x174] sm:$0xf0]  ;;  %v8497_v25 = vld [vmem:[#allocation5 + $0x16c] sm:$0xf]  ;;  %v5772_v40 = vld [vmem:[#allocation5 + $0x8] sm:$0xf] }
  0x4c   :  { %v5953_v28 = vor.u32 %v8497_v25, %v5950_v27  ;;  %v8489_v49 = vld [vmem:[#allocation5 + $0x12c] sm:$0xf]  ;;  %v5900_v53 = vld [vmem:[#allocation5 + $0x108] sm:$0xf]  ;;  %v5902_v59 = vld [vmem:[#allocation5 + $0x118] sm:$0xf0] }
  0x4d   :  { %757 = vmatpush.bf16.msrb.mxu3 %v5885_v18  ;;  %v8463_v18 = vld [vmem:[#allocation5 + $0x54] sm:$0xf0]  ;;  %v8485_v55 = vld [vmem:[#allocation5 + $0x10c] sm:$0xf]  ;;  %v8560_v25 = vld [vmem:[#allocation7 + $0x15c] sm:$0xf0] }
  0x4e   :  { %732 = vmatpush.bf16.msrb.mxu1 %v5833_v32  ;;  %v5892_v32 = vld [vmem:[#allocation5 + $0x100] sm:$0xf]  ;;  %v5805_v20 = vor.u32 %v8463_v18, %v5804_v17  ;;  %vm5649_vm2 = vcmask 523264   ;;  %s5677_s7 = sshll.u32 %s9750_s11, 4  ;;  %s5678_s7 = int_to_ptr.hbm [resolvable:$true] %s5677_s7 }
  0x4f   :  { %746 = vmatpush.bf16.msrb.mxu2 %v5961_v38  ;;  %v5893_v35 = vor.u32 %v8486_v33, %v5892_v32  ;;  %v5897_v38 = vor.u32 %v8484_v36, %v5894_v37  ;;  %v5790_v33 = vld [vmem:[#allocation5 + $0x38] sm:$0xf0]  ;;  %v6500_v17 = vld [vmem:[#allocation7 + $0x3c0] sm:$0xf] }
  0x50   :  { %v5793_v36 = vor.u32 %v8457_v31, %v5790_v33  ;;  %v8696_v18 = vld [vmem:[#allocation7 + $0x59c] sm:$0xf0] }
  0x51   :  { %758 = vmatpush.bf16.msrb.mxu3 %v5869_v30  ;;  %722 = vmatpush.bf16.msrb.mxu0 %v5893_v35  ;;  %v8459_v30 = vld [vmem:[#allocation5 + $0x34] sm:$0xf0] }
  0x52   :  { %733 = vmatpush.bf16.msrb.mxu1 %v5817_v44  ;;  %v5852_v44 = vld [vmem:[#allocation5 + $0xa8] sm:$0xf]  ;;  %v5789_v32 = vor.u32 %v8459_v30, %v5788_v29  ;;  %v8495_v35 = vld [vmem:[#allocation5 + $0x154] sm:$0xf0]  ;;  %v6692_v29 = vld [vmem:[#allocation7 + $0x540] sm:$0xf] }
  0x53   :  { %747 = vmatpush.bf16.msrb.mxu2 %v5945_v51  ;;  %v5996_v51 = vld [vmem:[#allocation5 + $0x1c8] sm:$0xf]  ;;  %v8688_v30 = vld [vmem:[#allocation7 + $0x55c] sm:$0xf0] }
  0x54   :  { %v5997_v54 = vor.u32 %v8511_v52, %v5996_v51 }
  0x55   :  { %771 = vmatpush.bf16.msra.mxu0 %v6013_v42  ;;  %v8455_v42 = vld [vmem:[#allocation5 + $0x14] sm:$0xf0] }
  0x56   :  { %734 = vmatpush.bf16.msrb.mxu1 %v5801_v58  ;;  %v8471_v58 = vld [vmem:[#allocation5 + $0x94] sm:$0xf0] }
  0x57   :  { %748 = vmatpush.bf16.msrb.mxu2 %v5929_v0  ;;  %v8507_v0 = vld [vmem:[#allocation5 + $0x1b4] sm:$0xf0] }
  0x59   :  { %772 = vmatpush.bf16.msra.mxu0 %v5997_v54  ;;  %v8487_v54 = vld [vmem:[#allocation5 + $0x114] sm:$0xf0] }
  0x5a   :  { %735 = vmatpush.bf16.msrb.mxu1 %v5785_v3  ;;  %v5982_v3 = vld [vmem:[#allocation5 + $0x1b8] sm:$0xf0] }
  0x5b   :  { %749 = vmatpush.bf16.msrb.mxu2 %v5913_v26  ;;  %v5985_v4 = vor.u32 %v8505_v1, %v5982_v3  ;;  %v5949_v26 = vor.u32 %v8499_v24, %v5948_v23  ;;  %v6244_v3 = vld [vmem:[#allocation7 + $0x1c0] sm:$0xf] }
  0x5c   :  { %v6180_v24 = vld [vmem:[#allocation7 + $0x140] sm:$0xf] }
  0x5e   :  { %736 = vmatpush.bf16.msrb.mxu1 %v5769_v13  ;;  %v8501_v13 = vld [vmem:[#allocation5 + $0x18c] sm:$0xf] }
  0x5f   :  { %750 = vmatpush.bf16.msrb.mxu2 %v5897_v38  ;;  %v5969_v16 = vor.u32 %v8501_v13, %v5966_v15  ;;  %v8493_v38 = vld [vmem:[#allocation5 + $0x14c] sm:$0xf]  ;;  %v8568_v13 = vld [vmem:[#allocation7 + $0x19c] sm:$0xf0] }
  0x60   :  { %v5937_v41 = vor.u32 %v8493_v38, %v5934_v39  ;;  %v6724_v15 = vld [vmem:[#allocation7 + $0x580] sm:$0xf]  ;;  %v6181_v38 = vor.u32 %v8560_v25, %v6180_v24  ;;  %v6214_v24 = vld [vmem:[#allocation7 + $0x1a0] sm:$0xf0] }
  0x61   :  { %v6148_v39 = vld [vmem:[#allocation7 + $0x100] sm:$0xf] }
  0x62   :  { %v6276_v25 = vld [vmem:[#allocation7 + $0x200] sm:$0xf] }
  0xa0   :  { %v163_v47 = vpop.f32.mrf.mxu0 }
  0xa1   :  { %v164_v2 = vadd.f32 %v9140_v57, %v163_v47  ;;  %v5853_v47 = vor.u32 %v8475_v45, %v5852_v44  ;;  %v5774_v44 = vld [vmem:[#allocation5 + $0x18] sm:$0xf0]  ;;  %v5773_v45 = vor.u32 %v8455_v42, %v5772_v40  ;;  %v6693_v40 = vor.u32 %v8688_v30, %v6692_v29  ;;  %v6660_v42 = vld [vmem:[#allocation7 + $0x500] sm:$0xf] }
  0xa3   :  { %v168_v11 = vmax.f32 %v164_v2, 0.0  ;;  %759 = vmatpush.bf16.msrb.mxu3 %v5853_v47  ;;  %v5981_v2 = vor.u32 %v8507_v0, %v5980_v63  ;;  %v5916_v47 = vld [vmem:[#allocation5 + $0x128] sm:$0xf] }
  0xa4   :  { %v5917_v51 = vor.u32 %v8491_v48, %v5916_v47  ;;  %v8624_v47 = vld [vmem:[#allocation7 + $0x35c] sm:$0xf0] }
  0xa5   :  { %773 = vmatpush.bf16.msra.mxu0 %v5981_v2  ;;  %v6948_v48 = vld [vmem:[#allocation7 + $0x740] sm:$0xf] }
  0xa8   :  { %v165_v6 = vpop.f32.mrf.mxu0 }
  0xa9   :  { %v166_v7 = vadd.f32 %v9140_v57, %v165_v6  ;;  %v5836_v57 = vld [vmem:[#allocation5 + $0x88] sm:$0xf]  ;;  %v8467_v6 = vld [vmem:[#allocation5 + $0x74] sm:$0xf0] }
  0xaa   :  { %v5837_v60 = vor.u32 %v8471_v58, %v5836_v57  ;;  %v5821_v8 = vor.u32 %v8467_v6, %v5820_v5  ;;  %v5901_v58 = vor.u32 %v8487_v54, %v5900_v53  ;;  %v8544_v53 = vld [vmem:[#allocation7 + $0xdc] sm:$0xf0] }
  0xab   :  { %v169_v12 = vmax.f32 %v166_v7, 0.0  ;;  %v8465_v7 = vld [vmem:[#allocation5 + $0x6c] sm:$0xf]  ;;  %v6628_v54 = vld [vmem:[#allocation7 + $0x4c0] sm:$0xf] }
  0xac   :  { %760 = vmatpush.bf16.msrb.mxu3 %v5837_v60  ;;  %v5825_v10 = vor.u32 %v8465_v7, %v5822_v9  ;;  %v5905_v60 = vor.u32 %v8485_v55, %v5902_v59  ;;  %v6756_v7 = vld [vmem:[#allocation7 + $0x5c0] sm:$0xf] }
  0xad   :  { %v170_v14 = vpack.c.bf16 %v169_v12, %v168_v11  ;;  %v5964_v11 = vld [vmem:[#allocation5 + $0x188] sm:$0xf]  ;;  %v8503_v12 = vld [vmem:[#allocation5 + $0x194] sm:$0xf0]  ;;  %v8704_v9 = vld [vmem:[#allocation7 + $0x5dc] sm:$0xf0] }
  0xae   :  { %v8672_v55 = vld [vmem:[#allocation7 + $0x4dc] sm:$0xf0] }
  0xaf   :  { %281 = vmatmul.bf16.vlgmr.msra.gmra.mxu1 %v170_v14  ;;  %295 = vmatmul.bf16.vlgmr.msra.gmra.mxu2 %v170_v14  ;;  %v5965_v14 = vor.u32 %v8503_v12, %v5964_v11  ;;  %v6212_v12 = vld [vmem:[#allocation7 + $0x180] sm:$0xf] }
  0xb0   :  { %785 = vmatpush.bf16.msra.mxu1 %v5889_v22  ;;  %799 = vmatpush.bf16.msra.mxu2 %v6017_v46  ;;  %v5809_v22 = vor.u32 %v8461_v19, %v5806_v21  ;;  %v5777_v46 = vor.u32 %v8453_v43, %v5774_v44  ;;  %v7012_v21 = vld [vmem:[#allocation7 + $0x7c0] sm:$0xf]  ;;  %v6213_v23 = vor.u32 %v8568_v13, %v6212_v12 }
  0xb1   :  { %761 = vmatpush.bf16.msrb.mxu3 %v5821_v8  ;;  %774 = vmatpush.bf16.msra.mxu0 %v5965_v14  ;;  %v6757_v14 = vor.u32 %v8704_v9, %v6756_v7  ;;  %v8680_v43 = vld [vmem:[#allocation7 + $0x51c] sm:$0xf0] }
  0xb2   :  { %v8616_v59 = vld [vmem:[#allocation7 + $0x31c] sm:$0xf0] }
  0xb3   :  { %v6052_v7 = vld [vmem:[#allocation7 + $0x40] sm:$0xf] }
  0xb4   :  { %786 = vmatpush.bf16.msra.mxu1 %v5873_v34  ;;  %800 = vmatpush.bf16.msra.mxu2 %v6001_v56  ;;  %v5932_v34 = vld [vmem:[#allocation5 + $0x148] sm:$0xf]  ;;  %v171_v56 = vld [vmem:[%s9740_s1 + $0x1] sm:$0x3] }
  0xb5   :  { %762 = vmatpush.bf16.msrb.mxu3 %v5805_v20  ;;  %775 = vmatpush.bf16.msra.mxu0 %v5949_v26  ;;  %v5933_v37 = vor.u32 %v8495_v35, %v5932_v34  ;;  %v189_v61 = vperm.slane %v171_v56, 0  ;;  %v190_v1 = vperm.slane %v171_v56, 1  ;;  %v8640_v20 = vld [vmem:[#allocation7 + $0x3dc] sm:$0xf0]  ;;  %v6725_v26 = vor.u32 %v8696_v18, %v6724_v15 }
  0xb6   :  { %v6501_v31 = vor.u32 %v8640_v20, %v6500_v17  ;;  %v8632_v35 = vld [vmem:[#allocation7 + $0x39c] sm:$0xf0]  ;;  %v6246_v17 = vld [vmem:[#allocation7 + $0x1e0] sm:$0xf0] }
  0xb7   :  { %v8600_v12 = vld [vmem:[#allocation7 + $0x29c] sm:$0xf0] }
  0xb8   :  { %787 = vmatpush.bf16.msra.mxu1 %v5857_v50  ;;  %801 = vmatpush.bf16.msra.mxu2 %v5985_v4  ;;  %v5918_v50 = vld [vmem:[#allocation5 + $0x138] sm:$0xf0]  ;;  %v8576_v4 = vld [vmem:[#allocation7 + $0x1dc] sm:$0xf0] }
  0xb9   :  { %763 = vmatpush.bf16.msrb.mxu3 %v5789_v32  ;;  %776 = vmatpush.bf16.msra.mxu0 %v5933_v37  ;;  %v5921_v52 = vor.u32 %v8489_v49, %v5918_v50  ;;  %v6245_v8 = vor.u32 %v8576_v4, %v6244_v3  ;;  %v6468_v32 = vld [vmem:[#allocation7 + $0x380] sm:$0xf] }
  0xba   :  { %v8760_v37 = vld [vmem:[#allocation7 + $0x79c] sm:$0xf0]  ;;  %v6469_v44 = vor.u32 %v8632_v35, %v6468_v32 }
  0xbb   :  { %v8752_v49 = vld [vmem:[#allocation7 + $0x75c] sm:$0xf0] }
  0xbc   :  { %788 = vmatpush.bf16.msra.mxu1 %v5841_v62  ;;  %802 = vmatpush.bf16.msra.mxu2 %v5969_v16  ;;  %v6372_v4 = vld [vmem:[#allocation7 + $0x2c0] sm:$0xf] }
  0xbd   :  { %764 = vmatpush.bf16.msrb.mxu3 %v5773_v45  ;;  %777 = vmatpush.bf16.msra.mxu0 %v5917_v51  ;;  %v6436_v45 = vld [vmem:[#allocation7 + $0x340] sm:$0xf] }
  0xbe   :  { %v6116_v51 = vld [vmem:[#allocation7 + $0xc0] sm:$0xf]  ;;  %v6437_v56 = vor.u32 %v8624_v47, %v6436_v45 }
  0xbf   :  { %v6308_v18 = vld [vmem:[#allocation7 + $0x240] sm:$0xf] }
  0xc0   :  { %789 = vmatpush.bf16.msra.mxu1 %v5825_v10  ;;  %803 = vmatpush.bf16.msra.mxu2 %v5953_v28  ;;  %v6596_v32 = vld [vmem:[#allocation7 + $0x480] sm:$0xf] }
  0xc1   :  { %778 = vmatpush.bf16.msra.mxu0 %v5901_v58  ;;  %v6949_v58 = vor.u32 %v8752_v49, %v6948_v48  ;;  %v8656_v45 = vld [vmem:[#allocation7 + $0x45c] sm:$0xf0] }
  0xc2   :  { %v8728_v48 = vld [vmem:[#allocation7 + $0x69c] sm:$0xf0] }
  0xc4   :  { %790 = vmatpush.bf16.msra.mxu1 %v5809_v22  ;;  %804 = vmatpush.bf16.msra.mxu2 %v5937_v41  ;;  %v8768_v22 = vld [vmem:[#allocation7 + $0x7dc] sm:$0xf0] }
  0xc5   :  { %v7013_v33 = vor.u32 %v8768_v22, %v7012_v21  ;;  %v8552_v41 = vld [vmem:[#allocation7 + $0x11c] sm:$0xf0] }
  0xc6   :  { %v6149_v50 = vor.u32 %v8552_v41, %v6148_v39  ;;  %v8628_v41 = vld [vmem:[#allocation7 + $0x384] sm:$0xf] }
  0xc8   :  { %791 = vmatpush.bf16.msra.mxu1 %v5793_v36  ;;  %805 = vmatpush.bf16.msra.mxu2 %v5921_v52  ;;  %v6980_v36 = vld [vmem:[#allocation7 + $0x780] sm:$0xf]  ;;  %v6661_v52 = vor.u32 %v8680_v43, %v6660_v42  ;;  %v6470_v42 = vld [vmem:[#allocation7 + $0x3a0] sm:$0xf0] }
  0xc9   :  { %v6473_v43 = vor.u32 %v8628_v41, %v6470_v42 }
  0xcc   :  { %792 = vmatpush.bf16.msra.mxu1 %v5777_v46  ;;  %806 = vmatpush.bf16.msra.mxu2 %v5905_v60  ;;  %v6981_v46 = vor.u32 %v8760_v37, %v6980_v36  ;;  %v6916_v60 = vld [vmem:[#allocation7 + $0x700] sm:$0xf]  ;;  %v8556_v37 = vld [vmem:[#allocation7 + $0x144] sm:$0xf] }
  0xcd   :  { %v8736_v36 = vld [vmem:[#allocation7 + $0x6dc] sm:$0xf0] }
 0x12c   :  { %v282_v57 = vpop.f32.mrf.mxu1 }
 0x12d   :  { %v283_v63 = vadd.f32 %v282_v57, %v189_v61  ;;  %v6404_v57 = vld [vmem:[#allocation7 + $0x300] sm:$0xf] }
 0x12f   :  { %v301_v5 = vmax.f32 %v283_v63, 0.0  ;;  %v6629_v63 = vor.u32 %v8672_v55, %v6628_v54  ;;  %v6438_v54 = vld [vmem:[#allocation7 + $0x360] sm:$0xf0] }
 0x132   :  { %v296_v62 = vpop.f32.mrf.mxu2 }
 0x133   :  { %v297_v10 = vadd.f32 %v296_v62, %v190_v1  ;;  %v6117_v62 = vor.u32 %v8544_v53, %v6116_v51  ;;  %v6150_v51 = vld [vmem:[#allocation7 + $0x120] sm:$0xf0] }
 0x134   :  { %v284_v0 = vpop.f32.mrf.mxu1 }
 0x135   :  { %v285_v2 = vadd.f32 %v284_v0, %v189_v61  ;;  %v302_v27 = vmax.f32 %v297_v10, 0.0  ;;  %v8744_v61 = vld [vmem:[#allocation7 + $0x71c] sm:$0xf0] }
 0x136   :  { %v6084_v0 = vld [vmem:[#allocation7 + $0x80] sm:$0xf]  ;;  %v6917_v3 = vor.u32 %v8744_v61, %v6916_v60  ;;  %v8540_v61 = vld [vmem:[#allocation7 + $0xc4] sm:$0xf] }
 0x137   :  { %v303_v6 = vmax.f32 %v285_v2, 0.0  ;;  %v6405_v2 = vor.u32 %v8616_v59, %v6404_v57  ;;  %v6340_v10 = vld [vmem:[#allocation7 + $0x280] sm:$0xf] }
 0x138   :  { %v6341_v15 = vor.u32 %v8600_v12, %v6340_v10  ;;  %v8648_v57 = vld [vmem:[#allocation7 + $0x41c] sm:$0xf0]  ;;  %v8532_v10 = vld [vmem:[#allocation7 + $0x84] sm:$0xf] }
 0x139   :  { %v9432_v11 = vpack.c.bf16 %v303_v6, %v301_v5  ;;  %v8608_v5 = vld [vmem:[#allocation7 + $0x2dc] sm:$0xf0]  ;;  %v6086_v12 = vld [vmem:[#allocation7 + $0xa0] sm:$0xf0] }
 0x13a   :  { %v298_v16 = vpop.f32.mrf.mxu2  ;;  %v6373_v9 = vor.u32 %v8608_v5, %v6372_v4  ;;  %v8720_v60 = vld [vmem:[#allocation7 + $0x65c] sm:$0xf0]  ;;  %v6758_v5 = vld [vmem:[#allocation7 + $0x5e0] sm:$0xf0] }
 0x13b   :  { %v299_v19 = vadd.f32 %v298_v16, %v190_v1  ;;  %709 = vmatmul.bf16.vlgmr.msra.gmra.mxu3 %v9432_v11  ;;  %737 = vmatmul.bf16.vlgmr.msrb.gmra.mxu1 %v9432_v11  ;;  %v8536_v1 = vld [vmem:[#allocation7 + $0x9c] sm:$0xf0]  ;;  %v8572_v16 = vld [vmem:[#allocation7 + $0x1c4] sm:$0xf] }
 0x13c   :  { %2379 = vmatpush.bf16.msra.mxu3 %v6245_v8  ;;  %2407 = vmatpush.bf16.msrb.mxu1 %v6757_v14  ;;  %v6085_v6 = vor.u32 %v8536_v1, %v6084_v0  ;;  %v8528_v8 = vld [vmem:[#allocation7 + $0x5c] sm:$0xf0]  ;;  %v6249_v21 = vor.u32 %v8572_v16, %v6246_v17  ;;  %v8612_v1 = vld [vmem:[#allocation7 + $0x304] sm:$0xf] }
 0x13d   :  { %v304_v28 = vmax.f32 %v299_v19, 0.0  ;;  %v6053_v13 = vor.u32 %v8528_v8, %v6052_v7  ;;  %v6020_v14 = vld [vmem:[#allocation7] sm:$0xf]  ;;  %v6726_v16 = vld [vmem:[#allocation7 + $0x5a0] sm:$0xf0] }
 0x13e   :  { %v8592_v19 = vld [vmem:[#allocation7 + $0x25c] sm:$0xf0] }
 0x13f   :  { %v9436_v34 = vpack.c.bf16 %v304_v28, %v302_v27  ;;  %v6309_v22 = vor.u32 %v8592_v19, %v6308_v18  ;;  %v8636_v27 = vld [vmem:[#allocation7 + $0x3c4] sm:$0xf]  ;;  %v6788_v7 = vld [vmem:[#allocation7 + $0x600] sm:$0xf] }
 0x140   :  { %2380 = vmatpush.bf16.msra.mxu3 %v6213_v23  ;;  %2408 = vmatpush.bf16.msrb.mxu1 %v6725_v26  ;;  %v8564_v23 = vld [vmem:[#allocation7 + $0x184] sm:$0xf]  ;;  %v8584_v26 = vld [vmem:[#allocation7 + $0x21c] sm:$0xf0] }
 0x141   :  { %723 = vmatmul.bf16.vlgmr.msrb.gmra.mxu0 %v9436_v34  ;;  %751 = vmatmul.bf16.vlgmr.msrb.gmra.mxu2 %v9436_v34  ;;  %v6502_v28 = vld [vmem:[#allocation7 + $0x3e0] sm:$0xf0]  ;;  %v6217_v29 = vor.u32 %v8564_v23, %v6214_v24  ;;  %v6277_v30 = vor.u32 %v8584_v26, %v6276_v25  ;;  %v8712_v8 = vld [vmem:[#allocation7 + $0x61c] sm:$0xf0] }
 0x142   :  { %2393 = vmatpush.bf16.msrb.mxu0 %v6501_v31  ;;  %2421 = vmatpush.bf16.msrb.mxu2 %v7013_v33  ;;  %v6505_v31 = vor.u32 %v8636_v27, %v6502_v28  ;;  %v8664_v33 = vld [vmem:[#allocation7 + $0x49c] sm:$0xf0]  ;;  %v8764_v19 = vld [vmem:[#allocation7 + $0x7c4] sm:$0xf] }
 0x143   :  { %v6597_v35 = vor.u32 %v8664_v33, %v6596_v32  ;;  %v6054_v23 = vld [vmem:[#allocation7 + $0x60] sm:$0xf0] }
 0x144   :  { %2381 = vmatpush.bf16.msra.mxu3 %v6181_v38  ;;  %2409 = vmatpush.bf16.msrb.mxu1 %v6693_v40  ;;  %v6182_v38 = vld [vmem:[#allocation7 + $0x160] sm:$0xf0] }
 0x145   :  { %v6185_v40 = vor.u32 %v8556_v37, %v6182_v38  ;;  %v8596_v25 = vld [vmem:[#allocation7 + $0x284] sm:$0xf] }
 0x146   :  { %2394 = vmatpush.bf16.msrb.mxu0 %v6469_v44  ;;  %2422 = vmatpush.bf16.msrb.mxu2 %v6981_v46  ;;  %v6564_v44 = vld [vmem:[#allocation7 + $0x440] sm:$0xf]  ;;  %v6342_v26 = vld [vmem:[#allocation7 + $0x2a0] sm:$0xf0] }
 0x147   :  { %v6852_v46 = vld [vmem:[#allocation7 + $0x680] sm:$0xf]  ;;  %v6565_v47 = vor.u32 %v8656_v45, %v6564_v44  ;;  %v8684_v27 = vld [vmem:[#allocation7 + $0x544] sm:$0xf]  ;;  %v6345_v28 = vor.u32 %v8596_v25, %v6342_v26 }
 0x148   :  { %2382 = vmatpush.bf16.msra.mxu3 %v6149_v50  ;;  %2410 = vmatpush.bf16.msrb.mxu1 %v6661_v52  ;;  %v6853_v49 = vor.u32 %v8728_v48, %v6852_v46  ;;  %v8548_v50 = vld [vmem:[#allocation7 + $0x104] sm:$0xf] }
 0x149   :  { %v8620_v52 = vld [vmem:[#allocation7 + $0x344] sm:$0xf]  ;;  %v6153_v53 = vor.u32 %v8548_v50, %v6150_v51 }
 0x14a   :  { %2395 = vmatpush.bf16.msrb.mxu0 %v6437_v56  ;;  %2423 = vmatpush.bf16.msrb.mxu2 %v6949_v58  ;;  %v6441_v55 = vor.u32 %v8620_v52, %v6438_v54  ;;  %v6532_v56 = vld [vmem:[#allocation7 + $0x400] sm:$0xf]  ;;  %v6310_v38 = vld [vmem:[#allocation7 + $0x260] sm:$0xf0] }
 0x14b   :  { %765 = vmatmul.bf16.vlgmr.msrb.gmra.mxu3 %v9432_v11  ;;  %793 = vmatmul.bf16.vlgmr.msra.gmra.mxu1 %v9432_v11  ;;  %v8520_v11 = vld [vmem:[#allocation7 + $0x1c] sm:$0xf0]  ;;  %v6533_v59 = vor.u32 %v8648_v57, %v6532_v56  ;;  %v6950_v44 = vld [vmem:[#allocation7 + $0x760] sm:$0xf0] }
 0x14c   :  { %2383 = vmatpush.bf16.msra.mxu3 %v6117_v62  ;;  %2411 = vmatpush.bf16.msrb.mxu1 %v6629_v63  ;;  %v6021_v20 = vor.u32 %v8520_v11, %v6020_v14  ;;  %v6820_v58 = vld [vmem:[#allocation7 + $0x640] sm:$0xf]  ;;  %v6118_v62 = vld [vmem:[#allocation7 + $0xe0] sm:$0xf0]  ;;  %v6089_v14 = vor.u32 %v8532_v10, %v6086_v12 }
 0x14d   :  { %v6821_v63 = vor.u32 %v8720_v60, %v6820_v58  ;;  %v6121_v0 = vor.u32 %v8540_v61, %v6118_v62  ;;  %v6374_v11 = vld [vmem:[#allocation7 + $0x2e0] sm:$0xf0] }
 0x14e   :  { %2396 = vmatpush.bf16.msrb.mxu0 %v6405_v2  ;;  %2424 = vmatpush.bf16.msrb.mxu2 %v6917_v3  ;;  %v6406_v2 = vld [vmem:[#allocation7 + $0x320] sm:$0xf0] }
 0x14f   :  { %v8700_v3 = vld [vmem:[#allocation7 + $0x5c4] sm:$0xf]  ;;  %v6409_v4 = vor.u32 %v8612_v1, %v6406_v2 }
 0x150   :  { %2384 = vmatpush.bf16.msra.mxu3 %v6085_v6  ;;  %2412 = vmatpush.bf16.msrb.mxu1 %v6597_v35  ;;  %v6761_v6 = vor.u32 %v8700_v3, %v6758_v5  ;;  %v6022_v35 = vld [vmem:[#allocation7 + $0x20] sm:$0xf0] }
 0x151   :  { %779 = vmatmul.bf16.vlgmr.msra.gmra.mxu0 %v9436_v34  ;;  %807 = vmatmul.bf16.vlgmr.msra.gmra.mxu2 %v9436_v34  ;;  %v6884_v34 = vld [vmem:[#allocation7 + $0x6c0] sm:$0xf]  ;;  %v8580_v46 = vld [vmem:[#allocation7 + $0x204] sm:$0xf] }
 0x152   :  { %2397 = vmatpush.bf16.msrb.mxu0 %v6373_v9  ;;  %v6885_v39 = vor.u32 %v8736_v36, %v6884_v34  ;;  %v6789_v9 = vor.u32 %v8712_v8, %v6788_v7  ;;  %v8516_v34 = vld [vmem:[#allocation7 + $0x4] sm:$0xf] }
 0x153   :  { %v8588_v36 = vld [vmem:[#allocation7 + $0x244] sm:$0xf]  ;;  %v6025_v37 = vor.u32 %v8516_v34, %v6022_v35  ;;  %v6220_v35 = vld [vmem:[#allocation7 + $0x188] sm:$0xf] }
 0x154   :  { %2385 = vmatpush.bf16.msra.mxu3 %v6053_v13  ;;  %2425 = vmatpush.bf16.msrb.mxu2 %v6885_v39  ;;  %v8604_v13 = vld [vmem:[#allocation7 + $0x2c4] sm:$0xf]  ;;  %v6313_v41 = vor.u32 %v8588_v36, %v6310_v38 }
 0x155   :  { %2413 = vmatpush.bf16.msrb.mxu1 %v6565_v47  ;;  %v6377_v17 = vor.u32 %v8604_v13, %v6374_v11  ;;  %v8676_v39 = vld [vmem:[#allocation7 + $0x504] sm:$0xf] }
 0x156   :  { %2398 = vmatpush.bf16.msrb.mxu0 %v6341_v15  ;;  %v8692_v15 = vld [vmem:[#allocation7 + $0x584] sm:$0xf] }
 0x157   :  { %v6729_v18 = vor.u32 %v8692_v15, %v6726_v16  ;;  %v6278_v47 = vld [vmem:[#allocation7 + $0x220] sm:$0xf0] }
 0x158   :  { %2386 = vmatpush.bf16.msra.mxu3 %v6021_v20  ;;  %2426 = vmatpush.bf16.msrb.mxu2 %v6853_v49  ;;  %v7014_v20 = vld [vmem:[#allocation7 + $0x7e0] sm:$0xf0]  ;;  %v6281_v49 = vor.u32 %v8580_v46, %v6278_v47 }
 0x159   :  { %2414 = vmatpush.bf16.msrb.mxu1 %v6533_v59  ;;  %v8668_v48 = vld [vmem:[#allocation7 + $0x4c4] sm:$0xf] }
 0x15a   :  { %2399 = vmatpush.bf16.msrb.mxu0 %v6309_v22  ;;  %v8524_v22 = vld [vmem:[#allocation7 + $0x44] sm:$0xf] }
 0x15b   :  { %v6057_v24 = vor.u32 %v8524_v22, %v6054_v23  ;;  %v6630_v50 = vld [vmem:[#allocation7 + $0x4e0] sm:$0xf0] }
 0x15c   :  { %2435 = vmatpush.bf16.msrb.mxu3 %v6249_v21  ;;  %2427 = vmatpush.bf16.msrb.mxu2 %v6821_v63  ;;  %v7017_v21 = vor.u32 %v8764_v19, %v7014_v20  ;;  %v8740_v51 = vld [vmem:[#allocation7 + $0x704] sm:$0xf] }
 0x15d   :  { %2463 = vmatpush.bf16.msra.mxu1 %v6761_v6  ;;  %v6918_v52 = vld [vmem:[#allocation7 + $0x720] sm:$0xf0] }
 0x15e   :  { %2400 = vmatpush.bf16.msrb.mxu0 %v6277_v30  ;;  %v8756_v30 = vld [vmem:[#allocation7 + $0x784] sm:$0xf]  ;;  %v6921_v54 = vor.u32 %v8740_v51, %v6918_v52  ;;  %v8561_v51 = vld [vmem:[#allocation7 + $0x164] sm:$0xf0] }
 0x15f   :  { %v6598_v56 = vld [vmem:[#allocation7 + $0x4a0] sm:$0xf0]  ;;  %v6476_v52 = vld [vmem:[#allocation7 + $0x388] sm:$0xf] }
 0x160   :  { %2436 = vmatpush.bf16.msrb.mxu3 %v6217_v29  ;;  %2428 = vmatpush.bf16.msrb.mxu2 %v6789_v9  ;;  %v6694_v29 = vld [vmem:[#allocation7 + $0x560] sm:$0xf0] }
 0x161   :  { %2464 = vmatpush.bf16.msra.mxu1 %v6729_v18  ;;  %v6697_v32 = vor.u32 %v8684_v27, %v6694_v29  ;;  %v8732_v57 = vld [vmem:[#allocation7 + $0x6c4] sm:$0xf]  ;;  %v6252_v27 = vld [vmem:[#allocation7 + $0x1c8] sm:$0xf] }
 0x162   :  { %2449 = vmatpush.bf16.msra.mxu0 %v6505_v31  ;;  %v6982_v31 = vld [vmem:[#allocation7 + $0x7a0] sm:$0xf0] }
 0x163   :  { %v6985_v33 = vor.u32 %v8756_v30, %v6982_v31  ;;  %v6886_v59 = vld [vmem:[#allocation7 + $0x6e0] sm:$0xf0] }
 0x164   :  { %2437 = vmatpush.bf16.msrb.mxu3 %v6185_v40  ;;  %2477 = vmatpush.bf16.msra.mxu2 %v7017_v21  ;;  %v6662_v40 = vld [vmem:[#allocation7 + $0x520] sm:$0xf0]  ;;  %v6889_v60 = vor.u32 %v8732_v57, %v6886_v59  ;;  %v6156_v59 = vld [vmem:[#allocation7 + $0x108] sm:$0xf] }
 0x165   :  { %2465 = vmatpush.bf16.msra.mxu1 %v6697_v32  ;;  %v6665_v42 = vor.u32 %v8676_v39, %v6662_v40  ;;  %v8652_v61 = vld [vmem:[#allocation7 + $0x444] sm:$0xf]  ;;  %v8569_v39 = vld [vmem:[#allocation7 + $0x1a4] sm:$0xf0] }
 0x166   :  { %2450 = vmatpush.bf16.msra.mxu0 %v6473_v43  ;;  %v8748_v43 = vld [vmem:[#allocation7 + $0x744] sm:$0xf]  ;;  %v6508_v40 = vld [vmem:[#allocation7 + $0x3c8] sm:$0xf]  ;;  %v6221_v47 = vor.u32 %v8569_v39, %v6220_v35 }
 0x167   :  { %v6953_v45 = vor.u32 %v8748_v43, %v6950_v44  ;;  %v6566_v62 = vld [vmem:[#allocation7 + $0x460] sm:$0xf0] }
 0x168   :  { %2438 = vmatpush.bf16.msrb.mxu3 %v6153_v53  ;;  %2478 = vmatpush.bf16.msra.mxu2 %v6985_v33  ;;  %v6633_v53 = vor.u32 %v8668_v48, %v6630_v50  ;;  %v8724_v63 = vld [vmem:[#allocation7 + $0x684] sm:$0xf]  ;;  %v6569_v1 = vor.u32 %v8652_v61, %v6566_v62  ;;  %v6444_v61 = vld [vmem:[#allocation7 + $0x348] sm:$0xf] }
 0x169   :  { %2466 = vmatpush.bf16.msra.mxu1 %v6665_v42  ;;  %v6854_v2 = vld [vmem:[#allocation7 + $0x6a0] sm:$0xf0]  ;;  %v8625_v62 = vld [vmem:[#allocation7 + $0x364] sm:$0xf0] }
 0x16a   :  { %2451 = vmatpush.bf16.msra.mxu0 %v6441_v55  ;;  %v8660_v55 = vld [vmem:[#allocation7 + $0x484] sm:$0xf]  ;;  %v6857_v3 = vor.u32 %v8724_v63, %v6854_v2 }
 0x16b   :  { %v6601_v58 = vor.u32 %v8660_v55, %v6598_v56  ;;  %v6534_v5 = vld [vmem:[#allocation7 + $0x420] sm:$0xf0] }
 0x16c   :  { %2439 = vmatpush.bf16.msrb.mxu3 %v6121_v0  ;;  %2479 = vmatpush.bf16.msra.mxu2 %v6953_v45  ;;  %v8716_v6 = vld [vmem:[#allocation7 + $0x644] sm:$0xf] }
 0x16d   :  { %2467 = vmatpush.bf16.msra.mxu1 %v6633_v53  ;;  %v6822_v8 = vld [vmem:[#allocation7 + $0x660] sm:$0xf0]  ;;  %v8633_v53 = vld [vmem:[#allocation7 + $0x3a4] sm:$0xf0] }
 0x16e   :  { %2452 = vmatpush.bf16.msra.mxu0 %v6409_v4  ;;  %v8644_v4 = vld [vmem:[#allocation7 + $0x404] sm:$0xf]  ;;  %v6825_v13 = vor.u32 %v8716_v6, %v6822_v8  ;;  %v6124_v6 = vld [vmem:[#allocation7 + $0xc8] sm:$0xf] }
 0x16f   :  { %v6537_v7 = vor.u32 %v8644_v4, %v6534_v5  ;;  %v9447_v9 = vld [vmem:[%s9740_s1 + $0x3] sm:$0xf]  ;;  %v6445_v5 = vor.u32 %v8625_v62, %v6444_v61  ;;  %v8573_v61 = vld [vmem:[#allocation7 + $0x1cc] sm:$0xf] }
 0x170   :  { %2440 = vmatpush.bf16.msrb.mxu3 %v6089_v14  ;;  %2480 = vmatpush.bf16.msra.mxu2 %v6921_v54  ;;  %v373_v14 = vperm.slane %v9447_v9, 0  ;;  %v8708_v11 = vld [vmem:[#allocation7 + $0x604] sm:$0xf]  ;;  %v374_v20 = vperm.slane %v9447_v9, 1  ;;  %v375_v46 = vperm.slane %v9447_v9, 2  ;;  %v376_v55 = vperm.slane %v9447_v9, 3 }
 0x171   :  { %2468 = vmatpush.bf16.msra.mxu1 %v6601_v58  ;;  %v6790_v15 = vld [vmem:[#allocation7 + $0x620] sm:$0xf0]  ;;  %v6477_v58 = vor.u32 %v8633_v53, %v6476_v52  ;;  %v8545_v9 = vld [vmem:[#allocation7 + $0xe4] sm:$0xf0]  ;;  %v6254_v62 = vld [vmem:[#allocation7 + $0x1e8] sm:$0xf0] }
 0x172   :  { %2453 = vmatpush.bf16.msra.mxu0 %v6377_v17  ;;  %v6793_v16 = vor.u32 %v8708_v11, %v6790_v15  ;;  %v8521_v52 = vld [vmem:[#allocation7 + $0x24] sm:$0xf0] }
 0x174   :  { %2441 = vmatpush.bf16.msrb.mxu3 %v6057_v24  ;;  %2481 = vmatpush.bf16.msra.mxu2 %v6889_v60  ;;  %v8553_v60 = vld [vmem:[#allocation7 + $0x124] sm:$0xf0] }
 0x175   :  { %2469 = vmatpush.bf16.msra.mxu1 %v6569_v1  ;;  %v6157_v4 = vor.u32 %v8553_v60, %v6156_v59  ;;  %v6956_v59 = vld [vmem:[#allocation7 + $0x748] sm:$0xf] }
 0x176   :  { %2454 = vmatpush.bf16.msra.mxu0 %v6345_v28  ;;  %v8577_v28 = vld [vmem:[#allocation7 + $0x1e4] sm:$0xf0] }
 0x177   :  { %v6253_v34 = vor.u32 %v8577_v28, %v6252_v27  ;;  %v8609_v27 = vld [vmem:[#allocation7 + $0x2e4] sm:$0xf0] }
 0x178   :  { %2442 = vmatpush.bf16.msrb.mxu3 %v6025_v37  ;;  %2482 = vmatpush.bf16.msra.mxu2 %v6857_v3  ;;  %v6732_v28 = vld [vmem:[#allocation7 + $0x588] sm:$0xf] }
 0x179   :  { %2470 = vmatpush.bf16.msra.mxu1 %v6537_v7  ;;  %v8753_v60 = vld [vmem:[#allocation7 + $0x764] sm:$0xf0] }
 0x17a   :  { %2455 = vmatpush.bf16.msra.mxu0 %v6313_v41  ;;  %v8641_v41 = vld [vmem:[#allocation7 + $0x3e4] sm:$0xf0] }
 0x17b   :  { %v6509_v48 = vor.u32 %v8641_v41, %v6508_v40 }
 0x17c   :  { %2483 = vmatpush.bf16.msra.mxu2 %v6825_v13  ;;  %v6764_v13 = vld [vmem:[#allocation7 + $0x5c8] sm:$0xf] }
 0x17e   :  { %2456 = vmatpush.bf16.msra.mxu0 %v6281_v49  ;;  %v6188_v49 = vld [vmem:[#allocation7 + $0x148] sm:$0xf] }
 0x17f   :  { %v6189_v57 = vor.u32 %v8561_v51, %v6188_v49  ;;  %v6028_v51 = vld [vmem:[#allocation7 + $0x8] sm:$0xf] }
 0x180   :  { %2484 = vmatpush.bf16.msra.mxu2 %v6793_v16 }
 0x1b8   :  { %v738_v0 = vpop.f32.mrf.mxu1 }
 0x1b9   :  { %v739_v25 = vadd.f32 %v738_v0, %v374_v20 }
 0x1be   :  { %v710_v10 = vpop.f32.mrf.mxu3  ;;  %v724_v12 = vpop.f32.mrf.mxu0 }
 0x1bf   :  { %v711_v17 = vadd.f32 %v710_v10, %v373_v14  ;;  %v6412_v10 = vld [vmem:[#allocation7 + $0x308] sm:$0xf] }
 0x1c0   :  { %v740_v18 = vpop.f32.mrf.mxu1 }
 0x1c1   :  { %v725_v23 = vadd.f32 %v724_v12, %v711_v17  ;;  %v741_v30 = vadd.f32 %v740_v18, %v374_v20  ;;  %v8617_v12 = vld [vmem:[#allocation7 + $0x324] sm:$0xf0] }
 0x1c2   :  { %v6413_v20 = vor.u32 %v8617_v12, %v6412_v10  ;;  %v8565_v10 = vld [vmem:[#allocation7 + $0x18c] sm:$0xf] }
 0x1c3   :  { %v813_v29 = vmax.f32 %v725_v23, 0.0  ;;  %v6222_v12 = vld [vmem:[#allocation7 + $0x1a8] sm:$0xf0] }
 0x1c4   :  { %v752_v19 = vpop.f32.mrf.mxu2 }
 0x1c5   :  { %v753_v31 = vadd.f32 %v752_v19, %v739_v25  ;;  %v6125_v19 = vor.u32 %v8545_v9, %v6124_v6  ;;  %v8673_v6 = vld [vmem:[#allocation7 + $0x4e4] sm:$0xf0] }
 0x1c6   :  { %v712_v21 = vpop.f32.mrf.mxu3  ;;  %v726_v22 = vpop.f32.mrf.mxu0  ;;  %v8745_v9 = vld [vmem:[#allocation7 + $0x724] sm:$0xf0] }
 0x1c7   :  { %v713_v24 = vadd.f32 %v712_v21, %v373_v14  ;;  %v814_v44 = vmax.f32 %v753_v31, 0.0  ;;  %v8705_v14 = vld [vmem:[#allocation7 + $0x5e4] sm:$0xf0] }
 0x1c8   :  { %v794_v37 = vpop.f32.mrf.mxu1  ;;  %v6092_v21 = vld [vmem:[#allocation7 + $0x88] sm:$0xf]  ;;  %v6765_v25 = vor.u32 %v8705_v14, %v6764_v13  ;;  %v8637_v13 = vld [vmem:[#allocation7 + $0x3cc] sm:$0xf] }
 0x1c9   :  { %v727_v26 = vadd.f32 %v726_v22, %v713_v24  ;;  %v795_v7 = vadd.f32 %v794_v37, %v376_v55  ;;  %v8537_v22 = vld [vmem:[#allocation7 + $0xa4] sm:$0xf0]  ;;  %v6510_v14 = vld [vmem:[#allocation7 + $0x3e8] sm:$0xf0] }
 0x1ca   :  { %v8769_v31 = vld [vmem:[#allocation7 + $0x7e4] sm:$0xf0] }
 0x1cb   :  { %v817_v32 = vmax.f32 %v727_v26, 0.0  ;;  %v6380_v26 = vld [vmem:[#allocation7 + $0x2c8] sm:$0xf] }
 0x1cc   :  { %v754_v33 = vpop.f32.mrf.mxu2  ;;  %v6381_v35 = vor.u32 %v8609_v27, %v6380_v26  ;;  %v6060_v37 = vld [vmem:[#allocation7 + $0x48] sm:$0xf]  ;;  %v8629_v26 = vld [vmem:[#allocation7 + $0x38c] sm:$0xf] }
 0x1cd   :  { %v9451_v36 = vpack.c.bf16 %v817_v32, %v813_v29  ;;  %v755_v38 = vadd.f32 %v754_v33, %v741_v30  ;;  %v8697_v29 = vld [vmem:[#allocation7 + $0x5a4] sm:$0xf0]  ;;  %v6478_v27 = vld [vmem:[#allocation7 + $0x3a8] sm:$0xf0] }
 0x1ce   :  { %v766_v42 = vpop.f32.mrf.mxu3  ;;  %v780_v43 = vpop.f32.mrf.mxu0  ;;  %v7020_v30 = vld [vmem:[#allocation7 + $0x7c8] sm:$0xf]  ;;  %v6733_v40 = vor.u32 %v8697_v29, %v6732_v28 }
 0x1cf   :  { %v818_v45 = vmax.f32 %v755_v38, 0.0  ;;  %2387 = vmatmul.bf16.vlgmr.msra.gmra.mxu3 %v9451_v36  ;;  %v767_v54 = vadd.f32 %v766_v42, %v375_v46  ;;  %v8529_v38 = vld [vmem:[#allocation7 + $0x64] sm:$0xf0]  ;;  %v7021_v41 = vor.u32 %v8769_v31, %v7020_v30 }
 0x1d0   :  { %2491 = vmatpush.bf16.msra.mxu3 %v6253_v34  ;;  %v796_v2 = vpop.f32.mrf.mxu1  ;;  %v6093_v34 = vor.u32 %v8537_v22, %v6092_v21  ;;  %v6348_v42 = vld [vmem:[#allocation7 + $0x288] sm:$0xf] }
 0x1d1   :  { %v9455_v50 = vpack.c.bf16 %v818_v45, %v814_v44  ;;  %v781_v0 = vadd.f32 %v780_v43, %v767_v54  ;;  %v797_v15 = vadd.f32 %v796_v2, %v376_v55  ;;  %v8601_v43 = vld [vmem:[#allocation7 + $0x2a4] sm:$0xf0] }
 0x1d2   :  { %v6700_v44 = vld [vmem:[#allocation7 + $0x548] sm:$0xf]  ;;  %v6349_v49 = vor.u32 %v8601_v43, %v6348_v42 }
 0x1d3   :  { %2401 = vmatmul.bf16.vlgmr.msrb.gmra.mxu0 %v9455_v50  ;;  %v815_v11 = vmax.f32 %v781_v0, 0.0  ;;  %v8689_v45 = vld [vmem:[#allocation7 + $0x564] sm:$0xf0] }
 0x1d4   :  { %2492 = vmatpush.bf16.msra.mxu3 %v6221_v47  ;;  %2505 = vmatpush.bf16.msrb.mxu0 %v6509_v48  ;;  %v808_v56 = vpop.f32.mrf.mxu2  ;;  %v8761_v47 = vld [vmem:[#allocation7 + $0x7a4] sm:$0xf0]  ;;  %v6061_v48 = vor.u32 %v8529_v38, %v6060_v37  ;;  %v6701_v53 = vor.u32 %v8689_v45, %v6700_v44  ;;  %v8549_v37 = vld [vmem:[#allocation7 + $0x10c] sm:$0xf] }
 0x1d5   :  { %v809_v16 = vadd.f32 %v808_v56, %v795_v7  ;;  %v6316_v55 = vld [vmem:[#allocation7 + $0x248] sm:$0xf]  ;;  %v6257_v7 = vor.u32 %v8573_v61, %v6254_v62  ;;  %v6158_v38 = vld [vmem:[#allocation7 + $0x128] sm:$0xf0] }
 0x1d6   :  { %v768_v63 = vpop.f32.mrf.mxu3  ;;  %v782_v3 = vpop.f32.mrf.mxu0  ;;  %v8593_v56 = vld [vmem:[#allocation7 + $0x264] sm:$0xf0] }
 0x1d7   :  { %v769_v1 = vadd.f32 %v768_v63, %v375_v46  ;;  %v816_v32 = vmax.f32 %v809_v16, 0.0  ;;  %v6988_v46 = vld [vmem:[#allocation7 + $0x788] sm:$0xf]  ;;  %v6029_v63 = vor.u32 %v8521_v52, %v6028_v51  ;;  %v6317_v0 = vor.u32 %v8593_v56, %v6316_v55  ;;  %v8541_v51 = vld [vmem:[#allocation7 + $0xcc] sm:$0xf] }
 0x1d8   :  { %2493 = vmatpush.bf16.msra.mxu3 %v6189_v57  ;;  %2506 = vmatpush.bf16.msrb.mxu0 %v6477_v58  ;;  %v6989_v54 = vor.u32 %v8761_v47, %v6988_v46  ;;  %v6668_v57 = vld [vmem:[#allocation7 + $0x508] sm:$0xf]  ;;  %v6161_v46 = vor.u32 %v8549_v37, %v6158_v38  ;;  %v6126_v52 = vld [vmem:[#allocation7 + $0xe8] sm:$0xf0] }
 0x1d9   :  { %v783_v8 = vadd.f32 %v782_v3, %v769_v1  ;;  %v8681_v58 = vld [vmem:[#allocation7 + $0x524] sm:$0xf0]  ;;  %v6957_v3 = vor.u32 %v8753_v60, %v6956_v59  ;;  %v8701_v55 = vld [vmem:[#allocation7 + $0x5cc] sm:$0xf]  ;;  %v6129_v60 = vor.u32 %v8541_v51, %v6126_v52  ;;  %v8570_v51 = vld [vmem:[#allocation7 + $0x1ac] sm:$0xf0] }
 0x1da   :  { %v6284_v1 = vld [vmem:[#allocation7 + $0x208] sm:$0xf]  ;;  %v6669_v2 = vor.u32 %v8681_v58, %v6668_v57  ;;  %v6766_v56 = vld [vmem:[#allocation7 + $0x5e8] sm:$0xf0]  ;;  %v6516_v52 = vld [vmem:[#allocation7 + $0x3d0] sm:$0xf] }
 0x1db   :  { %v819_v17 = vmax.f32 %v783_v8, 0.0  ;;  %v6924_v8 = vld [vmem:[#allocation7 + $0x708] sm:$0xf] }
 0x1dc   :  { %2494 = vmatpush.bf16.msra.mxu3 %v6157_v4  ;;  %2507 = vmatpush.bf16.msrb.mxu0 %v6445_v5  ;;  %v810_v18 = vpop.f32.mrf.mxu2  ;;  %v8585_v4 = vld [vmem:[#allocation7 + $0x224] sm:$0xf0]  ;;  %v6925_v16 = vor.u32 %v8745_v9, %v6924_v8 }
 0x1dd   :  { %v9459_v23 = vpack.c.bf16 %v819_v17, %v815_v11  ;;  %v811_v24 = vadd.f32 %v810_v18, %v797_v15  ;;  %v6636_v5 = vld [vmem:[#allocation7 + $0x4c8] sm:$0xf]  ;;  %v6285_v11 = vor.u32 %v8585_v4, %v6284_v1  ;;  %v6769_v1 = vor.u32 %v8701_v55, %v6766_v56  ;;  %v8693_v4 = vld [vmem:[#allocation7 + $0x58c] sm:$0xf] }
 0x1de   :  { %v6637_v15 = vor.u32 %v8673_v6, %v6636_v5  ;;  %v6604_v17 = vld [vmem:[#allocation7 + $0x488] sm:$0xf]  ;;  %v6734_v5 = vld [vmem:[#allocation7 + $0x5a8] sm:$0xf0] }
 0x1df   :  { %v820_v33 = vmax.f32 %v811_v24, 0.0  ;;  %2415 = vmatmul.bf16.vlgmr.msrb.gmra.mxu1 %v9459_v23  ;;  %2443 = vmatmul.bf16.vlgmr.msrb.gmra.mxu3 %v9451_v36  ;;  %v8665_v18 = vld [vmem:[#allocation7 + $0x4a4] sm:$0xf0]  ;;  %v8557_v24 = vld [vmem:[#allocation7 + $0x14c] sm:$0xf] }
 0x1e0   :  { %2495 = vmatpush.bf16.msra.mxu3 %v6125_v19  ;;  %2508 = vmatpush.bf16.msrb.mxu0 %v6413_v20  ;;  %v6225_v19 = vor.u32 %v8565_v10, %v6222_v12  ;;  %v6513_v20 = vor.u32 %v8637_v13, %v6510_v14  ;;  %v6892_v21 = vld [vmem:[#allocation7 + $0x6c8] sm:$0xf]  ;;  %v6605_v28 = vor.u32 %v8665_v18, %v6604_v17  ;;  %v8765_v6 = vld [vmem:[#allocation7 + $0x7cc] sm:$0xf] }
 0x1e1   :  { %v9463_v39 = vpack.c.bf16 %v820_v33, %v816_v32  ;;  %2519 = vmatpush.bf16.msrb.mxu1 %v6765_v25  ;;  %v8737_v22 = vld [vmem:[#allocation7 + $0x6e4] sm:$0xf0]  ;;  %v6190_v25 = vld [vmem:[#allocation7 + $0x168] sm:$0xf0]  ;;  %v6481_v33 = vor.u32 %v8629_v26, %v6478_v27  ;;  %v6737_v14 = vor.u32 %v8693_v4, %v6734_v5 }
 0x1e2   :  { %v6893_v29 = vor.u32 %v8737_v22, %v6892_v21  ;;  %v6572_v30 = vld [vmem:[#allocation7 + $0x448] sm:$0xf]  ;;  %v6193_v32 = vor.u32 %v8557_v24, %v6190_v25  ;;  %v8525_v12 = vld [vmem:[#allocation7 + $0x4c] sm:$0xf] }
 0x1e3   :  { %2429 = vmatmul.bf16.vlgmr.msrb.gmra.mxu2 %v9463_v39  ;;  %2457 = vmatmul.bf16.vlgmr.msra.gmra.mxu0 %v9455_v50  ;;  %v8657_v31 = vld [vmem:[#allocation7 + $0x464] sm:$0xf0]  ;;  %v6062_v13 = vld [vmem:[#allocation7 + $0x68] sm:$0xf0] }
 0x1e4   :  { %2496 = vmatpush.bf16.msra.mxu3 %v6093_v34  ;;  %2509 = vmatpush.bf16.msrb.mxu0 %v6381_v35  ;;  %v6860_v34 = vld [vmem:[#allocation7 + $0x688] sm:$0xf]  ;;  %v6573_v42 = vor.u32 %v8657_v31, %v6572_v30  ;;  %v8685_v17 = vld [vmem:[#allocation7 + $0x54c] sm:$0xf]  ;;  %v6065_v21 = vor.u32 %v8525_v12, %v6062_v13  ;;  %v6164_v12 = vld [vmem:[#allocation7 + $0x110] sm:$0xf] }
 0x1e5   :  { %2520 = vmatpush.bf16.msrb.mxu1 %v6733_v40  ;;  %2533 = vmatpush.bf16.msrb.mxu2 %v7021_v41  ;;  %v8729_v35 = vld [vmem:[#allocation7 + $0x6a4] sm:$0xf0]  ;;  %v8621_v40 = vld [vmem:[#allocation7 + $0x34c] sm:$0xf]  ;;  %v8554_v13 = vld [vmem:[#allocation7 + $0x12c] sm:$0xf0] }
 0x1e6   :  { %v6446_v41 = vld [vmem:[#allocation7 + $0x368] sm:$0xf0]  ;;  %v6861_v43 = vor.u32 %v8729_v35, %v6860_v34  ;;  %v6540_v44 = vld [vmem:[#allocation7 + $0x408] sm:$0xf]  ;;  %v6260_v34 = vld [vmem:[#allocation7 + $0x1d0] sm:$0xf] }
 0x1e7   :  { %v8649_v45 = vld [vmem:[#allocation7 + $0x424] sm:$0xf0]  ;;  %v6449_v47 = vor.u32 %v8621_v40, %v6446_v41  ;;  %v6702_v18 = vld [vmem:[#allocation7 + $0x568] sm:$0xf0]  ;;  %v8578_v35 = vld [vmem:[#allocation7 + $0x1ec] sm:$0xf0] }
 0x1e8   :  { %2497 = vmatpush.bf16.msra.mxu3 %v6061_v48  ;;  %2510 = vmatpush.bf16.msrb.mxu0 %v6349_v49  ;;  %v6828_v48 = vld [vmem:[#allocation7 + $0x648] sm:$0xf]  ;;  %v6541_v57 = vor.u32 %v8649_v45, %v6540_v44  ;;  %v8517_v24 = vld [vmem:[#allocation7 + $0xc] sm:$0xf]  ;;  %v6705_v26 = vor.u32 %v8685_v17, %v6702_v18 }
 0x1e9   :  { %2521 = vmatpush.bf16.msrb.mxu1 %v6701_v53  ;;  %2534 = vmatpush.bf16.msrb.mxu2 %v6989_v54  ;;  %v8721_v49 = vld [vmem:[#allocation7 + $0x664] sm:$0xf0]  ;;  %v8613_v53 = vld [vmem:[#allocation7 + $0x30c] sm:$0xf] }
 0x1ea   :  { %v6414_v54 = vld [vmem:[#allocation7 + $0x328] sm:$0xf0]  ;;  %v6829_v58 = vor.u32 %v8721_v49, %v6828_v48  ;;  %v6796_v59 = vld [vmem:[#allocation7 + $0x608] sm:$0xf]  ;;  %v6228_v49 = vld [vmem:[#allocation7 + $0x190] sm:$0xf] }
 0x1eb   :  { %v6417_v61 = vor.u32 %v8613_v53, %v6414_v54  ;;  %v8713_v62 = vld [vmem:[#allocation7 + $0x624] sm:$0xf0]  ;;  %v6030_v25 = vld [vmem:[#allocation7 + $0x28] sm:$0xf0]  ;;  %v8642_v53 = vld [vmem:[#allocation7 + $0x3ec] sm:$0xf0] }
 0x1ec   :  { %2498 = vmatpush.bf16.msra.mxu3 %v6029_v63  ;;  %2511 = vmatpush.bf16.msrb.mxu0 %v6317_v0  ;;  %v8533_v63 = vld [vmem:[#allocation7 + $0x8c] sm:$0xf]  ;;  %v6797_v8 = vor.u32 %v8713_v62, %v6796_v59  ;;  %v6033_v37 = vor.u32 %v8517_v24, %v6030_v25  ;;  %v6229_v59 = vor.u32 %v8570_v51, %v6228_v49  ;;  %v6132_v24 = vld [vmem:[#allocation7 + $0xd0] sm:$0xf] }
 0x1ed   :  { %2522 = vmatpush.bf16.msrb.mxu1 %v6669_v2  ;;  %2535 = vmatpush.bf16.msrb.mxu2 %v6957_v3  ;;  %v6094_v0 = vld [vmem:[#allocation7 + $0xa8] sm:$0xf0]  ;;  %v8546_v25 = vld [vmem:[#allocation7 + $0xec] sm:$0xf0] }
 0x1ee   :  { %v8605_v2 = vld [vmem:[#allocation7 + $0x2cc] sm:$0xf]  ;;  %v6097_v9 = vor.u32 %v8533_v63, %v6094_v0  ;;  %v6196_v63 = vld [vmem:[#allocation7 + $0x150] sm:$0xf] }
 0x1ef   :  { %2471 = vmatmul.bf16.vlgmr.msra.gmra.mxu1 %v9459_v23  ;;  %2499 = vmatmul.bf16.vlgmr.msra.gmra.mxu3 %v9451_v36  ;;  %v6382_v3 = vld [vmem:[#allocation7 + $0x2e8] sm:$0xf0]  ;;  %v8562_v0 = vld [vmem:[#allocation7 + $0x16c] sm:$0xf0] }
 0x1f0   :  { %2547 = vmatpush.bf16.msrb.mxu3 %v6257_v7  ;;  %2512 = vmatpush.bf16.msrb.mxu0 %v6285_v11  ;;  %v7022_v7 = vld [vmem:[#allocation7 + $0x7e8] sm:$0xf0]  ;;  %v6385_v10 = vor.u32 %v8605_v2, %v6382_v3  ;;  %v8634_v2 = vld [vmem:[#allocation7 + $0x3ac] sm:$0xf0] }
 0x1f1   :  { %2523 = vmatpush.bf16.msrb.mxu1 %v6637_v15  ;;  %2536 = vmatpush.bf16.msrb.mxu2 %v6925_v16  ;;  %v7025_v11 = vor.u32 %v8765_v6, %v7022_v7  ;;  %v8597_v15 = vld [vmem:[#allocation7 + $0x28c] sm:$0xf]  ;;  %v6197_v7 = vor.u32 %v8562_v0, %v6196_v63  ;;  %v6068_v51 = vld [vmem:[#allocation7 + $0x50] sm:$0xf] }
 0x1f2   :  { %v6350_v16 = vld [vmem:[#allocation7 + $0x2a8] sm:$0xf0]  ;;  %v6036_v63 = vld [vmem:[#allocation7 + $0x10] sm:$0xf] }
 0x1f3   :  { %2485 = vmatmul.bf16.vlgmr.msra.gmra.mxu2 %v9463_v39  ;;  %2513 = vmatmul.bf16.vlgmr.msrb.gmra.mxu0 %v9455_v50  ;;  %v6353_v22 = vor.u32 %v8597_v15, %v6350_v16  ;;  %v8677_v30 = vld [vmem:[#allocation7 + $0x50c] sm:$0xf]  ;;  %v8522_v0 = vld [vmem:[#allocation7 + $0x2c] sm:$0xf0] }
 0x1f4   :  { %2548 = vmatpush.bf16.msrb.mxu3 %v6225_v19  ;;  %2561 = vmatpush.bf16.msra.mxu0 %v6513_v20  ;;  %v8757_v19 = vld [vmem:[#allocation7 + $0x78c] sm:$0xf] }
 0x1f5   :  { %2524 = vmatpush.bf16.msrb.mxu1 %v6605_v28  ;;  %2537 = vmatpush.bf16.msrb.mxu2 %v6893_v29  ;;  %v6990_v20 = vld [vmem:[#allocation7 + $0x7a8] sm:$0xf0] }
 0x1f6   :  { %v6993_v27 = vor.u32 %v8757_v19, %v6990_v20  ;;  %v8589_v28 = vld [vmem:[#allocation7 + $0x24c] sm:$0xf]  ;;  %v6165_v19 = vor.u32 %v8554_v13, %v6164_v12  ;;  %v6037_v12 = vor.u32 %v8522_v0, %v6036_v63  ;;  %v8542_v63 = vld [vmem:[#allocation7 + $0xd4] sm:$0xf] }
 0x1f7   :  { %v6318_v29 = vld [vmem:[#allocation7 + $0x268] sm:$0xf0]  ;;  %v6134_v0 = vld [vmem:[#allocation7 + $0xf0] sm:$0xf0] }
 0x1f8   :  { %2549 = vmatpush.bf16.msrb.mxu3 %v6193_v32  ;;  %2562 = vmatpush.bf16.msra.mxu0 %v6481_v33  ;;  %v6670_v31 = vld [vmem:[#allocation7 + $0x528] sm:$0xf0]  ;;  %v6321_v38 = vor.u32 %v8589_v28, %v6318_v29  ;;  %v6772_v28 = vld [vmem:[#allocation7 + $0x5d0] sm:$0xf] }
 0x1f9   :  { %2525 = vmatpush.bf16.msrb.mxu1 %v6573_v42  ;;  %2538 = vmatpush.bf16.msrb.mxu2 %v6861_v43  ;;  %v8749_v32 = vld [vmem:[#allocation7 + $0x74c] sm:$0xf]  ;;  %v6673_v41 = vor.u32 %v8677_v30, %v6670_v31  ;;  %v8706_v29 = vld [vmem:[#allocation7 + $0x5ec] sm:$0xf0] }
 0x1fa   :  { %v6958_v33 = vld [vmem:[#allocation7 + $0x768] sm:$0xf0] }
 0x1fb   :  { %v8581_v40 = vld [vmem:[#allocation7 + $0x20c] sm:$0xf]  ;;  %v6961_v42 = vor.u32 %v8749_v32, %v6958_v33  ;;  %v6133_v33 = vor.u32 %v8546_v25, %v6132_v24  ;;  %v6230_v24 = vld [vmem:[#allocation7 + $0x1b0] sm:$0xf0] }
 0x1fc   :  { %2550 = vmatpush.bf16.msrb.mxu3 %v6161_v46  ;;  %2563 = vmatpush.bf16.msra.mxu0 %v6449_v47  ;;  %v6286_v43 = vld [vmem:[#allocation7 + $0x228] sm:$0xf0]  ;;  %v6261_v46 = vor.u32 %v8578_v35, %v6260_v34  ;;  %v8638_v25 = vld [vmem:[#allocation7 + $0x3d4] sm:$0xf] }
 0x1fd   :  { %2526 = vmatpush.bf16.msrb.mxu1 %v6541_v57  ;;  %2539 = vmatpush.bf16.msrb.mxu2 %v6829_v58  ;;  %v8669_v44 = vld [vmem:[#allocation7 + $0x4cc] sm:$0xf]  ;;  %v6289_v54 = vor.u32 %v8581_v40, %v6286_v43  ;;  %v6773_v40 = vor.u32 %v8706_v29, %v6772_v28  ;;  %v6740_v43 = vld [vmem:[#allocation7 + $0x590] sm:$0xf] }
 0x1fe   :  { %v6638_v45 = vld [vmem:[#allocation7 + $0x4e8] sm:$0xf0] }
 0x1ff   :  { %v8741_v47 = vld [vmem:[#allocation7 + $0x70c] sm:$0xf]  ;;  %v6641_v55 = vor.u32 %v8669_v44, %v6638_v45  ;;  %v8698_v44 = vld [vmem:[#allocation7 + $0x5ac] sm:$0xf0] }
 0x200   :  { %2551 = vmatpush.bf16.msrb.mxu3 %v6129_v60  ;;  %2564 = vmatpush.bf16.msra.mxu0 %v6417_v61  ;;  %v6926_v48 = vld [vmem:[#allocation7 + $0x728] sm:$0xf0]  ;;  %v6517_v60 = vor.u32 %v8642_v53, %v6516_v52  ;;  %v7028_v45 = vld [vmem:[#allocation7 + $0x7d0] sm:$0xf]  ;;  %v6741_v53 = vor.u32 %v8698_v44, %v6740_v43 }
 0x201   :  { %2575 = vmatpush.bf16.msra.mxu1 %v6769_v1  ;;  %2540 = vmatpush.bf16.msrb.mxu2 %v6797_v8  ;;  %v6929_v56 = vor.u32 %v8741_v47, %v6926_v48  ;;  %v8661_v57 = vld [vmem:[#allocation7 + $0x48c] sm:$0xf]  ;;  %v6484_v1 = vld [vmem:[#allocation7 + $0x390] sm:$0xf] }
 0x202   :  { %2527 = vmatmul.bf16.vlgmr.msrb.gmra.mxu1 %v9459_v23  ;;  %v6606_v58 = vld [vmem:[#allocation7 + $0x4a8] sm:$0xf0]  ;;  %v6485_v8 = vor.u32 %v8634_v2, %v6484_v1  ;;  %v8530_v52 = vld [vmem:[#allocation7 + $0x6c] sm:$0xf0] }
 0x203   :  { %v8733_v61 = vld [vmem:[#allocation7 + $0x6cc] sm:$0xf]  ;;  %v6609_v3 = vor.u32 %v8661_v57, %v6606_v58  ;;  %v6708_v57 = vld [vmem:[#allocation7 + $0x550] sm:$0xf] }
 0x204   :  { %2552 = vmatpush.bf16.msrb.mxu3 %v6097_v9  ;;  %2565 = vmatpush.bf16.msra.mxu0 %v6385_v10  ;;  %v6894_v62 = vld [vmem:[#allocation7 + $0x6e8] sm:$0xf0]  ;;  %v8690_v58 = vld [vmem:[#allocation7 + $0x56c] sm:$0xf0] }
 0x205   :  { %2576 = vmatpush.bf16.msra.mxu1 %v6737_v14  ;;  %2589 = vmatpush.bf16.msra.mxu2 %v7025_v11  ;;  %v6897_v4 = vor.u32 %v8733_v61, %v6894_v62  ;;  %v8653_v5 = vld [vmem:[#allocation7 + $0x44c] sm:$0xf]  ;;  %v6452_v14 = vld [vmem:[#allocation7 + $0x350] sm:$0xf]  ;;  %v6069_v61 = vor.u32 %v8530_v52, %v6068_v51  ;;  %v6709_v1 = vor.u32 %v8690_v58, %v6708_v57  ;;  %v8550_v51 = vld [vmem:[#allocation7 + $0x114] sm:$0xf] }
 0x206   :  { %2541 = vmatmul.bf16.vlgmr.msrb.gmra.mxu2 %v9463_v39  ;;  %v6574_v6 = vld [vmem:[#allocation7 + $0x468] sm:$0xf0]  ;;  %v8626_v11 = vld [vmem:[#allocation7 + $0x36c] sm:$0xf0]  ;;  %v6166_v52 = vld [vmem:[#allocation7 + $0x130] sm:$0xf0] }
 0x207   :  { %v8725_v9 = vld [vmem:[#allocation7 + $0x68c] sm:$0xf]  ;;  %v6577_v15 = vor.u32 %v8653_v5, %v6574_v6  ;;  %v6453_v20 = vor.u32 %v8626_v11, %v6452_v14  ;;  %v6676_v5 = vld [vmem:[#allocation7 + $0x510] sm:$0xf] }
 0x208   :  { %2553 = vmatpush.bf16.msrb.mxu3 %v6065_v21  ;;  %2566 = vmatpush.bf16.msra.mxu0 %v6353_v22  ;;  %v6862_v10 = vld [vmem:[#allocation7 + $0x6a8] sm:$0xf0]  ;;  %v8682_v6 = vld [vmem:[#allocation7 + $0x52c] sm:$0xf0] }
 0x209   :  { %2577 = vmatpush.bf16.msra.mxu1 %v6705_v26  ;;  %2590 = vmatpush.bf16.msra.mxu2 %v6993_v27  ;;  %v6865_v16 = vor.u32 %v8725_v9, %v6862_v10  ;;  %v8645_v17 = vld [vmem:[#allocation7 + $0x40c] sm:$0xf]  ;;  %v6420_v26 = vld [vmem:[#allocation7 + $0x310] sm:$0xf]  ;;  %v8574_v9 = vld [vmem:[#allocation7 + $0x1d4] sm:$0xf]  ;;  %v6677_v11 = vor.u32 %v8682_v6, %v6676_v5 }
 0x20a   :  { %v6542_v18 = vld [vmem:[#allocation7 + $0x428] sm:$0xf0]  ;;  %v8618_v27 = vld [vmem:[#allocation7 + $0x32c] sm:$0xf0]  ;;  %v6262_v10 = vld [vmem:[#allocation7 + $0x1f0] sm:$0xf0] }
 0x20b   :  { %v8717_v21 = vld [vmem:[#allocation7 + $0x64c] sm:$0xf]  ;;  %v6545_v30 = vor.u32 %v8645_v17, %v6542_v18  ;;  %v6421_v34 = vor.u32 %v8618_v27, %v6420_v26  ;;  %v6292_v14 = vld [vmem:[#allocation7 + $0x210] sm:$0xf]  ;;  %v6518_v26 = vld [vmem:[#allocation7 + $0x3f0] sm:$0xf0] }
 0x20c   :  { %2554 = vmatpush.bf16.msrb.mxu3 %v6033_v37  ;;  %2567 = vmatpush.bf16.msra.mxu0 %v6321_v38  ;;  %v6830_v22 = vld [vmem:[#allocation7 + $0x668] sm:$0xf0]  ;;  %v6100_v37 = vld [vmem:[#allocation7 + $0x90] sm:$0xf] }
 0x20d   :  { %2578 = vmatpush.bf16.msra.mxu1 %v6673_v41  ;;  %2591 = vmatpush.bf16.msra.mxu2 %v6961_v42  ;;  %v6833_v31 = vor.u32 %v8717_v21, %v6830_v22  ;;  %v8709_v32 = vld [vmem:[#allocation7 + $0x60c] sm:$0xf]  ;;  %v8538_v38 = vld [vmem:[#allocation7 + $0xac] sm:$0xf0]  ;;  %v8566_v22 = vld [vmem:[#allocation7 + $0x194] sm:$0xf] }
 0x20e   :  { %v6798_v35 = vld [vmem:[#allocation7 + $0x628] sm:$0xf0]  ;;  %v6388_v41 = vld [vmem:[#allocation7 + $0x2d0] sm:$0xf]  ;;  %v6101_v48 = vor.u32 %v8538_v38, %v6100_v37  ;;  %v8558_v37 = vld [vmem:[#allocation7 + $0x154] sm:$0xf] }
 0x20f   :  { %2555 = vmatmul.bf16.vlgmr.msrb.gmra.mxu3 %v9451_v36  ;;  %v8610_v42 = vld [vmem:[#allocation7 + $0x2ec] sm:$0xf0]  ;;  %v6801_v47 = vor.u32 %v8709_v32, %v6798_v35  ;;  %v6233_v32 = vor.u32 %v8566_v22, %v6230_v24  ;;  %v6198_v38 = vld [vmem:[#allocation7 + $0x170] sm:$0xf0] }
 0x210   :  { %2603 = vmatpush.bf16.msra.mxu3 %v6261_v46  ;;  %2568 = vmatpush.bf16.msra.mxu0 %v6289_v54  ;;  %v8770_v46 = vld [vmem:[#allocation7 + $0x7ec] sm:$0xf0]  ;;  %v6389_v49 = vor.u32 %v8610_v42, %v6388_v41  ;;  %v6486_v41 = vld [vmem:[#allocation7 + $0x3b0] sm:$0xf0] }
 0x211   :  { %2579 = vmatpush.bf16.msra.mxu1 %v6641_v55  ;;  %2592 = vmatpush.bf16.msra.mxu2 %v6929_v56  ;;  %v7029_v54 = vor.u32 %v8770_v46, %v7028_v45  ;;  %v6356_v55 = vld [vmem:[#allocation7 + $0x290] sm:$0xf]  ;;  %v6201_v46 = vor.u32 %v8558_v37, %v6198_v38  ;;  %v8526_v24 = vld [vmem:[#allocation7 + $0x54] sm:$0xf] }
 0x212   :  { %v8602_v56 = vld [vmem:[#allocation7 + $0x2ac] sm:$0xf0]  ;;  %v8518_v37 = vld [vmem:[#allocation7 + $0x14] sm:$0xf] }
 0x213   :  { %2569 = vmatmul.bf16.vlgmr.msra.gmra.mxu0 %v9455_v50  ;;  %v6357_v62 = vor.u32 %v8602_v56, %v6356_v55  ;;  %v6644_v17 = vld [vmem:[#allocation7 + $0x4d0] sm:$0xf]  ;;  %v6038_v38 = vld [vmem:[#allocation7 + $0x30] sm:$0xf0] }
 0x214   :  { %2604 = vmatpush.bf16.msra.mxu3 %v6229_v59  ;;  %2617 = vmatpush.bf16.msrb.mxu0 %v6517_v60  ;;  %v6996_v59 = vld [vmem:[#allocation7 + $0x790] sm:$0xf] }
 0x215   :  { %2580 = vmatpush.bf16.msra.mxu1 %v6609_v3  ;;  %2593 = vmatpush.bf16.msra.mxu2 %v6897_v4  ;;  %v8762_v60 = vld [vmem:[#allocation7 + $0x7ac] sm:$0xf0] }
 0x216   :  { %v6997_v2 = vor.u32 %v8762_v60, %v6996_v59  ;;  %v6324_v3 = vld [vmem:[#allocation7 + $0x250] sm:$0xf]  ;;  %v6169_v59 = vor.u32 %v8550_v51, %v6166_v52  ;;  %v6041_v51 = vor.u32 %v8518_v37, %v6038_v38  ;;  %v6140_v37 = vld [vmem:[#allocation7 + $0xd8] sm:$0xf] }
 0x217   :  { %v8594_v4 = vld [vmem:[#allocation7 + $0x26c] sm:$0xf0]  ;;  %v8547_v38 = vld [vmem:[#allocation7 + $0xf4] sm:$0xf0] }
 0x218   :  { %2605 = vmatpush.bf16.msra.mxu3 %v6197_v7  ;;  %2618 = vmatpush.bf16.msrb.mxu0 %v6485_v8  ;;  %v6964_v7 = vld [vmem:[#allocation7 + $0x750] sm:$0xf]  ;;  %v6325_v13 = vor.u32 %v8594_v4, %v6324_v3  ;;  %v8702_v3 = vld [vmem:[#allocation7 + $0x5d4] sm:$0xf] }
 0x219   :  { %2581 = vmatpush.bf16.msra.mxu1 %v6577_v15  ;;  %2594 = vmatpush.bf16.msra.mxu2 %v6865_v16  ;;  %v8754_v8 = vld [vmem:[#allocation7 + $0x76c] sm:$0xf0]  ;;  %v6774_v4 = vld [vmem:[#allocation7 + $0x5f0] sm:$0xf0] }
 0x21a   :  { %v6965_v15 = vor.u32 %v8754_v8, %v6964_v7  ;;  %v8586_v16 = vld [vmem:[#allocation7 + $0x22c] sm:$0xf0]  ;;  %v6137_v8 = vor.u32 %v8542_v63, %v6134_v0  ;;  %v8571_v63 = vld [vmem:[#allocation7 + $0x1b4] sm:$0xf0] }
 0x21b   :  { %v8674_v18 = vld [vmem:[#allocation7 + $0x4ec] sm:$0xf0]  ;;  %v6293_v27 = vor.u32 %v8586_v16, %v6292_v14  ;;  %v6777_v14 = vor.u32 %v8702_v3, %v6774_v4  ;;  %v8694_v16 = vld [vmem:[#allocation7 + $0x594] sm:$0xf]  ;;  %v6524_v0 = vld [vmem:[#allocation7 + $0x3d8] sm:$0xf] }
 0x21c   :  { %2606 = vmatpush.bf16.msra.mxu3 %v6165_v19  ;;  %2619 = vmatpush.bf16.msrb.mxu0 %v6453_v20  ;;  %v6265_v19 = vor.u32 %v8574_v9, %v6262_v10  ;;  %v6932_v20 = vld [vmem:[#allocation7 + $0x710] sm:$0xf]  ;;  %v6645_v28 = vor.u32 %v8674_v18, %v6644_v17  ;;  %v6742_v17 = vld [vmem:[#allocation7 + $0x5b0] sm:$0xf0] }
 0x21d   :  { %2582 = vmatpush.bf16.msra.mxu1 %v6545_v30  ;;  %2595 = vmatpush.bf16.msra.mxu2 %v6833_v31  ;;  %v8746_v21 = vld [vmem:[#allocation7 + $0x72c] sm:$0xf0]  ;;  %v8766_v18 = vld [vmem:[#allocation7 + $0x7d4] sm:$0xf] }
 0x21e   :  { %v6933_v29 = vor.u32 %v8746_v21, %v6932_v20  ;;  %v6612_v30 = vld [vmem:[#allocation7 + $0x490] sm:$0xf] }
 0x21f   :  { %v8666_v31 = vld [vmem:[#allocation7 + $0x4ac] sm:$0xf0] }
 0x220   :  { %2607 = vmatpush.bf16.msra.mxu3 %v6133_v33  ;;  %2620 = vmatpush.bf16.msrb.mxu0 %v6421_v34  ;;  %v6521_v33 = vor.u32 %v8638_v25, %v6518_v26  ;;  %v6900_v34 = vld [vmem:[#allocation7 + $0x6d0] sm:$0xf]  ;;  %v6613_v42 = vor.u32 %v8666_v31, %v6612_v30  ;;  %v6070_v25 = vld [vmem:[#allocation7 + $0x70] sm:$0xf0]  ;;  %v6745_v26 = vor.u32 %v8694_v16, %v6742_v17 }
 0x221   :  { %2631 = vmatpush.bf16.msrb.mxu1 %v6773_v40  ;;  %2596 = vmatpush.bf16.msra.mxu2 %v6801_v47  ;;  %v8738_v35 = vld [vmem:[#allocation7 + $0x6ec] sm:$0xf0]  ;;  %v8630_v40 = vld [vmem:[#allocation7 + $0x394] sm:$0xf] }
 0x222   :  { %2583 = vmatmul.bf16.vlgmr.msra.gmra.mxu1 %v9459_v23  ;;  %v6901_v43 = vor.u32 %v8738_v35, %v6900_v34  ;;  %v6580_v44 = vld [vmem:[#allocation7 + $0x450] sm:$0xf]  ;;  %v6489_v47 = vor.u32 %v8630_v40, %v6486_v41  ;;  %v8686_v30 = vld [vmem:[#allocation7 + $0x554] sm:$0xf]  ;;  %v6073_v34 = vor.u32 %v8526_v24, %v6070_v25  ;;  %v6172_v24 = vld [vmem:[#allocation7 + $0x118] sm:$0xf] }
 0x223   :  { %v8658_v45 = vld [vmem:[#allocation7 + $0x46c] sm:$0xf0]  ;;  %v6710_v31 = vld [vmem:[#allocation7 + $0x570] sm:$0xf0]  ;;  %v8555_v25 = vld [vmem:[#allocation7 + $0x134] sm:$0xf0] }
 0x224   :  { %2608 = vmatpush.bf16.msra.mxu3 %v6101_v48  ;;  %2621 = vmatpush.bf16.msrb.mxu0 %v6389_v49  ;;  %v6868_v48 = vld [vmem:[#allocation7 + $0x690] sm:$0xf]  ;;  %v6581_v55 = vor.u32 %v8658_v45, %v6580_v44  ;;  %v6713_v40 = vor.u32 %v8686_v30, %v6710_v31  ;;  %v8678_v44 = vld [vmem:[#allocation7 + $0x514] sm:$0xf] }
 0x225   :  { %2632 = vmatpush.bf16.msrb.mxu1 %v6741_v53  ;;  %2645 = vmatpush.bf16.msrb.mxu2 %v7029_v54  ;;  %v8730_v49 = vld [vmem:[#allocation7 + $0x6ac] sm:$0xf0]  ;;  %v8622_v53 = vld [vmem:[#allocation7 + $0x354] sm:$0xf] }
 0x226   :  { %2597 = vmatmul.bf16.vlgmr.msra.gmra.mxu2 %v9463_v39  ;;  %v6454_v54 = vld [vmem:[#allocation7 + $0x370] sm:$0xf0]  ;;  %v6869_v56 = vor.u32 %v8730_v49, %v6868_v48  ;;  %v6548_v57 = vld [vmem:[#allocation7 + $0x410] sm:$0xf]  ;;  %v6268_v48 = vld [vmem:[#allocation7 + $0x1d8] sm:$0xf] }
 0x227   :  { %v8650_v58 = vld [vmem:[#allocation7 + $0x42c] sm:$0xf0]  ;;  %v6457_v60 = vor.u32 %v8622_v53, %v6454_v54  ;;  %v6678_v45 = vld [vmem:[#allocation7 + $0x530] sm:$0xf0]  ;;  %v8579_v49 = vld [vmem:[#allocation7 + $0x1f4] sm:$0xf0] }
 0x228   :  { %2609 = vmatpush.bf16.msra.mxu3 %v6069_v61  ;;  %2622 = vmatpush.bf16.msrb.mxu0 %v6357_v62  ;;  %v6836_v61 = vld [vmem:[#allocation7 + $0x650] sm:$0xf]  ;;  %v6549_v5 = vor.u32 %v8650_v58, %v6548_v57  ;;  %v8582_v53 = vld [vmem:[#allocation7 + $0x214] sm:$0xf]  ;;  %v6681_v54 = vor.u32 %v8678_v44, %v6678_v45 }
 0x229   :  { %2633 = vmatpush.bf16.msrb.mxu1 %v6709_v1  ;;  %2646 = vmatpush.bf16.msrb.mxu2 %v6997_v2  ;;  %v8722_v62 = vld [vmem:[#allocation7 + $0x66c] sm:$0xf0]  ;;  %v8614_v1 = vld [vmem:[#allocation7 + $0x314] sm:$0xf] }
 0x22a   :  { %v6422_v2 = vld [vmem:[#allocation7 + $0x330] sm:$0xf0]  ;;  %v6837_v6 = vor.u32 %v8722_v62, %v6836_v61  ;;  %v6804_v7 = vld [vmem:[#allocation7 + $0x610] sm:$0xf]  ;;  %v6236_v62 = vld [vmem:[#allocation7 + $0x198] sm:$0xf] }
 0x22b   :  { %v6425_v9 = vor.u32 %v8614_v1, %v6422_v2  ;;  %v8714_v10 = vld [vmem:[#allocation7 + $0x62c] sm:$0xf0]  ;;  %v8670_v57 = vld [vmem:[#allocation7 + $0x4d4] sm:$0xf]  ;;  %v8643_v1 = vld [vmem:[#allocation7 + $0x3f4] sm:$0xf0] }
 0x22c   :  { %2610 = vmatpush.bf16.msra.mxu3 %v6037_v12  ;;  %2623 = vmatpush.bf16.msrb.mxu0 %v6325_v13  ;;  %v8534_v12 = vld [vmem:[#allocation7 + $0x94] sm:$0xf]  ;;  %v6805_v20 = vor.u32 %v8714_v10, %v6804_v7  ;;  %v6237_v7 = vor.u32 %v8571_v63, %v6236_v62  ;;  %v6076_v63 = vld [vmem:[#allocation7 + $0x58] sm:$0xf] }
 0x22d   :  { %2634 = vmatpush.bf16.msrb.mxu1 %v6677_v11  ;;  %2647 = vmatpush.bf16.msrb.mxu2 %v6965_v15  ;;  %v6102_v13 = vld [vmem:[#allocation7 + $0xb0] sm:$0xf0] }
 0x22e   :  { %v8606_v11 = vld [vmem:[#allocation7 + $0x2d4] sm:$0xf]  ;;  %v6105_v21 = vor.u32 %v8534_v12, %v6102_v13  ;;  %v6204_v12 = vld [vmem:[#allocation7 + $0x158] sm:$0xf] }
 0x22f   :  { %2611 = vmatmul.bf16.vlgmr.msra.gmra.mxu3 %v9451_v36  ;;  %v6390_v15 = vld [vmem:[#allocation7 + $0x2f0] sm:$0xf0]  ;;  %v8563_v13 = vld [vmem:[#allocation7 + $0x174] sm:$0xf0] }
 0x230   :  { %2659 = vmatpush.bf16.msrb.mxu3 %v6265_v19  ;;  %2624 = vmatpush.bf16.msrb.mxu0 %v6293_v27  ;;  %v7030_v19 = vld [vmem:[#allocation7 + $0x7f0] sm:$0xf0]  ;;  %v6393_v22 = vor.u32 %v8606_v11, %v6390_v15  ;;  %v8635_v11 = vld [vmem:[#allocation7 + $0x3b4] sm:$0xf0] }
 0x231   :  { %2635 = vmatpush.bf16.msrb.mxu1 %v6645_v28  ;;  %2648 = vmatpush.bf16.msrb.mxu2 %v6933_v29  ;;  %v7033_v27 = vor.u32 %v8766_v18, %v7030_v19  ;;  %v8598_v28 = vld [vmem:[#allocation7 + $0x294] sm:$0xf]  ;;  %v6205_v19 = vor.u32 %v8563_v13, %v6204_v12  ;;  %v6044_v12 = vld [vmem:[#allocation7 + $0x18] sm:$0xf] }
 0x232   :  { %v6358_v29 = vld [vmem:[#allocation7 + $0x2b0] sm:$0xf0]  ;;  %v8523_v13 = vld [vmem:[#allocation7 + $0x34] sm:$0xf0] }
 0x233   :  { %2625 = vmatmul.bf16.vlgmr.msrb.gmra.mxu0 %v9455_v50  ;;  %v6361_v35 = vor.u32 %v8598_v28, %v6358_v29  ;;  %v6646_v58 = vld [vmem:[#allocation7 + $0x4f0] sm:$0xf0] }
 0x234   :  { %2660 = vmatpush.bf16.msrb.mxu3 %v6233_v32  ;;  %2673 = vmatpush.bf16.msra.mxu0 %v6521_v33  ;;  %v8758_v32 = vld [vmem:[#allocation7 + $0x794] sm:$0xf]  ;;  %v6649_v3 = vor.u32 %v8670_v57, %v6646_v58  ;;  %v8699_v57 = vld [vmem:[#allocation7 + $0x5b4] sm:$0xf0] }
 0x235   :  { %2636 = vmatpush.bf16.msrb.mxu1 %v6613_v42  ;;  %2649 = vmatpush.bf16.msrb.mxu2 %v6901_v43  ;;  %v6998_v33 = vld [vmem:[#allocation7 + $0x7b0] sm:$0xf0]  ;;  %v7036_v58 = vld [vmem:[#allocation7 + $0x7d8] sm:$0xf] }
 0x236   :  { %v7001_v41 = vor.u32 %v8758_v32, %v6998_v33  ;;  %v8590_v42 = vld [vmem:[#allocation7 + $0x254] sm:$0xf]  ;;  %v6173_v32 = vor.u32 %v8555_v25, %v6172_v24  ;;  %v6270_v24 = vld [vmem:[#allocation7 + $0x1f8] sm:$0xf0]  ;;  %v6045_v25 = vor.u32 %v8523_v13, %v6044_v12  ;;  %v8651_v12 = vld [vmem:[#allocation7 + $0x434] sm:$0xf0] }
 0x237   :  { %v6326_v43 = vld [vmem:[#allocation7 + $0x270] sm:$0xf0] }
 0x238   :  { %2661 = vmatpush.bf16.msrb.mxu3 %v6201_v46  ;;  %2674 = vmatpush.bf16.msra.mxu0 %v6489_v47  ;;  %v8750_v46 = vld [vmem:[#allocation7 + $0x754] sm:$0xf]  ;;  %v6329_v52 = vor.u32 %v8590_v42, %v6326_v43  ;;  %v6780_v42 = vld [vmem:[#allocation7 + $0x5d8] sm:$0xf] }
 0x239   :  { %2637 = vmatpush.bf16.msrb.mxu1 %v6581_v55  ;;  %2650 = vmatpush.bf16.msrb.mxu2 %v6869_v56  ;;  %v6966_v47 = vld [vmem:[#allocation7 + $0x770] sm:$0xf0]  ;;  %v8707_v43 = vld [vmem:[#allocation7 + $0x5f4] sm:$0xf0] }
 0x23a   :  { %v6969_v55 = vor.u32 %v8750_v46, %v6966_v47  ;;  %v6294_v56 = vld [vmem:[#allocation7 + $0x230] sm:$0xf0]  ;;  %v6141_v47 = vor.u32 %v8547_v38, %v6140_v37  ;;  %v8567_v37 = vld [vmem:[#allocation7 + $0x19c] sm:$0xf] }
 0x23b   :  { %v6934_v61 = vld [vmem:[#allocation7 + $0x730] sm:$0xf0]  ;;  %v6297_v2 = vor.u32 %v8582_v53, %v6294_v56  ;;  %v6781_v53 = vor.u32 %v8707_v43, %v6780_v42  ;;  %v6748_v56 = vld [vmem:[#allocation7 + $0x598] sm:$0xf]  ;;  %v6238_v38 = vld [vmem:[#allocation7 + $0x1b8] sm:$0xf0] }
 0x23c   :  { %2662 = vmatpush.bf16.msrb.mxu3 %v6169_v59  ;;  %2675 = vmatpush.bf16.msra.mxu0 %v6457_v60  ;;  %v6269_v59 = vor.u32 %v8579_v49, %v6268_v48  ;;  %v8742_v60 = vld [vmem:[#allocation7 + $0x714] sm:$0xf] }
 0x23d   :  { %2638 = vmatpush.bf16.msrb.mxu1 %v6549_v5  ;;  %2651 = vmatpush.bf16.msrb.mxu2 %v6837_v6  ;;  %v6937_v4 = vor.u32 %v8742_v60, %v6934_v61  ;;  %v8662_v5 = vld [vmem:[#allocation7 + $0x494] sm:$0xf] }
 0x23e   :  { %v6614_v6 = vld [vmem:[#allocation7 + $0x4b0] sm:$0xf0] }
 0x23f   :  { %v6902_v10 = vld [vmem:[#allocation7 + $0x6f0] sm:$0xf0]  ;;  %v6617_v15 = vor.u32 %v8662_v5, %v6614_v6  ;;  %v6716_v5 = vld [vmem:[#allocation7 + $0x558] sm:$0xf] }
 0x240   :  { %2663 = vmatpush.bf16.msrb.mxu3 %v6137_v8  ;;  %2676 = vmatpush.bf16.msra.mxu0 %v6425_v9  ;;  %v6525_v8 = vor.u32 %v8643_v1, %v6524_v0  ;;  %v8734_v9 = vld [vmem:[#allocation7 + $0x6d4] sm:$0xf]  ;;  %v8531_v0 = vld [vmem:[#allocation7 + $0x74] sm:$0xf0]  ;;  %v6749_v1 = vor.u32 %v8699_v57, %v6748_v56  ;;  %v8631_v56 = vld [vmem:[#allocation7 + $0x39c] sm:$0xf] }
 0x241   :  { %2687 = vmatpush.bf16.msra.mxu1 %v6777_v14  ;;  %2652 = vmatpush.bf16.msrb.mxu2 %v6805_v20  ;;  %v6492_v14 = vld [vmem:[#allocation7 + $0x398] sm:$0xf]  ;;  %v6905_v16 = vor.u32 %v8734_v9, %v6902_v10  ;;  %v8654_v17 = vld [vmem:[#allocation7 + $0x454] sm:$0xf]  ;;  %v6077_v9 = vor.u32 %v8531_v0, %v6076_v63  ;;  %v6494_v57 = vld [vmem:[#allocation7 + $0x3b8] sm:$0xf0] }
 0x242   :  { %2639 = vmatmul.bf16.vlgmr.msrb.gmra.mxu1 %v9459_v23  ;;  %v6582_v18 = vld [vmem:[#allocation7 + $0x470] sm:$0xf0]  ;;  %v6493_v20 = vor.u32 %v8635_v11, %v6492_v14  ;;  %v8691_v6 = vld [vmem:[#allocation7 + $0x574] sm:$0xf0]  ;;  %v6497_v0 = vor.u32 %v8631_v56, %v6494_v57  ;;  %v6366_v56 = vld [vmem:[#allocation7 + $0x2b8] sm:$0xf0] }
 0x243   :  { %v6585_v28 = vor.u32 %v8654_v17, %v6582_v18  ;;  %v8646_v30 = vld [vmem:[#allocation7 + $0x414] sm:$0xf]  ;;  %v6717_v14 = vor.u32 %v8691_v6, %v6716_v5  ;;  %v6684_v17 = vld [vmem:[#allocation7 + $0x518] sm:$0xf]  ;;  %v6174_v5 = vld [vmem:[#allocation7 + $0x138] sm:$0xf0] }
 0x244   :  { %2664 = vmatpush.bf16.msrb.mxu3 %v6105_v21  ;;  %2677 = vmatpush.bf16.msra.mxu0 %v6393_v22  ;;  %v8726_v21 = vld [vmem:[#allocation7 + $0x694] sm:$0xf]  ;;  %v8683_v18 = vld [vmem:[#allocation7 + $0x534] sm:$0xf0]  ;;  %v8623_v6 = vld [vmem:[#allocation7 + $0x35c] sm:$0xf] }
 0x245   :  { %2688 = vmatpush.bf16.msra.mxu1 %v6745_v26  ;;  %2701 = vmatpush.bf16.msra.mxu2 %v7033_v27  ;;  %v6870_v22 = vld [vmem:[#allocation7 + $0x6b0] sm:$0xf0]  ;;  %v6460_v26 = vld [vmem:[#allocation7 + $0x358] sm:$0xf]  ;;  %v8687_v57 = vld [vmem:[#allocation7 + $0x55c] sm:$0xf] }
 0x246   :  { %2653 = vmatmul.bf16.vlgmr.msrb.gmra.mxu2 %v9463_v39  ;;  %v8627_v27 = vld [vmem:[#allocation7 + $0x374] sm:$0xf0]  ;;  %v6873_v29 = vor.u32 %v8726_v21, %v6870_v22  ;;  %v6550_v31 = vld [vmem:[#allocation7 + $0x430] sm:$0xf0]  ;;  %v8575_v22 = vld [vmem:[#allocation7 + $0x1dc] sm:$0xf] }
 0x247   :  { %v6461_v33 = vor.u32 %v8627_v27, %v6460_v26  ;;  %v6553_v44 = vor.u32 %v8646_v30, %v6550_v31  ;;  %v8710_v46 = vld [vmem:[#allocation7 + $0x614] sm:$0xf]  ;;  %v6300_v27 = vld [vmem:[#allocation7 + $0x218] sm:$0xf] }
 0x248   :  { %2665 = vmatpush.bf16.msrb.mxu3 %v6073_v34  ;;  %2678 = vmatpush.bf16.msra.mxu0 %v6361_v35  ;;  %v8718_v34 = vld [vmem:[#allocation7 + $0x654] sm:$0xf]  ;;  %v8587_v30 = vld [vmem:[#allocation7 + $0x234] sm:$0xf0] }
 0x249   :  { %2689 = vmatpush.bf16.msra.mxu1 %v6713_v40  ;;  %2702 = vmatpush.bf16.msra.mxu2 %v7001_v41  ;;  %v6838_v35 = vld [vmem:[#allocation7 + $0x670] sm:$0xf0]  ;;  %v6428_v40 = vld [vmem:[#allocation7 + $0x318] sm:$0xf]  ;;  %v6301_v42 = vor.u32 %v8587_v30, %v6300_v27 }
 0x24a   :  { %v8619_v41 = vld [vmem:[#allocation7 + $0x334] sm:$0xf0]  ;;  %v6841_v45 = vor.u32 %v8718_v34, %v6838_v35  ;;  %v6806_v49 = vld [vmem:[#allocation7 + $0x630] sm:$0xf0] }
 0x24b   :  { %v6429_v48 = vor.u32 %v8619_v41, %v6428_v40  ;;  %v6809_v60 = vor.u32 %v8710_v46, %v6806_v49  ;;  %v6652_v31 = vld [vmem:[#allocation7 + $0x4d8] sm:$0xf]  ;;  %v8639_v40 = vld [vmem:[#allocation7 + $0x3dc] sm:$0xf]  ;;  %v6241_v49 = vor.u32 %v8567_v37, %v6238_v38 }
 0x24c   :  { %2666 = vmatpush.bf16.msrb.mxu3 %v6041_v51  ;;  %2679 = vmatpush.bf16.msra.mxu0 %v6329_v52  ;;  %v6108_v51 = vld [vmem:[#allocation7 + $0x98] sm:$0xf]  ;;  %v6526_v41 = vld [vmem:[#allocation7 + $0x3f8] sm:$0xf0] }
 0x24d   :  { %2690 = vmatpush.bf16.msra.mxu1 %v6681_v54  ;;  %2703 = vmatpush.bf16.msra.mxu2 %v6969_v55  ;;  %v8539_v52 = vld [vmem:[#allocation7 + $0xb4] sm:$0xf0]  ;;  %v8607_v37 = vld [vmem:[#allocation7 + $0x2dc] sm:$0xf] }
 0x24e   :  { %v6396_v54 = vld [vmem:[#allocation7 + $0x2d8] sm:$0xf]  ;;  %v6109_v61 = vor.u32 %v8539_v52, %v6108_v51  ;;  %v6529_v51 = vor.u32 %v8639_v40, %v6526_v41  ;;  %v6398_v38 = vld [vmem:[#allocation7 + $0x2f8] sm:$0xf0] }
 0x24f   :  { %2667 = vmatmul.bf16.vlgmr.msrb.gmra.mxu3 %v9451_v36  ;;  %v8611_v55 = vld [vmem:[#allocation7 + $0x2f4] sm:$0xf0]  ;;  %v8695_v40 = vld [vmem:[#allocation7 + $0x59c] sm:$0xf] }
 0x250   :  { %2715 = vmatpush.bf16.msra.mxu3 %v6269_v59  ;;  %2680 = vmatpush.bf16.msra.mxu0 %v6297_v2  ;;  %v8771_v59 = vld [vmem:[#allocation7 + $0x7f4] sm:$0xf0]  ;;  %v6397_v62 = vor.u32 %v8611_v55, %v6396_v54  ;;  %v9487_v43 = vpop.f32.mrf.mxu0  ;;  %v8559_v54 = vld [vmem:[#allocation7 + $0x15c] sm:$0xf] }
 0x251   :  { %2691 = vmatpush.bf16.msra.mxu1 %v6649_v3  ;;  %2704 = vmatpush.bf16.msra.mxu2 %v6937_v4  ;;  %v7037_v2 = vor.u32 %v8771_v59, %v7036_v58  ;;  %v6364_v3 = vld [vmem:[#allocation7 + $0x298] sm:$0xf]  ;;  %v6206_v55 = vld [vmem:[#allocation7 + $0x178] sm:$0xf0] }
 0x252   :  { %v8603_v4 = vld [vmem:[#allocation7 + $0x2b4] sm:$0xf0]  ;;  %v9485_v21 = vpop.f32.mrf.mxu3  ;;  %v6209_v63 = vor.u32 %v8559_v54, %v6206_v55  ;;  %v6750_v41 = vld [vmem:[#allocation7 + $0x5b8] sm:$0xf0] }
 0x253   :  { %2681 = vmatmul.bf16.vlgmr.msra.gmra.mxu0 %v9455_v50  ;;  %v6365_v10 = vor.u32 %v8603_v4, %v6364_v3  ;;  %v6940_v34 = vld [vmem:[#allocation7 + $0x718] sm:$0xf]  ;;  %v8551_v3 = vld [vmem:[#allocation7 + $0x11c] sm:$0xf] }
 0x254   :  { %2716 = vmatpush.bf16.msra.mxu3 %v6237_v7  ;;  %2729 = vmatpush.bf16.msrb.mxu0 %v6525_v8  ;;  %v7004_v7 = vld [vmem:[#allocation7 + $0x798] sm:$0xf]  ;;  %v6177_v13 = vor.u32 %v8551_v3, %v6174_v5  ;;  %v8599_v55 = vld [vmem:[#allocation7 + $0x29c] sm:$0xf] }
 0x255   :  { %2692 = vmatpush.bf16.msra.mxu1 %v6617_v15  ;;  %2705 = vmatpush.bf16.msra.mxu2 %v6905_v16  ;;  %v8763_v8 = vld [vmem:[#allocation7 + $0x7b4] sm:$0xf0]  ;;  %v6046_v3 = vld [vmem:[#allocation7 + $0x38] sm:$0xf0] }
 0x256   :  { %v7005_v11 = vor.u32 %v8763_v8, %v7004_v7  ;;  %v6332_v15 = vld [vmem:[#allocation7 + $0x258] sm:$0xf]  ;;  %v6462_v7 = vld [vmem:[#allocation7 + $0x378] sm:$0xf0] }
 0x257   :  { %v8595_v16 = vld [vmem:[#allocation7 + $0x274] sm:$0xf0] }
 0x258   :  { %2717 = vmatpush.bf16.msra.mxu3 %v6205_v19  ;;  %2730 = vmatpush.bf16.msrb.mxu0 %v6493_v20  ;;  %v6972_v19 = vld [vmem:[#allocation7 + $0x758] sm:$0xf]  ;;  %v6333_v26 = vor.u32 %v8595_v16, %v6332_v15  ;;  %v8543_v16 = vld [vmem:[#allocation7 + $0xdc] sm:$0xf] }
 0x259   :  { %2693 = vmatpush.bf16.msra.mxu1 %v6585_v28  ;;  %2706 = vmatpush.bf16.msra.mxu2 %v6873_v29  ;;  %v8755_v20 = vld [vmem:[#allocation7 + $0x774] sm:$0xf0]  ;;  %v6685_v28 = vor.u32 %v8683_v18, %v6684_v17  ;;  %v9497_v17 = vpop.f32.mrf.mxu0 }
 0x25a   :  { %v6973_v29 = vor.u32 %v8755_v20, %v6972_v19  ;;  %v8747_v35 = vld [vmem:[#allocation7 + $0x734] sm:$0xf0]  ;;  %v9492_v58 = vpop.f32.mrf.mxu3  ;;  %v6142_v19 = vld [vmem:[#allocation7 + $0xf8] sm:$0xf0] }
 0x25b   :  { %v6941_v46 = vor.u32 %v8747_v35, %v6940_v34  ;;  %v6908_v52 = vld [vmem:[#allocation7 + $0x6d8] sm:$0xf]  ;;  %v8615_v20 = vld [vmem:[#allocation7 + $0x31c] sm:$0xf] }
 0x25c   :  { %2718 = vmatpush.bf16.msra.mxu3 %v6173_v32  ;;  %2731 = vmatpush.bf16.msrb.mxu0 %v6461_v33  ;;  %v8675_v32 = vld [vmem:[#allocation7 + $0x4f4] sm:$0xf0]  ;;  %v6273_v33 = vor.u32 %v8575_v22, %v6270_v24  ;;  %v6430_v22 = vld [vmem:[#allocation7 + $0x338] sm:$0xf0] }
 0x25d   :  { %2694 = vmatpush.bf16.msra.mxu1 %v6553_v44  ;;  %2707 = vmatpush.bf16.msra.mxu2 %v6841_v45  ;;  %v9489_v44 = vpop.f32.mrf.mxu1  ;;  %v6653_v45 = vor.u32 %v8675_v32, %v6652_v31  ;;  %v8723_v15 = vld [vmem:[#allocation7 + $0x674] sm:$0xf0]  ;;  %v8703_v24 = vld [vmem:[#allocation7 + $0x5dc] sm:$0xf]  ;;  %v6433_v30 = vor.u32 %v8615_v20, %v6430_v22 }
 0x25e   :  { %v8715_v31 = vld [vmem:[#allocation7 + $0x634] sm:$0xf0]  ;;  %v8535_v32 = vld [vmem:[#allocation7 + $0x9c] sm:$0xf] }
 0x25f   :  { %v8583_v20 = vld [vmem:[#allocation7 + $0x21c] sm:$0xf] }
 0x260   :  { %2719 = vmatpush.bf16.msra.mxu3 %v6141_v47  ;;  %2732 = vmatpush.bf16.msrb.mxu0 %v6429_v48  ;;  %v6620_v47 = vld [vmem:[#allocation7 + $0x498] sm:$0xf] }
 0x261   :  { %2743 = vmatpush.bf16.msrb.mxu1 %v6781_v53  ;;  %2708 = vmatpush.bf16.msra.mxu2 %v6809_v60  ;;  %v8667_v48 = vld [vmem:[#allocation7 + $0x4b4] sm:$0xf0] }
 0x262   :  { %2695 = vmatmul.bf16.vlgmr.msra.gmra.mxu1 %v9459_v23  ;;  %v8739_v53 = vld [vmem:[#allocation7 + $0x6f4] sm:$0xf0]  ;;  %v6621_v59 = vor.u32 %v8667_v48, %v6620_v47  ;;  %v9501_v34 = vpop.f32.mrf.mxu3 }
 0x263   :  { %v6909_v60 = vor.u32 %v8739_v53, %v6908_v52  ;;  %v6078_v52 = vld [vmem:[#allocation7 + $0x78] sm:$0xf0]  ;;  %v6753_v53 = vor.u32 %v8695_v40, %v6750_v41 }
 0x264   :  { %2720 = vmatpush.bf16.msra.mxu3 %v6109_v61  ;;  %2733 = vmatpush.bf16.msrb.mxu0 %v6397_v62  ;;  %v6588_v61 = vld [vmem:[#allocation7 + $0x458] sm:$0xf] }
 0x265   :  { %2744 = vmatpush.bf16.msrb.mxu1 %v6749_v1  ;;  %2757 = vmatpush.bf16.msrb.mxu2 %v7037_v2  ;;  %v8659_v62 = vld [vmem:[#allocation7 + $0x474] sm:$0xf0]  ;;  %v9499_v18 = vpop.f32.mrf.mxu1 }
 0x266   :  { %2709 = vmatmul.bf16.vlgmr.msra.gmra.mxu2 %v9463_v39  ;;  %v6876_v1 = vld [vmem:[#allocation7 + $0x698] sm:$0xf]  ;;  %v9494_v4 = vpop.f32.mrf.mxu2  ;;  %v6589_v8 = vor.u32 %v8659_v62, %v6588_v61  ;;  %v7006_v61 = vld [vmem:[#allocation7 + $0x7b8] sm:$0xf0]  ;;  %v9506_v62 = vpop.f32.mrf.mxu0 }
 0x267   :  { %v8731_v2 = vld [vmem:[#allocation7 + $0x6b4] sm:$0xf0] }
 0x268   :  { %2721 = vmatpush.bf16.msra.mxu3 %v6077_v9  ;;  %2734 = vmatpush.bf16.msrb.mxu0 %v6365_v10  ;;  %v6877_v9 = vor.u32 %v8731_v2, %v6876_v1  ;;  %v6556_v10 = vld [vmem:[#allocation7 + $0x418] sm:$0xf]  ;;  %v6369_v1 = vor.u32 %v8599_v55, %v6366_v56  ;;  %v8519_v2 = vld [vmem:[#allocation7 + $0x1c] sm:$0xf]  ;;  %v8794_v55 = vld [vmem:[#allocation8 + $0xac] sm:$0xf0] }
 0x269   :  { %2745 = vmatpush.bf16.msrb.mxu1 %v6717_v14  ;;  %2758 = vmatpush.bf16.msrb.mxu2 %v7005_v11  ;;  %v6465_v14 = vor.u32 %v8623_v6, %v6462_v7  ;;  %v6844_v11 = vld [vmem:[#allocation7 + $0x658] sm:$0xf]  ;;  %v8591_v7 = vld [vmem:[#allocation7 + $0x25c] sm:$0xf]  ;;  %v7268_v56 = vld [vmem:[#allocation8 + $0x1c0] sm:$0xf] }
 0x26a   :  { %v6845_v27 = vor.u32 %v8723_v15, %v6844_v11  ;;  %v7156_v11 = vld [vmem:[#allocation8 + $0xe0] sm:$0xf]  ;;  %v8802_v15 = vld [vmem:[#allocation8 + $0xec] sm:$0xf0] }
 0x26c   :  { %2722 = vmatpush.bf16.msra.mxu3 %v6045_v25  ;;  %2735 = vmatpush.bf16.msrb.mxu0 %v6333_v26  ;;  %v6782_v25 = vld [vmem:[#allocation7 + $0x5f8] sm:$0xf0]  ;;  %v6557_v26 = vor.u32 %v8651_v12, %v6556_v10 }
 0x26d   :  { %2746 = vmatpush.bf16.msrb.mxu1 %v6685_v28  ;;  %2759 = vmatpush.bf16.msrb.mxu2 %v6973_v29  ;;  %v6812_v28 = vld [vmem:[#allocation7 + $0x618] sm:$0xf]  ;;  %v6145_v29 = vor.u32 %v8543_v16, %v6142_v19  ;;  %v6785_v35 = vor.u32 %v8703_v24, %v6782_v25  ;;  %v6686_v10 = vld [vmem:[#allocation7 + $0x538] sm:$0xf0]  ;;  %v6049_v16 = vor.u32 %v8519_v2, %v6046_v3 }
 0x26e   :  { %v6813_v47 = vor.u32 %v8715_v31, %v6812_v28  ;;  %v8751_v12 = vld [vmem:[#allocation7 + $0x75c] sm:$0xf]  ;;  %v9515_v40 = vpop.f32.mrf.mxu0 }
 0x26f   :  { %2723 = vmatmul.bf16.vlgmr.msra.gmra.mxu3 %v9451_v36  ;;  %v6654_v28 = vld [vmem:[#allocation7 + $0x4f8] sm:$0xf0] }
 0x270   :  { %2771 = vmatpush.bf16.msrb.mxu3 %v6273_v33  ;;  %2736 = vmatpush.bf16.msrb.mxu0 %v6301_v42  ;;  %v6110_v33 = vld [vmem:[#allocation7 + $0xb8] sm:$0xf0] }
 0x271   :  { %2747 = vmatpush.bf16.msrb.mxu1 %v6653_v45  ;;  %2760 = vmatpush.bf16.msrb.mxu2 %v6941_v46  ;;  %v8767_v42 = vld [vmem:[#allocation7 + $0x7dc] sm:$0xf]  ;;  %v9503_v46 = vpop.f32.mrf.mxu2  ;;  %v6113_v48 = vor.u32 %v8535_v32, %v6110_v33  ;;  %v7140_v32 = vld [vmem:[#allocation8 + $0xc0] sm:$0xf]  ;;  %v8798_v33 = vld [vmem:[#allocation8 + $0xcc] sm:$0xf0] }
 0x272   :  { %v7038_v45 = vld [vmem:[#allocation7 + $0x7f8] sm:$0xf0] }
 0x273   :  { %2737 = vmatmul.bf16.vlgmr.msrb.gmra.mxu0 %v9455_v50  ;;  %v7041_v54 = vor.u32 %v8767_v42, %v7038_v45  ;;  %v6942_v31 = vld [vmem:[#allocation7 + $0x738] sm:$0xf0] }
 0x274   :  { %2772 = vmatpush.bf16.msrb.mxu3 %v6241_v49  ;;  %2785 = vmatpush.bf16.msra.mxu0 %v6529_v51  ;;  %v6401_v49 = vor.u32 %v8607_v37, %v6398_v38  ;;  %v8527_v51 = vld [vmem:[#allocation7 + $0x5c] sm:$0xf]  ;;  %v8834_v37 = vld [vmem:[#allocation8 + $0x1ec] sm:$0xf0] }
 0x275   :  { %2748 = vmatpush.bf16.msrb.mxu1 %v6621_v59  ;;  %2761 = vmatpush.bf16.msrb.mxu2 %v6909_v60  ;;  %v6718_v59 = vld [vmem:[#allocation7 + $0x578] sm:$0xf0] }
 0x276   :  { %v8759_v60 = vld [vmem:[#allocation7 + $0x79c] sm:$0xf]  ;;  %v6721_v5 = vor.u32 %v8687_v57, %v6718_v59  ;;  %v8830_v57 = vld [vmem:[#allocation8 + $0x1cc] sm:$0xf0]  ;;  %v9523_v59 = vld [vmem:[%s9740_s1 + $0x7] sm:$0xff] }
 0x277   :  { %v7009_v6 = vor.u32 %v8759_v60, %v7006_v61  ;;  %v6590_v2 = vld [vmem:[#allocation7 + $0x478] sm:$0xf0]  ;;  %v7269_v3 = vor.u32 %v8830_v57, %v7268_v56  ;;  %v8818_v56 = vld [vmem:[#allocation8 + $0x16c] sm:$0xf0] }
 0x278   :  { %2773 = vmatpush.bf16.msrb.mxu3 %v6209_v63  ;;  %2786 = vmatpush.bf16.msra.mxu0 %v6497_v0  ;;  %v9508_v63 = vpop.f32.mrf.mxu1  ;;  %v6081_v0 = vor.u32 %v8527_v51, %v6078_v52  ;;  %v8735_v52 = vld [vmem:[#allocation7 + $0x6dc] sm:$0xf] }
 0x279   :  { %2749 = vmatpush.bf16.msrb.mxu1 %v6589_v8  ;;  %2762 = vmatpush.bf16.msrb.mxu2 %v6877_v9  ;;  %v6334_v8 = vld [vmem:[#allocation7 + $0x278] sm:$0xf0]  ;;  %v9513_v22 = vpop.f32.mrf.mxu2 }
 0x27a   :  { %v8679_v9 = vld [vmem:[#allocation7 + $0x51c] sm:$0xf]  ;;  %v6337_v19 = vor.u32 %v8591_v7, %v6334_v8  ;;  %v7108_v7 = vld [vmem:[#allocation8 + $0x80] sm:$0xf] }
 0x27b   :  { %v6689_v24 = vor.u32 %v8679_v9, %v6686_v10  ;;  %v8790_v9 = vld [vmem:[#allocation8 + $0x8c] sm:$0xf0]  ;;  %v7252_v10 = vld [vmem:[#allocation8 + $0x1a0] sm:$0xf] }
 0x27c   :  { %2774 = vmatpush.bf16.msrb.mxu3 %v6177_v13  ;;  %2787 = vmatpush.bf16.msra.mxu0 %v6465_v14  ;;  %v6974_v13 = vld [vmem:[#allocation7 + $0x778] sm:$0xf0]  ;;  %v9511_v14 = vpop.f32.mrf.mxu3 }
 0x27d   :  { %2750 = vmatpush.bf16.msrb.mxu1 %v6557_v26  ;;  %2763 = vmatpush.bf16.msrb.mxu2 %v6845_v27  ;;  %v6977_v25 = vor.u32 %v8751_v12, %v6974_v13  ;;  %v6302_v26 = vld [vmem:[#allocation7 + $0x238] sm:$0xf0]  ;;  %v8826_v12 = vld [vmem:[#allocation8 + $0x1ac] sm:$0xf0]  ;;  %v1083_v13 = vperm.slane %v9523_v59, 0 }
 0x27e   :  { %v8671_v27 = vld [vmem:[#allocation7 + $0x4dc] sm:$0xf]  ;;  %v6305_v38 = vor.u32 %v8583_v20, %v6302_v26  ;;  %v7109_v20 = vor.u32 %v8790_v9, %v7108_v7 }
 0x27f   :  { %v6657_v42 = vor.u32 %v8671_v27, %v6654_v28  ;;  %v6846_v26 = vld [vmem:[#allocation7 + $0x678] sm:$0xf0]  ;;  %v7092_v27 = vld [vmem:[#allocation8 + $0x60] sm:$0xf]  ;;  %v9531_v28 = vpop.f32.mrf.mxu0 }
 0x280   :  { %2775 = vmatpush.bf16.msrb.mxu3 %v6145_v29  ;;  %2788 = vmatpush.bf16.msra.mxu0 %v6433_v30  ;;  %v7157_v29 = vor.u32 %v8802_v15, %v7156_v11  ;;  %v8743_v30 = vld [vmem:[#allocation7 + $0x71c] sm:$0xf]  ;;  %v9517_v41 = vpop.f32.mrf.mxu1 }
 0x281   :  { %2799 = vmatpush.bf16.msra.mxu1 %v6785_v35  ;;  %2764 = vmatpush.bf16.msrb.mxu2 %v6813_v47  ;;  %v7284_v35 = vld [vmem:[#allocation8 + $0x1e0] sm:$0xf]  ;;  %v6945_v45 = vor.u32 %v8743_v30, %v6942_v31  ;;  %v8663_v47 = vld [vmem:[#allocation7 + $0x49c] sm:$0xf]  ;;  %v9527_v8 = vpop.f32.mrf.mxu2  ;;  %v8822_v31 = vld [vmem:[#allocation8 + $0x18c] sm:$0xf0] }
 0x282   :  { %2751 = vmatmul.bf16.vlgmr.msrb.gmra.mxu1 %v9459_v23  ;;  %v7285_v51 = vor.u32 %v8834_v37, %v7284_v35  ;;  %v7236_v30 = vld [vmem:[#allocation8 + $0x180] sm:$0xf]  ;;  %v8866_v35 = vld [vmem:[#allocation8 + $0x2ec] sm:$0xf0]  ;;  %v2391_v37 = vadd.f32 %v9492_v58, %v1083_v13 }
 0x283   :  { %v7396_v58 = vld [vmem:[#allocation8 + $0x2c0] sm:$0xf] }
 0x284   :  { %2776 = vmatpush.bf16.msrb.mxu3 %v6113_v48  ;;  %2789 = vmatpush.bf16.msra.mxu0 %v6401_v49  ;;  %v6622_v48 = vld [vmem:[#allocation7 + $0x4b8] sm:$0xf0]  ;;  %v7141_v49 = vor.u32 %v8798_v33, %v7140_v32  ;;  %v9525_v60 = vpop.f32.mrf.mxu3  ;;  %v2389_v32 = vadd.f32 %v9485_v21, %v1083_v13  ;;  %v7412_v33 = vld [vmem:[#allocation8 + $0x2e0] sm:$0xf] }
 0x285   :  { %2800 = vmatpush.bf16.msra.mxu1 %v6753_v53  ;;  %2813 = vmatpush.bf16.msra.mxu2 %v7041_v54  ;;  %v6910_v53 = vld [vmem:[#allocation7 + $0x6f8] sm:$0xf0]  ;;  %v7124_v54 = vld [vmem:[#allocation8 + $0xa0] sm:$0xf]  ;;  %v6625_v61 = vor.u32 %v8663_v47, %v6622_v48  ;;  %v7413_v21 = vor.u32 %v8866_v35, %v7412_v33 }
 0x286   :  { %2765 = vmatmul.bf16.vlgmr.msrb.gmra.mxu2 %v9463_v39  ;;  %v8711_v47 = vld [vmem:[#allocation7 + $0x61c] sm:$0xf]  ;;  %v2403_v57 = vadd.f32 %v9487_v43, %v2389_v32  ;;  %v8778_v43 = vld [vmem:[#allocation8 + $0x2c] sm:$0xf0]  ;;  %v7188_v35 = vld [vmem:[#allocation8 + $0x120] sm:$0xf] }
 0x288   :  { %2777 = vmatpush.bf16.msrb.mxu3 %v6081_v0  ;;  %2790 = vmatpush.bf16.msra.mxu0 %v6369_v1  ;;  %v6913_v0 = vor.u32 %v8735_v52, %v6910_v53  ;;  %v8655_v1 = vld [vmem:[#allocation7 + $0x45c] sm:$0xf]  ;;  %v7076_v52 = vld [vmem:[#allocation8 + $0x40] sm:$0xf]  ;;  %v8782_v53 = vld [vmem:[#allocation8 + $0x4c] sm:$0xf0] }
 0x289   :  { %2801 = vmatpush.bf16.msra.mxu1 %v6721_v5  ;;  %2814 = vmatpush.bf16.msra.mxu2 %v7009_v6  ;;  %v8727_v5 = vld [vmem:[#allocation7 + $0x69c] sm:$0xf]  ;;  %v6593_v11 = vor.u32 %v8655_v1, %v6590_v2  ;;  %v8898_v1 = vld [vmem:[#allocation8 + $0x3ec] sm:$0xf0]  ;;  %v7077_v7 = vor.u32 %v8782_v53, %v7076_v52 }
 0x28a   :  { %v6878_v6 = vld [vmem:[#allocation7 + $0x6b8] sm:$0xf0]  ;;  %v8930_v52 = vld [vmem:[#allocation8 + $0x4ec] sm:$0xf0] }
 0x28b   :  { %v6881_v15 = vor.u32 %v8727_v5, %v6878_v6 }
 0x28c   :  { %2778 = vmatpush.bf16.msrb.mxu3 %v6049_v16  ;;  %2791 = vmatpush.bf16.msra.mxu0 %v6337_v19  ;;  %v8647_v16 = vld [vmem:[#allocation7 + $0x41c] sm:$0xf] }
 0x28d   :  { %2802 = vmatpush.bf16.msra.mxu1 %v6689_v24  ;;  %2815 = vmatpush.bf16.msra.mxu2 %v6977_v25  ;;  %v6558_v19 = vld [vmem:[#allocation7 + $0x438] sm:$0xf0]  ;;  %v7253_v24 = vor.u32 %v8826_v12, %v7252_v10  ;;  %v7060_v10 = vld [vmem:[#allocation8 + $0x20] sm:$0xf]  ;;  %v2417_v12 = vadd.f32 %v9489_v44, %v2403_v57 }
 0x28e   :  { %v8719_v25 = vld [vmem:[#allocation7 + $0x65c] sm:$0xf] }
 0x28f   :  { %2779 = vmatmul.bf16.vlgmr.msrb.gmra.mxu3 %v9451_v36  ;;  %v7125_v36 = vor.u32 %v8794_v55, %v7124_v54  ;;  %v9538_v54 = vpop.f32.mrf.mxu3  ;;  %v7220_v55 = vld [vmem:[#allocation8 + $0x160] sm:$0xf] }
 0x290   :  { %4397 = vmatpush.bf16.msra.mxu3 %v7157_v29  ;;  %2792 = vmatpush.bf16.msra.mxu0 %v6305_v38  ;;  %v8786_v29 = vld [vmem:[#allocation8 + $0x6c] sm:$0xf0]  ;;  %v1084_v38 = vperm.slane %v9523_v59, 1  ;;  %v7221_v9 = vor.u32 %v8818_v56, %v7220_v55 }
 0x291   :  { %2803 = vmatpush.bf16.msra.mxu1 %v6657_v42  ;;  %2816 = vmatpush.bf16.msra.mxu2 %v6945_v45  ;;  %v6561_v42 = vor.u32 %v8647_v16, %v6558_v19  ;;  %v6849_v45 = vor.u32 %v8719_v25, %v6846_v26  ;;  %v7093_v48 = vor.u32 %v8786_v29, %v7092_v27  ;;  %v7380_v16 = vld [vmem:[#allocation8 + $0x2a0] sm:$0xf]  ;;  %v8858_v19 = vld [vmem:[#allocation8 + $0x2ac] sm:$0xf0]  ;;  %v1085_v27 = vperm.slane %v9523_v59, 2 }
 0x292   :  { %v2445_v2 = vadd.f32 %v9501_v34, %v1084_v38  ;;  %v2447_v6 = vadd.f32 %v9511_v14, %v1084_v38  ;;  %v7524_v14 = vld [vmem:[#allocation8 + $0x3c0] sm:$0xf]  ;;  %v7061_v29 = vor.u32 %v8778_v43, %v7060_v10  ;;  %v8962_v43 = vld [vmem:[#allocation8 + $0x5ec] sm:$0xf0] }
 0x293   :  { %2793 = vmatmul.bf16.vlgmr.msra.gmra.mxu0 %v9455_v50  ;;  %v9533_v50 = vpop.f32.mrf.mxu1  ;;  %v7364_v38 = vld [vmem:[#allocation8 + $0x280] sm:$0xf] }
 0x294   :  { %4398 = vmatpush.bf16.msra.mxu3 %v7141_v49  ;;  %4411 = vmatpush.bf16.msrb.mxu0 %v7285_v51  ;;  %v7237_v49 = vor.u32 %v8822_v31, %v7236_v30  ;;  %v6814_v51 = vld [vmem:[#allocation7 + $0x638] sm:$0xf0]  ;;  %v2459_v25 = vadd.f32 %v9506_v62, %v2445_v2  ;;  %v8774_v31 = vld [vmem:[#allocation8 + $0xc] sm:$0xf0]  ;;  %v7492_v2 = vld [vmem:[#allocation8 + $0x380] sm:$0xf] }
 0x295   :  { %2804 = vmatpush.bf16.msra.mxu1 %v6625_v61  ;;  %2817 = vmatpush.bf16.msra.mxu2 %v6913_v0  ;;  %v8862_v61 = vld [vmem:[#allocation8 + $0x2cc] sm:$0xf0]  ;;  %v7540_v0 = vld [vmem:[#allocation8 + $0x3e0] sm:$0xf]  ;;  %v6817_v5 = vor.u32 %v8711_v47, %v6814_v51 }
 0x296   :  { %v7397_v34 = vor.u32 %v8862_v61, %v7396_v58  ;;  %v2473_v62 = vadd.f32 %v9508_v63, %v2459_v25  ;;  %v8890_v47 = vld [vmem:[#allocation8 + $0x3ac] sm:$0xf0]  ;;  %v7668_v51 = vld [vmem:[#allocation8 + $0x4e0] sm:$0xf] }
 0x297   :  { %v9563_v32 = vpop.f32.mrf.mxu3  ;;  %v8806_v61 = vld [vmem:[#allocation8 + $0x10c] sm:$0xf0]  ;;  %v7796_v10 = vld [vmem:[#allocation8 + $0x5e0] sm:$0xf] }
 0x298   :  { %4399 = vmatpush.bf16.msra.mxu3 %v7125_v36  ;;  %4412 = vmatpush.bf16.msrb.mxu0 %v7269_v3  ;;  %v2405_v36 = vadd.f32 %v9497_v17, %v2391_v37  ;;  %v9543_v3 = vpop.f32.mrf.mxu2  ;;  %v7541_v17 = vor.u32 %v8898_v1, %v7540_v0  ;;  %v8810_v37 = vld [vmem:[#allocation8 + $0x12c] sm:$0xf0]  ;;  %v7348_v0 = vld [vmem:[#allocation8 + $0x260] sm:$0xf]  ;;  %v7669_v1 = vor.u32 %v8930_v52, %v7668_v51 }
 0x299   :  { %2805 = vmatpush.bf16.msra.mxu1 %v6593_v11  ;;  %2818 = vmatpush.bf16.msra.mxu2 %v6881_v15  ;;  %v7204_v11 = vld [vmem:[#allocation8 + $0x140] sm:$0xf]  ;;  %v8814_v15 = vld [vmem:[#allocation8 + $0x14c] sm:$0xf0]  ;;  %v7189_v55 = vor.u32 %v8810_v37, %v7188_v35 }
 0x29a   :  { %v2419_v13 = vadd.f32 %v9499_v18, %v2405_v36  ;;  %v9556_v18 = vpop.f32.mrf.mxu0  ;;  %v7205_v30 = vor.u32 %v8814_v15, %v7204_v11  ;;  %v8886_v36 = vld [vmem:[#allocation8 + $0x38c] sm:$0xf0]  ;;  %v7636_v25 = vld [vmem:[#allocation8 + $0x4a0] sm:$0xf] }
 0x29b   :  { %v9558_v26 = vpop.f32.mrf.mxu1  ;;  %v7316_v37 = vld [vmem:[#allocation8 + $0x220] sm:$0xf]  ;;  %v8954_v51 = vld [vmem:[#allocation8 + $0x5ac] sm:$0xf0] }
 0x29c   :  { %4400 = vmatpush.bf16.msra.mxu3 %v7109_v20  ;;  %4413 = vmatpush.bf16.msrb.mxu0 %v7253_v24  ;;  %v8894_v20 = vld [vmem:[#allocation8 + $0x3cc] sm:$0xf0]  ;;  %v9550_v24 = vadd.f32 %v9494_v4, %v2417_v12  ;;  %v9554_v44 = vadd.f32 %v9503_v46, %v2419_v13  ;;  %v7044_v4 = vld [vmem:[#allocation8] sm:$0xf]  ;;  %v7381_v46 = vor.u32 %v8858_v19, %v7380_v16 }
 0x29d   :  { %2806 = vmatpush.bf16.msra.mxu1 %v6561_v42  ;;  %2819 = vmatpush.bf16.msra.mxu2 %v6849_v45  ;;  %v7525_v33 = vor.u32 %v8894_v20, %v7524_v14  ;;  %v7508_v45 = vld [vmem:[#allocation8 + $0x3a0] sm:$0xf]  ;;  %v2503_v13 = vadd.f32 %v9538_v54, %v1085_v27  ;;  %v8846_v19 = vld [vmem:[#allocation8 + $0x24c] sm:$0xf0] }
 0x29e   :  { %v2835_v63 = vmax.f32 %v9554_v44, 0.0  ;;  %v7509_v57 = vor.u32 %v8890_v47, %v7508_v45  ;;  %v7332_v16 = vld [vmem:[#allocation8 + $0x240] sm:$0xf]  ;;  %v8922_v44 = vld [vmem:[#allocation8 + $0x4ac] sm:$0xf0] }
 0x29f   :  { %v7476_v14 = vld [vmem:[#allocation8 + $0x360] sm:$0xf]  ;;  %v2558_v54 = vpop.f32.mrf.mxu3  ;;  %v7637_v35 = vor.u32 %v8922_v44, %v7636_v25  ;;  %v8878_v47 = vld [vmem:[#allocation8 + $0x34c] sm:$0xf0] }
 0x2a0   :  { %4401 = vmatpush.bf16.msra.mxu3 %v7093_v48  ;;  %4414 = vmatpush.bf16.msrb.mxu0 %v7237_v49  ;;  %v2827_v48 = vmax.f32 %v9550_v24, 0.0  ;;  %v2487_v49 = vadd.f32 %v9513_v22, %v2473_v62  ;;  %v9572_v56 = vpop.f32.mrf.mxu2  ;;  %v8850_v22 = vld [vmem:[#allocation8 + $0x26c] sm:$0xf0]  ;;  %v7333_v62 = vor.u32 %v8846_v19, %v7332_v16  ;;  %v7588_v16 = vld [vmem:[#allocation8 + $0x440] sm:$0xf] }
 0x2a1   :  { %4425 = vmatpush.bf16.msrb.mxu1 %v7413_v21  ;;  %2820 = vmatpush.bf16.msra.mxu2 %v6817_v5  ;;  %v1086_v21 = vperm.slane %v9523_v59, 3  ;;  %v2501_v5 = vadd.f32 %v9525_v60, %v1085_v27  ;;  %v7349_v15 = vor.u32 %v8850_v22, %v7348_v0  ;;  %v7493_v60 = vor.u32 %v8886_v36, %v7492_v2  ;;  %v8882_v24 = vld [vmem:[#allocation8 + $0x36c] sm:$0xf0]  ;;  %v7780_v27 = vld [vmem:[#allocation8 + $0x5c0] sm:$0xf] }
 0x2a2   :  { %2807 = vmatmul.bf16.vlgmr.msra.gmra.mxu1 %v9459_v23  ;;  %v2461_v23 = vadd.f32 %v9515_v40, %v2447_v6  ;;  %v8854_v40 = vld [vmem:[#allocation8 + $0x28c] sm:$0xf0]  ;;  %v9575_v6 = vpop.f32.mrf.mxu0  ;;  %v2828_v12 = vmax.f32 %v2487_v49, 0.0  ;;  %v9580_v11 = vpack.c.bf16 %v2835_v63, %v2827_v48  ;;  %v7764_v49 = vld [vmem:[#allocation8 + $0x5a0] sm:$0xf] }
 0x2a3   :  { %v7365_v58 = vor.u32 %v8854_v40, %v7364_v38  ;;  %v8842_v38 = vld [vmem:[#allocation8 + $0x22c] sm:$0xf0]  ;;  %v2557_v40 = vadd.f32 %v9563_v32, %v1086_v21  ;;  %v2559_v45 = vadd.f32 %v2558_v54, %v1086_v21  ;;  %v7748_v36 = vld [vmem:[#allocation8 + $0x580] sm:$0xf] }
 0x2a4   :  { %4402 = vmatpush.bf16.msra.mxu3 %v7077_v7  ;;  %4415 = vmatpush.bf16.msrb.mxu0 %v7221_v9  ;;  %v2475_v42 = vadd.f32 %v9517_v41, %v2461_v23  ;;  %v7045_v41 = vor.u32 %v8774_v31, %v7044_v4  ;;  %v9577_v7 = vpop.f32.mrf.mxu1  ;;  %v8926_v9 = vld [vmem:[#allocation8 + $0x4cc] sm:$0xf0]  ;;  %v7797_v23 = vor.u32 %v8962_v43, %v7796_v10  ;;  %v7572_v44 = vld [vmem:[#allocation8 + $0x420] sm:$0xf] }
 0x2a5   :  { %4426 = vmatpush.bf16.msrb.mxu1 %v7397_v34  ;;  %4439 = vmatpush.bf16.msrb.mxu2 %v7541_v17  ;;  %v2517_v31 = vadd.f32 %v9556_v18, %v2503_v13  ;;  %v8918_v48 = vld [vmem:[#allocation8 + $0x48c] sm:$0xf0] }
 0x2a6   :  { %2821 = vmatmul.bf16.vlgmr.msra.gmra.mxu2 %v9463_v39  ;;  %v2489_v53 = vadd.f32 %v9527_v8, %v2475_v42  ;;  %v7172_v39 = vld [vmem:[#allocation8 + $0x100] sm:$0xf]  ;;  %v8874_v22 = vld [vmem:[#allocation8 + $0x32c] sm:$0xf0] }
 0x2a7   :  { %v7652_v8 = vld [vmem:[#allocation8 + $0x4c0] sm:$0xf]  ;;  %v7173_v17 = vor.u32 %v8806_v61, %v7172_v39  ;;  %v2531_v18 = vadd.f32 %v9558_v26, %v2517_v31  ;;  %v2571_v26 = vadd.f32 %v9575_v6, %v2557_v40  ;;  %v8914_v2 = vld [vmem:[#allocation8 + $0x46c] sm:$0xf0] }
 0x2a8   :  { %4403 = vmatpush.bf16.msra.mxu3 %v7061_v29  ;;  %4416 = vmatpush.bf16.msrb.mxu0 %v7205_v30  ;;  %v2836_v34 = vmax.f32 %v2489_v53, 0.0  ;;  %v7653_v20 = vor.u32 %v8926_v9, %v7652_v8  ;;  %v8958_v29 = vld [vmem:[#allocation8 + $0x5cc] sm:$0xf0]  ;;  %v2515_v30 = vadd.f32 %v9531_v28, %v2501_v5  ;;  %v7460_v42 = vld [vmem:[#allocation8 + $0x340] sm:$0xf]  ;;  %v7317_v53 = vor.u32 %v8842_v38, %v7316_v37 }
 0x2a9   :  { %4427 = vmatpush.bf16.msrb.mxu1 %v7381_v46  ;;  %4440 = vmatpush.bf16.msrb.mxu2 %v7525_v33  ;;  %v2598_v46 = vpop.f32.mrf.mxu2  ;;  %v7477_v33 = vor.u32 %v8882_v24, %v7476_v14  ;;  %v7620_v28 = vld [vmem:[#allocation8 + $0x480] sm:$0xf]  ;;  %v7781_v63 = vor.u32 %v8958_v29, %v7780_v27  ;;  %v7461_v21 = vor.u32 %v8878_v47, %v7460_v42  ;;  %v8910_v14 = vld [vmem:[#allocation8 + $0x44c] sm:$0xf0] }
 0x2aa   :  { %v9584_v4 = vpack.c.bf16 %v2836_v34, %v2828_v12  ;;  %v2529_v52 = vadd.f32 %v9533_v50, %v2515_v30  ;;  %v7621_v39 = vor.u32 %v8918_v48, %v7620_v28  ;;  %v7444_v61 = vld [vmem:[#allocation8 + $0x320] sm:$0xf]  ;;  %v7765_v50 = vor.u32 %v8954_v51, %v7764_v49  ;;  %v8906_v29 = vld [vmem:[#allocation8 + $0x42c] sm:$0xf0]  ;;  %v8800_v49 = vld [vmem:[#allocation8 + $0xe4] sm:$0xf] }
 0x2ab   :  { %v2585_v5 = vadd.f32 %v9577_v7, %v2571_v26  ;;  %v7445_v6 = vor.u32 %v8874_v22, %v7444_v61  ;;  %v7589_v27 = vor.u32 %v8910_v14, %v7588_v16  ;;  %v7716_v31 = vld [vmem:[#allocation8 + $0x540] sm:$0xf]  ;;  %v7573_v38 = vor.u32 %v8906_v29, %v7572_v44  ;;  %v8902_v40 = vld [vmem:[#allocation8 + $0x40c] sm:$0xf0]  ;;  %v7158_v51 = vld [vmem:[#allocation8 + $0xf0] sm:$0xf0] }
 0x2ac   :  { %4404 = vmatpush.bf16.msra.mxu3 %v7045_v41  ;;  %4417 = vmatpush.bf16.msrb.mxu0 %v7189_v55  ;;  %v2545_v41 = vadd.f32 %v9572_v56, %v2531_v18  ;;  %v2572_v55 = vpop.f32.mrf.mxu0  ;;  %v2586_v32 = vpop.f32.mrf.mxu1  ;;  %v8950_v56 = vld [vmem:[#allocation8 + $0x58c] sm:$0xf0]  ;;  %v2543_v8 = vadd.f32 %v9543_v3, %v2529_v52  ;;  %v7732_v3 = vld [vmem:[#allocation8 + $0x560] sm:$0xf]  ;;  %v7142_v61 = vld [vmem:[#allocation8 + $0xd0] sm:$0xf0] }
 0x2ad   :  { %4428 = vmatpush.bf16.msrb.mxu1 %v7365_v58  ;;  %4441 = vmatpush.bf16.msrb.mxu2 %v7509_v57  ;;  %v7300_v58 = vld [vmem:[#allocation8 + $0x200] sm:$0xf]  ;;  %v8838_v57 = vld [vmem:[#allocation8 + $0x20c] sm:$0xf0]  ;;  %v2573_v0 = vadd.f32 %v2572_v55, %v2559_v45  ;;  %v2599_v34 = vadd.f32 %v2598_v46, %v2585_v5  ;;  %v7749_v19 = vor.u32 %v8950_v56, %v7748_v36  ;;  %v8832_v26 = vld [vmem:[#allocation8 + $0x1e4] sm:$0xf] }
 0x2ae   :  { %v2837_v10 = vmax.f32 %v2545_v41, 0.0  ;;  %v7301_v43 = vor.u32 %v8838_v57, %v7300_v58  ;;  %v2829_v7 = vmax.f32 %v2543_v8, 0.0  ;;  %v7924_v46 = vld [vmem:[#allocation8 + $0x6e0] sm:$0xf]  ;;  %v8938_v48 = vld [vmem:[#allocation8 + $0x52c] sm:$0xf0] }
 0x2af   :  { %4405 = vmatmul.bf16.vlgmr.msra.gmra.mxu3 %v9580_v11  ;;  %v2587_v9 = vadd.f32 %v2586_v32, %v2573_v0  ;;  %v2830_v54 = vmax.f32 %v2599_v34, 0.0  ;;  %v7556_v42 = vld [vmem:[#allocation8 + $0x400] sm:$0xf]  ;;  %v8990_v18 = vld [vmem:[#allocation8 + $0x6cc] sm:$0xf0] }
 0x2b0   :  { %4453 = vmatpush.bf16.msrb.mxu3 %v7669_v1  ;;  %4418 = vmatpush.bf16.msrb.mxu0 %v7173_v17  ;;  %v7604_v1 = vld [vmem:[#allocation8 + $0x460] sm:$0xf]  ;;  %v8796_v41 = vld [vmem:[#allocation8 + $0xc4] sm:$0xf]  ;;  %v8986_v57 = vld [vmem:[#allocation8 + $0x6ac] sm:$0xf0] }
 0x2b1   :  { %4429 = vmatpush.bf16.msrb.mxu1 %v7349_v15  ;;  %4442 = vmatpush.bf16.msrb.mxu2 %v7493_v60  ;;  %v2600_v12 = vpop.f32.mrf.mxu2  ;;  %v7605_v13 = vor.u32 %v8914_v2, %v7604_v1  ;;  %v7428_v15 = vld [vmem:[#allocation8 + $0x300] sm:$0xf]  ;;  %v8870_v60 = vld [vmem:[#allocation8 + $0x30c] sm:$0xf0]  ;;  %v7286_v0 = vld [vmem:[#allocation8 + $0x1f0] sm:$0xf0]  ;;  %v7145_v56 = vor.u32 %v8796_v41, %v7142_v61 }
 0x2b2   :  { %v2601_v17 = vadd.f32 %v2600_v12, %v2587_v9  ;;  %v7429_v25 = vor.u32 %v8870_v60, %v7428_v15  ;;  %v7700_v47 = vld [vmem:[#allocation8 + $0x520] sm:$0xf]  ;;  %v2612_v28 = vpop.f32.mrf.mxu3  ;;  %v8792_v8 = vld [vmem:[#allocation8 + $0xa4] sm:$0xf]  ;;  %v7289_v5 = vor.u32 %v8832_v26, %v7286_v0  ;;  %v7062_v26 = vld [vmem:[#allocation8 + $0x30] sm:$0xf0] }
 0x2b3   :  { %4419 = vmatmul.bf16.vlgmr.msrb.gmra.mxu0 %v9584_v4  ;;  %v7701_v55 = vor.u32 %v8938_v48, %v7700_v47  ;;  %v7684_v32 = vld [vmem:[#allocation8 + $0x500] sm:$0xf]  ;;  %v8828_v12 = vld [vmem:[#allocation8 + $0x1c4] sm:$0xf] }
 0x2b4   :  { %4454 = vmatpush.bf16.msrb.mxu3 %v7653_v20  ;;  %4467 = vmatpush.bf16.msra.mxu0 %v7797_v23  ;;  %v8946_v20 = vld [vmem:[#allocation8 + $0x56c] sm:$0xf0]  ;;  %v2838_v24 = vmax.f32 %v2601_v17, 0.0  ;;  %v9595_v23 = vpack.c.bf16 %v2837_v10, %v2829_v7  ;;  %v7892_v58 = vld [vmem:[#allocation8 + $0x6a0] sm:$0xf]  ;;  %v2626_v1 = vpop.f32.mrf.mxu0 }
 0x2b5   :  { %4430 = vmatpush.bf16.msrb.mxu1 %v7333_v62  ;;  %4443 = vmatpush.bf16.msrb.mxu2 %v7477_v33  ;;  %v7733_v30 = vor.u32 %v8946_v20, %v7732_v3  ;;  %v8942_v62 = vld [vmem:[#allocation8 + $0x54c] sm:$0xf0]  ;;  %v7893_v22 = vor.u32 %v8986_v57, %v7892_v58  ;;  %v7876_v9 = vld [vmem:[#allocation8 + $0x680] sm:$0xf]  ;;  %v8788_v16 = vld [vmem:[#allocation8 + $0x84] sm:$0xf] }
 0x2b6   :  { %v8994_v33 = vld [vmem:[#allocation8 + $0x6ec] sm:$0xf0]  ;;  %v7717_v45 = vor.u32 %v8942_v62, %v7716_v31  ;;  %v7860_v14 = vld [vmem:[#allocation8 + $0x660] sm:$0xf]  ;;  %v7110_v7 = vld [vmem:[#allocation8 + $0x90] sm:$0xf0] }
 0x2b7   :  { %v7925_v37 = vor.u32 %v8994_v33, %v7924_v46  ;;  %v8982_v10 = vld [vmem:[#allocation8 + $0x68c] sm:$0xf0]  ;;  %v8784_v31 = vld [vmem:[#allocation8 + $0x64] sm:$0xf]  ;;  %v7844_v46 = vld [vmem:[#allocation8 + $0x640] sm:$0xf] }
 0x2b8   :  { %4455 = vmatpush.bf16.msrb.mxu3 %v7637_v35  ;;  %4468 = vmatpush.bf16.msra.mxu0 %v7781_v63  ;;  %v9597_v35 = vpack.c.bf16 %v2838_v24, %v2830_v54  ;;  %v7908_v63 = vld [vmem:[#allocation8 + $0x6c0] sm:$0xf]  ;;  %v8978_v3 = vld [vmem:[#allocation8 + $0x66c] sm:$0xf0]  ;;  %v8824_v24 = vld [vmem:[#allocation8 + $0x1a4] sm:$0xf] }
 0x2b9   :  { %4431 = vmatpush.bf16.msrb.mxu1 %v7317_v53  ;;  %4444 = vmatpush.bf16.msrb.mxu2 %v7461_v21  ;;  %v7909_v52 = vor.u32 %v8990_v18, %v7908_v63  ;;  %v7557_v53 = vor.u32 %v8902_v40, %v7556_v42  ;;  %v7161_v21 = vor.u32 %v8800_v49, %v7158_v51  ;;  %v8974_v33 = vld [vmem:[#allocation8 + $0x64c] sm:$0xf0]  ;;  %v7094_v42 = vld [vmem:[#allocation8 + $0x70] sm:$0xf0]  ;;  %v8820_v40 = vld [vmem:[#allocation8 + $0x184] sm:$0xf] }
 0x2ba   :  { %v2614_v34 = vpop.f32.mrf.mxu3  ;;  %v7861_v44 = vor.u32 %v8978_v3, %v7860_v14  ;;  %v7845_v47 = vor.u32 %v8974_v33, %v7844_v46  ;;  %v7097_v18 = vor.u32 %v8784_v31, %v7094_v42  ;;  %v8780_v49 = vld [vmem:[#allocation8 + $0x44] sm:$0xf]  ;;  %v9022_v14 = vld [vmem:[#allocation8 + $0x7cc] sm:$0xf0]  ;;  %v7174_v31 = vld [vmem:[#allocation8 + $0x110] sm:$0xf0] }
 0x2bb   :  { %v8776_v61 = vld [vmem:[#allocation8 + $0x24] sm:$0xf]  ;;  %v8020_v46 = vld [vmem:[#allocation8 + $0x7a0] sm:$0xf]  ;;  %v9018_v33 = vld [vmem:[#allocation8 + $0x7ac] sm:$0xf0] }
 0x2bc   :  { %4456 = vmatpush.bf16.msrb.mxu3 %v7621_v39  ;;  %4469 = vmatpush.bf16.msra.mxu0 %v7765_v50  ;;  %v8934_v39 = vld [vmem:[#allocation8 + $0x50c] sm:$0xf0]  ;;  %v1087_v50 = vperm.slane %v9523_v59, 4  ;;  %v8860_v3 = vld [vmem:[#allocation8 + $0x2c4] sm:$0xf] }
 0x2bd   :  { %4432 = vmatpush.bf16.msrb.mxu1 %v7301_v43  ;;  %4445 = vmatpush.bf16.msrb.mxu2 %v7445_v6  ;;  %v7685_v36 = vor.u32 %v8934_v39, %v7684_v32  ;;  %v7126_v43 = vld [vmem:[#allocation8 + $0xb0] sm:$0xf0]  ;;  %v8816_v32 = vld [vmem:[#allocation8 + $0x164] sm:$0xf] }
 0x2be   :  { %v7270_v6 = vld [vmem:[#allocation8 + $0x1d0] sm:$0xf0]  ;;  %v2613_v17 = vadd.f32 %v2612_v28, %v1087_v50  ;;  %v7129_v60 = vor.u32 %v8792_v8, %v7126_v43  ;;  %v2615_v20 = vadd.f32 %v2614_v34, %v1087_v50  ;;  %v8966_v50 = vld [vmem:[#allocation8 + $0x60c] sm:$0xf0]  ;;  %v8864_v43 = vld [vmem:[#allocation8 + $0x2e4] sm:$0xf]  ;;  %v7065_v34 = vor.u32 %v8776_v61, %v7062_v26 }
 0x2bf   :  { %v2640_v2 = vpop.f32.mrf.mxu1  ;;  %v7654_v42 = vld [vmem:[#allocation8 + $0x4d0] sm:$0xf0]  ;;  %v7988_v61 = vld [vmem:[#allocation8 + $0x760] sm:$0xf]  ;;  %v9010_v26 = vld [vmem:[#allocation8 + $0x76c] sm:$0xf0] }
 0x2c0   :  { %4457 = vmatpush.bf16.msrb.mxu3 %v7605_v13  ;;  %4470 = vmatpush.bf16.msra.mxu0 %v7749_v19  ;;  %v7877_v13 = vor.u32 %v8982_v10, %v7876_v9  ;;  %v7273_v19 = vor.u32 %v8828_v12, %v7270_v6  ;;  %v2627_v54 = vadd.f32 %v2626_v1, %v2613_v17  ;;  %v8812_v1 = vld [vmem:[#allocation8 + $0x144] sm:$0xf]  ;;  %v9026_v9 = vld [vmem:[#allocation8 + $0x7ec] sm:$0xf0]  ;;  %v7414_v12 = vld [vmem:[#allocation8 + $0x2f0] sm:$0xf0] }
 0x2c1   :  { %4433 = vmatmul.bf16.vlgmr.msrb.gmra.mxu1 %v9595_v23  ;;  %4446 = vmatpush.bf16.msrb.mxu2 %v7429_v25  ;;  %v7254_v25 = vld [vmem:[#allocation8 + $0x1b0] sm:$0xf0]  ;;  %v8772_v6 = vld [vmem:[#allocation8 + $0x4] sm:$0xf] }
 0x2c2   :  { %4481 = vmatpush.bf16.msra.mxu1 %v7925_v37  ;;  %v7257_v62 = vor.u32 %v8824_v24, %v7254_v25  ;;  %v2641_v37 = vadd.f32 %v2640_v2, %v2627_v54  ;;  %v7812_v2 = vld [vmem:[#allocation8 + $0x600] sm:$0xf]  ;;  %v7046_v17 = vld [vmem:[#allocation8 + $0x10] sm:$0xf0] }
 0x2c3   :  { %v7813_v8 = vor.u32 %v8966_v50, %v7812_v2  ;;  %v7670_v24 = vld [vmem:[#allocation8 + $0x4f0] sm:$0xf0]  ;;  %v7989_v50 = vor.u32 %v9010_v26, %v7988_v61 }
 0x2c4   :  { %4458 = vmatpush.bf16.msrb.mxu3 %v7589_v27  ;;  %4471 = vmatpush.bf16.msra.mxu0 %v7733_v30  ;;  %v2628_v27 = vpop.f32.mrf.mxu0  ;;  %v7113_v30 = vor.u32 %v8788_v16, %v7110_v7  ;;  %v7190_v16 = vld [vmem:[#allocation8 + $0x130] sm:$0xf0]  ;;  %v8928_v7 = vld [vmem:[#allocation8 + $0x4e4] sm:$0xf] }
 0x2c5   :  { %4447 = vmatmul.bf16.vlgmr.msrb.gmra.mxu2 %v9597_v35  ;;  %v7622_v2 = vld [vmem:[#allocation8 + $0x490] sm:$0xf0] }
 0x2c6   :  { %4482 = vmatpush.bf16.msra.mxu1 %v7909_v52  ;;  %v7828_v52 = vld [vmem:[#allocation8 + $0x620] sm:$0xf]  ;;  %v7558_v61 = vld [vmem:[#allocation8 + $0x410] sm:$0xf0] }
 0x2c7   :  { %v2642_v29 = vpop.f32.mrf.mxu1 }
 0x2c8   :  { %4459 = vmatpush.bf16.msrb.mxu3 %v7573_v38  ;;  %4472 = vmatpush.bf16.msra.mxu0 %v7717_v45  ;;  %v2629_v38 = vadd.f32 %v2628_v27, %v2615_v20  ;;  %v7238_v45 = vld [vmem:[#allocation8 + $0x190] sm:$0xf0]  ;;  %v7049_v27 = vor.u32 %v8772_v6, %v7046_v17  ;;  %v9006_v6 = vld [vmem:[#allocation8 + $0x74c] sm:$0xf0] }
 0x2c9   :  { %v2654_v15 = vpop.f32.mrf.mxu2  ;;  %v7241_v51 = vor.u32 %v8820_v40, %v7238_v45  ;;  %v8021_v40 = vor.u32 %v9018_v33, %v8020_v46  ;;  %v7382_v45 = vld [vmem:[#allocation8 + $0x2b0] sm:$0xf0]  ;;  %v8960_v33 = vld [vmem:[#allocation8 + $0x5e4] sm:$0xf] }
 0x2ca   :  { %4483 = vmatpush.bf16.msra.mxu1 %v7893_v22  ;;  %v2643_v28 = vadd.f32 %v2642_v29, %v2629_v38  ;;  %v2655_v48 = vadd.f32 %v2654_v15, %v2641_v37  ;;  %v8856_v37 = vld [vmem:[#allocation8 + $0x2a4] sm:$0xf]  ;;  %v7606_v17 = vld [vmem:[#allocation8 + $0x470] sm:$0xf0] }
 0x2cb   :  { %v8924_v38 = vld [vmem:[#allocation8 + $0x4c4] sm:$0xf] }
 0x2cc   :  { %4460 = vmatpush.bf16.msrb.mxu3 %v7557_v53  ;;  %4473 = vmatpush.bf16.msra.mxu0 %v7701_v55  ;;  %v8970_v53 = vld [vmem:[#allocation8 + $0x62c] sm:$0xf0]  ;;  %v7078_v55 = vld [vmem:[#allocation8 + $0x50] sm:$0xf0]  ;;  %v2831_v58 = vmax.f32 %v2655_v48, 0.0  ;;  %v1088_v48 = vperm.slane %v9523_v59, 5 }
 0x2cd   :  { %v7829_v39 = vor.u32 %v8970_v53, %v7828_v52  ;;  %v7081_v0 = vor.u32 %v8780_v49, %v7078_v55  ;;  %v7657_v49 = vor.u32 %v8924_v38, %v7654_v42  ;;  %v9014_v52 = vld [vmem:[#allocation8 + $0x78c] sm:$0xf0]  ;;  %v8852_v53 = vld [vmem:[#allocation8 + $0x284] sm:$0xf]  ;;  %v7638_v55 = vld [vmem:[#allocation8 + $0x4b0] sm:$0xf0] }
 0x2ce   :  { %4484 = vmatpush.bf16.msra.mxu1 %v7877_v13  ;;  %v7417_v13 = vor.u32 %v8864_v43, %v7414_v12  ;;  %v8912_v43 = vld [vmem:[#allocation8 + $0x464] sm:$0xf]  ;;  %v7972_v12 = vld [vmem:[#allocation8 + $0x740] sm:$0xf] }
 0x2cf   :  { %v8904_v42 = vld [vmem:[#allocation8 + $0x424] sm:$0xf] }
 0x2d0   :  { %4509 = vmatpush.bf16.msra.mxu3 %v7161_v21  ;;  %4474 = vmatpush.bf16.msra.mxu0 %v7685_v36  ;;  %v7222_v21 = vld [vmem:[#allocation8 + $0x170] sm:$0xf0] }
 0x2d1   :  { %v2656_v63 = vpop.f32.mrf.mxu2  ;;  %v7225_v22 = vor.u32 %v8816_v32, %v7222_v21  ;;  %v7366_v21 = vld [vmem:[#allocation8 + $0x290] sm:$0xf0] }
 0x2d2   :  { %4485 = vmatpush.bf16.msra.mxu1 %v7861_v44  ;;  %v2657_v41 = vadd.f32 %v2656_v63, %v2643_v28  ;;  %v2668_v20 = vpop.f32.mrf.mxu3  ;;  %v7398_v44 = vld [vmem:[#allocation8 + $0x2d0] sm:$0xf0]  ;;  %v2682_v28 = vpop.f32.mrf.mxu0 }
 0x2d3   :  { %v7401_v54 = vor.u32 %v8860_v3, %v7398_v44  ;;  %v9002_v44 = vld [vmem:[#allocation8 + $0x72c] sm:$0xf0] }
 0x2d4   :  { %4510 = vmatpush.bf16.msra.mxu3 %v7145_v56  ;;  %4523 = vmatpush.bf16.msrb.mxu0 %v7289_v5  ;;  %v2839_v57 = vmax.f32 %v2657_v41, 0.0  ;;  %v7206_v56 = vld [vmem:[#allocation8 + $0x150] sm:$0xf0]  ;;  %v8052_v5 = vld [vmem:[#allocation8 + $0x7e0] sm:$0xf] }
 0x2d5   :  { %v8053_v10 = vor.u32 %v9026_v9, %v8052_v5  ;;  %v7209_v15 = vor.u32 %v8812_v1, %v7206_v56  ;;  %v8920_v41 = vld [vmem:[#allocation8 + $0x4a4] sm:$0xf]  ;;  %v7350_v56 = vld [vmem:[#allocation8 + $0x270] sm:$0xf0] }
 0x2d6   :  { %4486 = vmatpush.bf16.msra.mxu1 %v7845_v47  ;;  %v9602_v36 = vpack.c.bf16 %v2839_v57, %v2831_v58  ;;  %v7385_v47 = vor.u32 %v8856_v37, %v7382_v45  ;;  %v2669_v57 = vadd.f32 %v2668_v20, %v1088_v48  ;;  %v7641_v59 = vor.u32 %v8920_v41, %v7638_v55  ;;  %v8916_v1 = vld [vmem:[#allocation8 + $0x484] sm:$0xf]  ;;  %v7798_v37 = vld [vmem:[#allocation8 + $0x5f0] sm:$0xf0] }
 0x2d7   :  { %4495 = vmatpush.bf16.msra.mxu2 %v8053_v10  ;;  %v7625_v10 = vor.u32 %v8916_v1, %v7622_v2  ;;  %v7782_v55 = vld [vmem:[#allocation8 + $0x5d0] sm:$0xf0]  ;;  %v8803_v2 = vld [vmem:[#allocation8 + $0xf4] sm:$0xf0] }
 0x2d8   :  { %4511 = vmatpush.bf16.msra.mxu3 %v7129_v60  ;;  %4524 = vmatpush.bf16.msrb.mxu0 %v7273_v19  ;;  %v8808_v60 = vld [vmem:[#allocation8 + $0x124] sm:$0xf]  ;;  %v8036_v19 = vld [vmem:[#allocation8 + $0x7c0] sm:$0xf]  ;;  %v2683_v9 = vadd.f32 %v2682_v28, %v2669_v57  ;;  %v7526_v1 = vld [vmem:[#allocation8 + $0x3d0] sm:$0xf0] }
 0x2d9   :  { %4461 = vmatmul.bf16.vlgmr.msrb.gmra.mxu3 %v9602_v36  ;;  %v8037_v25 = vor.u32 %v9022_v14, %v8036_v19  ;;  %v7193_v29 = vor.u32 %v8808_v60, %v7190_v16  ;;  %v8844_v60 = vld [vmem:[#allocation8 + $0x244] sm:$0xf]  ;;  %v7334_v16 = vld [vmem:[#allocation8 + $0x250] sm:$0xf0] }
 0x2da   :  { %4487 = vmatpush.bf16.msra.mxu1 %v7829_v39  ;;  %v7369_v39 = vor.u32 %v8852_v53, %v7366_v21  ;;  %v2670_v58 = vpop.f32.mrf.mxu3  ;;  %v7337_v3 = vor.u32 %v8844_v60, %v7334_v16  ;;  %v7302_v53 = vld [vmem:[#allocation8 + $0x210] sm:$0xf0]  ;;  %v8896_v21 = vld [vmem:[#allocation8 + $0x3e4] sm:$0xf] }
 0x2db   :  { %4496 = vmatpush.bf16.msra.mxu2 %v8037_v25  ;;  %v7956_v25 = vld [vmem:[#allocation8 + $0x720] sm:$0xf]  ;;  %v9613_v16 = vld [vmem:[%s9740_s1 + $0x7] sm:$0xff] }
 0x2dc   :  { %4512 = vmatpush.bf16.msra.mxu3 %v7113_v30  ;;  %4525 = vmatpush.bf16.msrb.mxu0 %v7257_v62  ;;  %v8804_v30 = vld [vmem:[#allocation8 + $0x104] sm:$0xf]  ;;  %v7673_v62 = vor.u32 %v8928_v7, %v7670_v24  ;;  %v7609_v24 = vor.u32 %v8912_v43, %v7606_v17 }
 0x2dd   :  { %v8948_v17 = vld [vmem:[#allocation8 + $0x584] sm:$0xf] }
 0x2de   :  { %4488 = vmatpush.bf16.msra.mxu1 %v7813_v8  ;;  %v2671_v8 = vadd.f32 %v2670_v58, %v1088_v48  ;;  %v7940_v48 = vld [vmem:[#allocation8 + $0x700] sm:$0xf] }
 0x2df   :  { %v2696_v63 = vpop.f32.mrf.mxu1  ;;  %4497 = vmatpush.bf16.msra.mxu2 %v8021_v40  ;;  %v7574_v40 = vld [vmem:[#allocation8 + $0x430] sm:$0xf0] }
 0x2e0   :  { %4513 = vmatpush.bf16.msra.mxu3 %v7097_v18  ;;  %4526 = vmatpush.bf16.msrb.mxu0 %v7241_v51  ;;  %v7177_v18 = vor.u32 %v8804_v30, %v7174_v31  ;;  %v8004_v51 = vld [vmem:[#allocation8 + $0x780] sm:$0xf]  ;;  %v2697_v19 = vadd.f32 %v2696_v63, %v2683_v9  ;;  %v7590_v30 = vld [vmem:[#allocation8 + $0x450] sm:$0xf0]  ;;  %v7957_v31 = vor.u32 %v9002_v44, %v7956_v25  ;;  %v8998_v63 = vld [vmem:[#allocation8 + $0x70c] sm:$0xf0] }
 0x2e1   :  { %v8005_v32 = vor.u32 %v9014_v52, %v8004_v51  ;;  %v7941_v51 = vor.u32 %v8998_v63, %v7940_v48  ;;  %v8836_v52 = vld [vmem:[#allocation8 + $0x204] sm:$0xf]  ;;  %v7577_v57 = vor.u32 %v8904_v42, %v7574_v40  ;;  %v7494_v44 = vld [vmem:[#allocation8 + $0x390] sm:$0xf0]  ;;  %v8791_v40 = vld [vmem:[#allocation8 + $0x94] sm:$0xf0] }
 0x2e2   :  { %4537 = vmatpush.bf16.msrb.mxu1 %v7417_v13  ;;  %v2684_v13 = vpop.f32.mrf.mxu0  ;;  %v8884_v25 = vld [vmem:[#allocation8 + $0x384] sm:$0xf] }
 0x2e3   :  { %4498 = vmatpush.bf16.msra.mxu2 %v8005_v32  ;;  %v2685_v14 = vadd.f32 %v2684_v13, %v2671_v8  ;;  %v7305_v32 = vor.u32 %v8836_v52, %v7302_v53  ;;  %v7510_v13 = vld [vmem:[#allocation8 + $0x3b0] sm:$0xf0]  ;;  %v8876_v52 = vld [vmem:[#allocation8 + $0x344] sm:$0xf] }
 0x2e4   :  { %4514 = vmatpush.bf16.msra.mxu3 %v7081_v0  ;;  %4527 = vmatpush.bf16.msrb.mxu0 %v7225_v22  ;;  %v8848_v0 = vld [vmem:[#allocation8 + $0x264] sm:$0xf]  ;;  %v7462_v53 = vld [vmem:[#allocation8 + $0x350] sm:$0xf0] }
 0x2e5   :  { %v7353_v5 = vor.u32 %v8848_v0, %v7350_v56  ;;  %v7164_v0 = vld [vmem:[#allocation8 + $0xe8] sm:$0xf]  ;;  %v7766_v56 = vld [vmem:[#allocation8 + $0x5b0] sm:$0xf0] }
 0x2e6   :  { %4538 = vmatpush.bf16.msrb.mxu1 %v7401_v54  ;;  %v8840_v54 = vld [vmem:[#allocation8 + $0x224] sm:$0xf] }
 0x2e7   :  { %4499 = vmatpush.bf16.msra.mxu2 %v7989_v50  ;;  %v8952_v50 = vld [vmem:[#allocation8 + $0x5a4] sm:$0xf] }
 0x2e8   :  { %4515 = vmatpush.bf16.msra.mxu3 %v7065_v34  ;;  %4528 = vmatpush.bf16.msrb.mxu0 %v7209_v15  ;;  %v2698_v34 = vpop.f32.mrf.mxu1  ;;  %v7973_v15 = vor.u32 %v9006_v6, %v7972_v12  ;;  %v7769_v43 = vor.u32 %v8952_v50, %v7766_v56  ;;  %v7148_v12 = vld [vmem:[#allocation8 + $0xc8] sm:$0xf]  ;;  %v8888_v6 = vld [vmem:[#allocation8 + $0x3a4] sm:$0xf]  ;;  %v7446_v50 = vld [vmem:[#allocation8 + $0x330] sm:$0xf0] }
 0x2e9   :  { %v2710_v22 = vpop.f32.mrf.mxu2  ;;  %v2699_v20 = vadd.f32 %v2698_v34, %v2685_v14  ;;  %v8799_v34 = vld [vmem:[#allocation8 + $0xd4] sm:$0xf0]  ;;  %v7513_v60 = vor.u32 %v8888_v6, %v7510_v13  ;;  %v7292_v6 = vld [vmem:[#allocation8 + $0x1e8] sm:$0xf] }
 0x2ea   :  { %4539 = vmatpush.bf16.msrb.mxu1 %v7385_v47  ;;  %v2711_v7 = vadd.f32 %v2710_v22, %v2697_v19  ;;  %v8892_v22 = vld [vmem:[#allocation8 + $0x3c4] sm:$0xf]  ;;  %v1089_v19 = vperm.slane %v9613_v16, 6  ;;  %v8835_v13 = vld [vmem:[#allocation8 + $0x1f4] sm:$0xf0] }
 0x2eb   :  { %4500 = vmatpush.bf16.msra.mxu2 %v7973_v15  ;;  %v7529_v8 = vor.u32 %v8892_v22, %v7526_v1  ;;  %v7750_v15 = vld [vmem:[#allocation8 + $0x590] sm:$0xf0]  ;;  %v7084_v1 = vld [vmem:[#allocation8 + $0x48] sm:$0xf] }
 0x2ec   :  { %4516 = vmatpush.bf16.msra.mxu3 %v7049_v27  ;;  %4529 = vmatpush.bf16.msrb.mxu0 %v7193_v29  ;;  %v8908_v29 = vld [vmem:[#allocation8 + $0x444] sm:$0xf]  ;;  %v2832_v45 = vmax.f32 %v2711_v7, 0.0  ;;  %v7753_v7 = vor.u32 %v8948_v17, %v7750_v15  ;;  %v7926_v15 = vld [vmem:[#allocation8 + $0x6f0] sm:$0xf0] }
 0x2ed   :  { %v7593_v28 = vor.u32 %v8908_v29, %v7590_v30  ;;  %v7734_v29 = vld [vmem:[#allocation8 + $0x570] sm:$0xf0]  ;;  %v7497_v30 = vor.u32 %v8884_v25, %v7494_v44  ;;  %v8992_v17 = vld [vmem:[#allocation8 + $0x6e4] sm:$0xf]  ;;  %v7068_v25 = vld [vmem:[#allocation8 + $0x28] sm:$0xf] }
 0x2ee   :  { %4540 = vmatpush.bf16.msrb.mxu1 %v7369_v39  ;;  %v7542_v39 = vld [vmem:[#allocation8 + $0x3f0] sm:$0xf0]  ;;  %v8779_v44 = vld [vmem:[#allocation8 + $0x34] sm:$0xf0] }
 0x2ef   :  { %4517 = vmatmul.bf16.vlgmr.msra.gmra.mxu3 %v9580_v11  ;;  %4501 = vmatpush.bf16.msra.mxu2 %v7957_v31  ;;  %v7545_v58 = vor.u32 %v8896_v21, %v7542_v39  ;;  %v8936_v21 = vld [vmem:[#allocation8 + $0x524] sm:$0xf]  ;;  %v7702_v39 = vld [vmem:[#allocation8 + $0x530] sm:$0xf0] }
 0x2f0   :  { %4565 = vmatpush.bf16.msrb.mxu3 %v7673_v62  ;;  %4530 = vmatpush.bf16.msrb.mxu0 %v7177_v18  ;;  %v7318_v62 = vld [vmem:[#allocation8 + $0x230] sm:$0xf0]  ;;  %v7801_v18 = vor.u32 %v8960_v33, %v7798_v37  ;;  %v2738_v14 = vpop.f32.mrf.mxu0  ;;  %v7116_v33 = vld [vmem:[#allocation8 + $0x88] sm:$0xf]  ;;  %v8880_v37 = vld [vmem:[#allocation8 + $0x364] sm:$0xf]  ;;  %v7705_v22 = vor.u32 %v8936_v21, %v7702_v39 }
 0x2f1   :  { %v2712_v27 = vpop.f32.mrf.mxu2  ;;  %v7321_v38 = vor.u32 %v8840_v54, %v7318_v62  ;;  %v8795_v54 = vld [vmem:[#allocation8 + $0xb4] sm:$0xf0]  ;;  %v7244_v39 = vld [vmem:[#allocation8 + $0x188] sm:$0xf] }
 0x2f2   :  { %4541 = vmatpush.bf16.msrb.mxu1 %v7353_v5  ;;  %v2713_v46 = vadd.f32 %v2712_v27, %v2699_v20  ;;  %v2724_v5 = vpop.f32.mrf.mxu3  ;;  %v7149_v20 = vor.u32 %v8799_v34, %v7148_v12  ;;  %v8944_v27 = vld [vmem:[#allocation8 + $0x564] sm:$0xf]  ;;  %v8927_v21 = vld [vmem:[#allocation8 + $0x4d4] sm:$0xf0] }
 0x2f3   :  { %4502 = vmatpush.bf16.msra.mxu2 %v7941_v51  ;;  %v2725_v42 = vadd.f32 %v2724_v5, %v1089_v19  ;;  %v7100_v51 = vld [vmem:[#allocation8 + $0x68] sm:$0xf]  ;;  %v8783_v5 = vld [vmem:[#allocation8 + $0x54] sm:$0xf0] }
 0x2f4   :  { %4566 = vmatpush.bf16.msrb.mxu3 %v7657_v49  ;;  %v2840_v47 = vmax.f32 %v2713_v46, 0.0  ;;  %v8956_v49 = vld [vmem:[#allocation8 + $0x5c4] sm:$0xf]  ;;  %v7737_v46 = vor.u32 %v8944_v27, %v7734_v29  ;;  %v7276_v27 = vld [vmem:[#allocation8 + $0x1c8] sm:$0xf] }
 0x2f5   :  { %v7785_v26 = vor.u32 %v8956_v49, %v7782_v55  ;;  %v2739_v55 = vadd.f32 %v2738_v14, %v2725_v42  ;;  %v8868_v14 = vld [vmem:[#allocation8 + $0x304] sm:$0xf]  ;;  %v8831_v29 = vld [vmem:[#allocation8 + $0x1d4] sm:$0xf0] }
 0x2f6   :  { %4542 = vmatpush.bf16.msrb.mxu1 %v7337_v3  ;;  %v9607_v41 = vpack.c.bf16 %v2840_v47, %v2832_v45  ;;  %v8940_v45 = vld [vmem:[#allocation8 + $0x544] sm:$0xf]  ;;  %v7718_v47 = vld [vmem:[#allocation8 + $0x550] sm:$0xf0]  ;;  %v8775_v42 = vld [vmem:[#allocation8 + $0x14] sm:$0xf0] }
 0x2f7   :  { %4551 = vmatpush.bf16.msrb.mxu2 %v7545_v58  ;;  %v7721_v49 = vor.u32 %v8940_v45, %v7718_v47  ;;  %v7465_v58 = vor.u32 %v8876_v52, %v7462_v53  ;;  %v8931_v47 = vld [vmem:[#allocation8 + $0x4f4] sm:$0xf0] }
 0x2f8   :  { %4567 = vmatpush.bf16.msrb.mxu3 %v7641_v59  ;;  %4475 = vmatmul.bf16.vlgmr.msra.gmra.mxu0 %v9607_v41  ;;  %v8900_v59 = vld [vmem:[#allocation8 + $0x404] sm:$0xf] }
 0x2f9   :  { %4579 = vmatpush.bf16.msra.mxu0 %v7801_v18  ;;  %v7561_v9 = vor.u32 %v8900_v59, %v7558_v61  ;;  %v7117_v18 = vor.u32 %v8791_v40, %v7116_v33  ;;  %v7069_v33 = vor.u32 %v8779_v44, %v7068_v25  ;;  %v7676_v40 = vld [vmem:[#allocation8 + $0x4e8] sm:$0xf] }
 0x2fa   :  { %4543 = vmatpush.bf16.msrb.mxu1 %v7321_v38  ;;  %v2726_v31 = vpop.f32.mrf.mxu3  ;;  %v7478_v38 = vld [vmem:[#allocation8 + $0x370] sm:$0xf0]  ;;  %v7677_v52 = vor.u32 %v8931_v47, %v7676_v40  ;;  %v7612_v44 = vld [vmem:[#allocation8 + $0x468] sm:$0xf] }
 0x2fb   :  { %4552 = vmatpush.bf16.msrb.mxu2 %v7529_v8  ;;  %v2727_v63 = vadd.f32 %v2726_v31, %v1089_v19 }
 0x2fc   :  { %4568 = vmatpush.bf16.msrb.mxu3 %v7625_v10  ;;  %v7165_v10 = vor.u32 %v8803_v2, %v7164_v0  ;;  %v8872_v2 = vld [vmem:[#allocation8 + $0x324] sm:$0xf] }
 0x2fd   :  { %4580 = vmatpush.bf16.msra.mxu0 %v7785_v26 }
 0x2fe   :  { %4544 = vmatpush.bf16.msrb.mxu1 %v7305_v32  ;;  %v8787_v32 = vld [vmem:[#allocation8 + $0x74] sm:$0xf0] }
 0x2ff   :  { %v2752_v3 = vpop.f32.mrf.mxu1  ;;  %4553 = vmatpush.bf16.msrb.mxu2 %v7513_v60  ;;  %v7101_v0 = vor.u32 %v8787_v32, %v7100_v51  ;;  %v7085_v60 = vor.u32 %v8783_v5, %v7084_v1  ;;  %v7862_v5 = vld [vmem:[#allocation8 + $0x670] sm:$0xf0] }
 0x300   :  { %4569 = vmatpush.bf16.msrb.mxu3 %v7609_v24  ;;  %v7132_v24 = vld [vmem:[#allocation8 + $0xa8] sm:$0xf]  ;;  %v2753_v61 = vadd.f32 %v2752_v3, %v2739_v55  ;;  %v7430_v3 = vld [vmem:[#allocation8 + $0x310] sm:$0xf0] }
 0x301   :  { %4581 = vmatpush.bf16.msra.mxu0 %v7769_v43  ;;  %v7133_v62 = vor.u32 %v8795_v54, %v7132_v24  ;;  %v7449_v43 = vor.u32 %v8872_v2, %v7446_v50  ;;  %v7293_v24 = vor.u32 %v8835_v13, %v7292_v6  ;;  %v7929_v54 = vor.u32 %v8992_v17, %v7926_v15  ;;  %v7660_v55 = vld [vmem:[#allocation8 + $0x4c8] sm:$0xf]  ;;  %v8972_v17 = vld [vmem:[#allocation8 + $0x644] sm:$0xf] }
 0x302   :  { %v7644_v50 = vld [vmem:[#allocation8 + $0x4a8] sm:$0xf] }
 0x303   :  { %4554 = vmatpush.bf16.msrb.mxu2 %v7497_v30  ;;  %v7433_v30 = vor.u32 %v8868_v14, %v7430_v3  ;;  %v7628_v13 = vld [vmem:[#allocation8 + $0x488] sm:$0xf]  ;;  %v8815_v14 = vld [vmem:[#allocation8 + $0x154] sm:$0xf0] }
 0x304   :  { %4570 = vmatpush.bf16.msrb.mxu3 %v7593_v28  ;;  %v7481_v28 = vor.u32 %v8880_v37, %v7478_v38  ;;  %v7277_v37 = vor.u32 %v8831_v29, %v7276_v27  ;;  %v7052_v38 = vld [vmem:[#allocation8 + $0x8] sm:$0xf]  ;;  %v8968_v27 = vld [vmem:[#allocation8 + $0x624] sm:$0xf] }
 0x305   :  { %4582 = vmatpush.bf16.msra.mxu0 %v7753_v7  ;;  %v7053_v51 = vor.u32 %v8775_v42, %v7052_v38 }
 0x307   :  { %4555 = vmatpush.bf16.msrb.mxu2 %v7481_v28  ;;  %v2754_v59 = vpop.f32.mrf.mxu1  ;;  %v7260_v28 = vld [vmem:[#allocation8 + $0x1a8] sm:$0xf] }
 0x308   :  { %4571 = vmatpush.bf16.msrb.mxu3 %v7577_v57  ;;  %4531 = vmatmul.bf16.vlgmr.msrb.gmra.mxu0 %v9584_v4  ;;  %v2740_v57 = vpop.f32.mrf.mxu0 }
 0x309   :  { %v2766_v48 = vpop.f32.mrf.mxu2  ;;  %4583 = vmatpush.bf16.msra.mxu0 %v7737_v46  ;;  %v2741_v26 = vadd.f32 %v2740_v57, %v2727_v63  ;;  %v7910_v46 = vld [vmem:[#allocation8 + $0x6d0] sm:$0xf0]  ;;  %v8984_v63 = vld [vmem:[#allocation8 + $0x6a4] sm:$0xf] }
 0x30a   :  { %v2767_v8 = vadd.f32 %v2766_v48, %v2753_v61  ;;  %v8827_v48 = vld [vmem:[#allocation8 + $0x1b4] sm:$0xf0]  ;;  %v8980_v57 = vld [vmem:[#allocation8 + $0x684] sm:$0xf]  ;;  %v1090_v61 = vperm.slane %v9613_v16, 7 }
 0x30b   :  { %v2755_v56 = vadd.f32 %v2754_v59, %v2741_v26  ;;  %4556 = vmatpush.bf16.msrb.mxu2 %v7465_v58  ;;  %v7261_v53 = vor.u32 %v8827_v48, %v7260_v28  ;;  %v8823_v58 = vld [vmem:[#allocation8 + $0x194] sm:$0xf0]  ;;  %v7878_v59 = vld [vmem:[#allocation8 + $0x690] sm:$0xf0]  ;;  %v7661_v26 = vor.u32 %v8927_v21, %v7660_v55  ;;  %v7596_v28 = vld [vmem:[#allocation8 + $0x448] sm:$0xf] }
 0x30c   :  { %4572 = vmatpush.bf16.msrb.mxu3 %v7561_v9  ;;  %v8932_v9 = vld [vmem:[#allocation8 + $0x504] sm:$0xf]  ;;  %v7881_v2 = vor.u32 %v8980_v57, %v7878_v59  ;;  %v8911_v48 = vld [vmem:[#allocation8 + $0x454] sm:$0xf0]  ;;  %v7420_v21 = vld [vmem:[#allocation8 + $0x2e8] sm:$0xf] }
 0x30d   :  { %4584 = vmatpush.bf16.msra.mxu0 %v7721_v49  ;;  %v7597_v57 = vor.u32 %v8911_v48, %v7596_v28  ;;  %v8054_v59 = vld [vmem:[#allocation8 + $0x7f0] sm:$0xf0] }
 0x30e   :  { %v8006_v28 = vld [vmem:[#allocation8 + $0x790] sm:$0xf0] }
 0x30f   :  { %4573 = vmatmul.bf16.vlgmr.msrb.gmra.mxu3 %v9602_v36  ;;  %4557 = vmatpush.bf16.msrb.mxu2 %v7449_v43 }
 0x310   :  { %4621 = vmatpush.bf16.msra.mxu3 %v7165_v10  ;;  %v7686_v10 = vld [vmem:[#allocation8 + $0x510] sm:$0xf0] }
 0x311   :  { %v2768_v12 = vpop.f32.mrf.mxu2  ;;  %4585 = vmatpush.bf16.msra.mxu0 %v7705_v22  ;;  %v7689_v19 = vor.u32 %v8932_v9, %v7686_v10  ;;  %v2794_v22 = vpop.f32.mrf.mxu0  ;;  %v7228_v9 = vld [vmem:[#allocation8 + $0x168] sm:$0xf]  ;;  %v8819_v10 = vld [vmem:[#allocation8 + $0x174] sm:$0xf0] }
 0x312   :  { %v2769_v34 = vadd.f32 %v2768_v12, %v2755_v56  ;;  %v2780_v49 = vpop.f32.mrf.mxu3  ;;  %v8923_v56 = vld [vmem:[#allocation8 + $0x4b4] sm:$0xf0]  ;;  %v7229_v6 = vor.u32 %v8819_v10, %v7228_v9  ;;  %v9020_v10 = vld [vmem:[#allocation8 + $0x7c4] sm:$0xf] }
 0x313   :  { %4558 = vmatpush.bf16.msrb.mxu2 %v7433_v30  ;;  %v7645_v43 = vor.u32 %v8923_v56, %v7644_v50  ;;  %v2781_v15 = vadd.f32 %v2780_v49, %v1090_v61  ;;  %v7830_v30 = vld [vmem:[#allocation8 + $0x630] sm:$0xf0] }
 0x314   :  { %4622 = vmatpush.bf16.msra.mxu3 %v7149_v20  ;;  %v2833_v20 = vmax.f32 %v2767_v8, 0.0  ;;  %v2841_v7 = vmax.f32 %v2769_v34, 0.0  ;;  %v8976_v8 = vld [vmem:[#allocation8 + $0x664] sm:$0xf]  ;;  %v8919_v34 = vld [vmem:[#allocation8 + $0x494] sm:$0xf0] }
 0x315   :  { %4586 = vmatpush.bf16.msra.mxu0 %v7689_v19  ;;  %v7865_v12 = vor.u32 %v8976_v8, %v7862_v5  ;;  %v7212_v19 = vld [vmem:[#allocation8 + $0x148] sm:$0xf]  ;;  %v2795_v29 = vadd.f32 %v2794_v22, %v2781_v15 }
 0x316   :  { %v9618_v31 = vpack.c.bf16 %v2841_v7, %v2833_v20  ;;  %v7629_v7 = vor.u32 %v8919_v34, %v7628_v13  ;;  %v7213_v25 = vor.u32 %v8815_v14, %v7212_v19  ;;  %v8038_v13 = vld [vmem:[#allocation8 + $0x7d0] sm:$0xf0]  ;;  %v7788_v34 = vld [vmem:[#allocation8 + $0x5c8] sm:$0xf]  ;;  %v8801_v14 = vld [vmem:[#allocation8 + $0xec] sm:$0xf] }
 0x317   :  { %v7564_v15 = vld [vmem:[#allocation8 + $0x408] sm:$0xf] }
 0x318   :  { %4623 = vmatpush.bf16.msra.mxu3 %v7133_v62  ;;  %v8988_v62 = vld [vmem:[#allocation8 + $0x6c4] sm:$0xf]  ;;  %4489 = vmatmul.bf16.vlgmr.msra.gmra.mxu1 %v9618_v31 }
 0x319   :  { %4635 = vmatpush.bf16.msrb.mxu0 %v7293_v24  ;;  %4593 = vmatpush.bf16.msra.mxu1 %v7929_v54  ;;  %v7913_v45 = vor.u32 %v8988_v62, %v7910_v46  ;;  %v8915_v54 = vld [vmem:[#allocation8 + $0x474] sm:$0xf0]  ;;  %v7196_v62 = vld [vmem:[#allocation8 + $0x128] sm:$0xf] }
 0x31a   :  { %4587 = vmatmul.bf16.vlgmr.msra.gmra.mxu0 %v9607_v41  ;;  %v2782_v16 = vpop.f32.mrf.mxu3  ;;  %v8811_v46 = vld [vmem:[#allocation8 + $0x134] sm:$0xf0]  ;;  %v7613_v40 = vor.u32 %v8915_v54, %v7612_v44  ;;  %v9016_v54 = vld [vmem:[#allocation8 + $0x7a4] sm:$0xf] }
 0x31b   :  { %v2783_v20 = vadd.f32 %v2782_v16, %v1090_v61  ;;  %v7197_v47 = vor.u32 %v8811_v46, %v7196_v62  ;;  %v7804_v61 = vld [vmem:[#allocation8 + $0x5e8] sm:$0xf]  ;;  %v8863_v16 = vld [vmem:[#allocation8 + $0x2d4] sm:$0xf0] }
 0x31c   :  { %4624 = vmatpush.bf16.msra.mxu3 %v7117_v18  ;;  %v7894_v18 = vld [vmem:[#allocation8 + $0x6b0] sm:$0xf0]  ;;  %v8955_v62 = vld [vmem:[#allocation8 + $0x5b4] sm:$0xf0] }
 0x31d   :  { %4636 = vmatpush.bf16.msrb.mxu0 %v7277_v37  ;;  %4594 = vmatpush.bf16.msra.mxu1 %v7913_v45  ;;  %v7897_v32 = vor.u32 %v8984_v63, %v7894_v18  ;;  %v7833_v45 = vor.u32 %v8968_v27, %v7830_v30  ;;  %v8964_v63 = vld [vmem:[#allocation8 + $0x604] sm:$0xf]  ;;  %v8022_v27 = vld [vmem:[#allocation8 + $0x7b0] sm:$0xf0]  ;;  %v7772_v30 = vld [vmem:[#allocation8 + $0x5a8] sm:$0xf] }
 0x31f   :  { %v2808_v1 = vpop.f32.mrf.mxu1 }
 0x320   :  { %4625 = vmatpush.bf16.msra.mxu3 %v7101_v0  ;;  %v7245_v0 = vor.u32 %v8823_v58, %v7244_v39  ;;  %v2809_v38 = vadd.f32 %v2808_v1, %v2795_v29  ;;  %v8867_v39 = vld [vmem:[#allocation8 + $0x2f4] sm:$0xf0]  ;;  %v7580_v1 = vld [vmem:[#allocation8 + $0x428] sm:$0xf] }
 0x321   :  { %4637 = vmatpush.bf16.msrb.mxu0 %v7261_v53  ;;  %4595 = vmatpush.bf16.msra.mxu1 %v7897_v32  ;;  %v8807_v53 = vld [vmem:[#allocation8 + $0x114] sm:$0xf0]  ;;  %v9024_v32 = vld [vmem:[#allocation8 + $0x7e4] sm:$0xf]  ;;  %v7421_v8 = vor.u32 %v8867_v39, %v7420_v21 }
 0x322   :  { %v8057_v5 = vor.u32 %v9024_v32, %v8054_v59  ;;  %v8851_v32 = vld [vmem:[#allocation8 + $0x274] sm:$0xf0]  ;;  %v9008_v39 = vld [vmem:[#allocation8 + $0x764] sm:$0xf]  ;;  %v7740_v59 = vld [vmem:[#allocation8 + $0x568] sm:$0xf] }
 0x324   :  { %4626 = vmatpush.bf16.msra.mxu3 %v7085_v60  ;;  %v7846_v60 = vld [vmem:[#allocation8 + $0x650] sm:$0xf0] }
 0x325   :  { %4638 = vmatpush.bf16.msrb.mxu0 %v7245_v0  ;;  %4596 = vmatpush.bf16.msra.mxu1 %v7881_v2  ;;  %v7849_v24 = vor.u32 %v8972_v17, %v7846_v60  ;;  %v8907_v2 = vld [vmem:[#allocation8 + $0x434] sm:$0xf0] }
 0x326   :  { %v8959_v17 = vld [vmem:[#allocation8 + $0x5d4] sm:$0xf0] }
 0x327   :  { %v2810_v37 = vpop.f32.mrf.mxu1  ;;  %v8903_v60 = vld [vmem:[#allocation8 + $0x414] sm:$0xf0] }
 0x328   :  { %4627 = vmatpush.bf16.msra.mxu3 %v7069_v33  ;;  %4545 = vmatmul.bf16.vlgmr.msrb.gmra.mxu1 %v9595_v23  ;;  %v2796_v33 = vpop.f32.mrf.mxu0  ;;  %v7565_v44 = vor.u32 %v8903_v60, %v7564_v15  ;;  %v8843_v15 = vld [vmem:[#allocation8 + $0x234] sm:$0xf0] }
 0x329   :  { %v2822_v3 = vpop.f32.mrf.mxu2  ;;  %4597 = vmatpush.bf16.msra.mxu1 %v7865_v12  ;;  %4639 = vmatpush.bf16.msrb.mxu0 %v7229_v6  ;;  %v2797_v42 = vadd.f32 %v2796_v33, %v2783_v20  ;;  %v7581_v6 = vor.u32 %v8907_v2, %v7580_v1  ;;  %v8041_v20 = vor.u32 %v9020_v10, %v8038_v13  ;;  %v8797_v33 = vld [vmem:[#allocation8 + $0xcc] sm:$0xf]  ;;  %v7340_v2 = vld [vmem:[#allocation8 + $0x248] sm:$0xf]  ;;  %v7102_v13 = vld [vmem:[#allocation8 + $0x78] sm:$0xf0] }
 0x32a   :  { %v2823_v49 = vadd.f32 %v2822_v3, %v2809_v38  ;;  %v7166_v3 = vld [vmem:[#allocation8 + $0xf8] sm:$0xf0]  ;;  %v8025_v38 = vor.u32 %v9016_v54, %v8022_v27  ;;  %v7724_v10 = vld [vmem:[#allocation8 + $0x548] sm:$0xf]  ;;  %v8996_v54 = vld [vmem:[#allocation8 + $0x704] sm:$0xf] }
 0x32b   :  { %v2811_v18 = vadd.f32 %v2810_v37, %v2797_v42  ;;  %v7169_v29 = vor.u32 %v8801_v14, %v7166_v3  ;;  %v7150_v37 = vld [vmem:[#allocation8 + $0xd8] sm:$0xf0]  ;;  %v7372_v42 = vld [vmem:[#allocation8 + $0x288] sm:$0xf]  ;;  %v7958_v14 = vld [vmem:[#allocation8 + $0x730] sm:$0xf0] }
 0x32c   :  { %4628 = vmatpush.bf16.msra.mxu3 %v7053_v51  ;;  %v7814_v51 = vld [vmem:[#allocation8 + $0x610] sm:$0xf0]  ;;  %v2834_v50 = vmax.f32 %v2823_v49, 0.0  ;;  %v7153_v48 = vor.u32 %v8797_v33, %v7150_v37  ;;  %v8935_v37 = vld [vmem:[#allocation8 + $0x514] sm:$0xf0] }
 0x32d   :  { %4598 = vmatpush.bf16.msra.mxu1 %v7849_v24  ;;  %4640 = vmatpush.bf16.msrb.mxu0 %v7213_v25  ;;  %v7817_v0 = vor.u32 %v8964_v63, %v7814_v51  ;;  %v7388_v24 = vld [vmem:[#allocation8 + $0x2a8] sm:$0xf]  ;;  %v8859_v25 = vld [vmem:[#allocation8 + $0x2b4] sm:$0xf0]  ;;  %v8793_v51 = vld [vmem:[#allocation8 + $0xac] sm:$0xf] }
 0x32e   :  { %v7389_v46 = vor.u32 %v8859_v25, %v7388_v24  ;;  %v7756_v63 = vld [vmem:[#allocation8 + $0x588] sm:$0xf]  ;;  %v8781_v24 = vld [vmem:[#allocation8 + $0x4c] sm:$0xf]  ;;  %v7942_v27 = vld [vmem:[#allocation8 + $0x710] sm:$0xf0] }
 0x32f   :  { %4629 = vmatmul.bf16.vlgmr.msra.gmra.mxu3 %v9580_v11 }
 0x330   :  { %4677 = vmatpush.bf16.msrb.mxu3 %v7677_v52  ;;  %v7180_v52 = vld [vmem:[#allocation8 + $0x108] sm:$0xf] }
 0x331   :  { %v2824_v55 = vpop.f32.mrf.mxu2  ;;  %4599 = vmatpush.bf16.msra.mxu1 %v7833_v45  ;;  %4641 = vmatpush.bf16.msrb.mxu0 %v7197_v47  ;;  %v7181_v22 = vor.u32 %v8807_v53, %v7180_v52  ;;  %v7773_v45 = vor.u32 %v8955_v62, %v7772_v30  ;;  %v9012_v47 = vld [vmem:[#allocation8 + $0x784] sm:$0xf]  ;;  %v7134_v52 = vld [vmem:[#allocation8 + $0xb8] sm:$0xf0]  ;;  %v7308_v30 = vld [vmem:[#allocation8 + $0x208] sm:$0xf] }
 0x332   :  { %v2825_v58 = vadd.f32 %v2824_v55, %v2811_v18  ;;  %v8951_v18 = vld [vmem:[#allocation8 + $0x594] sm:$0xf0]  ;;  %v8009_v53 = vor.u32 %v9012_v47, %v8006_v28  ;;  %v7356_v55 = vld [vmem:[#allocation8 + $0x268] sm:$0xf]  ;;  %v8833_v28 = vld [vmem:[#allocation8 + $0x1ec] sm:$0xf] }
 0x333   :  { %v7757_v21 = vor.u32 %v8951_v18, %v7756_v63  ;;  %v8839_v62 = vld [vmem:[#allocation8 + $0x214] sm:$0xf0]  ;;  %v7294_v63 = vld [vmem:[#allocation8 + $0x1f8] sm:$0xf0]  ;;  %v8777_v18 = vld [vmem:[#allocation8 + $0x2c] sm:$0xf] }
 0x334   :  { %4678 = vmatpush.bf16.msrb.mxu3 %v7661_v26  ;;  %v8963_v26 = vld [vmem:[#allocation8 + $0x5f4] sm:$0xf0]  ;;  %v2842_v56 = vmax.f32 %v2825_v58, 0.0  ;;  %v7990_v58 = vld [vmem:[#allocation8 + $0x770] sm:$0xf0] }
 0x335   :  { %v7805_v9 = vor.u32 %v8963_v26, %v7804_v61  ;;  %4600 = vmatpush.bf16.msra.mxu1 %v7817_v0  ;;  %4642 = vmatpush.bf16.msrb.mxu0 %v7181_v22  ;;  %v8947_v61 = vld [vmem:[#allocation8 + $0x574] sm:$0xf0]  ;;  %v7357_v26 = vor.u32 %v8851_v32, %v7356_v55  ;;  %v8789_v0 = vld [vmem:[#allocation8 + $0x8c] sm:$0xf]  ;;  %v7118_v22 = vld [vmem:[#allocation8 + $0x98] sm:$0xf0]  ;;  %v7993_v1 = vor.u32 %v9008_v39, %v7990_v58 }
 0x336   :  { %v9625_v12 = vpack.c.bf16 %v2842_v56, %v2834_v50  ;;  %v8847_v50 = vld [vmem:[#allocation8 + $0x254] sm:$0xf0]  ;;  %v7741_v56 = vor.u32 %v8947_v61, %v7740_v59  ;;  %v7916_v32 = vld [vmem:[#allocation8 + $0x6c8] sm:$0xf]  ;;  %v7297_v39 = vor.u32 %v8833_v28, %v7294_v63  ;;  %v8829_v61 = vld [vmem:[#allocation8 + $0x1cc] sm:$0xf] }
 0x337   :  { %v8899_v47 = vld [vmem:[#allocation8 + $0x3f4] sm:$0xf0]  ;;  %v7630_v63 = vld [vmem:[#allocation8 + $0x498] sm:$0xf0] }
 0x338   :  { %4679 = vmatpush.bf16.msrb.mxu3 %v7645_v43  ;;  %v7404_v43 = vld [vmem:[#allocation8 + $0x2c8] sm:$0xf]  ;;  %4503 = vmatmul.bf16.vlgmr.msra.gmra.mxu2 %v9625_v12  ;;  %v8895_v59 = vld [vmem:[#allocation8 + $0x3d4] sm:$0xf0] }
 0x339   :  { %4649 = vmatpush.bf16.msrb.mxu1 %v7421_v8  ;;  %v7405_v19 = vor.u32 %v8863_v16, %v7404_v43  ;;  %4607 = vmatpush.bf16.msra.mxu2 %v8057_v5  ;;  %v9004_v8 = vld [vmem:[#allocation8 + $0x744] sm:$0xf]  ;;  %v7974_v5 = vld [vmem:[#allocation8 + $0x750] sm:$0xf0]  ;;  %v8943_v43 = vld [vmem:[#allocation8 + $0x554] sm:$0xf0]  ;;  %v7341_v16 = vor.u32 %v8847_v50, %v7340_v2 }
 0x33a   :  { %4691 = vmatpush.bf16.msra.mxu0 %v7805_v9  ;;  %4601 = vmatmul.bf16.vlgmr.msra.gmra.mxu1 %v9618_v31  ;;  %v7121_v9 = vor.u32 %v8789_v0, %v7118_v22  ;;  %v7725_v60 = vor.u32 %v8943_v43, %v7724_v10  ;;  %v8773_v0 = vld [vmem:[#allocation8 + $0xc] sm:$0xf]  ;;  %v7054_v22 = vld [vmem:[#allocation8 + $0x18] sm:$0xf0]  ;;  %v7516_v43 = vld [vmem:[#allocation8 + $0x3a8] sm:$0xf] }
 0x33b   :  { %4643 = vmatmul.bf16.vlgmr.msrb.gmra.mxu0 %v9584_v4  ;;  %v8929_v2 = vld [vmem:[#allocation8 + $0x4ec] sm:$0xf]  ;;  %v7678_v50 = vld [vmem:[#allocation8 + $0x4f8] sm:$0xf0]  ;;  %v7057_v10 = vor.u32 %v8773_v0, %v7054_v22  ;;  %v7452_v22 = vld [vmem:[#allocation8 + $0x328] sm:$0xf] }
 0x33c   :  { %4680 = vmatpush.bf16.msrb.mxu3 %v7629_v7  ;;  %v7789_v7 = vor.u32 %v8959_v17, %v7788_v34  ;;  %v7977_v34 = vor.u32 %v9004_v8, %v7974_v5  ;;  %v7324_v17 = vld [vmem:[#allocation8 + $0x228] sm:$0xf]  ;;  %v8987_v5 = vld [vmem:[#allocation8 + $0x6b4] sm:$0xf0] }
 0x33d   :  { %4650 = vmatpush.bf16.msrb.mxu1 %v7405_v19  ;;  %4608 = vmatpush.bf16.msra.mxu2 %v8041_v20  ;;  %v9000_v19 = vld [vmem:[#allocation8 + $0x724] sm:$0xf]  ;;  %v7708_v20 = vld [vmem:[#allocation8 + $0x528] sm:$0xf]  ;;  %v7325_v25 = vor.u32 %v8843_v15, %v7324_v17  ;;  %v8925_v15 = vld [vmem:[#allocation8 + $0x4cc] sm:$0xf] }
 0x33e   :  { %4692 = vmatpush.bf16.msra.mxu0 %v7789_v7  ;;  %v8939_v7 = vld [vmem:[#allocation8 + $0x534] sm:$0xf0]  ;;  %v7900_v8 = vld [vmem:[#allocation8 + $0x6a8] sm:$0xf] }
 0x33f   :  { %v7709_v33 = vor.u32 %v8939_v7, %v7708_v20  ;;  %v7901_v17 = vor.u32 %v8987_v5, %v7900_v8  ;;  %v7500_v7 = vld [vmem:[#allocation8 + $0x388] sm:$0xf]  ;;  %v8909_v8 = vld [vmem:[#allocation8 + $0x44c] sm:$0xf] }
 0x340   :  { %4681 = vmatpush.bf16.msrb.mxu3 %v7613_v40  ;;  %v8855_v40 = vld [vmem:[#allocation8 + $0x294] sm:$0xf0] }
 0x341   :  { %4651 = vmatpush.bf16.msrb.mxu1 %v7389_v46  ;;  %v7373_v49 = vor.u32 %v8855_v40, %v7372_v42  ;;  %4609 = vmatpush.bf16.msra.mxu2 %v8025_v38  ;;  %v7692_v46 = vld [vmem:[#allocation8 + $0x508] sm:$0xf]  ;;  %v8995_v42 = vld [vmem:[#allocation8 + $0x6f4] sm:$0xf0] }
 0x342   :  { %4693 = vmatpush.bf16.msra.mxu0 %v7773_v45  ;;  %v7932_v38 = vld [vmem:[#allocation8 + $0x6e8] sm:$0xf] }
 0x343   :  { %v7548_v45 = vld [vmem:[#allocation8 + $0x3e8] sm:$0xf] }
 0x344   :  { %4682 = vmatpush.bf16.msrb.mxu3 %v7597_v57  ;;  %v7137_v57 = vor.u32 %v8793_v51, %v7134_v52  ;;  %v7945_v51 = vor.u32 %v8996_v54, %v7942_v27  ;;  %v7933_v52 = vor.u32 %v8995_v42, %v7932_v38  ;;  %v7549_v55 = vor.u32 %v8899_v47, %v7548_v45  ;;  %v7246_v54 = vld [vmem:[#allocation8 + $0x198] sm:$0xf0]  ;;  %v7484_v38 = vld [vmem:[#allocation8 + $0x368] sm:$0xf]  ;;  %v8883_v42 = vld [vmem:[#allocation8 + $0x374] sm:$0xf0] }
 0x345   :  { %4652 = vmatpush.bf16.msrb.mxu1 %v7373_v49  ;;  %4610 = vmatpush.bf16.msra.mxu2 %v8009_v53  ;;  %v7070_v49 = vld [vmem:[#allocation8 + $0x38] sm:$0xf0]  ;;  %v7693_v53 = vor.u32 %v8935_v37, %v7692_v46  ;;  %v7868_v46 = vld [vmem:[#allocation8 + $0x668] sm:$0xf]  ;;  %v8817_v45 = vld [vmem:[#allocation8 + $0x16c] sm:$0xf] }
 0x346   :  { %4694 = vmatpush.bf16.msra.mxu0 %v7757_v21  ;;  %v8991_v21 = vld [vmem:[#allocation8 + $0x6d4] sm:$0xf0]  ;;  %v7073_v58 = vor.u32 %v8777_v18, %v7070_v49  ;;  %v7230_v47 = vld [vmem:[#allocation8 + $0x178] sm:$0xf0]  ;;  %v7485_v18 = vor.u32 %v8883_v42, %v7484_v38  ;;  %v7852_v49 = vld [vmem:[#allocation8 + $0x648] sm:$0xf] }
 0x347   :  { %v8044_v42 = vld [vmem:[#allocation8 + $0x7c8] sm:$0xf] }
 0x348   :  { %4683 = vmatpush.bf16.msrb.mxu3 %v7581_v6  ;;  %4559 = vmatmul.bf16.vlgmr.msrb.gmra.mxu2 %v9597_v35  ;;  %v8785_v6 = vld [vmem:[#allocation8 + $0x6c] sm:$0xf] }
 0x349   :  { %4653 = vmatpush.bf16.msrb.mxu1 %v7357_v26  ;;  %4611 = vmatpush.bf16.msra.mxu2 %v7993_v1  ;;  %v7105_v3 = vor.u32 %v8785_v6, %v7102_v13  ;;  %v7278_v26 = vld [vmem:[#allocation8 + $0x1d8] sm:$0xf0]  ;;  %v7917_v1 = vor.u32 %v8991_v21, %v7916_v32  ;;  %v7681_v6 = vor.u32 %v8929_v2, %v7678_v50  ;;  %v8825_v13 = vld [vmem:[#allocation8 + $0x1ac] sm:$0xf] }
 0x34a   :  { %4695 = vmatpush.bf16.msra.mxu0 %v7741_v56  ;;  %v8813_v32 = vld [vmem:[#allocation8 + $0x14c] sm:$0xf]  ;;  %v7214_v21 = vld [vmem:[#allocation8 + $0x158] sm:$0xf0] }
 0x34b   :  { %v7217_v0 = vor.u32 %v8813_v32, %v7214_v21  ;;  %v8809_v50 = vld [vmem:[#allocation8 + $0x12c] sm:$0xf]  ;;  %v7774_v21 = vld [vmem:[#allocation8 + $0x5b8] sm:$0xf0] }
 0x34c   :  { %4684 = vmatpush.bf16.msrb.mxu3 %v7565_v44  ;;  %v7086_v44 = vld [vmem:[#allocation8 + $0x58] sm:$0xf0]  ;;  %v8953_v32 = vld [vmem:[#allocation8 + $0x5ac] sm:$0xf] }
 0x34d   :  { %4654 = vmatpush.bf16.msrb.mxu1 %v7341_v16  ;;  %4612 = vmatpush.bf16.msra.mxu2 %v7977_v34  ;;  %v7089_v40 = vor.u32 %v8781_v24, %v7086_v44  ;;  %v8891_v16 = vld [vmem:[#allocation8 + $0x3b4] sm:$0xf0]  ;;  %v7262_v34 = vld [vmem:[#allocation8 + $0x1b8] sm:$0xf0]  ;;  %v8821_v44 = vld [vmem:[#allocation8 + $0x18c] sm:$0xf] }
 0x34e   :  { %4696 = vmatpush.bf16.msra.mxu0 %v7725_v60  ;;  %v7662_v60 = vld [vmem:[#allocation8 + $0x4d8] sm:$0xf0]  ;;  %v7265_v20 = vor.u32 %v8825_v13, %v7262_v34  ;;  %v8887_v24 = vld [vmem:[#allocation8 + $0x394] sm:$0xf0]  ;;  %v7249_v37 = vor.u32 %v8821_v44, %v7246_v54  ;;  %v8805_v34 = vld [vmem:[#allocation8 + $0x10c] sm:$0xf] }
 0x34f   :  { %4685 = vmatmul.bf16.vlgmr.msrb.gmra.mxu3 %v9602_v36  ;;  %v8967_v13 = vld [vmem:[#allocation8 + $0x614] sm:$0xf0]  ;;  %v8905_v44 = vld [vmem:[#allocation8 + $0x42c] sm:$0xf]  ;;  %v7582_v54 = vld [vmem:[#allocation8 + $0x438] sm:$0xf0] }
 0x350   :  { %4733 = vmatpush.bf16.msra.mxu3 %v7169_v29  ;;  %v7961_v29 = vor.u32 %v9000_v19, %v7958_v14  ;;  %v7517_v19 = vor.u32 %v8891_v16, %v7516_v43  ;;  %v7884_v14 = vld [vmem:[#allocation8 + $0x688] sm:$0xf]  ;;  %v8871_v43 = vld [vmem:[#allocation8 + $0x314] sm:$0xf0]  ;;  %v7585_v38 = vor.u32 %v8905_v44, %v7582_v54 }
 0x351   :  { %4655 = vmatpush.bf16.msrb.mxu1 %v7325_v25  ;;  %v7665_v25 = vor.u32 %v8925_v15, %v7662_v60  ;;  %v7182_v15 = vld [vmem:[#allocation8 + $0x118] sm:$0xf0]  ;;  %v8865_v60 = vld [vmem:[#allocation8 + $0x2ec] sm:$0xf] }
 0x352   :  { %4613 = vmatpush.bf16.msra.mxu2 %v7961_v29  ;;  %4697 = vmatpush.bf16.msra.mxu0 %v7709_v33  ;;  %v8921_v29 = vld [vmem:[#allocation8 + $0x4ac] sm:$0xf]  ;;  %v8979_v33 = vld [vmem:[#allocation8 + $0x674] sm:$0xf0] }
 0x353   :  { %v7869_v28 = vor.u32 %v8979_v33, %v7868_v46  ;;  %v8861_v46 = vld [vmem:[#allocation8 + $0x2cc] sm:$0xf]  ;;  %v7406_v33 = vld [vmem:[#allocation8 + $0x2d8] sm:$0xf0] }
 0x354   :  { %4734 = vmatpush.bf16.msra.mxu3 %v7153_v48  ;;  %v7309_v48 = vor.u32 %v8839_v62, %v7308_v30  ;;  %v7646_v30 = vld [vmem:[#allocation8 + $0x4b8] sm:$0xf0]  ;;  %v7501_v62 = vor.u32 %v8887_v24, %v7500_v7  ;;  %v8961_v7 = vld [vmem:[#allocation8 + $0x5ec] sm:$0xf] }
 0x356   :  { %4656 = vmatpush.bf16.msrb.mxu1 %v7309_v48  ;;  %4614 = vmatpush.bf16.msra.mxu2 %v7945_v51  ;;  %v8917_v48 = vld [vmem:[#allocation8 + $0x48c] sm:$0xf]  ;;  %v8975_v51 = vld [vmem:[#allocation8 + $0x654] sm:$0xf0] }
 0x357   :  { %4698 = vmatpush.bf16.msra.mxu0 %v7693_v53  ;;  %v8879_v53 = vld [vmem:[#allocation8 + $0x354] sm:$0xf0] }
 0x358   :  { %4735 = vmatpush.bf16.msra.mxu3 %v7137_v57  ;;  %v7532_v57 = vld [vmem:[#allocation8 + $0x3c8] sm:$0xf] }
 0x359   :  { %v7533_v56 = vor.u32 %v8895_v59, %v7532_v57  ;;  %4657 = vmatmul.bf16.vlgmr.msrb.gmra.mxu1 %v9595_v23  ;;  %4615 = vmatmul.bf16.vlgmr.msra.gmra.mxu2 %v9625_v12  ;;  %v7614_v57 = vld [vmem:[#allocation8 + $0x478] sm:$0xf0] }
 0x35a   :  { %4705 = vmatpush.bf16.msra.mxu1 %v7933_v52  ;;  %4663 = vmatpush.bf16.msrb.mxu2 %v7549_v55  ;;  %v7468_v52 = vld [vmem:[#allocation8 + $0x348] sm:$0xf]  ;;  %v7633_v55 = vor.u32 %v8917_v48, %v7630_v63  ;;  %v7566_v48 = vld [vmem:[#allocation8 + $0x418] sm:$0xf0]  ;;  %v7409_v63 = vor.u32 %v8861_v46, %v7406_v33  ;;  %v9003_v46 = vld [vmem:[#allocation8 + $0x734] sm:$0xf0] }
 0x35b   :  { %4747 = vmatpush.bf16.msrb.mxu0 %v7297_v39  ;;  %v7853_v39 = vor.u32 %v8975_v51, %v7852_v49  ;;  %v7469_v59 = vor.u32 %v8879_v53, %v7468_v52  ;;  %v8857_v49 = vld [vmem:[#allocation8 + $0x2ac] sm:$0xf]  ;;  %v7390_v51 = vld [vmem:[#allocation8 + $0x2b8] sm:$0xf0]  ;;  %v8028_v53 = vld [vmem:[#allocation8 + $0x7a8] sm:$0xf] }
 0x35c   :  { %4736 = vmatpush.bf16.msra.mxu3 %v7121_v9  ;;  %v7281_v9 = vor.u32 %v8829_v61, %v7278_v26  ;;  %4699 = vmatmul.bf16.vlgmr.msra.gmra.mxu0 %v9607_v41  ;;  %v7836_v61 = vld [vmem:[#allocation8 + $0x628] sm:$0xf]  ;;  %v8971_v26 = vld [vmem:[#allocation8 + $0x634] sm:$0xf0]  ;;  %v8937_v33 = vld [vmem:[#allocation8 + $0x52c] sm:$0xf] }
 0x35d   :  { %v7837_v5 = vor.u32 %v8971_v26, %v7836_v61  ;;  %v7777_v61 = vor.u32 %v8953_v32, %v7774_v21  ;;  %v8012_v26 = vld [vmem:[#allocation8 + $0x788] sm:$0xf]  ;;  %v7694_v32 = vld [vmem:[#allocation8 + $0x518] sm:$0xf0]  ;;  %v8897_v21 = vld [vmem:[#allocation8 + $0x3ec] sm:$0xf] }
 0x35e   :  { %4706 = vmatpush.bf16.msra.mxu1 %v7917_v1  ;;  %4664 = vmatpush.bf16.msrb.mxu2 %v7533_v56  ;;  %v8875_v1 = vld [vmem:[#allocation8 + $0x334] sm:$0xf0]  ;;  %v7198_v56 = vld [vmem:[#allocation8 + $0x138] sm:$0xf0] }
 0x35f   :  { %4748 = vmatpush.bf16.msrb.mxu0 %v7281_v9  ;;  %v7598_v9 = vld [vmem:[#allocation8 + $0x458] sm:$0xf0]  ;;  %v7453_v16 = vor.u32 %v8875_v1, %v7452_v22  ;;  %v8949_v22 = vld [vmem:[#allocation8 + $0x58c] sm:$0xf] }
 0x360   :  { %4737 = vmatpush.bf16.msra.mxu3 %v7105_v3  ;;  %v8983_v3 = vld [vmem:[#allocation8 + $0x694] sm:$0xf0]  ;;  %v7758_v1 = vld [vmem:[#allocation8 + $0x598] sm:$0xf0] }
 0x361   :  { %v7885_v27 = vor.u32 %v8983_v3, %v7884_v14  ;;  %v7601_v14 = vor.u32 %v8909_v8, %v7598_v9  ;;  %v8060_v3 = vld [vmem:[#allocation8 + $0x7e8] sm:$0xf]  ;;  %v7358_v8 = vld [vmem:[#allocation8 + $0x278] sm:$0xf0]  ;;  %v9011_v9 = vld [vmem:[#allocation8 + $0x774] sm:$0xf0] }
 0x362   :  { %4707 = vmatpush.bf16.msra.mxu1 %v7901_v17  ;;  %4665 = vmatpush.bf16.msrb.mxu2 %v7517_v19  ;;  %v7201_v17 = vor.u32 %v8809_v50, %v7198_v56  ;;  %v7422_v19 = vld [vmem:[#allocation8 + $0x2f8] sm:$0xf0]  ;;  %v8849_v56 = vld [vmem:[#allocation8 + $0x26c] sm:$0xf] }
 0x363   :  { %4749 = vmatpush.bf16.msrb.mxu0 %v7265_v20  ;;  %v9027_v20 = vld [vmem:[#allocation8 + $0x7f4] sm:$0xf0] }
 0x364   :  { %4738 = vmatpush.bf16.msra.mxu3 %v7089_v40  ;;  %v7649_v40 = vor.u32 %v8921_v29, %v7646_v30  ;;  %v7425_v29 = vor.u32 %v8865_v60, %v7422_v19  ;;  %v7185_v30 = vor.u32 %v8805_v34, %v7182_v15  ;;  %v7361_v34 = vor.u32 %v8849_v56, %v7358_v8  ;;  %v7980_v15 = vld [vmem:[#allocation8 + $0x748] sm:$0xf]  ;;  %v8845_v60 = vld [vmem:[#allocation8 + $0x24c] sm:$0xf]  ;;  %v7342_v19 = vld [vmem:[#allocation8 + $0x258] sm:$0xf0] }
 0x365   :  { %v7345_v44 = vor.u32 %v8845_v60, %v7342_v19  ;;  %v9035_v56 = vld [vmem:[#allocation10 + $0x34] sm:$0xf0]  ;;  %v8885_v19 = vld [vmem:[#allocation8 + $0x38c] sm:$0xf] }
 0x366   :  { %4708 = vmatpush.bf16.msra.mxu1 %v7885_v27  ;;  %4666 = vmatpush.bf16.msrb.mxu2 %v7501_v62  ;;  %v8061_v62 = vor.u32 %v9027_v20, %v8060_v3  ;;  %v8116_v3 = vld [vmem:[#allocation10 + $0x60] sm:$0xf]  ;;  %v9041_v20 = vld [vmem:[#allocation10 + $0x64] sm:$0xf0] }
 0x367   :  { %4750 = vmatpush.bf16.msrb.mxu0 %v7249_v37 }
 0x368   :  { %4739 = vmatpush.bf16.msra.mxu3 %v7073_v58  ;;  %v8913_v58 = vld [vmem:[#allocation8 + $0x46c] sm:$0xf] }
 0x369   :  { %v7617_v2 = vor.u32 %v8913_v58, %v7614_v57  ;;  %v8853_v57 = vld [vmem:[#allocation8 + $0x28c] sm:$0xf] }
 0x36a   :  { %4709 = vmatpush.bf16.msra.mxu1 %v7869_v28  ;;  %4667 = vmatpush.bf16.msrb.mxu2 %v7485_v18  ;;  %v8901_v28 = vld [vmem:[#allocation8 + $0x40c] sm:$0xf] }
 0x36b   :  { %v7569_v52 = vor.u32 %v8901_v28, %v7566_v48  ;;  %v8837_v28 = vld [vmem:[#allocation8 + $0x20c] sm:$0xf] }
 0x36c   :  { %4740 = vmatpush.bf16.msra.mxu3 %v7057_v10  ;;  %v7436_v10 = vld [vmem:[#allocation8 + $0x308] sm:$0xf] }
 0x36d   :  { %v7437_v27 = vor.u32 %v8871_v43, %v7436_v10  ;;  %v8124_v10 = vld [vmem:[#allocation10 + $0x70] sm:$0xf]  ;;  %v9043_v43 = vld [vmem:[#allocation10 + $0x74] sm:$0xf0] }
 0x36e   :  { %4710 = vmatpush.bf16.msra.mxu1 %v7853_v39  ;;  %4668 = vmatpush.bf16.msrb.mxu2 %v7469_v59  ;;  %v7393_v39 = vor.u32 %v8857_v49, %v7390_v51  ;;  %v7374_v59 = vld [vmem:[#allocation8 + $0x298] sm:$0xf0]  ;;  %v8933_v49 = vld [vmem:[#allocation8 + $0x50c] sm:$0xf] }
 0x36f   :  { %4741 = vmatmul.bf16.vlgmr.msra.gmra.mxu3 %v9580_v11  ;;  %v7233_v11 = vor.u32 %v8817_v45, %v7230_v47  ;;  %v8957_v45 = vld [vmem:[#allocation8 + $0x5cc] sm:$0xf]  ;;  %v7790_v47 = vld [vmem:[#allocation8 + $0x5d8] sm:$0xf0] }
 0x370   :  { %4789 = vmatpush.bf16.msrb.mxu3 %v7681_v6  ;;  %v7820_v6 = vld [vmem:[#allocation8 + $0x608] sm:$0xf]  ;;  %v8993_v51 = vld [vmem:[#allocation8 + $0x6ec] sm:$0xf] }
 0x371   :  { %4751 = vmatpush.bf16.msrb.mxu0 %v7233_v11  ;;  %v7821_v24 = vor.u32 %v8967_v13, %v7820_v6  ;;  %v7793_v11 = vor.u32 %v8957_v45, %v7790_v47  ;;  %v7742_v6 = vld [vmem:[#allocation8 + $0x578] sm:$0xf0]  ;;  %v8125_v13 = vor.u32 %v9043_v43, %v8124_v10  ;;  %v7948_v45 = vld [vmem:[#allocation8 + $0x708] sm:$0xf]  ;;  %v8999_v47 = vld [vmem:[#allocation8 + $0x714] sm:$0xf0] }
 0x372   :  { %4711 = vmatpush.bf16.msra.mxu1 %v7837_v5  ;;  %4669 = vmatpush.bf16.msrb.mxu2 %v7453_v16  ;;  %v7761_v5 = vor.u32 %v8949_v22, %v7758_v1  ;;  %v8945_v16 = vld [vmem:[#allocation8 + $0x56c] sm:$0xf] }
 0x373   :  { %v8893_v22 = vld [vmem:[#allocation8 + $0x3cc] sm:$0xf] }
 0x374   :  { %4790 = vmatpush.bf16.msrb.mxu3 %v7665_v25  ;;  %v7806_v25 = vld [vmem:[#allocation8 + $0x5f8] sm:$0xf0]  ;;  %v8989_v1 = vld [vmem:[#allocation8 + $0x6cc] sm:$0xf] }
 0x375   :  { %4752 = vmatpush.bf16.msrb.mxu0 %v7217_v0  ;;  %v7809_v37 = vor.u32 %v8961_v7, %v7806_v25  ;;  %v9015_v0 = vld [vmem:[#allocation8 + $0x794] sm:$0xf0]  ;;  %v8941_v7 = vld [vmem:[#allocation8 + $0x54c] sm:$0xf]  ;;  %v8117_v25 = vor.u32 %v9041_v20, %v8116_v3  ;;  %v7502_v3 = vld [vmem:[#allocation8 + $0x398] sm:$0xf0] }
 0x376   :  { %4712 = vmatpush.bf16.msra.mxu1 %v7821_v24  ;;  %4670 = vmatpush.bf16.msrb.mxu2 %v7437_v27  ;;  %v8013_v50 = vor.u32 %v9015_v0, %v8012_v26  ;;  %v7726_v24 = vld [vmem:[#allocation8 + $0x558] sm:$0xf0]  ;;  %v8841_v27 = vld [vmem:[#allocation8 + $0x22c] sm:$0xf]  ;;  %v7697_v26 = vor.u32 %v8933_v49, %v7694_v32  ;;  %v8076_v20 = vld [vmem:[#allocation10 + $0x10] sm:$0xf] }
 0x377   :  { %v8889_v10 = vld [vmem:[#allocation8 + $0x3ac] sm:$0xf]  ;;  %v8188_v49 = vld [vmem:[#allocation10 + $0xf0] sm:$0xf] }
 0x378   :  { %4791 = vmatpush.bf16.msrb.mxu3 %v7649_v40  ;;  %v9023_v40 = vld [vmem:[#allocation8 + $0x7d4] sm:$0xf0]  ;;  %v8985_v43 = vld [vmem:[#allocation8 + $0x6ac] sm:$0xf] }
 0x379   :  { %4753 = vmatpush.bf16.msrb.mxu0 %v7201_v17  ;;  %v8045_v18 = vor.u32 %v9023_v40, %v8044_v42  ;;  %4671 = vmatmul.bf16.vlgmr.msrb.gmra.mxu2 %v9597_v35  ;;  %v9039_v42 = vld [vmem:[#allocation10 + $0x54] sm:$0xf0] }
 0x37a   :  { %4761 = vmatpush.bf16.msrb.mxu1 %v7425_v29  ;;  %4719 = vmatpush.bf16.msra.mxu2 %v8061_v62  ;;  %v7326_v29 = vld [vmem:[#allocation8 + $0x238] sm:$0xf0]  ;;  %v7964_v62 = vld [vmem:[#allocation8 + $0x728] sm:$0xf] }
 0x37b   :  { %4713 = vmatmul.bf16.vlgmr.msra.gmra.mxu1 %v9618_v31  ;;  %v7329_v40 = vor.u32 %v8841_v27, %v7326_v29  ;;  %v7870_v27 = vld [vmem:[#allocation8 + $0x678] sm:$0xf0]  ;;  %v9645_v29 = vpop.f32.mrf.mxu0 }
 0x37c   :  { %4792 = vmatpush.bf16.msrb.mxu3 %v7633_v55  ;;  %v9019_v55 = vld [vmem:[#allocation8 + $0x7b4] sm:$0xf0] }
 0x37d   :  { %4754 = vmatpush.bf16.msrb.mxu0 %v7185_v30  ;;  %v8029_v58 = vor.u32 %v9019_v55, %v8028_v53  ;;  %v7729_v30 = vor.u32 %v8941_v7, %v7726_v24  ;;  %v8100_v53 = vld [vmem:[#allocation10 + $0x40] sm:$0xf]  ;;  %v9037_v55 = vld [vmem:[#allocation10 + $0x44] sm:$0xf0]  ;;  %v9643_v24 = vpop.f32.mrf.mxu3 }
 0x37e   :  { %4762 = vmatpush.bf16.msrb.mxu1 %v7409_v63  ;;  %4720 = vmatpush.bf16.msra.mxu2 %v8045_v18  ;;  %v7965_v63 = vor.u32 %v9003_v46, %v7964_v62  ;;  %v7310_v18 = vld [vmem:[#allocation8 + $0x218] sm:$0xf0]  ;;  %v8068_v62 = vld [vmem:[#allocation10] sm:$0xf]  ;;  %v9029_v46 = vld [vmem:[#allocation10 + $0x4] sm:$0xf0] }
 0x380   :  { %4793 = vmatpush.bf16.msrb.mxu3 %v7617_v2  ;;  %4755 = vmatmul.bf16.vlgmr.msrb.gmra.mxu0 %v9584_v4  ;;  %v7377_v2 = vor.u32 %v8853_v57, %v7374_v59  ;;  %v7996_v4 = vld [vmem:[#allocation8 + $0x768] sm:$0xf]  ;;  %v7313_v57 = vor.u32 %v8837_v28, %v7310_v18  ;;  %v7949_v59 = vor.u32 %v8999_v47, %v7948_v45  ;;  %v8877_v47 = vld [vmem:[#allocation8 + $0x34c] sm:$0xf]  ;;  %v7470_v18 = vld [vmem:[#allocation8 + $0x358] sm:$0xf0] }
 0x381   :  { %4803 = vmatpush.bf16.msra.mxu0 %v7809_v37  ;;  %v7997_v17 = vor.u32 %v9011_v9, %v7996_v4  ;;  %v7710_v37 = vld [vmem:[#allocation8 + $0x538] sm:$0xf0]  ;;  %v8092_v4 = vld [vmem:[#allocation10 + $0x30] sm:$0xf]  ;;  %v8973_v28 = vld [vmem:[#allocation8 + $0x64c] sm:$0xf] }
 0x382   :  { %4763 = vmatpush.bf16.msrb.mxu1 %v7393_v39  ;;  %4721 = vmatpush.bf16.msra.mxu2 %v8029_v58  ;;  %v7550_v39 = vld [vmem:[#allocation8 + $0x3f8] sm:$0xf0]  ;;  %v8101_v58 = vor.u32 %v9037_v55, %v8100_v53  ;;  %v8093_v8 = vor.u32 %v9035_v56, %v8092_v4  ;;  %v8118_v53 = vld [vmem:[#allocation10 + $0x68] sm:$0xf0] }
 0x383   :  { %v7553_v0 = vor.u32 %v8897_v21, %v7550_v39  ;;  %v7473_v21 = vor.u32 %v8877_v47, %v7470_v18  ;;  %v8873_v39 = vld [vmem:[#allocation8 + $0x32c] sm:$0xf]  ;;  %v8156_v47 = vld [vmem:[#allocation10 + $0xb0] sm:$0xf]  ;;  %v9032_v18 = vld [vmem:[#allocation10 + $0x24] sm:$0xf] }
 0x384   :  { %4794 = vmatpush.bf16.msrb.mxu3 %v7601_v14  ;;  %v9007_v14 = vld [vmem:[#allocation8 + $0x754] sm:$0xf0]  ;;  %v8869_v56 = vld [vmem:[#allocation8 + $0x30c] sm:$0xf] }
 0x385   :  { %4804 = vmatpush.bf16.msra.mxu0 %v7793_v11  ;;  %v7981_v54 = vor.u32 %v9007_v14, %v7980_v15  ;;  %v7713_v11 = vor.u32 %v8937_v33, %v7710_v37  ;;  %v7886_v14 = vld [vmem:[#allocation8 + $0x698] sm:$0xf0]  ;;  %v8069_v33 = vor.u32 %v9029_v46, %v8068_v62  ;;  %v9042_v37 = vld [vmem:[#allocation10 + $0x74] sm:$0xf] }
 0x386   :  { %4764 = vmatpush.bf16.msrb.mxu1 %v7377_v2  ;;  %4722 = vmatpush.bf16.msra.mxu2 %v8013_v50  ;;  %v7918_v2 = vld [vmem:[#allocation8 + $0x6d8] sm:$0xf0]  ;;  %v9034_v62 = vld [vmem:[#allocation10 + $0x34] sm:$0xf] }
 0x387   :  { %v7534_v50 = vld [vmem:[#allocation8 + $0x3d8] sm:$0xf0] }
 0x388   :  { %4795 = vmatpush.bf16.msrb.mxu3 %v7585_v38  ;;  %v8108_v38 = vld [vmem:[#allocation10 + $0x50] sm:$0xf]  ;;  %v7537_v9 = vor.u32 %v8893_v22, %v7534_v50  ;;  %v9651_v50 = vpop.f32.mrf.mxu0  ;;  %v8094_v46 = vld [vmem:[#allocation10 + $0x38] sm:$0xf0] }
 0x389   :  { %4805 = vmatpush.bf16.msra.mxu0 %v7777_v61  ;;  %v8109_v48 = vor.u32 %v9039_v42, %v8108_v38  ;;  %v8126_v38 = vld [vmem:[#allocation10 + $0x78] sm:$0xf0] }
 0x38a   :  { %4765 = vmatpush.bf16.msrb.mxu1 %v7361_v34  ;;  %4723 = vmatpush.bf16.msra.mxu2 %v7997_v17  ;;  %v9033_v34 = vld [vmem:[#allocation10 + $0x24] sm:$0xf0] }
 0x38c   :  { %4796 = vmatpush.bf16.msrb.mxu3 %v7569_v52  ;;  %v7934_v52 = vld [vmem:[#allocation8 + $0x6f8] sm:$0xf0] }
 0x38d   :  { %4806 = vmatpush.bf16.msra.mxu0 %v7761_v5  ;;  %v7937_v61 = vor.u32 %v8993_v51, %v7934_v52  ;;  %v7921_v5 = vor.u32 %v8989_v1, %v7918_v2  ;;  %v9059_v51 = vld [vmem:[#allocation10 + $0xf4] sm:$0xf0]  ;;  %v9040_v52 = vld [vmem:[#allocation10 + $0x64] sm:$0xf]  ;;  %v9038_v1 = vld [vmem:[#allocation10 + $0x54] sm:$0xf] }
 0x38e   :  { %4766 = vmatpush.bf16.msrb.mxu1 %v7345_v44  ;;  %4724 = vmatpush.bf16.msra.mxu2 %v7981_v54  ;;  %v7505_v44 = vor.u32 %v8885_v19, %v7502_v3  ;;  %v8881_v54 = vld [vmem:[#allocation8 + $0x36c] sm:$0xf]  ;;  %v8121_v32 = vor.u32 %v9040_v52, %v8118_v53  ;;  %v8110_v2 = vld [vmem:[#allocation10 + $0x58] sm:$0xf0]  ;;  %v9049_v53 = vld [vmem:[#allocation10 + $0xa4] sm:$0xf0] }
 0x38f   :  { %4797 = vmatmul.bf16.vlgmr.msrb.gmra.mxu3 %v9602_v36  ;;  %v7745_v36 = vor.u32 %v8945_v16, %v7742_v6  ;;  %v7902_v16 = vld [vmem:[#allocation8 + $0x6b8] sm:$0xf0]  ;;  %v9658_v3 = vld [vmem:[%s9740_s1 + $0xf] sm:$0xf] }
 0x390   :  { %5247 = vmatpush.bf16.msra.mxu3 %v8125_v13  ;;  %v7518_v6 = vld [vmem:[#allocation8 + $0x3b8] sm:$0xf0]  ;;  %v8084_v13 = vld [vmem:[#allocation10 + $0x20] sm:$0xf]  ;;  %v7905_v15 = vor.u32 %v8985_v43, %v7902_v16  ;;  %v9025_v16 = vld [vmem:[#allocation8 + $0x7ec] sm:$0xf] }
 0x391   :  { %4807 = vmatpush.bf16.msra.mxu0 %v7745_v36  ;;  %v8085_v17 = vor.u32 %v9033_v34, %v8084_v13  ;;  %v7521_v60 = vor.u32 %v8889_v10, %v7518_v6  ;;  %v8981_v36 = vld [vmem:[#allocation8 + $0x68c] sm:$0xf]  ;;  %v7822_v43 = vld [vmem:[#allocation8 + $0x618] sm:$0xf0]  ;;  %v8172_v6 = vld [vmem:[#allocation10 + $0xd0] sm:$0xf] }
 0x392   :  { %4767 = vmatpush.bf16.msrb.mxu1 %v7329_v40  ;;  %4725 = vmatpush.bf16.msra.mxu2 %v7965_v63  ;;  %v8129_v40 = vor.u32 %v9042_v37, %v8126_v38  ;;  %v9647_v63 = vpop.f32.mrf.mxu1  ;;  %v8965_v10 = vld [vmem:[#allocation8 + $0x60c] sm:$0xf]  ;;  %v9055_v13 = vld [vmem:[#allocation10 + $0xd4] sm:$0xf0]  ;;  %v8062_v34 = vld [vmem:[#allocation8 + $0x7f8] sm:$0xf0]  ;;  %v8097_v37 = vor.u32 %v9034_v62, %v8094_v46 }
 0x393   :  { %v3109_v38 = vperm.slane %v9658_v3, 0  ;;  %v7966_v46 = vld [vmem:[#allocation8 + $0x738] sm:$0xf0] }
 0x394   :  { %5248 = vmatpush.bf16.msra.mxu3 %v8117_v25  ;;  %v7889_v25 = vor.u32 %v8981_v36, %v7886_v14  ;;  %v7825_v36 = vor.u32 %v8965_v10, %v7822_v43  ;;  %v8070_v10 = vld [vmem:[#allocation10 + $0x8] sm:$0xf0]  ;;  %v8132_v43 = vld [vmem:[#allocation10 + $0x80] sm:$0xf] }
 0x395   :  { %4808 = vmatpush.bf16.msra.mxu0 %v7729_v30  ;;  %v7486_v30 = vld [vmem:[#allocation8 + $0x378] sm:$0xf0] }
 0x396   :  { %4768 = vmatpush.bf16.msrb.mxu1 %v7313_v57  ;;  %4726 = vmatpush.bf16.msra.mxu2 %v7949_v59  ;;  %v7489_v45 = vor.u32 %v8881_v54, %v7486_v30  ;;  %v7838_v57 = vld [vmem:[#allocation8 + $0x638] sm:$0xf0]  ;;  %v9649_v59 = vpop.f32.mrf.mxu3  ;;  %v8164_v54 = vld [vmem:[#allocation10 + $0xc0] sm:$0xf] }
 0x398   :  { %5249 = vmatpush.bf16.msra.mxu3 %v8109_v48  ;;  %v7854_v48 = vld [vmem:[#allocation8 + $0x658] sm:$0xf0] }
 0x399   :  { %4809 = vmatpush.bf16.msra.mxu0 %v7713_v11  ;;  %4769 = vmatmul.bf16.vlgmr.msrb.gmra.mxu1 %v9595_v23  ;;  %v9031_v23 = vld [vmem:[#allocation10 + $0x14] sm:$0xf0]  ;;  %v8189_v11 = vor.u32 %v9059_v51, %v8188_v49  ;;  %v7857_v55 = vor.u32 %v8973_v28, %v7854_v48  ;;  %v8086_v49 = vld [vmem:[#allocation10 + $0x28] sm:$0xf0]  ;;  %v8148_v51 = vld [vmem:[#allocation10 + $0xa0] sm:$0xf] }
 0x39a   :  { %4817 = vmatpush.bf16.msra.mxu1 %v7937_v61  ;;  %4775 = vmatpush.bf16.msrb.mxu2 %v7553_v0  ;;  %v8077_v7 = vor.u32 %v9031_v23, %v8076_v20  ;;  %v7454_v61 = vld [vmem:[#allocation8 + $0x338] sm:$0xf0]  ;;  %v9057_v0 = vld [vmem:[#allocation10 + $0xe4] sm:$0xf0]  ;;  %v9653_v19 = vpop.f32.mrf.mxu1  ;;  %v9660_v23 = vpop.f32.mrf.mxu2  ;;  %v9051_v28 = vld [vmem:[#allocation10 + $0xb4] sm:$0xf0]  ;;  %v8089_v52 = vor.u32 %v9032_v18, %v8086_v49 }
 0x39b   :  { %4727 = vmatmul.bf16.vlgmr.msra.gmra.mxu2 %v9625_v12  ;;  %v8157_v48 = vor.u32 %v9051_v28, %v8156_v47  ;;  %v7950_v18 = vld [vmem:[#allocation8 + $0x718] sm:$0xf0]  ;;  %v9054_v49 = vld [vmem:[#allocation10 + $0xd4] sm:$0xf] }
 0x39c   :  { %5250 = vmatpush.bf16.msra.mxu3 %v8101_v58  ;;  %v8969_v58 = vld [vmem:[#allocation8 + $0x62c] sm:$0xf] }
 0x39d   :  { %4810 = vmatpush.bf16.msra.mxu0 %v7697_v26  ;;  %v8180_v26 = vld [vmem:[#allocation10 + $0xe0] sm:$0xf]  ;;  %v7841_v4 = vor.u32 %v8969_v58, %v7838_v57  ;;  %v8014_v58 = vld [vmem:[#allocation8 + $0x798] sm:$0xf0] }
 0x39e   :  { %4818 = vmatpush.bf16.msra.mxu1 %v7921_v5  ;;  %4776 = vmatpush.bf16.msrb.mxu2 %v7537_v9  ;;  %v8181_v22 = vor.u32 %v9057_v0, %v8180_v26  ;;  %v7457_v5 = vor.u32 %v8873_v39, %v7454_v61  ;;  %v7438_v9 = vld [vmem:[#allocation8 + $0x318] sm:$0xf0]  ;;  %v4407_v39 = vadd.f32 %v9643_v24, %v3109_v38 }
 0x39f   :  { %v7441_v20 = vor.u32 %v8869_v56, %v7438_v9  ;;  %v8078_v57 = vld [vmem:[#allocation10 + $0x18] sm:$0xf0]  ;;  %v8140_v56 = vld [vmem:[#allocation10 + $0x90] sm:$0xf]  ;;  %v9028_v9 = vld [vmem:[#allocation10 + $0x4] sm:$0xf] }
 0x3a0   :  { %5251 = vmatpush.bf16.msra.mxu3 %v8093_v8  ;;  %4811 = vmatmul.bf16.vlgmr.msra.gmra.mxu0 %v9607_v41  ;;  %v8977_v41 = vld [vmem:[#allocation8 + $0x66c] sm:$0xf]  ;;  %v8113_v8 = vor.u32 %v9038_v1, %v8110_v2 }
 0x3a1   :  { %v7873_v42 = vor.u32 %v8977_v41, %v7870_v27  ;;  %5261 = vmatpush.bf16.msrb.mxu0 %v8189_v11  ;;  %v9053_v41 = vld [vmem:[#allocation10 + $0xc4] sm:$0xf0]  ;;  %v8046_v27 = vld [vmem:[#allocation8 + $0x7d8] sm:$0xf0]  ;;  %v9009_v1 = vld [vmem:[#allocation8 + $0x76c] sm:$0xf] }
 0x3a2   :  { %4819 = vmatpush.bf16.msra.mxu1 %v7905_v15  ;;  %4777 = vmatpush.bf16.msrb.mxu2 %v7521_v60  ;;  %v9036_v15 = vld [vmem:[#allocation10 + $0x44] sm:$0xf]  ;;  %v8102_v60 = vld [vmem:[#allocation10 + $0x48] sm:$0xf0]  ;;  %v8165_v30 = vor.u32 %v9053_v41, %v8164_v54  ;;  %v9668_v11 = vpop.f32.mrf.mxu1  ;;  %v4450_v61 = vpop.f32.mrf.mxu2 }
 0x3a3   :  { %v8105_v14 = vor.u32 %v9036_v15, %v8102_v60  ;;  %v9005_v60 = vld [vmem:[#allocation8 + $0x74c] sm:$0xf] }
 0x3a4   :  { %5252 = vmatpush.bf16.msra.mxu3 %v8085_v17  ;;  %v8173_v17 = vor.u32 %v9055_v13, %v8172_v6  ;;  %v9045_v6 = vld [vmem:[#allocation10 + $0x84] sm:$0xf0] }
 0x3a5   :  { %5262 = vmatpush.bf16.msrb.mxu0 %v8181_v22  ;;  %v4409_v22 = vadd.f32 %v9649_v59, %v3109_v38 }
 0x3a6   :  { %4820 = vmatpush.bf16.msra.mxu1 %v7889_v25  ;;  %4778 = vmatpush.bf16.msrb.mxu2 %v7505_v44  ;;  %v8065_v25 = vor.u32 %v9025_v16, %v8062_v34  ;;  %v9021_v44 = vld [vmem:[#allocation8 + $0x7cc] sm:$0xf]  ;;  %v8073_v16 = vor.u32 %v9028_v9, %v8070_v10  ;;  %v8133_v34 = vor.u32 %v9045_v6, %v8132_v43 }
 0x3a7   :  { %v4423_v59 = vadd.f32 %v9651_v50, %v4409_v22  ;;  %v9050_v22 = vld [vmem:[#allocation10 + $0xb4] sm:$0xf] }
 0x3a8   :  { %5253 = vmatpush.bf16.msra.mxu3 %v8077_v7  ;;  %v9662_v7 = vpop.f32.mrf.mxu3 }
 0x3a9   :  { %5263 = vmatpush.bf16.msrb.mxu0 %v8173_v17 }
 0x3aa   :  { %4821 = vmatpush.bf16.msra.mxu1 %v7873_v42  ;;  %4779 = vmatpush.bf16.msrb.mxu2 %v7489_v45  ;;  %v9017_v42 = vld [vmem:[#allocation8 + $0x7ac] sm:$0xf]  ;;  %v8030_v45 = vld [vmem:[#allocation8 + $0x7b8] sm:$0xf0]  ;;  %v4492_v17 = vpop.f32.mrf.mxu1 }
 0x3ac   :  { %5254 = vmatpush.bf16.msra.mxu3 %v8069_v33  ;;  %v9664_v33 = vpop.f32.mrf.mxu0 }
 0x3ad   :  { %5264 = vmatpush.bf16.msrb.mxu0 %v8165_v30  ;;  %v9001_v30 = vld [vmem:[#allocation8 + $0x72c] sm:$0xf] }
 0x3ae   :  { %4822 = vmatpush.bf16.msra.mxu1 %v7857_v55  ;;  %4780 = vmatpush.bf16.msrb.mxu2 %v7473_v21  ;;  %v8149_v55 = vor.u32 %v9049_v53, %v8148_v51  ;;  %v9013_v21 = vld [vmem:[#allocation8 + $0x78c] sm:$0xf]  ;;  %v7969_v47 = vor.u32 %v9001_v30, %v7966_v46  ;;  %v8174_v51 = vld [vmem:[#allocation10 + $0xd8] sm:$0xf0]  ;;  %v8244_v30 = vld [vmem:[#allocation10 + $0x160] sm:$0xf] }
 0x3af   :  { %v8017_v2 = vor.u32 %v9013_v21, %v8014_v58  ;;  %v9052_v58 = vld [vmem:[#allocation10 + $0xc4] sm:$0xf] }
 0x3b0   :  { %5303 = vmatpush.bf16.msrb.mxu3 %v8129_v40  ;;  %v8049_v40 = vor.u32 %v9021_v44, %v8046_v27  ;;  %v4464_v26 = vpop.f32.mrf.mxu3 }
 0x3b1   :  { %5265 = vmatpush.bf16.msrb.mxu0 %v8157_v48 }
 0x3b2   :  { %4823 = vmatpush.bf16.msra.mxu1 %v7841_v4  ;;  %4781 = vmatpush.bf16.msrb.mxu2 %v7457_v5  ;;  %v7998_v4 = vld [vmem:[#allocation8 + $0x778] sm:$0xf0]  ;;  %v4421_v5 = vadd.f32 %v9645_v29, %v4407_v39 }
 0x3b3   :  { %v8001_v15 = vor.u32 %v9009_v1, %v7998_v4  ;;  %v8158_v1 = vld [vmem:[#allocation10 + $0xb8] sm:$0xf0] }
 0x3b4   :  { %5304 = vmatpush.bf16.msrb.mxu3 %v8121_v32  ;;  %v8033_v32 = vor.u32 %v9017_v42, %v8030_v45  ;;  %v4435_v13 = vadd.f32 %v9647_v63, %v4421_v5  ;;  %v8161_v4 = vor.u32 %v9050_v22, %v8158_v1  ;;  %v8196_v22 = vld [vmem:[#allocation10 + $0x100] sm:$0xf]  ;;  %v9061_v1 = vld [vmem:[#allocation10 + $0x104] sm:$0xf0] }
 0x3b5   :  { %5266 = vmatpush.bf16.msrb.mxu0 %v8149_v55 }
 0x3b6   :  { %4824 = vmatpush.bf16.msra.mxu1 %v7825_v36  ;;  %4782 = vmatpush.bf16.msrb.mxu2 %v7441_v20  ;;  %v4437_v36 = vadd.f32 %v9653_v19, %v4423_v59  ;;  %v4449_v29 = vadd.f32 %v9660_v23, %v4435_v13  ;;  %v9058_v20 = vld [vmem:[#allocation10 + $0xf4] sm:$0xf]  ;;  %v9056_v23 = vld [vmem:[#allocation10 + $0xe4] sm:$0xf]  ;;  %v8142_v59 = vld [vmem:[#allocation10 + $0x98] sm:$0xf0] }
 0x3b7   :  { %v9046_v13 = vld [vmem:[#allocation10 + $0x94] sm:$0xf] }
 0x3b8   :  { %5305 = vmatpush.bf16.msrb.mxu3 %v8113_v8  ;;  %v9047_v8 = vld [vmem:[#allocation10 + $0x94] sm:$0xf0]  ;;  %v4451_v41 = vadd.f32 %v4450_v61, %v4437_v36  ;;  %v4463_v63 = vadd.f32 %v9662_v7, %v4449_v29  ;;  %v4518_v50 = vpop.f32.mrf.mxu3  ;;  %v8997_v7 = vld [vmem:[#allocation8 + $0x70c] sm:$0xf] }
 0x3b9   :  { %4825 = vmatmul.bf16.vlgmr.msra.gmra.mxu1 %v9618_v31  ;;  %4783 = vmatmul.bf16.vlgmr.msrb.gmra.mxu2 %v9597_v35  ;;  %v9030_v31 = vld [vmem:[#allocation10 + $0x14] sm:$0xf]  ;;  %v4478_v35 = vpop.f32.mrf.mxu0  ;;  %v8141_v24 = vor.u32 %v9047_v8, %v8140_v56  ;;  %v8150_v56 = vld [vmem:[#allocation10 + $0xa8] sm:$0xf0] }
 0x3ba   :  { %4831 = vmatpush.bf16.msra.mxu2 %v8065_v25  ;;  %v8081_v0 = vor.u32 %v9030_v31, %v8078_v57  ;;  %v8190_v25 = vld [vmem:[#allocation10 + $0xf8] sm:$0xf0]  ;;  %v4465_v62 = vadd.f32 %v4464_v26, %v4451_v41  ;;  %v4477_v19 = vadd.f32 %v9664_v33, %v4463_v63  ;;  %v8177_v33 = vor.u32 %v9054_v49, %v8174_v51  ;;  %v9069_v49 = vld [vmem:[#allocation10 + $0x144] sm:$0xf0] }
 0x3bb   :  { %5267 = vmatpush.bf16.msrb.mxu0 %v8141_v24  ;;  %v4504_v44 = vpop.f32.mrf.mxu2  ;;  %v8193_v54 = vor.u32 %v9058_v20, %v8190_v25  ;;  %v3110_v26 = vperm.slane %v9658_v3, 1  ;;  %v9044_v20 = vld [vmem:[#allocation10 + $0x84] sm:$0xf] }
 0x3bc   :  { %5306 = vmatpush.bf16.msrb.mxu3 %v8105_v14  ;;  %v7982_v14 = vld [vmem:[#allocation8 + $0x758] sm:$0xf0]  ;;  %v4491_v45 = vadd.f32 %v9668_v11, %v4477_v19  ;;  %v8166_v11 = vld [vmem:[#allocation10 + $0xc8] sm:$0xf0] }
 0x3bd   :  { %v7985_v27 = vor.u32 %v9005_v60, %v7982_v14  ;;  %v8169_v57 = vor.u32 %v9052_v58, %v8166_v11  ;;  %v4519_v24 = vadd.f32 %v4518_v50, %v3110_v26  ;;  %v9075_v14 = vld [vmem:[#allocation10 + $0x174] sm:$0xf0]  ;;  %v8212_v58 = vld [vmem:[#allocation10 + $0x120] sm:$0xf]  ;;  %v9065_v11 = vld [vmem:[#allocation10 + $0x124] sm:$0xf0] }
 0x3be   :  { %4832 = vmatpush.bf16.msra.mxu2 %v8049_v40  ;;  %v4479_v40 = vadd.f32 %v4478_v35, %v4465_v62  ;;  %v4505_v48 = vadd.f32 %v4504_v44, %v4491_v45  ;;  %v9048_v35 = vld [vmem:[#allocation10 + $0xa4] sm:$0xf]  ;;  %v9073_v62 = vld [vmem:[#allocation10 + $0x164] sm:$0xf0] }
 0x3bf   :  { %5268 = vmatpush.bf16.msrb.mxu0 %v8133_v34  ;;  %v8153_v5 = vor.u32 %v9048_v35, %v8150_v56  ;;  %v8245_v46 = vor.u32 %v9073_v62, %v8244_v30  ;;  %v8197_v35 = vor.u32 %v9061_v1, %v8196_v22  ;;  %v9062_v62 = vld [vmem:[#allocation10 + $0x114] sm:$0xf] }
 0x3c0   :  { %5307 = vmatpush.bf16.msrb.mxu3 %v8097_v37  ;;  %v8182_v37 = vld [vmem:[#allocation10 + $0xe8] sm:$0xf0]  ;;  %v4493_v28 = vadd.f32 %v4492_v17, %v4479_v40  ;;  %v4845_v21 = vmax.f32 %v4505_v48, 0.0  ;;  %v4520_v31 = vpop.f32.mrf.mxu3  ;;  %v9071_v40 = vld [vmem:[#allocation10 + $0x154] sm:$0xf0] }
 0x3c1   :  { %v4532_v38 = vpop.f32.mrf.mxu0  ;;  %v8185_v42 = vor.u32 %v9056_v23, %v8182_v37  ;;  %v4521_v10 = vadd.f32 %v4520_v31, %v3110_v26  ;;  %v9063_v26 = vld [vmem:[#allocation10 + $0x114] sm:$0xf0] }
 0x3c2   :  { %4833 = vmatpush.bf16.msra.mxu2 %v8033_v32  ;;  %v7953_v32 = vor.u32 %v8997_v7, %v7950_v18  ;;  %v4533_v43 = vadd.f32 %v4532_v38, %v4519_v24  ;;  %v8228_v18 = vld [vmem:[#allocation10 + $0x140] sm:$0xf]  ;;  %v8246_v24 = vld [vmem:[#allocation10 + $0x168] sm:$0xf0] }
 0x3c3   :  { %5317 = vmatpush.bf16.msra.mxu0 %v8193_v54  ;;  %v4506_v53 = vpop.f32.mrf.mxu2  ;;  %v8134_v54 = vld [vmem:[#allocation10 + $0x88] sm:$0xf0] }
 0x3c4   :  { %5308 = vmatpush.bf16.msrb.mxu3 %v8089_v52  ;;  %v4546_v52 = vpop.f32.mrf.mxu1  ;;  %v4507_v55 = vadd.f32 %v4506_v53, %v4493_v28  ;;  %v8137_v63 = vor.u32 %v9044_v20, %v8134_v54  ;;  %v9064_v20 = vld [vmem:[#allocation10 + $0x124] sm:$0xf] }
 0x3c5   :  { %v4547_v6 = vadd.f32 %v4546_v52, %v4533_v43  ;;  %v8229_v52 = vor.u32 %v9069_v49, %v8228_v18  ;;  %v9070_v43 = vld [vmem:[#allocation10 + $0x154] sm:$0xf]  ;;  %v8316_v18 = vld [vmem:[#allocation10 + $0x1f0] sm:$0xf]  ;;  %v9091_v49 = vld [vmem:[#allocation10 + $0x1f4] sm:$0xf0] }
 0x3c6   :  { %4834 = vmatpush.bf16.msra.mxu2 %v8017_v2  ;;  %v4849_v39 = vmax.f32 %v4507_v55, 0.0 }
 0x3c7   :  { %5318 = vmatpush.bf16.msra.mxu0 %v8185_v42  ;;  %v8236_v42 = vld [vmem:[#allocation10 + $0x150] sm:$0xf] }
 0x3c8   :  { %5309 = vmatpush.bf16.msrb.mxu3 %v8081_v0  ;;  %v4853_v61 = vpack.c.bf16 %v4849_v39, %v4845_v21  ;;  %v4574_v9 = vpop.f32.mrf.mxu3  ;;  %v8237_v45 = vor.u32 %v9071_v40, %v8236_v42  ;;  %v9067_v21 = vld [vmem:[#allocation10 + $0x134] sm:$0xf0]  ;;  %v8198_v42 = vld [vmem:[#allocation10 + $0x108] sm:$0xf0] }
 0x3c9   :  { %v4534_v0 = vpop.f32.mrf.mxu0 }
 0x3ca   :  { %4835 = vmatpush.bf16.msra.mxu2 %v8001_v15  ;;  %5255 = vmatmul.bf16.vlgmr.msra.gmra.mxu3 %v4853_v61  ;;  %v8145_v15 = vor.u32 %v9046_v13, %v8142_v59  ;;  %v9068_v59 = vld [vmem:[#allocation10 + $0x144] sm:$0xf] }
 0x3cb   :  { %5319 = vmatpush.bf16.msra.mxu0 %v8177_v33  ;;  %v4560_v2 = vpop.f32.mrf.mxu2 }
 0x3cc   :  { %5310 = vmatpush.bf16.msrb.mxu3 %v8073_v16  ;;  %v4548_v8 = vpop.f32.mrf.mxu1  ;;  %v4535_v16 = vadd.f32 %v4534_v0, %v4521_v10  ;;  %v4561_v36 = vadd.f32 %v4560_v2, %v4547_v6  ;;  %v9074_v2 = vld [vmem:[#allocation10 + $0x174] sm:$0xf] }
 0x3ce   :  { %4836 = vmatpush.bf16.msra.mxu2 %v7985_v27  ;;  %v4549_v60 = vadd.f32 %v4548_v8, %v4535_v16  ;;  %v4575_v41 = vadd.f32 %v4574_v9, %v4561_v36  ;;  %v8238_v16 = vld [vmem:[#allocation10 + $0x158] sm:$0xf0]  ;;  %v9066_v36 = vld [vmem:[#allocation10 + $0x134] sm:$0xf] }
 0x3cf   :  { %5320 = vmatpush.bf16.msra.mxu0 %v8169_v57  ;;  %v8213_v57 = vor.u32 %v9065_v11, %v8212_v58  ;;  %v8241_v6 = vor.u32 %v9070_v43, %v8238_v16 }
 0x3d0   :  { %v4576_v50 = vpop.f32.mrf.mxu3 }
 0x3d1   :  { %v4588_v34 = vpop.f32.mrf.mxu0 }
 0x3d2   :  { %4837 = vmatpush.bf16.msra.mxu2 %v7969_v47  ;;  %v4589_v23 = vadd.f32 %v4588_v34, %v4575_v41  ;;  %v8230_v34 = vld [vmem:[#allocation10 + $0x148] sm:$0xf0] }
 0x3d3   :  { %5321 = vmatpush.bf16.msra.mxu0 %v8161_v4  ;;  %v4562_v17 = vpop.f32.mrf.mxu2  ;;  %v8254_v4 = vld [vmem:[#allocation10 + $0x178] sm:$0xf0] }
 0x3d4   :  { %v4563_v29 = vadd.f32 %v4562_v17, %v4549_v60  ;;  %v4602_v25 = vpop.f32.mrf.mxu1  ;;  %v8257_v56 = vor.u32 %v9074_v2, %v8254_v4  ;;  %v8233_v17 = vor.u32 %v9068_v59, %v8230_v34  ;;  %v8292_v4 = vld [vmem:[#allocation10 + $0x1c0] sm:$0xf]  ;;  %v9081_v59 = vld [vmem:[#allocation10 + $0x1a4] sm:$0xf0] }
 0x3d5   :  { %v4603_v47 = vadd.f32 %v4602_v25, %v4589_v23  ;;  %v8214_v25 = vld [vmem:[#allocation10 + $0x128] sm:$0xf0] }
 0x3d6   :  { %4838 = vmatpush.bf16.msra.mxu2 %v7953_v32  ;;  %v4577_v27 = vadd.f32 %v4576_v50, %v4563_v29  ;;  %v8220_v32 = vld [vmem:[#allocation10 + $0x130] sm:$0xf]  ;;  %v8222_v29 = vld [vmem:[#allocation10 + $0x138] sm:$0xf0]  ;;  %v8217_v54 = vor.u32 %v9064_v20, %v8214_v25  ;;  %v9090_v20 = vld [vmem:[#allocation10 + $0x1f4] sm:$0xf] }
 0x3d7   :  { %5322 = vmatpush.bf16.msra.mxu0 %v8153_v5  ;;  %v8221_v39 = vor.u32 %v9067_v21, %v8220_v32  ;;  %v9072_v5 = vld [vmem:[#allocation10 + $0x164] sm:$0xf]  ;;  %v8308_v32 = vld [vmem:[#allocation10 + $0x1e0] sm:$0xf]  ;;  %v9089_v21 = vld [vmem:[#allocation10 + $0x1e4] sm:$0xf0] }
 0x3d8   :  { %v4630_v8 = vpop.f32.mrf.mxu3  ;;  %v8249_v9 = vor.u32 %v9072_v5, %v8246_v24  ;;  %v8309_v58 = vor.u32 %v9089_v21, %v8308_v32  ;;  %v8284_v24 = vld [vmem:[#allocation10 + $0x1b0] sm:$0xf]  ;;  %v8318_v25 = vld [vmem:[#allocation10 + $0x1f8] sm:$0xf0]  ;;  %v9078_v21 = vld [vmem:[#allocation10 + $0x194] sm:$0xf] }
 0x3d9   :  { %4839 = vmatmul.bf16.vlgmr.msra.gmra.mxu2 %v9625_v12  ;;  %v8252_v12 = vld [vmem:[#allocation10 + $0x170] sm:$0xf]  ;;  %v4590_v37 = vpop.f32.mrf.mxu0 }
 0x3da   :  { %v8253_v44 = vor.u32 %v9075_v14, %v8252_v12  ;;  %5311 = vmatmul.bf16.vlgmr.msrb.gmra.mxu3 %v4853_v61  ;;  %v4591_v38 = vadd.f32 %v4590_v37, %v4577_v27  ;;  %v8204_v61 = vld [vmem:[#allocation10 + $0x110] sm:$0xf]  ;;  %v3111_v12 = vperm.slane %v9658_v3, 2  ;;  %v8225_v14 = vor.u32 %v9066_v36, %v8222_v29  ;;  %v8260_v29 = vld [vmem:[#allocation10 + $0x180] sm:$0xf] }
 0x3db   :  { %5323 = vmatpush.bf16.msra.mxu0 %v8145_v15  ;;  %v8205_v0 = vor.u32 %v9063_v26, %v8204_v61  ;;  %v8300_v61 = vld [vmem:[#allocation10 + $0x1d0] sm:$0xf]  ;;  %v9087_v26 = vld [vmem:[#allocation10 + $0x1d4] sm:$0xf0] }
 0x3dc   :  { %5275 = vmatpush.bf16.msrb.mxu1 %v8253_v44  ;;  %v4616_v19 = vpop.f32.mrf.mxu2  ;;  %v4604_v7 = vpop.f32.mrf.mxu1  ;;  %v4631_v41 = vadd.f32 %v4630_v8, %v3111_v12 }
 0x3dd   :  { %v4617_v28 = vadd.f32 %v4616_v19, %v4603_v47  ;;  %v4605_v48 = vadd.f32 %v4604_v7, %v4591_v38  ;;  %v8206_v19 = vld [vmem:[#allocation10 + $0x118] sm:$0xf0] }
 0x3de   :  { %v8209_v38 = vor.u32 %v9062_v62, %v8206_v19  ;;  %v8302_v62 = vld [vmem:[#allocation10 + $0x1d8] sm:$0xf0] }
 0x3df   :  { %5324 = vmatpush.bf16.msra.mxu0 %v8137_v63  ;;  %v4846_v33 = vmax.f32 %v4617_v28, 0.0 }
 0x3e0   :  { %5276 = vmatpush.bf16.msrb.mxu1 %v8245_v46  ;;  %v4632_v15 = vpop.f32.mrf.mxu3  ;;  %v9060_v46 = vld [vmem:[#allocation10 + $0x104] sm:$0xf] }
 0x3e1   :  { %v4644_v10 = vpop.f32.mrf.mxu0  ;;  %v4633_v27 = vadd.f32 %v4632_v15, %v3111_v12  ;;  %v8201_v28 = vor.u32 %v9060_v46, %v8198_v42  ;;  %v8268_v15 = vld [vmem:[#allocation10 + $0x190] sm:$0xf]  ;;  %v9077_v12 = vld [vmem:[#allocation10 + $0x184] sm:$0xf0] }
 0x3e2   :  { %v4645_v30 = vadd.f32 %v4644_v10, %v4631_v41  ;;  %v9088_v41 = vld [vmem:[#allocation10 + $0x1e4] sm:$0xf] }
 0x3e4   :  { %5277 = vmatpush.bf16.msrb.mxu1 %v8237_v45  ;;  %v4618_v51 = vpop.f32.mrf.mxu2  ;;  %v4658_v13 = vpop.f32.mrf.mxu1 }
 0x3e5   :  { %v4619_v53 = vadd.f32 %v4618_v51, %v4605_v48  ;;  %v4659_v37 = vadd.f32 %v4658_v13, %v4645_v30  ;;  %v8276_v13 = vld [vmem:[#allocation10 + $0x1a0] sm:$0xf]  ;;  %v9086_v30 = vld [vmem:[#allocation10 + $0x1d4] sm:$0xf] }
 0x3e6   :  { %v8305_v19 = vor.u32 %v9086_v30, %v8302_v62  ;;  %v9103_v30 = vld [vmem:[#allocation11 + $0x58] sm:$0xff] }
 0x3e7   :  { %v4850_v55 = vmax.f32 %v4619_v53, 0.0 }
 0x3e8   :  { %5278 = vmatpush.bf16.msrb.mxu1 %v8229_v52  ;;  %v4686_v63 = vpop.f32.mrf.mxu3  ;;  %v8317_v52 = vor.u32 %v9091_v49, %v8316_v18  ;;  %v8278_v18 = vld [vmem:[#allocation10 + $0x1a8] sm:$0xf0] }
 0x3e9   :  { %v4854_v31 = vpack.c.bf16 %v4850_v55, %v4846_v33  ;;  %v4646_v44 = vpop.f32.mrf.mxu0 }
 0x3ea   :  { %v4647_v23 = vadd.f32 %v4646_v44, %v4633_v27  ;;  %5289 = vmatpush.bf16.msrb.mxu2 %v8317_v52  ;;  %v8321_v44 = vor.u32 %v9090_v20, %v8318_v25  ;;  %v9095_v20 = vld [vmem:[#allocation11 + $0x18] sm:$0xff] }
 0x3eb   :  { %5269 = vmatmul.bf16.vlgmr.msrb.gmra.mxu0 %v4854_v31  ;;  %v9107_v25 = vld [vmem:[#allocation11 + $0x78] sm:$0xff] }
 0x3ec   :  { %5279 = vmatpush.bf16.msrb.mxu1 %v8221_v39  ;;  %v4660_v50 = vpop.f32.mrf.mxu1  ;;  %5511 = vmatpush.bf16.msrb.mxu0 %v9107_v25 }
 0x3ed   :  { %v4661_v47 = vadd.f32 %v4660_v50, %v4647_v23  ;;  %v9084_v23 = vld [vmem:[#allocation10 + $0x1c4] sm:$0xf] }
 0x3ee   :  { %5290 = vmatpush.bf16.msrb.mxu2 %v8309_v58 }
 0x3f0   :  { %5280 = vmatpush.bf16.msrb.mxu1 %v8213_v57  ;;  %v4688_v33 = vpop.f32.mrf.mxu3 }
 0x3f1   :  { %v4700_v40 = vpop.f32.mrf.mxu0 }
 0x3f4   :  { %5281 = vmatpush.bf16.msrb.mxu1 %v8205_v0  ;;  %v8301_v0 = vor.u32 %v9087_v26, %v8300_v61 }
 0x3f6   :  { %5291 = vmatpush.bf16.msrb.mxu2 %v8301_v0  ;;  %v9076_v0 = vld [vmem:[#allocation10 + $0x184] sm:$0xf] }
 0x3f8   :  { %5282 = vmatpush.bf16.msrb.mxu1 %v8197_v35  ;;  %v4714_v51 = vpop.f32.mrf.mxu1 }
 0x3fb   :  { %5325 = vmatmul.bf16.vlgmr.msra.gmra.mxu0 %v4854_v31  ;;  %v4702_v31 = vpop.f32.mrf.mxu0 }
 0x3fc   :  { %5331 = vmatpush.bf16.msra.mxu1 %v8257_v56  ;;  %v4672_v60 = vpop.f32.mrf.mxu2  ;;  %v9085_v56 = vld [vmem:[#allocation10 + $0x1c4] sm:$0xf0] }
 0x3fd   :  { %v4673_v7 = vadd.f32 %v4672_v60, %v4659_v37  ;;  %v8293_v5 = vor.u32 %v9085_v56, %v8292_v4  ;;  %v9079_v60 = vld [vmem:[#allocation10 + $0x194] sm:$0xf0]  ;;  %v8294_v37 = vld [vmem:[#allocation10 + $0x1c8] sm:$0xf0] }
 0x3fe   :  { %v8269_v36 = vor.u32 %v9079_v60, %v8268_v15 }
 0x3ff   :  { %v4687_v53 = vadd.f32 %v4686_v63, %v4673_v7  ;;  %5292 = vmatpush.bf16.msrb.mxu2 %v8293_v5  ;;  %v8310_v63 = vld [vmem:[#allocation10 + $0x1e8] sm:$0xf0]  ;;  %v3112_v7 = vperm.slane %v9658_v3, 3 }
 0x400   :  { %5332 = vmatpush.bf16.msra.mxu1 %v8249_v9  ;;  %v4716_v1 = vpop.f32.mrf.mxu1  ;;  %v9083_v9 = vld [vmem:[#allocation10 + $0x1b4] sm:$0xf0]  ;;  %v8313_v50 = vor.u32 %v9088_v41, %v8310_v63  ;;  %v9093_v41 = vld [vmem:[#allocation11 + $0x8] sm:$0xff] }
 0x401   :  { %v4701_v11 = vadd.f32 %v4700_v40, %v4687_v53  ;;  %v8285_v43 = vor.u32 %v9083_v9, %v8284_v24  ;;  %v9105_v63 = vld [vmem:[#allocation11 + $0x68] sm:$0xff] }
 0x403   :  { %v4715_v22 = vadd.f32 %v4714_v51, %v4701_v11  ;;  %5293 = vmatpush.bf16.msrb.mxu2 %v8285_v43  ;;  %v4756_v27 = vpop.f32.mrf.mxu0 }
 0x404   :  { %5333 = vmatpush.bf16.msra.mxu1 %v8241_v6  ;;  %v4674_v45 = vpop.f32.mrf.mxu2 }
 0x405   :  { %v4675_v48 = vadd.f32 %v4674_v45, %v4661_v47  ;;  %v9082_v45 = vld [vmem:[#allocation10 + $0x1b4] sm:$0xf]  ;;  %v8286_v47 = vld [vmem:[#allocation10 + $0x1b8] sm:$0xf0] }
 0x407   :  { %v4689_v55 = vadd.f32 %v4688_v33, %v4675_v48  ;;  %v9080_v48 = vld [vmem:[#allocation10 + $0x1a4] sm:$0xf] }
 0x408   :  { %5334 = vmatpush.bf16.msra.mxu1 %v8233_v17  ;;  %v8277_v17 = vor.u32 %v9081_v59, %v8276_v13  ;;  %v8281_v51 = vor.u32 %v9080_v48, %v8278_v18 }
 0x409   :  { %v4703_v57 = vadd.f32 %v4702_v31, %v4689_v55 }
 0x40a   :  { %5294 = vmatpush.bf16.msrb.mxu2 %v8277_v17 }
 0x40b   :  { %v4717_v2 = vadd.f32 %v4716_v1, %v4703_v57  ;;  %v4758_v49 = vpop.f32.mrf.mxu0 }
 0x40c   :  { %5335 = vmatpush.bf16.msra.mxu1 %v8225_v14  ;;  %v8261_v14 = vor.u32 %v9077_v12, %v8260_v29  ;;  %v9098_v29 = vld [vmem:[#allocation11 + $0x30] sm:$0xff]  ;;  %v9097_v12 = vld [vmem:[#allocation11 + $0x28] sm:$0xff] }
 0x40e   :  { %5295 = vmatpush.bf16.msrb.mxu2 %v8269_v36  ;;  %v9099_v36 = vld [vmem:[#allocation11 + $0x38] sm:$0xff] }
 0x40f   :  { %5497 = vmatpush.bf16.msra.mxu3 %v9099_v36  ;;  %v9108_v36 = vld [vmem:[%s9748_s9] sm:$0xff] }
 0x410   :  { %5336 = vmatpush.bf16.msra.mxu1 %v8217_v54  ;;  %v4742_v54 = vpop.f32.mrf.mxu3 }
 0x411   :  { %v4743_v52 = vadd.f32 %v4742_v54, %v3112_v7  ;;  %v9106_v54 = vld [vmem:[#allocation11 + $0x70] sm:$0xff] }
 0x412   :  { %5296 = vmatpush.bf16.msrb.mxu2 %v8261_v14  ;;  %v9096_v14 = vld [vmem:[#allocation11 + $0x20] sm:$0xff]  ;;  %5512 = vmatpush.bf16.msrb.mxu0 %v9106_v54 }
 0x413   :  { %v4757_v32 = vadd.f32 %v4756_v27, %v4743_v52  ;;  %5498 = vmatpush.bf16.msra.mxu3 %v9098_v29  ;;  %v9104_v27 = vld [vmem:[#allocation11 + $0x60] sm:$0xff]  ;;  %v9119_v29 = vld [vmem:[%s9749_s10 + $0x18] sm:$0xff] }
 0x414   :  { %5337 = vmatpush.bf16.msra.mxu1 %v8209_v38  ;;  %v8297_v38 = vor.u32 %v9084_v23, %v8294_v37  ;;  %v9101_v37 = vld [vmem:[#allocation11 + $0x48] sm:$0xff] }
 0x416   :  { %5345 = vmatpush.bf16.msra.mxu2 %v8321_v44  ;;  %v4770_v46 = vpop.f32.mrf.mxu1  ;;  %v9094_v44 = vld [vmem:[#allocation11 + $0x10] sm:$0xff]  ;;  %5513 = vmatpush.bf16.msrb.mxu0 %v9105_v63 }
 0x417   :  { %v4771_v11 = vadd.f32 %v4770_v46, %v4757_v32  ;;  %5499 = vmatpush.bf16.msra.mxu3 %v9097_v12 }
 0x418   :  { %5338 = vmatpush.bf16.msra.mxu1 %v8201_v28  ;;  %v4744_v42 = vpop.f32.mrf.mxu3  ;;  %v8289_v28 = vor.u32 %v9082_v45, %v8286_v47 }
 0x419   :  { %v4745_v55 = vadd.f32 %v4744_v42, %v3112_v7  ;;  %v9100_v42 = vld [vmem:[#allocation11 + $0x40] sm:$0xff]  ;;  %v9115_v7 = vld [vmem:[%s9748_s9 + $0x38] sm:$0xff] }
 0x41a   :  { %5346 = vmatpush.bf16.msra.mxu2 %v8313_v50  ;;  %v9092_v50 = vld [vmem:[#allocation11] sm:$0xff]  ;;  %5514 = vmatpush.bf16.msrb.mxu0 %v9104_v27 }
 0x41b   :  { %v4759_v58 = vadd.f32 %v4758_v49, %v4745_v55  ;;  %5500 = vmatpush.bf16.msra.mxu3 %v9096_v14  ;;  %v9114_v49 = vld [vmem:[%s9748_s9 + $0x30] sm:$0xff] }
 0x41d   :  { %v4812_v57 = vpop.f32.mrf.mxu0 }
 0x41e   :  { %v4728_v39 = vpop.f32.mrf.mxu2  ;;  %5347 = vmatpush.bf16.msra.mxu2 %v8305_v19  ;;  %v4772_v33 = vpop.f32.mrf.mxu1  ;;  %5515 = vmatpush.bf16.msrb.mxu0 %v9103_v30  ;;  %v9102_v19 = vld [vmem:[#allocation11 + $0x50] sm:$0xff] }
 0x41f   :  { %v4729_v35 = vadd.f32 %v4728_v39, %v4715_v22  ;;  %v8270_v39 = vld [vmem:[#allocation10 + $0x198] sm:$0xf0]  ;;  %v4773_v3 = vadd.f32 %v4772_v33, %v4759_v58  ;;  %v8262_v22 = vld [vmem:[#allocation10 + $0x188] sm:$0xf0]  ;;  %5501 = vmatpush.bf16.msra.mxu3 %v9095_v20  ;;  %v9141_v20 = vld [vmem:[%s9740_s1 + $0x15] ss:$0 sm:$0xff] }
 0x420   :  { %v4798_v53 = vpop.f32.mrf.mxu3  ;;  %v8273_v31 = vor.u32 %v9078_v21, %v8270_v39  ;;  %v8265_v1 = vor.u32 %v9076_v0, %v8262_v22 }
 0x421   :  { %v4847_v16 = vmax.f32 %v4729_v35, 0.0 }
 0x422   :  { %5348 = vmatpush.bf16.msra.mxu2 %v8297_v38  ;;  %5516 = vmatpush.bf16.msrb.mxu0 %v9102_v19  ;;  %v4857_v38 = vld [vmem:[%s9740_s1 + $0x13] sm:$0x3] }
 0x423   :  { %5502 = vmatpush.bf16.msra.mxu3 %v9094_v44  ;;  %v4923_v45 = vperm.slane %v4857_v38, 0  ;;  %v9118_v19 = vld [vmem:[%s9749_s10 + $0x10] sm:$0xff] }
 0x425   :  { %v4814_v9 = vpop.f32.mrf.mxu0 }
 0x426   :  { %v4730_v8 = vpop.f32.mrf.mxu2  ;;  %5349 = vmatpush.bf16.msra.mxu2 %v8289_v28  ;;  %5517 = vmatpush.bf16.msrb.mxu0 %v9101_v37 }
 0x427   :  { %v4731_v10 = vadd.f32 %v4730_v8, %v4717_v2  ;;  %5503 = vmatpush.bf16.msra.mxu3 %v9093_v41 }
 0x428   :  { %v4800_v56 = vpop.f32.mrf.mxu3 }
 0x429   :  { %v4851_v6 = vmax.f32 %v4731_v10, 0.0 }
 0x42a   :  { %5350 = vmatpush.bf16.msra.mxu2 %v8281_v51  ;;  %5518 = vmatpush.bf16.msrb.mxu0 %v9100_v42 }
 0x42b   :  { %v4855_v34 = vpack.c.bf16 %v4851_v6, %v4847_v16  ;;  %5504 = vmatpush.bf16.msra.mxu3 %v9092_v50 }
 0x42d   :  { %5283 = vmatmul.bf16.vlgmr.msrb.gmra.mxu1 %v4855_v34 }
 0x42e   :  { %5351 = vmatpush.bf16.msra.mxu2 %v8273_v31  ;;  %5596 = vmatpush.bf16.msrb.mxu1 %v9115_v7 }
 0x432   :  { %5352 = vmatpush.bf16.msra.mxu2 %v8265_v1  ;;  %5597 = vmatpush.bf16.msrb.mxu1 %v9114_v49 }
 0x436   :  { %v4826_v2 = vpop.f32.mrf.mxu1 }
 0x43c   :  { %v4784_v40 = vpop.f32.mrf.mxu2 }
 0x43d   :  { %5339 = vmatmul.bf16.vlgmr.msra.gmra.mxu1 %v4855_v34  ;;  %v4785_v26 = vadd.f32 %v4784_v40, %v4771_v11 }
 0x43e   :  { %v4828_v16 = vpop.f32.mrf.mxu1 }
 0x43f   :  { %v4799_v4 = vadd.f32 %v4798_v53, %v4785_v26 }
 0x441   :  { %v4813_v24 = vadd.f32 %v4812_v57, %v4799_v4 }
 0x443   :  { %v4827_v43 = vadd.f32 %v4826_v2, %v4813_v24 }
 0x444   :  { %v4786_v61 = vpop.f32.mrf.mxu2 }
 0x445   :  { %v4787_v35 = vadd.f32 %v4786_v61, %v4773_v3  ;;  %v4924_v3 = vperm.slane %v4857_v38, 1  ;;  %v9142_v38 = vld [vmem:[%s9740_s1 + $0x16] ss:$0 sm:$0xff] }
 0x447   :  { %v4801_v8 = vadd.f32 %v4800_v56, %v4787_v35 }
 0x449   :  { %v4815_v10 = vadd.f32 %v4814_v9, %v4801_v8 }
 0x44b   :  { %v4829_v13 = vadd.f32 %v4828_v16, %v4815_v10 }
 0x44d   :  { %v5256_v62 = vpop.f32.mrf.mxu3 }
 0x44e   :  { %v5257_v18 = vadd.f32 %v5256_v62, %v4923_v45 }
 0x455   :  { %v5258_v40 = vpop.f32.mrf.mxu3 }
 0x456   :  { %v5259_v51 = vadd.f32 %v5258_v40, %v4923_v45 }
 0x45c   :  { %v4840_v5 = vpop.f32.mrf.mxu2 }
 0x45d   :  { %v4841_v6 = vadd.f32 %v4840_v5, %v4827_v43  ;;  %v5312_v55 = vpop.f32.mrf.mxu3 }
 0x45e   :  { %v5313_v1 = vadd.f32 %v5312_v55, %v4924_v3 }
 0x45f   :  { %v4848_v17 = vmax.f32 %v4841_v6, 0.0 }
 0x464   :  { %v4842_v59 = vpop.f32.mrf.mxu2 }
 0x465   :  { %v4843_v34 = vadd.f32 %v4842_v59, %v4829_v13  ;;  %v5314_v0 = vpop.f32.mrf.mxu3  ;;  %v9113_v59 = vld [vmem:[%s9748_s9 + $0x28] sm:$0xff] }
 0x466   :  { %v5315_v2 = vadd.f32 %v5314_v0, %v4924_v3  ;;  %5598 = vmatpush.bf16.msrb.mxu1 %v9113_v59 }
 0x467   :  { %v4852_v15 = vmax.f32 %v4843_v34, 0.0  ;;  %v9112_v34 = vld [vmem:[%s9748_s9 + $0x20] sm:$0xff] }
 0x468   :  { %v5270_v46 = vpop.f32.mrf.mxu0 }
 0x469   :  { %v4856_v60 = vpack.c.bf16 %v4852_v15, %v4848_v17  ;;  %v5271_v52 = vadd.f32 %v5270_v46, %v5257_v18  ;;  %v9111_v17 = vld [vmem:[%s9748_s9 + $0x18] sm:$0xff]  ;;  %v9110_v15 = vld [vmem:[%s9748_s9 + $0x10] sm:$0xff]  ;;  %v9117_v46 = vld [vmem:[%s9749_s10 + $0x8] sm:$0xff] }
 0x46a   :  { %5599 = vmatpush.bf16.msrb.mxu1 %v9112_v34  ;;  %v9143_v18 = vld [vmem:[%s9740_s1 + $0x17] ss:$0 sm:$0xff] }
 0x46b   :  { %5297 = vmatmul.bf16.vlgmr.msrb.gmra.mxu2 %v4856_v60 }
 0x46c   :  { %5657 = vmatpush.bf16.msrb.mxu2 %v9119_v29 }
 0x46e   :  { %5600 = vmatpush.bf16.msrb.mxu1 %v9111_v17 }
 0x470   :  { %v5272_v47 = vpop.f32.mrf.mxu0  ;;  %5658 = vmatpush.bf16.msrb.mxu2 %v9118_v19 }
 0x471   :  { %v5273_v53 = vadd.f32 %v5272_v47, %v5259_v51 }
 0x472   :  { %5601 = vmatpush.bf16.msrb.mxu1 %v9110_v15 }
 0x474   :  { %5659 = vmatpush.bf16.msrb.mxu2 %v9117_v46 }
 0x478   :  { %v5326_v39 = vpop.f32.mrf.mxu0 }
 0x479   :  { %v5327_v4 = vadd.f32 %v5326_v39, %v5313_v1 }
 0x47b   :  { %5353 = vmatmul.bf16.vlgmr.msra.gmra.mxu2 %v4856_v60  ;;  %v9109_v60 = vld [vmem:[%s9748_s9 + $0x8] sm:$0xff] }
 0x47c   :  { %5602 = vmatpush.bf16.msrb.mxu1 %v9109_v60 }
 0x480   :  { %v5328_v35 = vpop.f32.mrf.mxu0  ;;  %5603 = vmatpush.bf16.msrb.mxu1 %v9108_v36 }
 0x481   :  { %v5329_v8 = vadd.f32 %v5328_v35, %v5315_v2 }
 0x4aa   :  { %v5284_v23 = vpop.f32.mrf.mxu1 }
 0x4ab   :  { %v5285_v33 = vadd.f32 %v5284_v23, %v5271_v52  ;;  %v9116_v23 = vld [vmem:[%s9749_s10] sm:$0xff]  ;;  %s9337_s10 = smov [#allocation13]  }
 0x4ac   :  { %5660 = vmatpush.bf16.msrb.mxu2 %v9116_v23  ;;  %s5675_s27 = sshll.u32 %s9337_s10, 4  ;;  %s5676_s27 = int_to_ptr.vmem [resolvable:$true] %s5675_s27 }
 0x4b2   :  { %v5286_v28 = vpop.f32.mrf.mxu1 }
 0x4b3   :  { %v5287_v32 = vadd.f32 %v5286_v28, %v5273_v53 }
 0x4ba   :  { %v5340_v31 = vpop.f32.mrf.mxu1 }
 0x4bb   :  { %v5341_v5 = vadd.f32 %v5340_v31, %v5327_v4 }
 0x4c2   :  { %v5342_v56 = vpop.f32.mrf.mxu1 }
 0x4c3   :  { %v5343_v24 = vadd.f32 %v5342_v56, %v5329_v8 }
 0x4ee   :  { %v5298_v48 = vpop.f32.mrf.mxu2 }
 0x4ef   :  { %v5299_v21 = vadd.f32 %v5298_v48, %v5285_v33 }
 0x4f1   :  { %v5359_v57 = vmax.f32 %v5299_v21, 0.0 }
 0x4f6   :  { %v5300_v58 = vpop.f32.mrf.mxu2 }
 0x4f7   :  { %v5301_v11 = vadd.f32 %v5300_v58, %v5287_v32 }
 0x4f9   :  { %v5361_v61 = vmax.f32 %v5301_v11, 0.0 }
 0x4fb   :  { %v5363_v26 = vpack.c.bf16 %v5361_v61, %v5359_v57 }
 0x4fd   :  { %5505 = vmatmul.bf16.vlgmr.msra.gmra.mxu3 %v5363_v26 }
 0x4fe   :  { %v5354_v22 = vpop.f32.mrf.mxu2 }
 0x4ff   :  { %v5355_v9 = vadd.f32 %v5354_v22, %v5341_v5 }
 0x501   :  { %v5360_v16 = vmax.f32 %v5355_v9, 0.0 }
 0x506   :  { %v5356_v10 = vpop.f32.mrf.mxu2 }
 0x507   :  { %v5357_v43 = vadd.f32 %v5356_v10, %v5343_v24 }
 0x509   :  { %v5362_v6 = vmax.f32 %v5357_v43, 0.0 }
 0x50b   :  { %v5364_v13 = vpack.c.bf16 %v5362_v6, %v5360_v16 }
 0x50d   :  { %5519 = vmatmul.bf16.vlgmr.msrb.gmra.mxu0 %v5364_v13 }
 0x580   :  { %v5506_v12 = vpop.f32.mrf.mxu3 }
 0x581   :  { %v5507_v44 = vadd.f32 %v9141_v20, %v5506_v12 }
 0x588   :  { %v5508_v25 = vpop.f32.mrf.mxu3 }
 0x589   :  { %v5509_v54 = vadd.f32 %v9141_v20, %v5508_v25 }
 0x58a   :  { %v5520_v14 = vpop.f32.mrf.mxu0 }
 0x58b   :  { %v5521_v41 = vadd.f32 %v5520_v14, %v5507_v44 }
 0x58d   :  { %v5525_v27 = vmax.f32 %v5521_v41, 0.0 }
 0x592   :  { %v5522_v63 = vpop.f32.mrf.mxu0 }
 0x593   :  { %v5523_v50 = vadd.f32 %v5522_v63, %v5509_v54 }
 0x595   :  { %v5526_v30 = vmax.f32 %v5523_v50, 0.0 }
 0x597   :  { %v5527_v62 = vpack.c.bf16 %v5526_v30, %v5525_v27 }
 0x599   :  { %5604 = vmatmul.bf16.vlgmr.msrb.gmra.mxu1 %v5527_v62 }
 0x616   :  { %v5605_v37 = vpop.f32.mrf.mxu1 }
 0x617   :  { %v5606_v42 = vadd.f32 %v9142_v38, %v5605_v37 }
 0x619   :  { %v5610_v47 = vmax.f32 %v5606_v42, 0.0 }
 0x61e   :  { %v5607_v40 = vpop.f32.mrf.mxu1 }
 0x61f   :  { %v5608_v45 = vadd.f32 %v9142_v38, %v5607_v40 }
 0x621   :  { %v5611_v7 = vmax.f32 %v5608_v45, 0.0 }
 0x623   :  { %v5612_v28 = vpack.c.bf16 %v5611_v7, %v5610_v47 }
 0x625   :  { %8434 = vmatmul.msk.bf16.vlgmr.msrb.gmra.mxu2 %vm5649_vm2, %v5612_v28 }
 0x6a8   :  { %v5662_v48 = vpop.f32.mrf.mxu2 }
 0x6a9   :  { %v5663_v51 = vadd.f32 %v9143_v18, %v5662_v48 }
 0x6b0   :  { %v5664_v49 = vpop.f32.mrf.mxu2 }
 0x6b1   :  { %v5665_v52 = vadd.f32 %v9143_v18, %v5664_v49 }
 0x6b3   :  { %v9123_v53 = vpack.c.bf16 %v5665_v52, %v5663_v51 }
 0x6b5   :  { %9124 = vst [vmem:[#allocation13] sm:$0xff] %v9123_v53  }
 0x6b6   :  { %5683 = dma.vmem_to_hbm [thread:$0]  %s5676_s27, 128, %s5678_s7, [#allocation4], %s9335_s30, %s9335_s30, %s9336_s12  }
 0x6b7   :  { %9321 = dma.done.wait [#allocation4], 128  }
 0x6b8   :  { %9322 = vsyncadd [#allocation4], 4294967168 }
 0x6b9   :  { %5688 = vsyncpa [#allocation3], 1 }
 0x6ba   :  { %5689 = vsyncpa [#allocation6], 1 }
 0x6bb   :  { %5690 = vsyncpa [#allocation9], 1 }
 0x6bc   :  { %5691 = vsyncpa [#allocation12], 1 }
 0x6bd   :  { %5692 = vsyncpa [#allocation4], 1 }

</bundles_post_ra>
